<compile_context>
chip_gen: v7x
topology: tpu7x:2x2x1
jax: 0.10.0
libtpu: 0.0.40
codegen_flags: <defaults>
</compile_context>

<pallas_src>
import jax
import jax.numpy as jnp
from jax.experimental import pallas as pl
from jax.experimental.pallas import tpu as pltpu

ACT = jnp.bfloat16   # activation dtype (HBM + VMEM)
WGT = jnp.bfloat16   # weight dtype


def _rup(c, m=128):
    """Round channel count up to a full lane tile."""
    return ((c + m - 1) // m) * m


def _nbytes(shape, dtype):
    n = 1
    for d in shape:
        n *= int(d)
    return n * jnp.dtype(dtype).itemsize


def _vmem_limit(scratch_bytes, block_bytes):
    """Scoped-VMEM budget: scratch + double-buffered pipeline blocks + headroom.

    Capped at 64 MiB so the request is valid on v5e/v6e/v7x alike; floored at
    the v6e/v7x default (32 MiB) since a budget is not an allocation.
    """
    need = int((scratch_bytes + 2 * block_bytes) * 1.5) + (8 << 20)
    return max(32 << 20, min(need, 64 << 20))


# ----------------------------- in-kernel helpers -----------------------------

def _zero_border(pad_ref):
    """Zero only the 1-px halo frame of a (H+2, W+2, CP) VMEM scratch.

    The interior is fully overwritten every invocation, so re-zeroing the whole
    buffer (previous behaviour) only burned the single store slot. The frame is
    tiny (perimeter only) so it is zeroed every invocation, which also keeps
    megacore-sharded grids correct (no reliance on program_id == 0 running on
    every core)."""
    Hp2, Wp2, CP = pad_ref.shape
    pad_ref[0:1, :, :] = jnp.zeros((1, Wp2, CP), pad_ref.dtype)
    pad_ref[Hp2 - 1:Hp2, :, :] = jnp.zeros((1, Wp2, CP), pad_ref.dtype)
    pad_ref[:, 0:1, :] = jnp.zeros((Hp2, 1, CP), pad_ref.dtype)
    pad_ref[:, Wp2 - 1:Wp2, :] = jnp.zeros((Hp2, 1, CP), pad_ref.dtype)


def _conv3x3(pad_ref, w_ref, s_ref, b_ref):
    """3x3 'SAME' conv + folded-BN affine + ReLU.

    Nine shifted bf16 matmuls accumulated in f32 (no im2col buffer).
      pad_ref: (H+2, W+2, CP) bf16 with a zero halo frame; CP multiple of 128.
      w_ref:   (9, CP, Co)   bf16, tap-major, zero-padded rows/cols.
      s_ref, b_ref: (1, Co)  f32, zero-padded so padded output lanes stay 0.
    Returns (H*W, Co) f32.
    """
    Hp2, Wp2, CP = pad_ref.shape
    H, W = Hp2 - 2, Wp2 - 2
    Co = w_ref.shape[2]
    acc = jnp.zeros((H * W, Co), jnp.float32)
    for t in range(9):
        dy, dx = t // 3, t % 3
        patch = pad_ref[dy:dy + H, dx:dx + W, :].reshape(H * W, CP)
        acc = acc + jnp.dot(patch, w_ref[t], preferred_element_type=jnp.float32)
    # TODO(synk): for Cin < 128 the zero channel lanes still occupy MXU K; a
    # densely packed K = rup(9*Cin, 128) layout would trim that (real first
    # layer), at the cost of non-lane-aligned activation storage.
    return jnp.maximum(acc * s_ref[...] + b_ref[...], 0.0)


# --------------------------------- kernels -----------------------------------

def _double_conv_kernel(x_ref, w1_ref, s1_ref, b1_ref, w2_ref, s2_ref, b2_ref,
                        o_ref, pad1, pad2):
    _, H, W, _ = x_ref.shape
    C1 = pad2.shape[2]
    _zero_border(pad1)
    _zero_border(pad2)
    pad1[1:H + 1, 1:W + 1, :] = x_ref[0]
    h1 = _conv3x3(pad1, w1_ref, s1_ref, b1_ref)            # (H*W, C1) f32
    pad2[1:H + 1, 1:W + 1, :] = h1.astype(ACT).reshape(H, W, C1)
    h2 = _conv3x3(pad2, w2_ref, s2_ref, b2_ref)
    o_ref[0] = h2.astype(o_ref.dtype).reshape(H, W, C1)


def _down_kernel(x_ref, w1_ref, s1_ref, b1_ref, w2_ref, s2_ref, b2_ref,
                 o_ref, pad1, pad2):
    _, Hp, Wp, C1 = o_ref.shape
    # 2x2 maxpool in bf16 (exact for max) -- no f32 upcast.
    x = x_ref[0]                                            # (2Hp, 2Wp, Cin)
    a = jnp.maximum(x[:, 0::2, :], x[:, 1::2, :])           # pairs along W
    pooled = jnp.maximum(a[0::2, :, :], a[1::2, :, :])      # pairs along H
    _zero_border(pad1)
    _zero_border(pad2)
    pad1[1:Hp + 1, 1:Wp + 1, :] = pooled
    h1 = _conv3x3(pad1, w1_ref, s1_ref, b1_ref)
    pad2[1:Hp + 1, 1:Wp + 1, :] = h1.astype(ACT).reshape(Hp, Wp, C1)
    h2 = _conv3x3(pad2, w2_ref, s2_ref, b2_ref)
    o_ref[0] = h2.astype(o_ref.dtype).reshape(Hp, Wp, C1)
    # TODO(synk): MC Dropout2d after the DoubleConv is identity in eval mode.


def _up_core(x_ref, skip_ref, wt_ref, bt_ref, w1_ref, s1_ref, b1_ref,
             w2_ref, s2_ref, b2_ref, pad1, pad2):
    _, Hs, Ws, Cin = x_ref.shape
    _, H, W, Csp = skip_ref.shape
    C1 = bt_ref.shape[1] // 4            # padded ConvT / DoubleConv out width

    # ConvTranspose2d(k=2, s=2): ONE matmul producing the 4 sub-pixel taps per
    # input pixel; columns packed (dy, dx, c), each tap block C1 (lane-aligned).
    xs = x_ref[0].reshape(Hs * Ws, Cin)
    y4 = jnp.dot(xs, wt_ref[...], preferred_element_type=jnp.float32) + bt_ref[...]
    y4 = y4.astype(ACT)
    taps = [y4[:, k * C1:(k + 1) * C1].reshape(Hs, Ws, C1) for k in range(4)]
    # sub-pixel interleave in bf16: dx along W, then dy along H.
    sel_w = jax.lax.broadcasted_iota(jnp.int32, (Hs, Ws, 2, C1), 2) == 0
    r0 = jnp.where(sel_w, taps[0][:, :, None, :],
                   taps[1][:, :, None, :]).reshape(Hs, W, C1)
    r1 = jnp.where(sel_w, taps[2][:, :, None, :],
                   taps[3][:, :, None, :]).reshape(Hs, W, C1)
    sel_h = jax.lax.broadcasted_iota(jnp.int32, (Hs, 2, W, C1), 1) == 0
    up = jnp.where(sel_h, r0[:, None, :, :], r1[:, None, :, :]).reshape(H, W, C1)

    # skip "concat" + DoubleConv entirely in VMEM (channel-split padded buffer,
    # channel order [skip | upsampled], matching torch.cat([skip, up], dim=1)).
    _zero_border(pad1)
    _zero_border(pad2)
    pad1[1:H + 1, 1:W + 1, 0:Csp] = skip_ref[0]
    pad1[1:H + 1, 1:W + 1, Csp:Csp + C1] = up
    h1 = _conv3x3(pad1, w1_ref, s1_ref, b1_ref)             # (H*W, C1) f32
    pad2[1:H + 1, 1:W + 1, :] = h1.astype(ACT).reshape(H, W, C1)
    h2 = _conv3x3(pad2, w2_ref, s2_ref, b2_ref)
    return h2, H, W, C1


def _up_kernel(x_ref, skip_ref, wt_ref, bt_ref, w1_ref, s1_ref, b1_ref,
               w2_ref, s2_ref, b2_ref, o_ref, pad1, pad2):
    h2, H, W, C1 = _up_core(x_ref, skip_ref, wt_ref, bt_ref, w1_ref, s1_ref,
                            b1_ref, w2_ref, s2_ref, b2_ref, pad1, pad2)
    o_ref[0] = h2.astype(o_ref.dtype).reshape(H, W, C1)


def _up_out_kernel(x_ref, skip_ref, wt_ref, bt_ref, w1_ref, s1_ref, b1_ref,
                   w2_ref, s2_ref, b2_ref, ow_ref, ob_ref, o_ref, pad1, pad2):
    h2, H, W, _ = _up_core(x_ref, skip_ref, wt_ref, bt_ref, w1_ref, s1_ref,
                           b1_ref, w2_ref, s2_ref, b2_ref, pad1, pad2)
    ncls_p = ob_ref.shape[1]                                # padded to 128 lanes
    logits = jnp.dot(h2.astype(ow_ref.dtype), ow_ref[...],
                     preferred_element_type=jnp.float32) + ob_ref[...]
    o_ref[0] = logits.astype(o_ref.dtype).reshape(H, W, ncls_p)


# -------------------------------- wrappers ------------------------------------

def _rep_spec(shape):
    """Grid-invariant (weight) input: whole array every grid step."""
    return pl.BlockSpec(shape, lambda *_: (0,) * len(shape))


def _batched_spec(shape):
    return pl.BlockSpec((1,) + tuple(shape[1:]),
                        lambda n: (n,) + (0,) * (len(shape) - 1))


def _weight_bytes(p, keys):
    return sum(_nbytes(p[k].shape, p[k].dtype) for k in keys)


def double_conv_call(x, p):
    N, H, W, CPin = x.shape
    C1 = p["w2"].shape[2]
    scratch = [pltpu.VMEM((H + 2, W + 2, CPin), ACT),
               pltpu.VMEM((H + 2, W + 2, C1), ACT)]
    scratch_bytes = (_nbytes((H + 2, W + 2, CPin), ACT)
                     + _nbytes((H + 2, W + 2, C1), ACT)
                     + 2 * _nbytes((H * W, C1), jnp.float32))
    block_bytes = (_nbytes((1, H, W, CPin), ACT) + _nbytes((1, H, W, C1), ACT)
                   + _weight_bytes(p, ("w1", "s1", "b1", "w2", "s2", "b2")))
    return pl.pallas_call(
        _double_conv_kernel,
        out_shape=jax.ShapeDtypeStruct((N, H, W, C1), ACT),
        grid=(N,),
        in_specs=[
            _batched_spec(x.shape),
            _rep_spec(p["w1"].shape), _rep_spec(p["s1"].shape), _rep_spec(p["b1"].shape),
            _rep_spec(p["w2"].shape), _rep_spec(p["s2"].shape), _rep_spec(p["b2"].shape),
        ],
        out_specs=_batched_spec((N, H, W, C1)),
        scratch_shapes=scratch,
        compiler_params=pltpu.CompilerParams(
            dimension_semantics=("parallel",),
            vmem_limit_bytes=_vmem_limit(scratch_bytes, block_bytes)),
    )(x, p["w1"], p["s1"], p["b1"], p["w2"], p["s2"], p["b2"])


def down_call(x, p):
    N, H, W, CPin = x.shape
    Hp, Wp = H // 2, W // 2
    C1 = p["w2"].shape[2]
    scratch = [pltpu.VMEM((Hp + 2, Wp + 2, CPin), ACT),
               pltpu.VMEM((Hp + 2, Wp + 2, C1), ACT)]
    scratch_bytes = (_nbytes((Hp + 2, Wp + 2, CPin), ACT)
                     + _nbytes((Hp + 2, Wp + 2, C1), ACT)
                     + 2 * _nbytes((Hp * Wp, C1), jnp.float32))
    block_bytes = (_nbytes((1, H, W, CPin), ACT) + _nbytes((1, Hp, Wp, C1), ACT)
                   + _weight_bytes(p, ("w1", "s1", "b1", "w2", "s2", "b2")))
    return pl.pallas_call(
        _down_kernel,
        out_shape=jax.ShapeDtypeStruct((N, Hp, Wp, C1), ACT),
        grid=(N,),
        in_specs=[
            _batched_spec(x.shape),
            _rep_spec(p["w1"].shape), _rep_spec(p["s1"].shape), _rep_spec(p["b1"].shape),
            _rep_spec(p["w2"].shape), _rep_spec(p["s2"].shape), _rep_spec(p["b2"].shape),
        ],
        out_specs=_batched_spec((N, Hp, Wp, C1)),
        scratch_shapes=scratch,
        compiler_params=pltpu.CompilerParams(
            dimension_semantics=("parallel",),
            vmem_limit_bytes=_vmem_limit(scratch_bytes, block_bytes)),
    )(x, p["w1"], p["s1"], p["b1"], p["w2"], p["s2"], p["b2"])


def up_call(x, skip, p, out_w=None, out_b=None):
    N, Hs, Ws, CPin = x.shape
    _, H, W, CSp = skip.shape
    C1 = p["w2"].shape[2]
    Ccat = p["w1"].shape[1]                   # = CSp + C1 (channel-split concat)
    scratch = [pltpu.VMEM((H + 2, W + 2, Ccat), ACT),
               pltpu.VMEM((H + 2, W + 2, C1), ACT)]
    scratch_bytes = (_nbytes((H + 2, W + 2, Ccat), ACT)
                     + _nbytes((H + 2, W + 2, C1), ACT)
                     + 3 * _nbytes((H * W, C1), jnp.float32))
    wkeys = ("wt", "bt", "w1", "s1", "b1", "w2", "s2", "b2")
    block_bytes = (_nbytes((1, Hs, Ws, CPin), ACT) + _nbytes((1, H, W, CSp), ACT)
                   + _weight_bytes(p, wkeys))

    if out_w is not None:
        kernel = _up_out_kernel
        out_c = out_b.shape[1]                # ncls padded to 128 lanes
        extra_in = [out_w, out_b]
        extra_specs = [_rep_spec(out_w.shape), _rep_spec(out_b.shape)]
        block_bytes += (_nbytes(out_w.shape, out_w.dtype)
                        + _nbytes(out_b.shape, out_b.dtype))
    else:
        kernel = _up_kernel
        out_c = C1
        extra_in, extra_specs = [], []
    block_bytes += _nbytes((1, H, W, out_c), ACT)

    return pl.pallas_call(
        kernel,
        out_shape=jax.ShapeDtypeStruct((N, H, W, out_c), ACT),
        grid=(N,),
        in_specs=[
            _batched_spec(x.shape),
            _batched_spec(skip.shape),
            _rep_spec(p["wt"].shape), _rep_spec(p["bt"].shape),
            _rep_spec(p["w1"].shape), _rep_spec(p["s1"].shape), _rep_spec(p["b1"].shape),
            _rep_spec(p["w2"].shape), _rep_spec(p["s2"].shape), _rep_spec(p["b2"].shape),
            *extra_specs,
        ],
        out_specs=_batched_spec((N, H, W, out_c)),
        scratch_shapes=scratch,
        compiler_params=pltpu.CompilerParams(
            dimension_semantics=("parallel",),
            vmem_limit_bytes=_vmem_limit(scratch_bytes, block_bytes)),
    )(x, skip, p["wt"], p["bt"], p["w1"], p["s1"], p["b1"],
      p["w2"], p["s2"], p["b2"], *extra_in)


# -------------------------------- parameters ----------------------------------

def _pack_conv3x3(w, cpi, cpo):
    """(3,3,cin,cout) f32 HWIO -> (9, cpi, cpo) bf16, zero-padded rows/cols."""
    cin, cout = w.shape[2], w.shape[3]
    wk = jnp.zeros((3, 3, cpi, cpo), jnp.float32).at[:, :, :cin, :cout].set(w)
    return wk.reshape(9, cpi, cpo).astype(WGT)


def _pad_row(v, cpo):
    """(c,) f32 -> (1, cpo) f32, zero-padded (keeps padded output lanes at 0)."""
    return jnp.pad(v, (0, cpo - v.shape[0]))[None, :]


def _double_conv_params(key, cin, cout):
    ks = jax.random.split(key, 6)
    cpi, cpo = _rup(cin), _rup(cout)
    w1 = jax.random.normal(ks[0], (3, 3, cin, cout), jnp.float32) / (3.0 * float(cin) ** 0.5)
    w2 = jax.random.normal(ks[3], (3, 3, cout, cout), jnp.float32) / (3.0 * float(cout) ** 0.5)
    return dict(
        w1=_pack_conv3x3(w1, cpi, cpo),
        s1=_pad_row(1.0 + 0.1 * jax.random.normal(ks[1], (cout,), jnp.float32), cpo),
        b1=_pad_row(0.1 * jax.random.normal(ks[2], (cout,), jnp.float32), cpo),
        w2=_pack_conv3x3(w2, cpo, cpo),
        s2=_pad_row(1.0 + 0.1 * jax.random.normal(ks[4], (cout,), jnp.float32), cpo),
        b2=_pad_row(0.1 * jax.random.normal(ks[5], (cout,), jnp.float32), cpo),
    )


def _up_params(key, cin, skip, cout):
    ks = jax.random.split(key, 9)
    cpi, csp, cpo = _rup(cin), _rup(skip), _rup(cout)
    # ConvTranspose2d(cin, cout, 2, 2): packed (cpi, 4*cpo), columns (dy, dx, c).
    wt = jax.random.normal(ks[0], (cin, 2, 2, cout), jnp.float32) * (0.5 / float(cin) ** 0.5)
    wt_p = jnp.zeros((cpi, 2, 2, cpo), jnp.float32).at[:cin, :, :, :cout].set(wt)
    wt_p = wt_p.reshape(cpi, 4 * cpo).astype(WGT)
    bt = 0.1 * jax.random.normal(ks[1], (cout,), jnp.float32)
    bt_p = jnp.tile(jnp.pad(bt, (0, cpo - cout)), 4)[None, :]       # (1, 4*cpo)
    # First DoubleConv conv sees channels laid out [skip | pad | upsampled | pad].
    sc = 1.0 / (3.0 * float(skip + cout) ** 0.5)
    w1_skip = jax.random.normal(ks[2], (3, 3, skip, cout), jnp.float32) * sc
    w1_up = jax.random.normal(ks[3], (3, 3, cout, cout), jnp.float32) * sc
    w1 = (jnp.zeros((3, 3, csp + cpo, cpo), jnp.float32)
          .at[:, :, :skip, :cout].set(w1_skip)
          .at[:, :, csp:csp + cout, :cout].set(w1_up))
    w1 = w1.reshape(9, csp + cpo, cpo).astype(WGT)
    w2 = jax.random.normal(ks[4], (3, 3, cout, cout), jnp.float32) / (3.0 * float(cout) ** 0.5)
    return dict(
        wt=wt_p, bt=bt_p, w1=w1,
        s1=_pad_row(1.0 + 0.1 * jax.random.normal(ks[5], (cout,), jnp.float32), cpo),
        b1=_pad_row(0.1 * jax.random.normal(ks[6], (cout,), jnp.float32), cpo),
        w2=_pack_conv3x3(w2, cpo, cpo),
        s2=_pad_row(1.0 + 0.1 * jax.random.normal(ks[7], (cout,), jnp.float32), cpo),
        b2=_pad_row(0.1 * jax.random.normal(ks[8], (cout,), jnp.float32), cpo),
    )


def init_params(key, in_channels, out_channels, features):
    f = features
    keys = jax.random.split(key, 11)
    ow = jax.random.normal(keys[9], (f[0], out_channels), jnp.float32) / float(f[0]) ** 0.5
    ow_p = (jnp.zeros((_rup(f[0]), _rup(out_channels)), jnp.float32)
            .at[:f[0], :out_channels].set(ow)).astype(WGT)
    ob = 0.1 * jax.random.normal(keys[10], (out_channels,), jnp.float32)
    return dict(
        init_conv=_double_conv_params(keys[0], in_channels, f[0]),
        down1=_double_conv_params(keys[1], f[0], f[1]),
        down2=_double_conv_params(keys[2], f[1], f[2]),
        down3=_double_conv_params(keys[3], f[2], f[3]),
        bottleneck=_double_conv_params(keys[4], f[3], f[3] * 2),
        up1=_up_params(keys[5], f[3] * 2, f[3], f[3]),
        up2=_up_params(keys[6], f[3], f[2], f[2]),
        up3=_up_params(keys[7], f[2], f[1], f[1]),
        up4=_up_params(keys[8], f[1], f[0], f[0]),
        out_w=ow_p,
        out_b=_pad_row(ob, _rup(out_channels)),
    )


# ---------------------------------- model -------------------------------------

def bayesian_unet_forward(params, x_nchw, out_channels):
    x = jnp.transpose(x_nchw, (0, 2, 3, 1)).astype(ACT)            # NCHW -> NHWC
    cin = x.shape[-1]
    if cin % 128:
        x = jnp.pad(x, ((0, 0), (0, 0), (0, 0), (0, _rup(cin) - cin)))
    x0 = double_conv_call(x, params["init_conv"])
    x1 = down_call(x0, params["down1"])
    x2 = down_call(x1, params["down2"])
    x3 = down_call(x2, params["down3"])
    x4 = down_call(x3, params["bottleneck"])
    u1 = up_call(x4, x3, params["up1"])
    u2 = up_call(u1, x2, params["up2"])
    u3 = up_call(u2, x1, params["up3"])
    out = up_call(u3, x0, params["up4"], params["out_w"], params["out_b"])
    # slice the channel padding exactly once, at the very end
    logits = out[..., :out_channels].astype(jnp.float32)
    return jnp.transpose(logits, (0, 3, 1, 2))                     # NHWC -> NCHW


# ----------------------------------- main --------------------------------------

if __name__ == "__main__":
    key = jax.random.PRNGKey(0)
    kx, kp = jax.random.split(key)

    in_ch, out_ch = 1, 4
    features = [8, 16, 32, 64]   # scaled-down analogue of [64, 128, 256, 512]
    N, H, W = 2, 16, 16

    x = jax.random.normal(kx, (N, in_ch, H, W), jnp.float32)       # PyTorch-style NCHW
    params = init_params(kp, in_ch, out_ch, features)

    # sanity check: fused Pallas DoubleConv matches an XLA reference (stage 1)
    x_nhwc = jnp.transpose(x, (0, 2, 3, 1)).astype(ACT)
    x_pad = jnp.pad(x_nhwc, ((0, 0), (0, 0), (0, 0), (0, _rup(in_ch) - in_ch)))
    p0 = params["init_conv"]
    c1 = features[0]
    cpi, cpo = _rup(in_ch), _rup(c1)
    w1_hwio = p0["w1"].reshape(3, 3, cpi, cpo)[:, :, :in_ch, :c1].astype(jnp.float32)
    w2_hwio = p0["w2"].reshape(3, 3, cpo, cpo)[:, :, :c1, :c1].astype(jnp.float32)
    ref = jax.lax.conv_general_dilated(
        x_nhwc.astype(jnp.float32), w1_hwio, (1, 1), "SAME",
        dimension_numbers=("NHWC", "HWIO", "NHWC"))
    ref = jnp.maximum(ref * p0["s1"][0, :c1] + p0["b1"][0, :c1], 0.0)
    ref = ref.astype(ACT).astype(jnp.float32)
    ref = jax.lax.conv_general_dilated(
        ref, w2_hwio, (1, 1), "SAME",
        dimension_numbers=("NHWC", "HWIO", "NHWC"))
    ref = jnp.maximum(ref * p0["s2"][0, :c1] + p0["b2"][0, :c1], 0.0)
    got = double_conv_call(x_pad, p0)[..., :c1].astype(jnp.float32)
    assert jnp.allclose(ref, got, atol=4e-2, rtol=4e-2), "fused DoubleConv mismatch"

    fwd = jax.jit(bayesian_unet_forward, static_argnums=2)
    out = jax.block_until_ready(fwd(params, x, out_ch))

    assert out.shape == (N, out_ch, H, W), out.shape
    assert bool(jnp.all(jnp.isfinite(out)))
    print("KERNEL_OK")
</pallas_src>

<mosaic_0001>
module attributes {stable_mosaic.version = 11 : i64} {
  func.func @_double_conv_kernel(%arg0: i32, %arg1: memref<1x16x16x128xbf16, #tpu.memory_space<vmem>>, %arg2: memref<9x128x128xbf16, #tpu.memory_space<vmem>>, %arg3: memref<1x128xf32, #tpu.memory_space<vmem>>, %arg4: memref<1x128xf32, #tpu.memory_space<vmem>>, %arg5: memref<9x128x128xbf16, #tpu.memory_space<vmem>>, %arg6: memref<1x128xf32, #tpu.memory_space<vmem>>, %arg7: memref<1x128xf32, #tpu.memory_space<vmem>>, %arg8: memref<1x16x16x128xbf16, #tpu.memory_space<vmem>>, %arg9: memref<18x18x128xbf16, #tpu.memory_space<vmem>>, %arg10: memref<18x18x128xbf16, #tpu.memory_space<vmem>>) attributes {dimension_semantics = [#tpu.dimension_semantics<parallel>], iteration_bounds = array<i64: 2>, scalar_prefetch = 0 : i64, scratch_operands = 2 : i64, tpu.core_type = #tpu.core_type<tc>, window_params = [{transform_indices = @transform_0, window_bounds = array<i64: 1, 16, 16, 128>}, {pipeline_mode = #tpu.pipeline_mode<synchronous>, transform_indices = @transform_1, window_bounds = array<i64: 9, 128, 128>}, {pipeline_mode = #tpu.pipeline_mode<synchronous>, transform_indices = @transform_2, window_bounds = array<i64: 1, 128>}, {pipeline_mode = #tpu.pipeline_mode<synchronous>, transform_indices = @transform_3, window_bounds = array<i64: 1, 128>}, {pipeline_mode = #tpu.pipeline_mode<synchronous>, transform_indices = @transform_4, window_bounds = array<i64: 9, 128, 128>}, {pipeline_mode = #tpu.pipeline_mode<synchronous>, transform_indices = @transform_5, window_bounds = array<i64: 1, 128>}, {pipeline_mode = #tpu.pipeline_mode<synchronous>, transform_indices = @transform_6, window_bounds = array<i64: 1, 128>}, {transform_indices = @transform_7, window_bounds = array<i64: 1, 16, 16, 128>}]} {
    %cst = arith.constant 0.000000e+00 : bf16
    %0 = vector.broadcast %cst : bf16 to vector<1x18x128xbf16>
    %c0 = arith.constant 0 : index
    %c0_0 = arith.constant 0 : index
    %c0_1 = arith.constant 0 : index
    %1 = vector.load %arg9[%c0, %c0_0, %c0_1] : memref<18x18x128xbf16, #tpu.memory_space<vmem>>, vector<1x18x128xbf16>
    tpu.vector_store %arg9[%c0, %c0_0, %c0_1], %0 {strides = array<i32>} : memref<18x18x128xbf16, #tpu.memory_space<vmem>>, vector<1x18x128xbf16>,
    %cst_2 = arith.constant 0.000000e+00 : bf16
    %2 = vector.broadcast %cst_2 : bf16 to vector<1x18x128xbf16>
    %c17 = arith.constant 17 : index
    %c0_3 = arith.constant 0 : index
    %c0_4 = arith.constant 0 : index
    %3 = vector.load %arg9[%c17, %c0_3, %c0_4] : memref<18x18x128xbf16, #tpu.memory_space<vmem>>, vector<1x18x128xbf16>
    tpu.vector_store %arg9[%c17, %c0_3, %c0_4], %2 {strides = array<i32>} : memref<18x18x128xbf16, #tpu.memory_space<vmem>>, vector<1x18x128xbf16>,
    %cst_5 = arith.constant 0.000000e+00 : bf16
    %4 = vector.broadcast %cst_5 : bf16 to vector<18x1x128xbf16>
    %c0_6 = arith.constant 0 : index
    %c0_7 = arith.constant 0 : index
    %c0_8 = arith.constant 0 : index
    %5 = vector.load %arg9[%c0_6, %c0_7, %c0_8] : memref<18x18x128xbf16, #tpu.memory_space<vmem>>, vector<18x1x128xbf16>
    tpu.vector_store %arg9[%c0_6, %c0_7, %c0_8], %4 {strides = array<i32>} : memref<18x18x128xbf16, #tpu.memory_space<vmem>>, vector<18x1x128xbf16>,
    %cst_9 = arith.constant 0.000000e+00 : bf16
    %6 = vector.broadcast %cst_9 : bf16 to vector<18x1x128xbf16>
    %c0_10 = arith.constant 0 : index
    %c17_11 = arith.constant 17 : index
    %c0_12 = arith.constant 0 : index
    %7 = vector.load %arg9[%c0_10, %c17_11, %c0_12] : memref<18x18x128xbf16, #tpu.memory_space<vmem>>, vector<18x1x128xbf16>
    tpu.vector_store %arg9[%c0_10, %c17_11, %c0_12], %6 {strides = array<i32>} : memref<18x18x128xbf16, #tpu.memory_space<vmem>>, vector<18x1x128xbf16>,
    %cst_13 = arith.constant 0.000000e+00 : bf16
    %8 = vector.broadcast %cst_13 : bf16 to vector<1x18x128xbf16>
    %c0_14 = arith.constant 0 : index
    %c0_15 = arith.constant 0 : index
    %c0_16 = arith.constant 0 : index
    %9 = vector.load %arg10[%c0_14, %c0_15, %c0_16] : memref<18x18x128xbf16, #tpu.memory_space<vmem>>, vector<1x18x128xbf16>
    tpu.vector_store %arg10[%c0_14, %c0_15, %c0_16], %8 {strides = array<i32>} : memref<18x18x128xbf16, #tpu.memory_space<vmem>>, vector<1x18x128xbf16>,
    %cst_17 = arith.constant 0.000000e+00 : bf16
    %10 = vector.broadcast %cst_17 : bf16 to vector<1x18x128xbf16>
    %c17_18 = arith.constant 17 : index
    %c0_19 = arith.constant 0 : index
    %c0_20 = arith.constant 0 : index
    %11 = vector.load %arg10[%c17_18, %c0_19, %c0_20] : memref<18x18x128xbf16, #tpu.memory_space<vmem>>, vector<1x18x128xbf16>
    tpu.vector_store %arg10[%c17_18, %c0_19, %c0_20], %10 {strides = array<i32>} : memref<18x18x128xbf16, #tpu.memory_space<vmem>>, vector<1x18x128xbf16>,
    %cst_21 = arith.constant 0.000000e+00 : bf16
    %12 = vector.broadcast %cst_21 : bf16 to vector<18x1x128xbf16>
    %c0_22 = arith.constant 0 : index
    %c0_23 = arith.constant 0 : index
    %c0_24 = arith.constant 0 : index
    %13 = vector.load %arg10[%c0_22, %c0_23, %c0_24] : memref<18x18x128xbf16, #tpu.memory_space<vmem>>, vector<18x1x128xbf16>
    tpu.vector_store %arg10[%c0_22, %c0_23, %c0_24], %12 {strides = array<i32>} : memref<18x18x128xbf16, #tpu.memory_space<vmem>>, vector<18x1x128xbf16>,
    %cst_25 = arith.constant 0.000000e+00 : bf16
    %14 = vector.broadcast %cst_25 : bf16 to vector<18x1x128xbf16>
    %c0_26 = arith.constant 0 : index
    %c17_27 = arith.constant 17 : index
    %c0_28 = arith.constant 0 : index
    %15 = vector.load %arg10[%c0_26, %c17_27, %c0_28] : memref<18x18x128xbf16, #tpu.memory_space<vmem>>, vector<18x1x128xbf16>
    tpu.vector_store %arg10[%c0_26, %c17_27, %c0_28], %14 {strides = array<i32>} : memref<18x18x128xbf16, #tpu.memory_space<vmem>>, vector<18x1x128xbf16>,
    %c0_29 = arith.constant 0 : index
    %c0_30 = arith.constant 0 : index
    %c0_31 = arith.constant 0 : index
    %c0_32 = arith.constant 0 : index
    %16 = vector.load %arg1[%c0_29, %c0_30, %c0_31, %c0_32] : memref<1x16x16x128xbf16, #tpu.memory_space<vmem>>, vector<1x16x16x128xbf16>
    %17 = vector.shape_cast %16 : vector<1x16x16x128xbf16> to vector<16x16x128xbf16>
    %c1 = arith.constant 1 : index
    %c1_33 = arith.constant 1 : index
    %c0_34 = arith.constant 0 : index
    %18 = vector.load %arg9[%c1, %c1_33, %c0_34] : memref<18x18x128xbf16, #tpu.memory_space<vmem>>, vector<16x16x128xbf16>
    tpu.vector_store %arg9[%c1, %c1_33, %c0_34], %17 {strides = array<i32>} : memref<18x18x128xbf16, #tpu.memory_space<vmem>>, vector<16x16x128xbf16>,
    %cst_35 = arith.constant 0.000000e+00 : f32
    %19 = vector.broadcast %cst_35 : f32 to vector<256x128xf32>
    %c0_36 = arith.constant 0 : index
    %c0_37 = arith.constant 0 : index
    %c0_38 = arith.constant 0 : index
    %20 = vector.load %arg9[%c0_36, %c0_37, %c0_38] : memref<18x18x128xbf16, #tpu.memory_space<vmem>>, vector<16x16x128xbf16>
    %21 = vector.shape_cast %20 : vector<16x16x128xbf16> to vector<256x128xbf16>
    %c0_39 = arith.constant 0 : index
    %c0_40 = arith.constant 0 : index
    %c0_41 = arith.constant 0 : index
    %22 = vector.load %arg2[%c0_39, %c0_40, %c0_41] : memref<9x128x128xbf16, #tpu.memory_space<vmem>>, vector<1x128x128xbf16>
    %23 = vector.shape_cast %22 : vector<1x128x128xbf16> to vector<128x128xbf16>
    %cst_42 = arith.constant dense<0.000000e+00> : vector<256x128xf32>
    %24 = tpu.matmul %21, %23, %cst_42 {dimension_numbers = #tpu.dot_dimension_numbers<[1], [0], [0], [1], [0, 0, 1, 1], [], []>} : vector<256x128xbf16>, vector<128x128xbf16>, vector<256x128xf32> -> vector<256x128xf32>
    %25 = arith.addf %19, %24 : vector<256x128xf32>
    %c0_43 = arith.constant 0 : index
    %c1_44 = arith.constant 1 : index
    %c0_45 = arith.constant 0 : index
    %26 = vector.load %arg9[%c0_43, %c1_44, %c0_45] : memref<18x18x128xbf16, #tpu.memory_space<vmem>>, vector<16x16x128xbf16>
    %27 = vector.shape_cast %26 : vector<16x16x128xbf16> to vector<256x128xbf16>
    %c1_46 = arith.constant 1 : index
    %c0_47 = arith.constant 0 : index
    %c0_48 = arith.constant 0 : index
    %28 = vector.load %arg2[%c1_46, %c0_47, %c0_48] : memref<9x128x128xbf16, #tpu.memory_space<vmem>>, vector<1x128x128xbf16>
    %29 = vector.shape_cast %28 : vector<1x128x128xbf16> to vector<128x128xbf16>
    %cst_49 = arith.constant dense<0.000000e+00> : vector<256x128xf32>
    %30 = tpu.matmul %27, %29, %cst_49 {dimension_numbers = #tpu.dot_dimension_numbers<[1], [0], [0], [1], [0, 0, 1, 1], [], []>} : vector<256x128xbf16>, vector<128x128xbf16>, vector<256x128xf32> -> vector<256x128xf32>
    %31 = arith.addf %25, %30 : vector<256x128xf32>
    %c0_50 = arith.constant 0 : index
    %c2 = arith.constant 2 : index
    %c0_51 = arith.constant 0 : index
    %32 = vector.load %arg9[%c0_50, %c2, %c0_51] : memref<18x18x128xbf16, #tpu.memory_space<vmem>>, vector<16x16x128xbf16>
    %33 = vector.shape_cast %32 : vector<16x16x128xbf16> to vector<256x128xbf16>
    %c2_52 = arith.constant 2 : index
    %c0_53 = arith.constant 0 : index
    %c0_54 = arith.constant 0 : index
    %34 = vector.load %arg2[%c2_52, %c0_53, %c0_54] : memref<9x128x128xbf16, #tpu.memory_space<vmem>>, vector<1x128x128xbf16>
    %35 = vector.shape_cast %34 : vector<1x128x128xbf16> to vector<128x128xbf16>
    %cst_55 = arith.constant dense<0.000000e+00> : vector<256x128xf32>
    %36 = tpu.matmul %33, %35, %cst_55 {dimension_numbers = #tpu.dot_dimension_numbers<[1], [0], [0], [1], [0, 0, 1, 1], [], []>} : vector<256x128xbf16>, vector<128x128xbf16>, vector<256x128xf32> -> vector<256x128xf32>
    %37 = arith.addf %31, %36 : vector<256x128xf32>
    %c1_56 = arith.constant 1 : index
    %c0_57 = arith.constant 0 : index
    %c0_58 = arith.constant 0 : index
    %38 = vector.load %arg9[%c1_56, %c0_57, %c0_58] : memref<18x18x128xbf16, #tpu.memory_space<vmem>>, vector<16x16x128xbf16>
    %39 = vector.shape_cast %38 : vector<16x16x128xbf16> to vector<256x128xbf16>
    %c3 = arith.constant 3 : index
    %c0_59 = arith.constant 0 : index
    %c0_60 = arith.constant 0 : index
    %40 = vector.load %arg2[%c3, %c0_59, %c0_60] : memref<9x128x128xbf16, #tpu.memory_space<vmem>>, vector<1x128x128xbf16>
    %41 = vector.shape_cast %40 : vector<1x128x128xbf16> to vector<128x128xbf16>
    %cst_61 = arith.constant dense<0.000000e+00> : vector<256x128xf32>
    %42 = tpu.matmul %39, %41, %cst_61 {dimension_numbers = #tpu.dot_dimension_numbers<[1], [0], [0], [1], [0, 0, 1, 1], [], []>} : vector<256x128xbf16>, vector<128x128xbf16>, vector<256x128xf32> -> vector<256x128xf32>
    %43 = arith.addf %37, %42 : vector<256x128xf32>
    %c1_62 = arith.constant 1 : index
    %c1_63 = arith.constant 1 : index
    %c0_64 = arith.constant 0 : index
    %44 = vector.load %arg9[%c1_62, %c1_63, %c0_64] : memref<18x18x128xbf16, #tpu.memory_space<vmem>>, vector<16x16x128xbf16>
    %45 = vector.shape_cast %44 : vector<16x16x128xbf16> to vector<256x128xbf16>
    %c4 = arith.constant 4 : index
    %c0_65 = arith.constant 0 : index
    %c0_66 = arith.constant 0 : index
    %46 = vector.load %arg2[%c4, %c0_65, %c0_66] : memref<9x128x128xbf16, #tpu.memory_space<vmem>>, vector<1x128x128xbf16>
    %47 = vector.shape_cast %46 : vector<1x128x128xbf16> to vector<128x128xbf16>
    %cst_67 = arith.constant dense<0.000000e+00> : vector<256x128xf32>
    %48 = tpu.matmul %45, %47, %cst_67 {dimension_numbers = #tpu.dot_dimension_numbers<[1], [0], [0], [1], [0, 0, 1, 1], [], []>} : vector<256x128xbf16>, vector<128x128xbf16>, vector<256x128xf32> -> vector<256x128xf32>
    %49 = arith.addf %43, %48 : vector<256x128xf32>
    %c1_68 = arith.constant 1 : index
    %c2_69 = arith.constant 2 : index
    %c0_70 = arith.constant 0 : index
    %50 = vector.load %arg9[%c1_68, %c2_69, %c0_70] : memref<18x18x128xbf16, #tpu.memory_space<vmem>>, vector<16x16x128xbf16>
    %51 = vector.shape_cast %50 : vector<16x16x128xbf16> to vector<256x128xbf16>
    %c5 = arith.constant 5 : index
    %c0_71 = arith.constant 0 : index
    %c0_72 = arith.constant 0 : index
    %52 = vector.load %arg2[%c5, %c0_71, %c0_72] : memref<9x128x128xbf16, #tpu.memory_space<vmem>>, vector<1x128x128xbf16>
    %53 = vector.shape_cast %52 : vector<1x128x128xbf16> to vector<128x128xbf16>
    %cst_73 = arith.constant dense<0.000000e+00> : vector<256x128xf32>
    %54 = tpu.matmul %51, %53, %cst_73 {dimension_numbers = #tpu.dot_dimension_numbers<[1], [0], [0], [1], [0, 0, 1, 1], [], []>} : vector<256x128xbf16>, vector<128x128xbf16>, vector<256x128xf32> -> vector<256x128xf32>
    %55 = arith.addf %49, %54 : vector<256x128xf32>
    %c2_74 = arith.constant 2 : index
    %c0_75 = arith.constant 0 : index
    %c0_76 = arith.constant 0 : index
    %56 = vector.load %arg9[%c2_74, %c0_75, %c0_76] : memref<18x18x128xbf16, #tpu.memory_space<vmem>>, vector<16x16x128xbf16>
    %57 = vector.shape_cast %56 : vector<16x16x128xbf16> to vector<256x128xbf16>
    %c6 = arith.constant 6 : index
    %c0_77 = arith.constant 0 : index
    %c0_78 = arith.constant 0 : index
    %58 = vector.load %arg2[%c6, %c0_77, %c0_78] : memref<9x128x128xbf16, #tpu.memory_space<vmem>>, vector<1x128x128xbf16>
    %59 = vector.shape_cast %58 : vector<1x128x128xbf16> to vector<128x128xbf16>
    %cst_79 = arith.constant dense<0.000000e+00> : vector<256x128xf32>
    %60 = tpu.matmul %57, %59, %cst_79 {dimension_numbers = #tpu.dot_dimension_numbers<[1], [0], [0], [1], [0, 0, 1, 1], [], []>} : vector<256x128xbf16>, vector<128x128xbf16>, vector<256x128xf32> -> vector<256x128xf32>
    %61 = arith.addf %55, %60 : vector<256x128xf32>
    %c2_80 = arith.constant 2 : index
    %c1_81 = arith.constant 1 : index
    %c0_82 = arith.constant 0 : index
    %62 = vector.load %arg9[%c2_80, %c1_81, %c0_82] : memref<18x18x128xbf16, #tpu.memory_space<vmem>>, vector<16x16x128xbf16>
    %63 = vector.shape_cast %62 : vector<16x16x128xbf16> to vector<256x128xbf16>
    %c7 = arith.constant 7 : index
    %c0_83 = arith.constant 0 : index
    %c0_84 = arith.constant 0 : index
    %64 = vector.load %arg2[%c7, %c0_83, %c0_84] : memref<9x128x128xbf16, #tpu.memory_space<vmem>>, vector<1x128x128xbf16>
    %65 = vector.shape_cast %64 : vector<1x128x128xbf16> to vector<128x128xbf16>
    %cst_85 = arith.constant dense<0.000000e+00> : vector<256x128xf32>
    %66 = tpu.matmul %63, %65, %cst_85 {dimension_numbers = #tpu.dot_dimension_numbers<[1], [0], [0], [1], [0, 0, 1, 1], [], []>} : vector<256x128xbf16>, vector<128x128xbf16>, vector<256x128xf32> -> vector<256x128xf32>
    %67 = arith.addf %61, %66 : vector<256x128xf32>
    %c2_86 = arith.constant 2 : index
    %c2_87 = arith.constant 2 : index
    %c0_88 = arith.constant 0 : index
    %68 = vector.load %arg9[%c2_86, %c2_87, %c0_88] : memref<18x18x128xbf16, #tpu.memory_space<vmem>>, vector<16x16x128xbf16>
    %69 = vector.shape_cast %68 : vector<16x16x128xbf16> to vector<256x128xbf16>
    %c8 = arith.constant 8 : index
    %c0_89 = arith.constant 0 : index
    %c0_90 = arith.constant 0 : index
    %70 = vector.load %arg2[%c8, %c0_89, %c0_90] : memref<9x128x128xbf16, #tpu.memory_space<vmem>>, vector<1x128x128xbf16>
    %71 = vector.shape_cast %70 : vector<1x128x128xbf16> to vector<128x128xbf16>
    %cst_91 = arith.constant dense<0.000000e+00> : vector<256x128xf32>
    %72 = tpu.matmul %69, %71, %cst_91 {dimension_numbers = #tpu.dot_dimension_numbers<[1], [0], [0], [1], [0, 0, 1, 1], [], []>} : vector<256x128xbf16>, vector<128x128xbf16>, vector<256x128xf32> -> vector<256x128xf32>
    %73 = arith.addf %67, %72 : vector<256x128xf32>
    %c0_92 = arith.constant 0 : index
    %c0_93 = arith.constant 0 : index
    %74 = vector.load %arg3[%c0_92, %c0_93] : memref<1x128xf32, #tpu.memory_space<vmem>>, vector<1x128xf32>
    %75 = vector.broadcast %74 : vector<1x128xf32> to vector<256x128xf32>
    %76 = arith.mulf %73, %75 : vector<256x128xf32>
    %c0_94 = arith.constant 0 : index
    %c0_95 = arith.constant 0 : index
    %77 = vector.load %arg4[%c0_94, %c0_95] : memref<1x128xf32, #tpu.memory_space<vmem>>, vector<1x128xf32>
    %78 = vector.broadcast %77 : vector<1x128xf32> to vector<256x128xf32>
    %79 = arith.addf %76, %78 : vector<256x128xf32>
    %cst_96 = arith.constant 0.000000e+00 : f32
    %80 = vector.broadcast %cst_96 : f32 to vector<256x128xf32>
    %81 = arith.maximumf %79, %80 : vector<256x128xf32>
    %82 = arith.truncf %81 : vector<256x128xf32> to vector<256x128xbf16>
    %83 = vector.shape_cast %82 : vector<256x128xbf16> to vector<16x16x128xbf16>
    %c1_97 = arith.constant 1 : index
    %c1_98 = arith.constant 1 : index
    %c0_99 = arith.constant 0 : index
    %84 = vector.load %arg10[%c1_97, %c1_98, %c0_99] : memref<18x18x128xbf16, #tpu.memory_space<vmem>>, vector<16x16x128xbf16>
    tpu.vector_store %arg10[%c1_97, %c1_98, %c0_99], %83 {strides = array<i32>} : memref<18x18x128xbf16, #tpu.memory_space<vmem>>, vector<16x16x128xbf16>,
    %cst_100 = arith.constant 0.000000e+00 : f32
    %85 = vector.broadcast %cst_100 : f32 to vector<256x128xf32>
    %c0_101 = arith.constant 0 : index
    %c0_102 = arith.constant 0 : index
    %c0_103 = arith.constant 0 : index
    %86 = vector.load %arg10[%c0_101, %c0_102, %c0_103] : memref<18x18x128xbf16, #tpu.memory_space<vmem>>, vector<16x16x128xbf16>
    %87 = vector.shape_cast %86 : vector<16x16x128xbf16> to vector<256x128xbf16>
    %c0_104 = arith.constant 0 : index
    %c0_105 = arith.constant 0 : index
    %c0_106 = arith.constant 0 : index
    %88 = vector.load %arg5[%c0_104, %c0_105, %c0_106] : memref<9x128x128xbf16, #tpu.memory_space<vmem>>, vector<1x128x128xbf16>
    %89 = vector.shape_cast %88 : vector<1x128x128xbf16> to vector<128x128xbf16>
    %cst_107 = arith.constant dense<0.000000e+00> : vector<256x128xf32>
    %90 = tpu.matmul %87, %89, %cst_107 {dimension_numbers = #tpu.dot_dimension_numbers<[1], [0], [0], [1], [0, 0, 1, 1], [], []>} : vector<256x128xbf16>, vector<128x128xbf16>, vector<256x128xf32> -> vector<256x128xf32>
    %91 = arith.addf %85, %90 : vector<256x128xf32>
    %c0_108 = arith.constant 0 : index
    %c1_109 = arith.constant 1 : index
    %c0_110 = arith.constant 0 : index
    %92 = vector.load %arg10[%c0_108, %c1_109, %c0_110] : memref<18x18x128xbf16, #tpu.memory_space<vmem>>, vector<16x16x128xbf16>
    %93 = vector.shape_cast %92 : vector<16x16x128xbf16> to vector<256x128xbf16>
    %c1_111 = arith.constant 1 : index
    %c0_112 = arith.constant 0 : index
    %c0_113 = arith.constant 0 : index
    %94 = vector.load %arg5[%c1_111, %c0_112, %c0_113] : memref<9x128x128xbf16, #tpu.memory_space<vmem>>, vector<1x128x128xbf16>
    %95 = vector.shape_cast %94 : vector<1x128x128xbf16> to vector<128x128xbf16>
    %cst_114 = arith.constant dense<0.000000e+00> : vector<256x128xf32>
    %96 = tpu.matmul %93, %95, %cst_114 {dimension_numbers = #tpu.dot_dimension_numbers<[1], [0], [0], [1], [0, 0, 1, 1], [], []>} : vector<256x128xbf16>, vector<128x128xbf16>, vector<256x128xf32> -> vector<256x128xf32>
    %97 = arith.addf %91, %96 : vector<256x128xf32>
    %c0_115 = arith.constant 0 : index
    %c2_116 = arith.constant 2 : index
    %c0_117 = arith.constant 0 : index
    %98 = vector.load %arg10[%c0_115, %c2_116, %c0_117] : memref<18x18x128xbf16, #tpu.memory_space<vmem>>, vector<16x16x128xbf16>
    %99 = vector.shape_cast %98 : vector<16x16x128xbf16> to vector<256x128xbf16>
    %c2_118 = arith.constant 2 : index
    %c0_119 = arith.constant 0 : index
    %c0_120 = arith.constant 0 : index
    %100 = vector.load %arg5[%c2_118, %c0_119, %c0_120] : memref<9x128x128xbf16, #tpu.memory_space<vmem>>, vector<1x128x128xbf16>
    %101 = vector.shape_cast %100 : vector<1x128x128xbf16> to vector<128x128xbf16>
    %cst_121 = arith.constant dense<0.000000e+00> : vector<256x128xf32>
    %102 = tpu.matmul %99, %101, %cst_121 {dimension_numbers = #tpu.dot_dimension_numbers<[1], [0], [0], [1], [0, 0, 1, 1], [], []>} : vector<256x128xbf16>, vector<128x128xbf16>, vector<256x128xf32> -> vector<256x128xf32>
    %103 = arith.addf %97, %102 : vector<256x128xf32>
    %c1_122 = arith.constant 1 : index
    %c0_123 = arith.constant 0 : index
    %c0_124 = arith.constant 0 : index
    %104 = vector.load %arg10[%c1_122, %c0_123, %c0_124] : memref<18x18x128xbf16, #tpu.memory_space<vmem>>, vector<16x16x128xbf16>
    %105 = vector.shape_cast %104 : vector<16x16x128xbf16> to vector<256x128xbf16>
    %c3_125 = arith.constant 3 : index
    %c0_126 = arith.constant 0 : index
    %c0_127 = arith.constant 0 : index
    %106 = vector.load %arg5[%c3_125, %c0_126, %c0_127] : memref<9x128x128xbf16, #tpu.memory_space<vmem>>, vector<1x128x128xbf16>
    %107 = vector.shape_cast %106 : vector<1x128x128xbf16> to vector<128x128xbf16>
    %cst_128 = arith.constant dense<0.000000e+00> : vector<256x128xf32>
    %108 = tpu.matmul %105, %107, %cst_128 {dimension_numbers = #tpu.dot_dimension_numbers<[1], [0], [0], [1], [0, 0, 1, 1], [], []>} : vector<256x128xbf16>, vector<128x128xbf16>, vector<256x128xf32> -> vector<256x128xf32>
    %109 = arith.addf %103, %108 : vector<256x128xf32>
    %c1_129 = arith.constant 1 : index
    %c1_130 = arith.constant 1 : index
    %c0_131 = arith.constant 0 : index
    %110 = vector.load %arg10[%c1_129, %c1_130, %c0_131] : memref<18x18x128xbf16, #tpu.memory_space<vmem>>, vector<16x16x128xbf16>
    %111 = vector.shape_cast %110 : vector<16x16x128xbf16> to vector<256x128xbf16>
    %c4_132 = arith.constant 4 : index
    %c0_133 = arith.constant 0 : index
    %c0_134 = arith.constant 0 : index
    %112 = vector.load %arg5[%c4_132, %c0_133, %c0_134] : memref<9x128x128xbf16, #tpu.memory_space<vmem>>, vector<1x128x128xbf16>
    %113 = vector.shape_cast %112 : vector<1x128x128xbf16> to vector<128x128xbf16>
    %cst_135 = arith.constant dense<0.000000e+00> : vector<256x128xf32>
    %114 = tpu.matmul %111, %113, %cst_135 {dimension_numbers = #tpu.dot_dimension_numbers<[1], [0], [0], [1], [0, 0, 1, 1], [], []>} : vector<256x128xbf16>, vector<128x128xbf16>, vector<256x128xf32> -> vector<256x128xf32>
    %115 = arith.addf %109, %114 : vector<256x128xf32>
    %c1_136 = arith.constant 1 : index
    %c2_137 = arith.constant 2 : index
    %c0_138 = arith.constant 0 : index
    %116 = vector.load %arg10[%c1_136, %c2_137, %c0_138] : memref<18x18x128xbf16, #tpu.memory_space<vmem>>, vector<16x16x128xbf16>
    %117 = vector.shape_cast %116 : vector<16x16x128xbf16> to vector<256x128xbf16>
    %c5_139 = arith.constant 5 : index
    %c0_140 = arith.constant 0 : index
    %c0_141 = arith.constant 0 : index
    %118 = vector.load %arg5[%c5_139, %c0_140, %c0_141] : memref<9x128x128xbf16, #tpu.memory_space<vmem>>, vector<1x128x128xbf16>
    %119 = vector.shape_cast %118 : vector<1x128x128xbf16> to vector<128x128xbf16>
    %cst_142 = arith.constant dense<0.000000e+00> : vector<256x128xf32>
    %120 = tpu.matmul %117, %119, %cst_142 {dimension_numbers = #tpu.dot_dimension_numbers<[1], [0], [0], [1], [0, 0, 1, 1], [], []>} : vector<256x128xbf16>, vector<128x128xbf16>, vector<256x128xf32> -> vector<256x128xf32>
    %121 = arith.addf %115, %120 : vector<256x128xf32>
    %c2_143 = arith.constant 2 : index
    %c0_144 = arith.constant 0 : index
    %c0_145 = arith.constant 0 : index
    %122 = vector.load %arg10[%c2_143, %c0_144, %c0_145] : memref<18x18x128xbf16, #tpu.memory_space<vmem>>, vector<16x16x128xbf16>
    %123 = vector.shape_cast %122 : vector<16x16x128xbf16> to vector<256x128xbf16>
    %c6_146 = arith.constant 6 : index
    %c0_147 = arith.constant 0 : index
    %c0_148 = arith.constant 0 : index
    %124 = vector.load %arg5[%c6_146, %c0_147, %c0_148] : memref<9x128x128xbf16, #tpu.memory_space<vmem>>, vector<1x128x128xbf16>
    %125 = vector.shape_cast %124 : vector<1x128x128xbf16> to vector<128x128xbf16>
    %cst_149 = arith.constant dense<0.000000e+00> : vector<256x128xf32>
    %126 = tpu.matmul %123, %125, %cst_149 {dimension_numbers = #tpu.dot_dimension_numbers<[1], [0], [0], [1], [0, 0, 1, 1], [], []>} : vector<256x128xbf16>, vector<128x128xbf16>, vector<256x128xf32> -> vector<256x128xf32>
    %127 = arith.addf %121, %126 : vector<256x128xf32>
    %c2_150 = arith.constant 2 : index
    %c1_151 = arith.constant 1 : index
    %c0_152 = arith.constant 0 : index
    %128 = vector.load %arg10[%c2_150, %c1_151, %c0_152] : memref<18x18x128xbf16, #tpu.memory_space<vmem>>, vector<16x16x128xbf16>
    %129 = vector.shape_cast %128 : vector<16x16x128xbf16> to vector<256x128xbf16>
    %c7_153 = arith.constant 7 : index
    %c0_154 = arith.constant 0 : index
    %c0_155 = arith.constant 0 : index
    %130 = vector.load %arg5[%c7_153, %c0_154, %c0_155] : memref<9x128x128xbf16, #tpu.memory_space<vmem>>, vector<1x128x128xbf16>
    %131 = vector.shape_cast %130 : vector<1x128x128xbf16> to vector<128x128xbf16>
    %cst_156 = arith.constant dense<0.000000e+00> : vector<256x128xf32>
    %132 = tpu.matmul %129, %131, %cst_156 {dimension_numbers = #tpu.dot_dimension_numbers<[1], [0], [0], [1], [0, 0, 1, 1], [], []>} : vector<256x128xbf16>, vector<128x128xbf16>, vector<256x128xf32> -> vector<256x128xf32>
    %133 = arith.addf %127, %132 : vector<256x128xf32>
    %c2_157 = arith.constant 2 : index
    %c2_158 = arith.constant 2 : index
    %c0_159 = arith.constant 0 : index
    %134 = vector.load %arg10[%c2_157, %c2_158, %c0_159] : memref<18x18x128xbf16, #tpu.memory_space<vmem>>, vector<16x16x128xbf16>
    %135 = vector.shape_cast %134 : vector<16x16x128xbf16> to vector<256x128xbf16>
    %c8_160 = arith.constant 8 : index
    %c0_161 = arith.constant 0 : index
    %c0_162 = arith.constant 0 : index
    %136 = vector.load %arg5[%c8_160, %c0_161, %c0_162] : memref<9x128x128xbf16, #tpu.memory_space<vmem>>, vector<1x128x128xbf16>
    %137 = vector.shape_cast %136 : vector<1x128x128xbf16> to vector<128x128xbf16>
    %cst_163 = arith.constant dense<0.000000e+00> : vector<256x128xf32>
    %138 = tpu.matmul %135, %137, %cst_163 {dimension_numbers = #tpu.dot_dimension_numbers<[1], [0], [0], [1], [0, 0, 1, 1], [], []>} : vector<256x128xbf16>, vector<128x128xbf16>, vector<256x128xf32> -> vector<256x128xf32>
    %139 = arith.addf %133, %138 : vector<256x128xf32>
    %c0_164 = arith.constant 0 : index
    %c0_165 = arith.constant 0 : index
    %140 = vector.load %arg6[%c0_164, %c0_165] : memref<1x128xf32, #tpu.memory_space<vmem>>, vector<1x128xf32>
    %141 = vector.broadcast %140 : vector<1x128xf32> to vector<256x128xf32>
    %142 = arith.mulf %139, %141 : vector<256x128xf32>
    %c0_166 = arith.constant 0 : index
    %c0_167 = arith.constant 0 : index
    %143 = vector.load %arg7[%c0_166, %c0_167] : memref<1x128xf32, #tpu.memory_space<vmem>>, vector<1x128xf32>
    %144 = vector.broadcast %143 : vector<1x128xf32> to vector<256x128xf32>
    %145 = arith.addf %142, %144 : vector<256x128xf32>
    %cst_168 = arith.constant 0.000000e+00 : f32
    %146 = vector.broadcast %cst_168 : f32 to vector<256x128xf32>
    %147 = arith.maximumf %145, %146 : vector<256x128xf32>
    %148 = arith.truncf %147 : vector<256x128xf32> to vector<256x128xbf16>
    %149 = vector.shape_cast %148 : vector<256x128xbf16> to vector<16x16x128xbf16>
    %c0_169 = arith.constant 0 : index
    %c0_170 = arith.constant 0 : index
    %c0_171 = arith.constant 0 : index
    %c0_172 = arith.constant 0 : index
    %150 = vector.load %arg8[%c0_169, %c0_170, %c0_171, %c0_172] : memref<1x16x16x128xbf16, #tpu.memory_space<vmem>>, vector<1x16x16x128xbf16>
    %151 = vector.shape_cast %150 : vector<1x16x16x128xbf16> to vector<16x16x128xbf16>
    %152 = vector.shape_cast %149 : vector<16x16x128xbf16> to vector<1x16x16x128xbf16>
    tpu.vector_store %arg8[%c0_169, %c0_170, %c0_171, %c0_172], %152 {strides = array<i32>} : memref<1x16x16x128xbf16, #tpu.memory_space<vmem>>, vector<1x16x16x128xbf16>,
    return
  }
  func.func @transform_0(%arg0: i32) -> (i32, i32, i32, i32) {
    %c0_i32 = arith.constant 0 : i32
    %c0_i32_0 = arith.constant 0 : i32
    %c0_i32_1 = arith.constant 0 : i32
    %c0_i32_2 = arith.constant 0 : i32
    return %arg0, %c0_i32, %c0_i32_0, %c0_i32_1 : i32, i32, i32, i32
  }
  func.func @transform_1(%arg0: i32) -> (i32, i32, i32) {
    %c0_i32 = arith.constant 0 : i32
    %c0_i32_0 = arith.constant 0 : i32
    %c0_i32_1 = arith.constant 0 : i32
    %c0_i32_2 = arith.constant 0 : i32
    return %c0_i32, %c0_i32_0, %c0_i32_1 : i32, i32, i32
  }
  func.func @transform_2(%arg0: i32) -> (i32, i32) {
    %c0_i32 = arith.constant 0 : i32
    %c0_i32_0 = arith.constant 0 : i32
    %c0_i32_1 = arith.constant 0 : i32
    return %c0_i32, %c0_i32_0 : i32, i32
  }
  func.func @transform_3(%arg0: i32) -> (i32, i32) {
    %c0_i32 = arith.constant 0 : i32
    %c0_i32_0 = arith.constant 0 : i32
    %c0_i32_1 = arith.constant 0 : i32
    return %c0_i32, %c0_i32_0 : i32, i32
  }
  func.func @transform_4(%arg0: i32) -> (i32, i32, i32) {
    %c0_i32 = arith.constant 0 : i32
    %c0_i32_0 = arith.constant 0 : i32
    %c0_i32_1 = arith.constant 0 : i32
    %c0_i32_2 = arith.constant 0 : i32
    return %c0_i32, %c0_i32_0, %c0_i32_1 : i32, i32, i32
  }
  func.func @transform_5(%arg0: i32) -> (i32, i32) {
    %c0_i32 = arith.constant 0 : i32
    %c0_i32_0 = arith.constant 0 : i32
    %c0_i32_1 = arith.constant 0 : i32
    return %c0_i32, %c0_i32_0 : i32, i32
  }
  func.func @transform_6(%arg0: i32) -> (i32, i32) {
    %c0_i32 = arith.constant 0 : i32
    %c0_i32_0 = arith.constant 0 : i32
    %c0_i32_1 = arith.constant 0 : i32
    return %c0_i32, %c0_i32_0 : i32, i32
  }
  func.func @transform_7(%arg0: i32) -> (i32, i32, i32, i32) {
    %c0_i32 = arith.constant 0 : i32
    %c0_i32_0 = arith.constant 0 : i32
    %c0_i32_1 = arith.constant 0 : i32
    %c0_i32_2 = arith.constant 0 : i32
    return %arg0, %c0_i32, %c0_i32_0, %c0_i32_1 : i32, i32, i32, i32
  }
}

</mosaic_0001>

<bundles_post_ra>
// kernel: tpu_custom_call.1
= control target key start
LH: loop header
LB: loop body
LE: loop exit
PB: predicated region body
PF: predicated region fallthrough
CT: control target
= control target key end

     0   :  { %12 = vsyncpa [#allocation5], 0  ;;  %s18301_s0 = inlined_call_operand.hbm [shape: bf16[2,16,16,128], index: 0, kind: input, shape index: {}]   ;;  %s18302_s1 = inlined_call_operand.hbm [shape: bf16[9,128,128], index: 1, kind: input, shape index: {}]   ;;  %s18303_s2 = inlined_call_operand.vmem [shape: f32[1,128], index: 2, kind: input, shape index: {}]   ;;  %s18304_s3 = inlined_call_operand.vmem [shape: f32[1,128], index: 3, kind: input, shape index: {}]   ;;  %s18305_s4 = inlined_call_operand.hbm [shape: bf16[9,128,128], index: 4, kind: input, shape index: {}]   ;;  %s18306_s5 = inlined_call_operand.vmem [shape: f32[1,128], index: 5, kind: input, shape index: {}]   ;;  %s18307_s6 = inlined_call_operand.vmem [shape: f32[1,128], index: 6, kind: input, shape index: {}]   ;;  %s18308_s7 = inlined_call_operand.hbm [shape: bf16[2,16,16,128], index: 7, kind: output, shape index: {}]  }
   0x1   :  { %14 = vsyncpa [#allocation5 + $0x1], 0 }
   0x2   :  { %15 = vsyncpa [#allocation8], 0 }
   0x3   :  { %16 = vsyncpa [#allocation6], 0 }
   0x4   :  { %18 = vsyncpa [#allocation6 + $0x1], 0  ;;  %s14838_s24 = smov 0   ;;  %s14840_s25 = smov 0  }
   0x5   :  { %s14842_s26 = smov 0   ;;  %s14844_s27 = smov 0  }
   0x6 LB: > { %s14859_s28 = sadd.s32 4294967295, %s14787_s27   ;;  %s11656_s29 = sadd.s32 4294967294, %s14787_s27   ;;  %s14787_s27 = sphi %s14844_s27, %s18673_s27   ;;  %s14783_s26 = sphi %s14842_s26, %s18672_s26   ;;  %s14779_s25 = sphi %s14840_s25, %s18671_s25   ;;  %s14775_s24 = sphi %s14838_s24, %s18670_s24  }
   0x7   : > { %p44_p0 = scmp.ne.s32.totalorder %s14779_s25, %s14775_s24  ;;  %p18309_p1 = scmp.eq.s32.totalorder %s14859_s28, 0 }
   0x8   : > { %p200_p3 = scmp.eq.s32.totalorder %s11656_s29, 1  ;;  %p11657_p5 = scmp.ge.s32.totalorder %s14787_s27, 1 }
   0x9   : > { %p14868_p4 = por %p18309_p1, %p44_p0  ;;  %p207_p7 = scmp.lt.s32.totalorder %s14787_s27, 3 }
   0xa   : > { %p14873_p6 = por %p200_p3, %p44_p0  ;;  %s14789_s10 = smov [#allocation7]  }
   0xb   : > { %s18405_s30 = scalar_select %p14868_p4, 1, 0 }
   0xc   : > { %s18406_s8 = scalar_select %p14873_p6, 1, 0 }
   0xd   : > { %p14878_p8 = pnand %p11657_p5, %p207_p7  ;;  %s219_s11 = sshll.u32 %s14789_s10, 4  ;;  %s14882_s11 = int_to_ptr.vmem [resolvable:$true] %s219_s11 }
   0xe   : > { %s14790_s13 = smov [#allocation9]   ;;  %s14631_s17 = scalar_lea.hbm %s18302_s1, 9216 }
   0xf   : > { %p14251_p9 = pneg %p14878_p8  ;;  %s238_s14 = sshll.u32 %s14790_s13, 4  ;;  %s14893_s14 = int_to_ptr.vmem [resolvable:$true] %s238_s14 }
  0x10   : > { %p14632_p12 = scmp.ne.s32.totalorder %s18302_s1, %s14631_s17  ;;  %p14638_p5 = scmp.lt.u32.totalorder %s14631_s17, %s18302_s1 }
  0x11   : > { %p14889_p11 = pnand %p14251_p9, %p18309_p1 }
  0x13   : > { %p14633_p13 = pneg %p14889_p11 }
  0x15   : > { %p14634_p0 = pnand %p14633_p13, %p14632_p12 }
  0x17   : > { %p14635_p3 = pneg %p14634_p0 }
  0x19   : > { %p14640_p7 = pnand %p14638_p5, %p14635_p3 }
  0x1b   : > { %14643 = shalt.err (!%p14640_p7)
}
  0x1c   : > { %s14644_s22 = scalar_lea.vmem %s14882_s11, 9216  ;;  %p14652_p2 = scmp.lt.s32.totalorder %s14882_s11, %s14882_s11 }
  0x1d   : > { %p14645_p9 = scmp.ne.s32.totalorder %s14882_s11, %s14644_s22  ;;  %p14653_p12 = scmp.lt.s32.totalorder %s14644_s22, %s14644_s22 }
  0x1f   : > { %p14647_p10 = pnand %p14645_p9, %p14633_p13  ;;  %p14654_p0 = por %p14653_p12, %p14652_p2 }
  0x21   : > { %p14648_p1 = pneg %p14647_p10 }
  0x23   : > { %p14655_p6 = pnand %p14654_p0, %p14648_p1 }
  0x25   : > { %14658 = shalt.err (!%p14655_p6)
}
  0x26   : > { %s18310_s23 = smov 64   ;;  %s14792_s29 = smov 4  }
  0x27   : > { %14254 = dma.hbm_to_vmem [thread:$0]  (!%p14889_p11), %s18302_s1, 9216, %s14882_s11, [#allocation8], %s18310_s23, %s18310_s23, %s14792_s29  }
  0x28   : > { %s14659_s17 = scalar_lea.hbm %s18305_s4, 9216 }
  0x29   : > { %p14660_p1 = scmp.ne.s32.totalorder %s18305_s4, %s14659_s17  ;;  %p14666_p10 = scmp.lt.u32.totalorder %s14659_s17, %s18305_s4 }
  0x2b   : > { %p14662_p2 = pnand %p14660_p1, %p14633_p13 }
  0x2d   : > { %p14663_p6 = pneg %p14662_p2 }
  0x2f   : > { %p14668_p3 = pnand %p14666_p10, %p14663_p6 }
  0x31   : > { %14671 = shalt.err (!%p14668_p3)
}
  0x32   : > { %s14672_s11 = scalar_lea.vmem %s14893_s14, 9216  ;;  %p14680_p12 = scmp.lt.s32.totalorder %s14893_s14, %s14893_s14 }
  0x33   : > { %p14673_p5 = scmp.ne.s32.totalorder %s14893_s14, %s14672_s11  ;;  %p14681_p0 = scmp.lt.s32.totalorder %s14672_s11, %s14672_s11 }
  0x35   : > { %p14675_p7 = pnand %p14673_p5, %p14633_p13  ;;  %p14682_p1 = por %p14681_p0, %p14680_p12 }
  0x37   : > { %p14676_p9 = pneg %p14675_p7 }
  0x39   : > { %p14683_p2 = pnand %p14682_p1, %p14676_p9 }
  0x3b   : > { %14686 = shalt.err (!%p14683_p2)
}
  0x3c   : > { %14257 = dma.hbm_to_vmem [thread:$0]  (!%p14889_p11), %s18305_s4, 9216, %s14893_s14, [#allocation8], %s18310_s23, %s18310_s23, %s14792_s29  }
  0x3d   : > { %s14954_s12 = sadd.s32 1, %s14787_s27   ;;  %s31_s13 = sadd.s32 1, %s14783_s26 }
  0x3e   : > { %s28_s15 = ssub.s32 %s14787_s27, %s14954_s12  ;;  %p38_p13 = scmp.ne.s32.totalorder %s14783_s26, %s14779_s25 }
  0x3f   : > { %p29_p6 = scmp.eq.s32.totalorder %s28_s15, 0  ;;  %p39_p10 = scmp.eq.s32.totalorder %s14787_s27, 0 }
  0x40   : > { %p18409_p3 = scmp.eq.s32.totalorder %s14859_s28, 1  ;;  %p14268_p7 = scmp.lt.s32.totalorder %s14787_s27, 2 }
  0x41   : > { %s14970_s17 = scalar_select %p29_p6, %s14783_s26, %s31_s13  }
  0x42   : > { %p14964_p5 = por %p18409_p3, %p38_p13  ;;  %p40_p9 = por %p39_p10, %p38_p13 }
  0x43   : > { %s258_s18 = sand.u32 1, %s14783_s26   ;;  %s12270_s14 = sshll.u32 %s14787_s27, 11 }
  0x44   : > { %s18410_s16 = scalar_select %p14964_p5, 1, 0 }
  0x45   : > { %s11661_s19 = sshll.u32 %s258_s18, 7  ;;  %s14977_s11 = scalar_lea.hbm %s18301_s0, %s12270_s14 }
  0x46   : > { %s262_s22 = scalar_lea.vmem [#allocation4], %s11661_s19  ;;  %p14981_p11 = pnand %p14268_p7, %p40_p9 }
  0x47   : > { %s269_s10 = sshll.u32 %s262_s22, 4  ;;  %s14985_s15 = scalar_lea.sflag [#allocation5], %s258_s18  ;;  %s14979_s10 = int_to_ptr.vmem [resolvable:$true] %s269_s10 }
  0x48   : > { %s14687_s23 = scalar_lea.hbm %s14977_s11, 2048  ;;  %p14689_p0 = pneg %p14981_p11 }
  0x49   : > { %p14688_p12 = scmp.ne.s32.totalorder %s14977_s11, %s14687_s23  ;;  %s14692_s20 = scalar_lea.hbm %s18301_s0, 4096 }
  0x4a   : > { %p14693_p13 = scmp.lt.u32.totalorder %s14977_s11, %s18301_s0  ;;  %p14694_p6 = scmp.lt.u32.totalorder %s14692_s20, %s14687_s23 }
  0x4b   : > { %p14690_p1 = pnand %p14689_p0, %p14688_p12  ;;  %p14696_p3 = scmp.lt.u32.totalorder %s14687_s23, %s14977_s11 }
  0x4c   : > { %p14695_p10 = por %p14694_p6, %p14693_p13 }
  0x4d   : > { %p14691_p2 = pneg %p14690_p1 }
  0x4e   : > { %p14697_p7 = por %p14696_p3, %p14695_p10 }
  0x50   : > { %p14698_p9 = pnand %p14697_p7, %p14691_p2 }
  0x52   : > { %14701 = shalt.err (!%p14698_p9)
}
  0x53   : > { %s14702_s18 = scalar_lea.vmem %s14979_s10, 2048  ;;  %s14793_s19 = smov [#allocation4]  }
  0x54   : > { %p14703_p12 = scmp.ne.s32.totalorder %s14979_s10, %s14702_s18  ;;  %s14707_s14 = sshll.u32 %s14793_s19, 4  ;;  %s14708_s14 = int_to_ptr.vmem [resolvable:$false] %s14707_s14 }
  0x55   : > { %s14709_s21 = scalar_lea.vmem %s14708_s14, 4096  ;;  %p14710_p4 = scmp.lt.s32.totalorder %s14979_s10, %s14708_s14 }
  0x56   : > { %p14705_p1 = pnand %p14703_p12, %p14689_p0  ;;  %p14711_p13 = scmp.lt.s32.totalorder %s14709_s21, %s14702_s18 }
  0x58   : > { %p14706_p5 = pneg %p14705_p1  ;;  %p14712_p6 = por %p14711_p13, %p14710_p4 }
  0x5a   : > { %p14713_p10 = pnand %p14712_p6, %p14706_p5 }
  0x5c   : > { %14716 = shalt.err (!%p14713_p10)
}
  0x5d   : > { %s18412_s23 = smov 64   ;;  %281 = sbr.rel (%p14878_p8) target bundleno = 1846 (0x736), region = 48 }
  0x5e   : > { %14261 = dma.hbm_to_vmem [thread:$0]  (!%p14981_p11), %s14977_s11, 2048, %s14979_s10, %s14985_s15, %s18412_s23, %s18412_s23, %s14792_s29  }
  0x64   : > { %s15019_s20 = sand.u32 1, %s14779_s25   ;;  %p18413_p4 = scmp.ne.s32.totalorder %s18405_s30, 0 }
  0x65   : > { %s11665_s22 = sshll.u32 %s15019_s20, 7  ;;  %s284_s18 = scalar_lea.sflag [#allocation5], %s15019_s20 }
  0x66   : > { %s15025_s13 = scalar_lea.vmem [#allocation4], %s11665_s22 }
  0x67   : > { %14762 = dma.done.wait (%p18413_p4), %s284_s18, 2048  }
  0x68   : > { %14764 = vsyncadd (%p18413_p4), %s284_s18, 4294965248  ;;  %p18414_p5 = scmp.eq.s32.totalorder %s14859_s28, 0 }
  0x6a   : > { %14766 = dma.done.wait (%p18414_p5), [#allocation8], 18432   ;;  %p18415_p8 = pmov %p18414_p5 }
  0x6b   : > { %v14794_v0 = vmov 0   ;;  %v14311_v1 = vld [vmem:[#allocation7 + $0x40] sm:$0xff]   ;;  %v14312_v2 = vld [vmem:[#allocation7 + $0x48] sm:$0xff]   ;;  %vm334_vm0 = vcmask 1040384   ;;  %vm335_vm1 = vsmask.f32 256 }
  0x6c   : > { %14768 = vsyncadd (%p18415_p8), [#allocation8], 4294948864  ;;  %327 = vst [vmem:[#allocation2] sm:$0xf] %v14794_v0  ;;  %12863 = vmatprep.subr.bf16.mxu0 %v14311_v1  ;;  %vm391_vm2 = vsmask.f32 7938 }
  0x6d   : > { %328 = vst [vmem:[#allocation2 + $0x4] sm:$0xf] %v14794_v0  ;;  %329 = vst [vmem:[#allocation2 + $0x8] sm:$0x1] %v14794_v0  ;;  %12864 = vmatpush3.bf16.msra.mxu0 %v14311_v1  ;;  %v14313_v3 = vld [vmem:[#allocation7 + $0x50] sm:$0xff]   ;;  %v18418_v5 = vmov 0 }
  0x6e   : > { %331 = vst [vmem:[#allocation2 + $0xcc] sm:$0xf] %v14794_v0  ;;  %332 = vst [vmem:[#allocation2 + $0xd0] sm:$0xf] %v14794_v0  ;;  %12865 = vmatprep.subr.bf16.mxu0 %v14312_v2  ;;  %vm594_vm5 = vsmask.f32 4368 }
  0x6f   : > { %333 = vst [vmem:[#allocation2 + $0xd4] sm:$0x1] %v14794_v0  ;;  %447 = vst [vmem:[#allocation3] sm:$0xf] %v14794_v0  ;;  %v14314_v6 = vld [vmem:[#allocation7 + $0x58] sm:$0xff]   ;;  %v14315_v23 = vld [vmem:[#allocation7 + $0x60] sm:$0xff]  }
  0x70   : > { %448 = vst [vmem:[#allocation3 + $0x4] sm:$0xf] %v14794_v0  ;;  %449 = vst [vmem:[#allocation3 + $0x8] sm:$0x1] %v14794_v0  ;;  %v340_v14 = vld [vmem:[#allocation2 + $0xc] sm:$0x1] }
  0x71   : > { %451 = vst [vmem:[#allocation3 + $0xcc] sm:$0xf] %v14794_v0  ;;  %452 = vst [vmem:[#allocation3 + $0xd0] sm:$0xf] %v14794_v0  ;;  %12866 = vmatpush3.bf16.msra.mxu0 %v14312_v2  ;;  %vm1095_vm6 = vsmask.f32 3328 }
  0x72   : > { %453 = vst [vmem:[#allocation3 + $0xd4] sm:$0x1] %v14794_v0  ;;  %vm15036_vm3 = vmand %vm334_vm0, %vm335_vm1  ;;  %12867 = vmatprep.subr.bf16.mxu0 %v14313_v3  ;;  %v396_v16 = vld [vmem:[#allocation2 + $0x14] sm:$0x1]  ;;  %v562_v17 = vld [vmem:[%s15025_s13] sm:$0xf] }
  0x73   : > { %vm15041_vm4 = vmand %vm334_vm0, %vm391_vm2  ;;  %v337_v7 = vld [vmem:[#allocation2] sm:$0x1]  ;;  %v341_v15 = vsel %vm15036_vm3, 0, %v340_v14  ;;  %v563_v21 = vld [vmem:[%s15025_s13 + $0x4] sm:$0xf]  ;;  %v597_v22 = vshrl.u32 %v562_v17, 16 }
  0x74   : > { %v18419_v5 = vsel %vm15041_vm4, 4294967295, %v18418_v5  ;;  %v393_v8 = vld [vmem:[#allocation2 + $0x8] sm:$0x1]  ;;  %v1032_v9 = vld [vmem:[#allocation2 + $0x4] sm:$0xf]  ;;  %v338_v10 = vsel %vm15036_vm3, 0, %v337_v7  ;;  %vm15063_vm9 = vmor %vm335_vm1, %vm594_vm5 }
  0x75   : > { %18420 = vst [vmem:[#allocation14_spill] sm:$0xff] %v18419_v5  ;;  %v394_v11 = vsel %vm15041_vm4, 0, %v393_v8  ;;  %v1108_v12 = vshll.u32 %v1032_v9, 16  ;;  %v1112_v13 = vshrl.u32 %v1032_v9, 16  ;;  %339 = vst [vmem:[#allocation2] sm:$0x1] %v338_v10  ;;  %12868 = vmatpush3.bf16.msra.mxu0 %v14313_v3 }
  0x76   : > { %395 = vst [vmem:[#allocation2 + $0x8] sm:$0x1] %v394_v11  ;;  %342 = vst [vmem:[#allocation2 + $0xc] sm:$0x1] %v341_v15  ;;  %v397_v20 = vsel %vm15041_vm4, 0, %v396_v16  ;;  %12869 = vmatprep.subr.bf16.mxu0 %v14314_v6  ;;  %v600_v24 = vshll.u32 %v562_v17, 16 }
  0x77   : > { %v15052_v18 = vrot.slane %v1108_v12, 5  ;;  %v1114_v19 = vrot.slane %v1112_v13, 4  ;;  %398 = vst [vmem:[#allocation2 + $0x14] sm:$0x1] %v397_v20  ;;  %v605_v25 = vshrl.u32 %v563_v21, 16  ;;  %v608_v26 = vshll.u32 %v563_v21, 16 }
  0x78   : > { %v599_v27 = vrot.slane %v597_v22, 7  ;;  %vm917_vm7 = vcmask 1043456   ;;  %v343_v28 = vld [vmem:[#allocation2 + $0x18] sm:$0x1]  ;;  %v399_v32 = vld [vmem:[#allocation2 + $0x20] sm:$0x1] }
  0x79   : > { %v1115_v29 = vor.u32 %v1114_v19, %v15052_v18  ;;  %v607_v30 = vrot.slane %v605_v25, 7  ;;  %v344_v31 = vsel %vm15036_vm3, 0, %v343_v28  ;;  %v564_v33 = vld [vmem:[%s15025_s13 + $0x8] sm:$0xf]  ;;  %12870 = vmatpush3.bf16.msra.mxu0 %v14314_v6  ;;  %vm1096_vm8 = vsmask.f32 7440  ;;  %vm15072_vm10 = vmand %vm917_vm7, %vm391_vm2 }
  0x7a   : > { %v18421_v34 = vmov 0  ;;  %v602_v35 = vor.u32 %v600_v24, %v599_v27  ;;  %v603_v36 = vrot.slane %v599_v27, 4  ;;  %345 = vst [vmem:[#allocation2 + $0x18] sm:$0x1] %v344_v31  ;;  %v400_v37 = vsel %vm15041_vm4, 0, %v399_v32  ;;  %12871 = vmatprep.subr.bf16.mxu0 %v14315_v23  ;;  %v14316_v39 = vld [vmem:[#allocation7 + $0x68] sm:$0xff]   ;;  %vm15087_vm11 = vmor %vm1095_vm6, %vm1096_vm8 }
  0x7b   : > { %v18422_v34 = vsel %vm15063_vm9, 4294967295, %v18421_v34  ;;  %v565_v38 = vld [vmem:[%s15025_s13 + $0xc] sm:$0xf]  ;;  %v610_v40 = vor.u32 %v608_v26, %v607_v30  ;;  %v612_v41 = vrot.slane %v607_v30, 4  ;;  %v18424_v42 = vmov 0  ;;  %v14317_v61 = vld [vmem:[#allocation7 + $0x70] sm:$0xff]  }
  0x7c   : > { %18423 = vst [vmem:[#allocation15_spill] sm:$0xff] %v18422_v34  ;;  %v18425_v42 = vsel %vm15072_vm10, 4294967295, %v18424_v42  ;;  %401 = vst [vmem:[#allocation2 + $0x20] sm:$0x1] %v400_v37  ;;  %v614_v43 = vshrl.u32 %v564_v33, 16  ;;  %v617_v44 = vshll.u32 %v564_v33, 16 }
  0x7d   : > { %18426 = vst [vmem:[#allocation16_spill] sm:$0xff] %v18425_v42  ;;  %v1031_v45 = vld [vmem:[#allocation2] sm:$0xf]  ;;  %v1079_v46 = vld [vmem:[#allocation2 + $0x8] sm:$0x1]  ;;  %v622_v47 = vshrl.u32 %v565_v38, 16  ;;  %12872 = vmatpush3.bf16.msra.mxu0 %v14315_v23  ;;  %v611_v55 = vsel %vm15063_vm9, %v603_v36, %v610_v40 }
  0x7e   : > { %v625_v48 = vshll.u32 %v565_v38, 16  ;;  %v346_v49 = vld [vmem:[#allocation2 + $0x24] sm:$0x1]  ;;  %v1099_v50 = vshrl.u32 %v1031_v45, 16  ;;  %v1102_v51 = vshll.u32 %v1031_v45, 16  ;;  %v15076_v52 = vrot.slane %v1115_v29, 4  ;;  %12873 = vmatprep.subr.bf16.mxu0 %v14316_v39 }
  0x7f   : > { %v1118_v53 = vshll.u32 %v1079_v46, 16  ;;  %v919_v54 = vld [vmem:[#allocation2 + $0xc] sm:$0xf]  ;;  %v923_v57 = vld [vmem:[#allocation2 + $0x14] sm:$0x1]  ;;  %v616_v58 = vrot.slane %v614_v43, 7 }
  0x80   : > { %v920_v56 = vsel %vm15072_vm10, %v602_v35, %v919_v54  ;;  %v624_v59 = vrot.slane %v622_v47, 7  ;;  %v402_v60 = vld [vmem:[#allocation2 + $0x2c] sm:$0x1]  ;;  %v1101_v62 = vrot.slane %v1099_v50, 4  ;;  %v1104_v63 = vrot.slane %v1102_v51, 5  ;;  %v15113_v35 = vld [vmem:[#allocation7] sm:$0xff]  }
  0x81   : > { %v1120_v0 = vrot.slane %v1118_v53, 5  ;;  %921 = vst [vmem:[#allocation2 + $0xc] sm:$0xf] %v920_v56  ;;  %922 = vst [vmem:[#allocation2 + $0x10] sm:$0xf] %v611_v55  ;;  %v924_v1 = vsel %vm15036_vm3, %v612_v41, %v923_v57  ;;  %v619_v6 = vor.u32 %v617_v44, %v616_v58  ;;  %v620_v7 = vrot.slane %v616_v58, 4  ;;  %12874 = vmatpush3.bf16.msra.mxu0 %v14316_v39 }
  0x82   : > { %v566_v2 = vld [vmem:[%s15025_s13 + $0x10] sm:$0xf]  ;;  %925 = vst [vmem:[#allocation2 + $0x14] sm:$0x1] %v924_v1  ;;  %v627_v8 = vor.u32 %v625_v48, %v624_v59  ;;  %v629_v9 = vrot.slane %v624_v59, 4  ;;  %v1105_v11 = vor.u32 %v1104_v63, %v1101_v62  ;;  %v347_v13 = vsel %vm15036_vm3, 0, %v346_v49  ;;  %12875 = vmatprep.subr.bf16.mxu0 %v14317_v61 }
  0x83   : > { %v567_v10 = vld [vmem:[%s15025_s13 + $0x14] sm:$0xf]  ;;  %v926_v12 = vld [vmem:[#allocation2 + $0x18] sm:$0xf]  ;;  %v403_v14 = vsel %vm15041_vm4, 0, %v402_v60  ;;  %v631_v19 = vshrl.u32 %v566_v2, 16  ;;  %v1121_v24 = vsel %vm15087_vm11, %v15076_v52, %v1120_v0 }
  0x84   : > { %v628_v15 = vsel %vm15063_vm9, %v620_v7, %v627_v8  ;;  %v927_v16 = vsel %vm15072_vm10, %v619_v6, %v926_v12  ;;  %v930_v17 = vld [vmem:[#allocation2 + $0x20] sm:$0x1]  ;;  %348 = vst [vmem:[#allocation2 + $0x24] sm:$0x1] %v347_v13  ;;  %404 = vst [vmem:[#allocation2 + $0x2c] sm:$0x1] %v403_v14 }
  0x85   : > { %v634_v20 = vshll.u32 %v566_v2, 16  ;;  %v349_v21 = vld [vmem:[#allocation2 + $0x30] sm:$0x1]  ;;  %v14318_v22 = vld [vmem:[#allocation7 + $0x78] sm:$0xff]   ;;  %v1106_v23 = vrot.slane %v1105_v11, 4  ;;  %v931_v25 = vsel %vm15036_vm3, %v629_v9, %v930_v17  ;;  %v639_v26 = vshrl.u32 %v567_v10, 16  ;;  %12876 = vmatpush3.bf16.msra.mxu0 %v14317_v61 }
  0x86   : > { %928 = vst [vmem:[#allocation2 + $0x18] sm:$0xf] %v927_v16  ;;  %929 = vst [vmem:[#allocation2 + $0x1c] sm:$0xf] %v628_v15  ;;  %v405_v27 = vld [vmem:[#allocation2 + $0x38] sm:$0x1]  ;;  %12877 = vmatprep.subr.bf16.mxu0 %v14318_v22 }
  0x87   : > { %932 = vst [vmem:[#allocation2 + $0x20] sm:$0x1] %v931_v25  ;;  %v633_v28 = vrot.slane %v631_v19, 7  ;;  %v642_v29 = vshll.u32 %v567_v10, 16  ;;  %v350_v30 = vsel %vm15036_vm3, 0, %v349_v21  ;;  %v406_v31 = vsel %vm15041_vm4, 0, %v405_v27 }
  0x88   : > { %v568_v32 = vld [vmem:[%s15025_s13 + $0x18] sm:$0xf]  ;;  %v1111_v33 = vsel %vm15087_vm11, %v1106_v23, %v15052_v18  ;;  %v641_v36 = vrot.slane %v639_v26, 7  ;;  %351 = vst [vmem:[#allocation2 + $0x30] sm:$0x1] %v350_v30  ;;  %vm2125_vm12 = vcmask 1042432  }
  0x89   : > { %407 = vst [vmem:[#allocation2 + $0x38] sm:$0x1] %v406_v31  ;;  %v15116_v37 = vld [vmem:[%s15025_s13 + $0x1c] sm:$0xf]  ;;  %v648_v38 = vshrl.u32 %v568_v32, 16  ;;  %v11669_v39 = vcombine.low %v1111_v33, %v1121_v24  ;;  %v636_v43 = vor.u32 %v634_v20, %v633_v28  ;;  %v637_v44 = vrot.slane %v633_v28, 4  ;;  %12878 = vmatpush3.bf16.msra.mxu0 %v14318_v22 }
  0x8a   : > { %v1033_v40 = vld [vmem:[#allocation2 + $0xc] sm:$0xf]  ;;  %v1034_v41 = vld [vmem:[#allocation2 + $0x10] sm:$0xf]  ;;  %v651_v45 = vshll.u32 %v568_v32, 16  ;;  %v644_v51 = vor.u32 %v642_v29, %v641_v36  ;;  %v646_v52 = vrot.slane %v641_v36, 4  ;;  %12911 = vmatprep.subr.bf16.mxu0 %v15113_v35 }
  0x8b   : > { %v1080_v46 = vld [vmem:[#allocation2 + $0x14] sm:$0x1]  ;;  %v1123_v47 = vshrl.u32 %v1033_v40, 16  ;;  %v1126_v48 = vshll.u32 %v1033_v40, 16  ;;  %v1132_v18 = vshll.u32 %v1034_v41, 16  ;;  %v1136_v49 = vshrl.u32 %v1034_v41, 16  ;;  %12879 = vmatprep.mubr.bf16.mxu0 %v11669_v39 }
  0x8c   : > { %v1142_v50 = vshll.u32 %v1080_v46, 16  ;;  %v656_v53 = vshrl.u32 %v15116_v37, 16  ;;  %v933_v58 = vld [vmem:[#allocation2 + $0x24] sm:$0xf]  ;;  %v645_v62 = vsel %vm15063_vm9, %v637_v44, %v644_v51  ;;  %v650_v0 = vrot.slane %v648_v38, 7  ;;  %v14320_v29 = vld [vmem:[#allocation7 + $0x8] sm:$0xff]  }
  0x8d   : > { %v1125_v54 = vrot.slane %v1123_v47, 4  ;;  %v1128_v55 = vrot.slane %v1126_v48, 5  ;;  %v1134_v56 = vrot.slane %v1132_v18, 5  ;;  %v1138_v57 = vrot.slane %v1136_v49, 4  ;;  %v1035_v60 = vld [vmem:[#allocation2 + $0x18] sm:$0xf] }
  0x8e   : > { %v1144_v59 = vrot.slane %v1142_v50, 5  ;;  %v1036_v61 = vld [vmem:[#allocation2 + $0x1c] sm:$0xf]  ;;  %v934_v63 = vsel %vm15072_vm10, %v636_v43, %v933_v58  ;;  %v1081_v6 = vld [vmem:[#allocation2 + $0x20] sm:$0x1]  ;;  %v1147_v7 = vshrl.u32 %v1035_v60, 16  ;;  %v653_v24 = vor.u32 %v651_v45, %v650_v0 }
  0x8f   : > { %v1129_v1 = vor.u32 %v1128_v55, %v1125_v54  ;;  %v1139_v2 = vor.u32 %v1138_v57, %v1134_v56  ;;  %v1150_v8 = vshll.u32 %v1035_v60, 16  ;;  %935 = vst [vmem:[#allocation2 + $0x24] sm:$0xf] %v934_v63  ;;  %936 = vst [vmem:[#allocation2 + $0x28] sm:$0xf] %v645_v62  ;;  %v1156_v10 = vshll.u32 %v1036_v61, 16 }
  0x90   : > { %v937_v9 = vld [vmem:[#allocation2 + $0x2c] sm:$0x1]  ;;  %v1160_v11 = vshrl.u32 %v1036_v61, 16  ;;  %v1166_v12 = vshll.u32 %v1081_v6, 16  ;;  %v352_v14 = vld [vmem:[#allocation2 + $0x3c] sm:$0x1] }
  0x91   : > { %v938_v13 = vsel %vm15036_vm3, %v646_v52, %v937_v9  ;;  %v1130_v15 = vrot.slane %v1129_v1, 4  ;;  %v1140_v16 = vrot.slane %v1139_v2, 4  ;;  %v1149_v17 = vrot.slane %v1147_v7, 4  ;;  %v940_v20 = vld [vmem:[#allocation2 + $0x30] sm:$0xf]  ;;  %s18178_s30 = scalar_lea.vmem [#allocation10], %s11665_s22 }
  0x92   : > { %v1152_v19 = vrot.slane %v1150_v8, 5  ;;  %939 = vst [vmem:[#allocation2 + $0x2c] sm:$0x1] %v938_v13  ;;  %v1158_v21 = vrot.slane %v1156_v10, 5  ;;  %v1162_v22 = vrot.slane %v1160_v11, 4  ;;  %v1168_v23 = vrot.slane %v1166_v12, 5 }
  0x93   : > { %v408_v25 = vld [vmem:[#allocation2 + $0x44] sm:$0x1]  ;;  %v1135_v26 = vsel %vm15087_vm11, %v1130_v15, %v1134_v56  ;;  %v1145_v27 = vsel %vm15087_vm11, %v1140_v16, %v1144_v59  ;;  %v654_v30 = vrot.slane %v650_v0, 4  ;;  %v944_v31 = vld [vmem:[#allocation2 + $0x38] sm:$0x1]  ;;  %v658_v36 = vrot.slane %v656_v53, 7 }
  0x94   : > { %v1153_v28 = vor.u32 %v1152_v19, %v1149_v17  ;;  %v11670_v32 = vcombine.low %v1135_v26, %v1145_v27  ;;  %v1163_v33 = vor.u32 %v1162_v22, %v1158_v21  ;;  %v659_v38 = vshll.u32 %v15116_v37, 16  ;;  %v570_v44 = vld [vmem:[%s15025_s13 + $0x20] sm:$0xf]  ;;  %v571_v52 = vld [vmem:[%s15025_s13 + $0x24] sm:$0xf]  ;;  %v14322_v15 = vld [vmem:[#allocation7 + $0x18] sm:$0xff]  }
  0x95   : > { %v941_v40 = vsel %vm15072_vm10, %v653_v24, %v940_v20  ;;  %v353_v41 = vsel %vm15036_vm3, 0, %v352_v14  ;;  %v409_v43 = vsel %vm15041_vm4, 0, %v408_v25  ;;  %v663_v18 = vrot.slane %v658_v36, 4  ;;  %v355_v58 = vld [vmem:[#allocation2 + $0x48] sm:$0x1]  ;;  %s12335_s22 = sshll.u32 %s14859_s28, 11 }
  0x96   : > { %v1154_v39 = vrot.slane %v1153_v28, 4  ;;  %12880 = vmatmul.mubr.bf16.vlgmr.msra.gmra.mrb[0].mxu0 %v11670_v32  ;;  %v1164_v45 = vrot.slane %v1163_v33, 4  ;;  %v1037_v46 = vld [vmem:[#allocation2 + $0x24] sm:$0xf]  ;;  %v1038_v47 = vld [vmem:[#allocation2 + $0x28] sm:$0xf]  ;;  %v661_v48 = vor.u32 %v659_v38, %v658_v36  ;;  %s18253_s10 = scalar_lea.hbm %s18308_s7, %s12335_s22 }
  0x97   : > { %942 = vst [vmem:[#allocation2 + $0x30] sm:$0xf] %v941_v40  ;;  %354 = vst [vmem:[#allocation2 + $0x3c] sm:$0x1] %v353_v41  ;;  %12912 = vmatpush3.bf16.msra.mxu0 %v15113_v35  ;;  %v1171_v49 = vshrl.u32 %v1037_v46, 16  ;;  %v1174_v50 = vshll.u32 %v1037_v46, 16  ;;  %v945_v57 = vsel %vm15036_vm3, %v663_v18, %v944_v31 }
  0x98   : > { %410 = vst [vmem:[#allocation2 + $0x44] sm:$0x1] %v409_v43  ;;  %v1159_v37 = vsel %vm15087_vm11, %v1154_v39, %v1158_v21  ;;  %v1180_v51 = vshll.u32 %v1038_v47, 16  ;;  %v1169_v53 = vsel %vm15087_vm11, %v1164_v45, %v1168_v23  ;;  %v1184_v55 = vshrl.u32 %v1038_v47, 16  ;;  %12913 = vmatprep.subr.bf16.mxu0 %v14320_v29  ;;  %v14321_v35 = vld [vmem:[#allocation7 + $0x10] sm:$0xff]   ;;  %v14323_v47 = vld [vmem:[#allocation7 + $0x20] sm:$0xff]  }
  0x99   : > { %v1082_v54 = vld [vmem:[#allocation2 + $0x2c] sm:$0x1]  ;;  %v662_v56 = vsel %vm15063_vm9, %v654_v30, %v661_v48  ;;  %v11671_v59 = vcombine.low %v1159_v37, %v1169_v53  ;;  %v1173_v60 = vrot.slane %v1171_v49, 4  ;;  %v1176_v61 = vrot.slane %v1174_v50, 5  ;;  %946 = vst [vmem:[#allocation2 + $0x38] sm:$0x1] %v945_v57 }
  0x9a   : > { %v1182_v62 = vrot.slane %v1180_v51, 5  ;;  %943 = vst [vmem:[#allocation2 + $0x34] sm:$0xf] %v662_v56  ;;  %v411_v63 = vld [vmem:[#allocation2 + $0x50] sm:$0x1]  ;;  %v1186_v0 = vrot.slane %v1184_v55, 4 }
  0x9b   : > { %v1190_v1 = vshll.u32 %v1082_v54, 16  ;;  %v665_v2 = vshrl.u32 %v570_v44, 16  ;;  %v668_v6 = vshll.u32 %v570_v44, 16  ;;  %12883 = vmatprep.mubr.bf16.mxu0 %v11671_v59  ;;  %v1177_v7 = vor.u32 %v1176_v61, %v1173_v60  ;;  %12914 = vmatpush3.bf16.msra.mxu0 %v14320_v29  ;;  %v572_v25 = vld [vmem:[%s15025_s13 + $0x28] sm:$0xf]  ;;  %s11564_s9 = sshll.u32 %s18178_s30, 4  ;;  %s18255_s9 = int_to_ptr.vmem [resolvable:$true] %s11564_s9 }
  0x9c   : > { %v673_v8 = vshrl.u32 %v571_v52, 16  ;;  %v676_v9 = vshll.u32 %v571_v52, 16  ;;  %v356_v10 = vsel %vm15036_vm3, 0, %v355_v58  ;;  %v1187_v11 = vor.u32 %v1186_v0, %v1182_v62  ;;  %12915 = vmatprep.subr.bf16.mxu0 %v14321_v35  ;;  %v573_v31 = vld [vmem:[%s15025_s13 + $0x2c] sm:$0xf]  ;;  %s11551_s28 = scalar_lea.sflag [#allocation6], %s15019_s20 }
  0x9d   : > { %v1192_v12 = vrot.slane %v1190_v1, 5  ;;  %v667_v13 = vrot.slane %v665_v2, 7  ;;  %357 = vst [vmem:[#allocation2 + $0x48] sm:$0x1] %v356_v10  ;;  %v412_v14 = vsel %vm15041_vm4, 0, %v411_v63  ;;  %v1178_v16 = vrot.slane %v1177_v7, 4 }
  0x9e   : > { %v1039_v17 = vld [vmem:[#allocation2 + $0x30] sm:$0xf]  ;;  %v675_v19 = vrot.slane %v673_v8, 7  ;;  %v947_v20 = vld [vmem:[#allocation2 + $0x3c] sm:$0xf]  ;;  %v1188_v21 = vrot.slane %v1187_v11, 4 }
  0x9f   : > { %413 = vst [vmem:[#allocation2 + $0x50] sm:$0x1] %v412_v14  ;;  %v1195_v22 = vshrl.u32 %v1039_v17, 16  ;;  %v1198_v23 = vshll.u32 %v1039_v17, 16  ;;  %v670_v24 = vor.u32 %v668_v6, %v667_v13  ;;  %v1183_v26 = vsel %vm15087_vm11, %v1178_v16, %v1182_v62  ;;  %v951_v30 = vld [vmem:[#allocation2 + $0x44] sm:$0x1]  ;;  %12916 = vmatpush3.bf16.msra.mxu0 %v14321_v35 }
  0xa0   : > { %v671_v27 = vrot.slane %v667_v13, 4  ;;  %v678_v28 = vor.u32 %v676_v9, %v675_v19  ;;  %v680_v29 = vrot.slane %v675_v19, 4  ;;  %v1193_v32 = vsel %vm15087_vm11, %v1188_v21, %v1192_v12  ;;  %v1083_v36 = vld [vmem:[#allocation2 + $0x38] sm:$0x1]  ;;  %v358_v41 = vld [vmem:[#allocation2 + $0x54] sm:$0x1]  ;;  %12917 = vmatprep.subr.bf16.mxu0 %v14322_v15 }
  0xa1   : > { %v1040_v33 = vld [vmem:[#allocation2 + $0x34] sm:$0xf]  ;;  %v1197_v38 = vrot.slane %v1195_v22, 4  ;;  %v1200_v39 = vrot.slane %v1198_v23, 5  ;;  %v948_v40 = vsel %vm15072_vm10, %v670_v24, %v947_v20  ;;  %v11672_v43 = vcombine.low %v1183_v26, %v1193_v32  ;;  %v414_v50 = vld [vmem:[#allocation2 + $0x5c] sm:$0x1] }
  0xa2   : > { %v1204_v44 = vshll.u32 %v1040_v33, 16  ;;  %v1208_v45 = vshrl.u32 %v1040_v33, 16  ;;  %v1214_v46 = vshll.u32 %v1083_v36, 16  ;;  %949 = vst [vmem:[#allocation2 + $0x3c] sm:$0xf] %v948_v40  ;;  %v679_v18 = vsel %vm15063_vm9, %v671_v27, %v678_v28  ;;  %v14324_v1 = vld [vmem:[#allocation7 + $0x28] sm:$0xff]  }
  0xa3   : > { %v1201_v48 = vor.u32 %v1200_v39, %v1197_v38  ;;  %v952_v37 = vsel %vm15036_vm3, %v680_v29, %v951_v30  ;;  %v682_v49 = vshrl.u32 %v572_v25, 16  ;;  %v574_v51 = vld [vmem:[%s15025_s13 + $0x30] sm:$0xf]  ;;  %12884 = vmatmul.mubr.bf16.gmra.mrb[4].mxu0 %v11672_v43  ;;  %950 = vst [vmem:[#allocation2 + $0x40] sm:$0xf] %v679_v18  ;;  %v685_v55 = vshll.u32 %v572_v25, 16 }
  0xa4   : > { %v1206_v52 = vrot.slane %v1204_v44, 5  ;;  %v1210_v53 = vrot.slane %v1208_v45, 4  ;;  %v1216_v54 = vrot.slane %v1214_v46, 5  ;;  %953 = vst [vmem:[#allocation2 + $0x44] sm:$0x1] %v952_v37  ;;  %v690_v35 = vshrl.u32 %v573_v31, 16  ;;  %12918 = vmatpush3.bf16.msra.mxu0 %v14322_v15 }
  0xa5   : > { %v1202_v56 = vrot.slane %v1201_v48, 4  ;;  %v684_v57 = vrot.slane %v682_v49, 7  ;;  %v693_v58 = vshll.u32 %v573_v31, 16  ;;  %v15166_v59 = vld [vmem:[%s15025_s13 + $0x34] sm:$0xf]  ;;  %v359_v62 = vsel %vm15036_vm3, 0, %v358_v41  ;;  %12919 = vmatprep.subr.bf16.mxu0 %v14323_v47 }
  0xa6   : > { %v1211_v60 = vor.u32 %v1210_v53, %v1206_v52  ;;  %v954_v61 = vld [vmem:[#allocation2 + $0x48] sm:$0xf]  ;;  %v415_v63 = vsel %vm15041_vm4, 0, %v414_v50  ;;  %v699_v0 = vshrl.u32 %v574_v51, 16  ;;  %v692_v8 = vrot.slane %v690_v35, 7  ;;  %v14325_v14 = vld [vmem:[#allocation7 + $0x30] sm:$0xff]  }
  0xa7   : > { %v1207_v2 = vsel %vm15087_vm11, %v1202_v56, %v1206_v52  ;;  %v687_v6 = vor.u32 %v685_v55, %v684_v57  ;;  %v688_v7 = vrot.slane %v684_v57, 4  ;;  %360 = vst [vmem:[#allocation2 + $0x54] sm:$0x1] %v359_v62  ;;  %416 = vst [vmem:[#allocation2 + $0x5c] sm:$0x1] %v415_v63  ;;  %v702_v12 = vshll.u32 %v574_v51, 16 }
  0xa8   : > { %v1212_v9 = vrot.slane %v1211_v60, 4  ;;  %v958_v10 = vld [vmem:[#allocation2 + $0x50] sm:$0x1]  ;;  %v701_v11 = vrot.slane %v699_v0, 7  ;;  %v707_v13 = vshrl.u32 %v15166_v59, 16  ;;  %v695_v16 = vor.u32 %v693_v58, %v692_v8  ;;  %12920 = vmatpush3.bf16.msra.mxu0 %v14323_v47  ;;  %v14326_v41 = vld [vmem:[#allocation7 + $0x38] sm:$0xff]  }
  0xa9   : > { %v1041_v15 = vld [vmem:[#allocation2 + $0x3c] sm:$0xf]  ;;  %v697_v17 = vrot.slane %v692_v8, 4  ;;  %v955_v19 = vsel %vm15072_vm10, %v687_v6, %v954_v61  ;;  %v710_v20 = vshll.u32 %v15166_v59, 16  ;;  %v361_v21 = vld [vmem:[#allocation2 + $0x60] sm:$0x1]  ;;  %12921 = vmatprep.subr.bf16.mxu0 %v14324_v1 }
  0xaa   : > { %v1217_v22 = vsel %vm15087_vm11, %v1212_v9, %v1216_v54  ;;  %v1219_v23 = vshrl.u32 %v1041_v15, 16  ;;  %v1222_v24 = vshll.u32 %v1041_v15, 16  ;;  %956 = vst [vmem:[#allocation2 + $0x48] sm:$0xf] %v955_v19  ;;  %v704_v25 = vor.u32 %v702_v12, %v701_v11  ;;  %v417_v26 = vld [vmem:[#allocation2 + $0x68] sm:$0x1] }
  0xab   : > { %v11673_v27 = vcombine.low %v1207_v2, %v1217_v22  ;;  %v1042_v28 = vld [vmem:[#allocation2 + $0x40] sm:$0xf]  ;;  %v1084_v29 = vld [vmem:[#allocation2 + $0x44] sm:$0x1]  ;;  %v696_v30 = vsel %vm15063_vm9, %v688_v7, %v695_v16  ;;  %v959_v31 = vsel %vm15036_vm3, %v697_v17, %v958_v10  ;;  %v705_v32 = vrot.slane %v701_v11, 4  ;;  %v15198_v6 = vld [vmem:[#allocation7 + $0x80] sm:$0xff]  }
  0xac   : > { %v576_v33 = vld [vmem:[%s15025_s13 + $0x38] sm:$0xf]  ;;  %v1221_v36 = vrot.slane %v1219_v23, 4  ;;  %v1224_v38 = vrot.slane %v1222_v24, 5  ;;  %v1228_v39 = vshll.u32 %v1042_v28, 16  ;;  %v1232_v40 = vshrl.u32 %v1042_v28, 16  ;;  %12922 = vmatpush3.bf16.msra.mxu0 %v14324_v1 }
  0xad   : > { %957 = vst [vmem:[#allocation2 + $0x4c] sm:$0xf] %v696_v30  ;;  %960 = vst [vmem:[#allocation2 + $0x50] sm:$0x1] %v959_v31  ;;  %12887 = vmatprep.mubr.bf16.mxu0 %v11673_v27  ;;  %v1238_v43 = vshll.u32 %v1084_v29, 16  ;;  %v709_v44 = vrot.slane %v707_v13, 7  ;;  %12923 = vmatprep.subr.bf16.mxu0 %v14325_v14 }
  0xae   : > { %v362_v45 = vsel %vm15036_vm3, 0, %v361_v21  ;;  %v418_v46 = vsel %vm15041_vm4, 0, %v417_v26  ;;  %v577_v47 = vld [vmem:[%s15025_s13 + $0x3c] sm:$0xf]  ;;  %v1225_v48 = vor.u32 %v1224_v38, %v1221_v36  ;;  %v1230_v18 = vrot.slane %v1228_v39, 5  ;;  %s14717_s15 = scalar_lea.vmem %s18255_s9, 2048 }
  0xaf   : > { %v1234_v37 = vrot.slane %v1232_v40, 4  ;;  %v961_v49 = vld [vmem:[#allocation2 + $0x54] sm:$0xf]  ;;  %v965_v50 = vld [vmem:[#allocation2 + $0x5c] sm:$0x1]  ;;  %v1240_v51 = vrot.slane %v1238_v43, 5  ;;  %v712_v52 = vor.u32 %v710_v20, %v709_v44  ;;  %p14718_p11 = scmp.ne.s32.totalorder %s18255_s9, %s14717_s15 }
  0xb0   : > { %363 = vst [vmem:[#allocation2 + $0x60] sm:$0x1] %v362_v45  ;;  %419 = vst [vmem:[#allocation2 + $0x68] sm:$0x1] %v418_v46  ;;  %v714_v53 = vrot.slane %v709_v44, 4  ;;  %v962_v54 = vsel %vm15072_vm10, %v704_v25, %v961_v49  ;;  %v1226_v55 = vrot.slane %v1225_v48, 4  ;;  %12924 = vmatpush3.bf16.msra.mxu0 %v14325_v14 }
  0xb1   : > { %v1235_v56 = vor.u32 %v1234_v37, %v1230_v18  ;;  %963 = vst [vmem:[#allocation2 + $0x54] sm:$0xf] %v962_v54  ;;  %v716_v57 = vshrl.u32 %v576_v33, 16  ;;  %v719_v35 = vshll.u32 %v576_v33, 16  ;;  %v1043_v58 = vld [vmem:[#allocation2 + $0x48] sm:$0xf]  ;;  %v713_v59 = vsel %vm15063_vm9, %v705_v32, %v712_v52  ;;  %12925 = vmatprep.subr.bf16.mxu0 %v14326_v41 }
  0xb2   : > { %v966_v60 = vsel %vm15036_vm3, %v714_v53, %v965_v50  ;;  %v724_v61 = vshrl.u32 %v577_v47, 16  ;;  %v727_v62 = vshll.u32 %v577_v47, 16  ;;  %v1231_v63 = vsel %vm15087_vm11, %v1226_v55, %v1230_v18  ;;  %964 = vst [vmem:[#allocation2 + $0x58] sm:$0xf] %v713_v59  ;;  %v364_v15 = vld [vmem:[#allocation2 + $0x6c] sm:$0x1] }
  0xb3   : > { %v1236_v0 = vrot.slane %v1235_v56, 4  ;;  %v1243_v1 = vshrl.u32 %v1043_v58, 16  ;;  %v1246_v2 = vshll.u32 %v1043_v58, 16  ;;  %967 = vst [vmem:[#allocation2 + $0x5c] sm:$0x1] %v966_v60  ;;  %v718_v9 = vrot.slane %v716_v57, 7 }
  0xb4   : > { %v1044_v7 = vld [vmem:[#allocation2 + $0x4c] sm:$0xf]  ;;  %v1085_v8 = vld [vmem:[#allocation2 + $0x50] sm:$0x1]  ;;  %v726_v10 = vrot.slane %v724_v61, 7  ;;  %12926 = vmatpush3.bf16.msra.mxu0 %v14326_v41  ;;  %v365_v47 = vsel %vm15036_vm3, 0, %v364_v15 }
  0xb5   : > { %v1241_v11 = vsel %vm15087_vm11, %v1236_v0, %v1240_v51  ;;  %v1245_v12 = vrot.slane %v1243_v1, 4  ;;  %v1248_v13 = vrot.slane %v1246_v2, 5  ;;  %v1252_v14 = vshll.u32 %v1044_v7, 16  ;;  %v420_v22 = vld [vmem:[#allocation2 + $0x74] sm:$0x1]  ;;  %12959 = vmatprep.subr.bf16.mxu0 %v15198_v6  ;;  %p18667_p0 = scmp.ne.s32.totalorder %s18410_s16, 0 }
  0xb6   : > { %v11674_v16 = vcombine.low %v1231_v63, %v1241_v11  ;;  %v1256_v17 = vshrl.u32 %v1044_v7, 16  ;;  %v1262_v19 = vshll.u32 %v1085_v8, 16  ;;  %v721_v20 = vor.u32 %v719_v35, %v718_v9  ;;  %v578_v28 = vld [vmem:[%s15025_s13 + $0x40] sm:$0xf]  ;;  %v579_v36 = vld [vmem:[%s15025_s13 + $0x44] sm:$0xf] }
  0xb7   : > { %v968_v21 = vld [vmem:[#allocation2 + $0x60] sm:$0xf]  ;;  %v1249_v23 = vor.u32 %v1248_v13, %v1245_v12  ;;  %v1254_v24 = vrot.slane %v1252_v14, 5  ;;  %v722_v25 = vrot.slane %v718_v9, 4  ;;  %v729_v26 = vor.u32 %v727_v62, %v726_v10  ;;  %v972_v27 = vld [vmem:[#allocation2 + $0x68] sm:$0x1]  ;;  %p14719_p2 = pnand %p14718_p11, %p18667_p0 }
  0xb8   : > { %12888 = vmatmul.mubr.bf16.gmra.mrb[8].mxu0 %v11674_v16  ;;  %v1258_v29 = vrot.slane %v1256_v17, 4  ;;  %v1264_v30 = vrot.slane %v1262_v19, 5  ;;  %v1045_v31 = vld [vmem:[#allocation2 + $0x54] sm:$0xf]  ;;  %v731_v32 = vrot.slane %v726_v10, 4  ;;  %v969_v33 = vsel %vm15072_vm10, %v721_v20, %v968_v21  ;;  %s14795_s19 = smov [#allocation10]  }
  0xb9   : > { %v1250_v38 = vrot.slane %v1249_v23, 4  ;;  %v1267_v39 = vshrl.u32 %v1045_v31, 16  ;;  %v1270_v40 = vshll.u32 %v1045_v31, 16  ;;  %v730_v41 = vsel %vm15063_vm9, %v722_v25, %v729_v26  ;;  %970 = vst [vmem:[#allocation2 + $0x60] sm:$0xf] %v969_v33  ;;  %p14720_p3 = pneg %p14719_p2  ;;  %s14721_s14 = sshll.u32 %s14795_s19, 4  ;;  %s14722_s14 = int_to_ptr.vmem [resolvable:$false] %s14721_s14 }
  0xba   : > { %v1259_v43 = vor.u32 %v1258_v29, %v1254_v24  ;;  %v1046_v44 = vld [vmem:[#allocation2 + $0x58] sm:$0xf]  ;;  %v1086_v45 = vld [vmem:[#allocation2 + $0x5c] sm:$0x1]  ;;  %971 = vst [vmem:[#allocation2 + $0x64] sm:$0xf] %v730_v41  ;;  %v973_v46 = vsel %vm15036_vm3, %v731_v32, %v972_v27  ;;  %p14724_p7 = scmp.lt.s32.totalorder %s18255_s9, %s14722_s14 }
  0xbb   : > { %v421_v48 = vsel %vm15041_vm4, 0, %v420_v22  ;;  %v1255_v18 = vsel %vm15087_vm11, %v1250_v38, %v1254_v24  ;;  %v1269_v37 = vrot.slane %v1267_v39, 4  ;;  %v1272_v49 = vrot.slane %v1270_v40, 5  ;;  %974 = vst [vmem:[#allocation2 + $0x68] sm:$0x1] %v973_v46  ;;  %s14723_s21 = scalar_lea.vmem %s14722_s14, 4096 }
  0xbc   : > { %v1276_v50 = vshll.u32 %v1046_v44, 16  ;;  %366 = vst [vmem:[#allocation2 + $0x6c] sm:$0x1] %v365_v47  ;;  %422 = vst [vmem:[#allocation2 + $0x74] sm:$0x1] %v421_v48  ;;  %v1260_v51 = vrot.slane %v1259_v43, 4  ;;  %p14725_p9 = scmp.lt.s32.totalorder %s14723_s21, %s14717_s15 }
  0xbd   : > { %v1280_v52 = vshrl.u32 %v1046_v44, 16  ;;  %v1286_v53 = vshll.u32 %v1086_v45, 16  ;;  %v733_v54 = vshrl.u32 %v578_v28, 16  ;;  %v1273_v55 = vor.u32 %v1272_v49, %v1269_v37  ;;  %v367_v58 = vld [vmem:[#allocation2 + $0x78] sm:$0x1] }
  0xbe   : > { %v1278_v56 = vrot.slane %v1276_v50, 5  ;;  %v736_v57 = vshll.u32 %v578_v28, 16  ;;  %v741_v35 = vshrl.u32 %v579_v36, 16  ;;  %v1265_v59 = vsel %vm15087_vm11, %v1260_v51, %v1264_v30  ;;  %v423_v17 = vld [vmem:[#allocation2 + $0x80] sm:$0x1]  ;;  %p14726_p12 = por %p14725_p9, %p14724_p7 }
  0xbf   : > { %v1282_v60 = vrot.slane %v1280_v52, 4  ;;  %v1288_v61 = vrot.slane %v1286_v53, 5  ;;  %v735_v62 = vrot.slane %v733_v54, 7  ;;  %v11675_v63 = vcombine.low %v1255_v18, %v1265_v59  ;;  %v580_v19 = vld [vmem:[%s15025_s13 + $0x48] sm:$0xf] }
  0xc0   : > { %v1274_v0 = vrot.slane %v1273_v55, 4  ;;  %v743_v1 = vrot.slane %v741_v35, 7  ;;  %v744_v2 = vshll.u32 %v579_v36, 16  ;;  %v1047_v8 = vld [vmem:[#allocation2 + $0x60] sm:$0xf]  ;;  %v368_v11 = vsel %vm15036_vm3, 0, %v367_v58  ;;  %p14727_p1 = pnand %p14726_p12, %p14720_p3 }
  0xc1   : > { %v1283_v7 = vor.u32 %v1282_v60, %v1278_v56  ;;  %v738_v9 = vor.u32 %v736_v57, %v735_v62  ;;  %v739_v10 = vrot.slane %v735_v62, 4  ;;  %12891 = vmatprep.mubr.bf16.mxu0 %v11675_v63  ;;  %v1048_v13 = vld [vmem:[#allocation2 + $0x64] sm:$0xf]  ;;  %v1291_v14 = vshrl.u32 %v1047_v8, 16  ;;  %369 = vst [vmem:[#allocation2 + $0x78] sm:$0x1] %v368_v11 }
  0xc2   : > { %v1279_v12 = vsel %vm15087_vm11, %v1274_v0, %v1278_v56  ;;  %v1294_v15 = vshll.u32 %v1047_v8, 16  ;;  %v746_v16 = vor.u32 %v744_v2, %v743_v1  ;;  %v1087_v21 = vld [vmem:[#allocation2 + $0x68] sm:$0x1]  ;;  %v1300_v22 = vshll.u32 %v1048_v13, 16  ;;  %v581_v25 = vld [vmem:[%s15025_s13 + $0x4c] sm:$0xf] }
  0xc3   : > { %v1284_v20 = vrot.slane %v1283_v7, 4  ;;  %v1304_v23 = vshrl.u32 %v1048_v13, 16  ;;  %v748_v24 = vrot.slane %v743_v1, 4  ;;  %v370_v26 = vld [vmem:[#allocation2 + $0x84] sm:$0x1]  ;;  %v1293_v27 = vrot.slane %v1291_v14, 4 }
  0xc4   : > { %v1296_v28 = vrot.slane %v1294_v15, 5  ;;  %v1310_v29 = vshll.u32 %v1087_v21, 16  ;;  %v747_v30 = vsel %vm15063_vm9, %v739_v10, %v746_v16  ;;  %v975_v31 = vld [vmem:[#allocation2 + $0x6c] sm:$0xf]  ;;  %v1302_v36 = vrot.slane %v1300_v22, 5 }
  0xc5   : > { %v426_v32 = vld [vmem:[#allocation2 + $0x8c] sm:$0x1]  ;;  %v1289_v33 = vsel %vm15087_vm11, %v1284_v20, %v1288_v61  ;;  %v1306_v38 = vrot.slane %v1304_v23, 4  ;;  %v976_v39 = vsel %vm15072_vm10, %v738_v9, %v975_v31  ;;  %978 = vst [vmem:[#allocation2 + $0x70] sm:$0xf] %v747_v30  ;;  %v424_v48 = vsel %vm15041_vm4, 0, %v423_v17 }
  0xc6   : > { %v979_v40 = vld [vmem:[#allocation2 + $0x74] sm:$0x1]  ;;  %v582_v41 = vld [vmem:[%s15025_s13 + $0x50] sm:$0xf]  ;;  %v11676_v43 = vcombine.low %v1279_v12, %v1289_v33  ;;  %v1297_v44 = vor.u32 %v1296_v28, %v1293_v27  ;;  %v1312_v45 = vrot.slane %v1310_v29, 5  ;;  %v750_v18 = vshrl.u32 %v580_v19, 16 }
  0xc7   : > { %977 = vst [vmem:[#allocation2 + $0x6c] sm:$0xf] %v976_v39  ;;  %v980_v46 = vsel %vm15036_vm3, %v748_v24, %v979_v40  ;;  %v1307_v47 = vor.u32 %v1306_v38, %v1302_v36  ;;  %v753_v37 = vshll.u32 %v580_v19, 16  ;;  %v583_v49 = vld [vmem:[%s15025_s13 + $0x54] sm:$0xf]  ;;  %v758_v51 = vshrl.u32 %v581_v25, 16 }
  0xc8   : > { %981 = vst [vmem:[#allocation2 + $0x74] sm:$0x1] %v980_v46  ;;  %12892 = vmatmul.mubr.bf16.gmra.mrb[12].mxu0 %v11676_v43  ;;  %v1298_v50 = vrot.slane %v1297_v44, 4  ;;  %425 = vst [vmem:[#allocation2 + $0x80] sm:$0x1] %v424_v48  ;;  %v761_v52 = vshll.u32 %v581_v25, 16 }
  0xc9   : > { %v371_v53 = vsel %vm15036_vm3, 0, %v370_v26  ;;  %v1308_v54 = vrot.slane %v1307_v47, 4  ;;  %v752_v55 = vrot.slane %v750_v18, 7  ;;  %v427_v56 = vsel %vm15041_vm4, 0, %v426_v32  ;;  %v982_v59 = vld [vmem:[#allocation2 + $0x78] sm:$0xf] }
  0xca   : > { %372 = vst [vmem:[#allocation2 + $0x84] sm:$0x1] %v371_v53  ;;  %v767_v57 = vshrl.u32 %v582_v41, 16  ;;  %v1303_v35 = vsel %vm15087_vm11, %v1298_v50, %v1302_v36  ;;  %v760_v58 = vrot.slane %v758_v51, 7  ;;  %428 = vst [vmem:[#allocation2 + $0x8c] sm:$0x1] %v427_v56 }
  0xcb   : > { %v770_v60 = vshll.u32 %v582_v41, 16  ;;  %v775_v61 = vshrl.u32 %v583_v49, 16  ;;  %v1313_v62 = vsel %vm15087_vm11, %v1308_v54, %v1312_v45  ;;  %v755_v63 = vor.u32 %v753_v37, %v752_v55  ;;  %v373_v16 = vld [vmem:[#allocation2 + $0x90] sm:$0x1]  ;;  %v429_v17 = vld [vmem:[#allocation2 + $0x98] sm:$0x1] }
  0xcc   : > { %v756_v0 = vrot.slane %v752_v55, 4  ;;  %v769_v1 = vrot.slane %v767_v57, 7  ;;  %v11677_v2 = vcombine.low %v1303_v35, %v1313_v62  ;;  %v15245_v7 = vld [vmem:[#allocation2 + $0x70] sm:$0xf]  ;;  %v763_v8 = vor.u32 %v761_v52, %v760_v58  ;;  %v584_v24 = vld [vmem:[%s15025_s13 + $0x58] sm:$0xf] }
  0xcd   : > { %v765_v9 = vrot.slane %v760_v58, 4  ;;  %v777_v10 = vrot.slane %v775_v61, 7  ;;  %v1324_v12 = vshll.u32 %v15245_v7, 16  ;;  %v1328_v13 = vshrl.u32 %v15245_v7, 16  ;;  %v585_v30 = vld [vmem:[%s15025_s13 + $0x5c] sm:$0xf] }
  0xce   : > { %v15247_v11 = vld [vmem:[#allocation2 + $0x6c] sm:$0xf]  ;;  %v983_v14 = vsel %vm15072_vm10, %v755_v63, %v982_v59  ;;  %v772_v15 = vor.u32 %v770_v60, %v769_v1  ;;  %12895 = vmatprep.mubr.bf16.mxu0 %v11677_v2  ;;  %v764_v22 = vsel %vm15063_vm9, %v756_v0, %v763_v8  ;;  %v773_v23 = vrot.slane %v769_v1, 4  ;;  %v376_v31 = vld [vmem:[#allocation2 + $0x9c] sm:$0x1] }
  0xcf   : > { %v15253_v19 = vld [vmem:[#allocation2 + $0x74] sm:$0x1]  ;;  %v1315_v20 = vshrl.u32 %v15247_v11, 16  ;;  %v1318_v21 = vshll.u32 %v15247_v11, 16  ;;  %984 = vst [vmem:[#allocation2 + $0x78] sm:$0xf] %v983_v14 }
  0xd0   : > { %v1326_v25 = vrot.slane %v1324_v12, 5  ;;  %v1330_v26 = vrot.slane %v1328_v13, 4  ;;  %v1334_v27 = vshll.u32 %v15253_v19, 16  ;;  %985 = vst [vmem:[#allocation2 + $0x7c] sm:$0xf] %v764_v22  ;;  %v778_v29 = vshll.u32 %v583_v49, 16 }
  0xd1   : > { %v986_v28 = vld [vmem:[#allocation2 + $0x80] sm:$0x1]  ;;  %v1317_v32 = vrot.slane %v1315_v20, 4  ;;  %v1320_v33 = vrot.slane %v1318_v21, 5  ;;  %v782_v38 = vrot.slane %v777_v10, 4  ;;  %v374_v37 = vsel %vm15036_vm3, 0, %v373_v16 }
  0xd2   : > { %v987_v36 = vsel %vm15036_vm3, %v765_v9, %v986_v28  ;;  %v989_v39 = vld [vmem:[#allocation2 + $0x84] sm:$0xf]  ;;  %v1331_v41 = vor.u32 %v1330_v26, %v1326_v25  ;;  %v1336_v43 = vrot.slane %v1334_v27, 5  ;;  %v780_v44 = vor.u32 %v778_v29, %v777_v10  ;;  %v993_v46 = vld [vmem:[#allocation2 + $0x8c] sm:$0x1] }
  0xd3   : > { %v432_v40 = vld [vmem:[#allocation2 + $0xa4] sm:$0x1]  ;;  %988 = vst [vmem:[#allocation2 + $0x80] sm:$0x1] %v987_v36  ;;  %v990_v45 = vsel %vm15072_vm10, %v772_v15, %v989_v39  ;;  %v15267_v47 = vld [vmem:[%s15025_s13 + $0x60] sm:$0xf]  ;;  %v1321_v48 = vor.u32 %v1320_v33, %v1317_v32  ;;  %v994_v18 = vsel %vm15036_vm3, %v782_v38, %v993_v46 }
  0xd4   : > { %991 = vst [vmem:[#allocation2 + $0x84] sm:$0xf] %v990_v45  ;;  %v430_v49 = vsel %vm15041_vm4, 0, %v429_v17  ;;  %v1332_v50 = vrot.slane %v1331_v41, 4  ;;  %v781_v51 = vsel %vm15063_vm9, %v773_v23, %v780_v44  ;;  %995 = vst [vmem:[#allocation2 + $0x8c] sm:$0x1] %v994_v18 }
  0xd5   : > { %375 = vst [vmem:[#allocation2 + $0x90] sm:$0x1] %v374_v37  ;;  %431 = vst [vmem:[#allocation2 + $0x98] sm:$0x1] %v430_v49  ;;  %v784_v52 = vshrl.u32 %v584_v24, 16  ;;  %v787_v53 = vshll.u32 %v584_v24, 16 }
  0xd6   : > { %v1322_v54 = vrot.slane %v1321_v48, 4  ;;  %992 = vst [vmem:[#allocation2 + $0x88] sm:$0xf] %v781_v51  ;;  %v792_v55 = vshrl.u32 %v585_v30, 16  ;;  %v795_v56 = vshll.u32 %v585_v30, 16  ;;  %v377_v57 = vsel %vm15036_vm3, 0, %v376_v31 }
  0xd7   : > { %v1337_v35 = vsel %vm15087_vm11, %v1332_v50, %v1336_v43  ;;  %v15281_v58 = vld [vmem:[#allocation2 + $0x78] sm:$0xf]  ;;  %v786_v59 = vrot.slane %v784_v52, 7  ;;  %378 = vst [vmem:[#allocation2 + $0x9c] sm:$0x1] %v377_v57  ;;  %v433_v60 = vsel %vm15041_vm4, 0, %v432_v40 }
  0xd8   : > { %v801_v61 = vshrl.u32 %v15267_v47, 16  ;;  %v1327_v62 = vsel %vm15087_vm11, %v1322_v54, %v1326_v25  ;;  %v15288_v63 = vld [vmem:[#allocation2 + $0x7c] sm:$0xf]  ;;  %v1339_v0 = vshrl.u32 %v15281_v58, 16  ;;  %v1342_v1 = vshll.u32 %v15281_v58, 16 }
  0xd9   : > { %v794_v2 = vrot.slane %v792_v55, 7  ;;  %434 = vst [vmem:[#allocation2 + $0xa4] sm:$0x1] %v433_v60  ;;  %v11678_v8 = vcombine.low %v1327_v62, %v1337_v35  ;;  %v1348_v9 = vshll.u32 %v15288_v63, 16  ;;  %v1352_v10 = vshrl.u32 %v15288_v63, 16 }
  0xda   : > { %v789_v12 = vor.u32 %v787_v53, %v786_v59  ;;  %v15294_v13 = vld [vmem:[#allocation2 + $0x80] sm:$0x1]  ;;  %v1341_v14 = vrot.slane %v1339_v0, 4  ;;  %v1344_v15 = vrot.slane %v1342_v1, 5  ;;  %v790_v16 = vrot.slane %v786_v59, 4 }
  0xdb   : > { %v797_v17 = vor.u32 %v795_v56, %v794_v2  ;;  %12896 = vmatmul.mubr.bf16.gmra.mrb[16].mxu0 %v11678_v8  ;;  %v1350_v20 = vrot.slane %v1348_v9, 5  ;;  %v1354_v21 = vrot.slane %v1352_v10, 4  ;;  %v1358_v22 = vshll.u32 %v15294_v13, 16  ;;  %v15297_v23 = vld [vmem:[#allocation2 + $0x84] sm:$0xf] }
  0xdc   : > { %v799_v24 = vrot.slane %v794_v2, 4  ;;  %v1345_v25 = vor.u32 %v1344_v15, %v1341_v14  ;;  %v15299_v26 = vld [vmem:[#allocation2 + $0x8c] sm:$0x1]  ;;  %v1363_v27 = vshrl.u32 %v15297_v23, 16  ;;  %v1366_v28 = vshll.u32 %v15297_v23, 16 }
  0xdd   : > { %v798_v29 = vsel %vm15063_vm9, %v790_v16, %v797_v17  ;;  %v996_v30 = vld [vmem:[#allocation2 + $0x90] sm:$0xf]  ;;  %v587_v31 = vld [vmem:[%s15025_s13 + $0x64] sm:$0xf]  ;;  %v1355_v32 = vor.u32 %v1354_v21, %v1350_v20  ;;  %v1360_v33 = vrot.slane %v1358_v22, 5  ;;  %v1382_v38 = vshll.u32 %v15299_v26, 16 }
  0xde   : > { %v15306_v36 = vld [vmem:[#allocation2 + $0x88] sm:$0xf]  ;;  %v997_v39 = vsel %vm15072_vm10, %v789_v12, %v996_v30  ;;  %999 = vst [vmem:[#allocation2 + $0x94] sm:$0xf] %v798_v29  ;;  %v1000_v40 = vld [vmem:[#allocation2 + $0x98] sm:$0x1] }
  0xdf   : > { %v1346_v41 = vrot.slane %v1345_v25, 4  ;;  %v1365_v43 = vrot.slane %v1363_v27, 4  ;;  %v1368_v44 = vrot.slane %v1366_v28, 5  ;;  %v1372_v45 = vshll.u32 %v15306_v36, 16  ;;  %998 = vst [vmem:[#allocation2 + $0x90] sm:$0xf] %v997_v39 }
  0xe0   : > { %v379_v46 = vld [vmem:[#allocation2 + $0xa8] sm:$0x1]  ;;  %v1356_v48 = vrot.slane %v1355_v32, 4  ;;  %v1376_v18 = vshrl.u32 %v15306_v36, 16  ;;  %v1384_v37 = vrot.slane %v1382_v38, 5  ;;  %v1001_v49 = vsel %vm15036_vm3, %v799_v24, %v1000_v40 }
  0xe1   : > { %v435_v50 = vld [vmem:[#allocation2 + $0xb0] sm:$0x1]  ;;  %v15316_v51 = vld [vmem:[%s15025_s13 + $0x68] sm:$0xf]  ;;  %v1351_v52 = vsel %vm15087_vm11, %v1346_v41, %v1350_v20  ;;  %v1369_v53 = vor.u32 %v1368_v44, %v1365_v43  ;;  %v1374_v54 = vrot.slane %v1372_v45, 5  ;;  %v803_v55 = vrot.slane %v801_v61, 7 }
  0xe2   : > { %1002 = vst [vmem:[#allocation2 + $0x98] sm:$0x1] %v1001_v49  ;;  %v1361_v56 = vsel %vm15087_vm11, %v1356_v48, %v1360_v33  ;;  %v1378_v57 = vrot.slane %v1376_v18, 4  ;;  %v804_v35 = vshll.u32 %v15267_v47, 16  ;;  %v809_v59 = vshrl.u32 %v587_v31, 16 }
  0xe3   : > { %v1003_v60 = vld [vmem:[#allocation2 + $0x9c] sm:$0xf]  ;;  %v11679_v62 = vcombine.low %v1351_v52, %v1361_v56  ;;  %v1370_v0 = vrot.slane %v1369_v53, 4  ;;  %v807_v1 = vrot.slane %v803_v55, 4  ;;  %v812_v2 = vshll.u32 %v587_v31, 16 }
  0xe4   : > { %v1379_v8 = vor.u32 %v1378_v57, %v1374_v54  ;;  %v806_v9 = vor.u32 %v804_v35, %v803_v55  ;;  %v811_v10 = vrot.slane %v809_v59, 7  ;;  %v380_v12 = vsel %vm15036_vm3, 0, %v379_v46  ;;  %v1007_v47 = vld [vmem:[#allocation2 + $0xa4] sm:$0x1]  ;;  %v589_v16 = vld [vmem:[%s15025_s13 + $0x6c] sm:$0xf] }
  0xe5   : > { %12899 = vmatprep.mubr.bf16.mxu0 %v11679_v62  ;;  %v1375_v61 = vsel %vm15087_vm11, %v1370_v0, %v1374_v54  ;;  %v15327_v14 = vld [vmem:[#allocation2 + $0x94] sm:$0xf]  ;;  %381 = vst [vmem:[#allocation2 + $0xa8] sm:$0x1] %v380_v12  ;;  %v436_v15 = vsel %vm15041_vm4, 0, %v435_v50  ;;  %v818_v17 = vshrl.u32 %v15316_v51, 16 }
  0xe6   : > { %v821_v20 = vshll.u32 %v15316_v51, 16  ;;  %v1380_v21 = vrot.slane %v1379_v8, 4  ;;  %v15334_v22 = vld [vmem:[#allocation2 + $0x90] sm:$0xf]  ;;  %v1396_v24 = vshll.u32 %v15327_v14, 16  ;;  %v1400_v25 = vshrl.u32 %v15327_v14, 16 }
  0xe7   : > { %v814_v27 = vor.u32 %v812_v2, %v811_v10  ;;  %437 = vst [vmem:[#allocation2 + $0xb0] sm:$0x1] %v436_v15  ;;  %v382_v28 = vld [vmem:[#allocation2 + $0xb4] sm:$0x1]  ;;  %v1387_v29 = vshrl.u32 %v15334_v22, 16  ;;  %v1390_v30 = vshll.u32 %v15334_v22, 16  ;;  %v1004_v32 = vsel %vm15072_vm10, %v806_v9, %v1003_v60 }
  0xe8   : > { %v816_v31 = vrot.slane %v811_v10, 4  ;;  %v1385_v33 = vsel %vm15087_vm11, %v1380_v21, %v1384_v37  ;;  %v1398_v39 = vrot.slane %v1396_v24, 5  ;;  %v1402_v40 = vrot.slane %v1400_v25, 4  ;;  %1005 = vst [vmem:[#allocation2 + $0x9c] sm:$0xf] %v1004_v32 }
  0xe9   : > { %v15344_v38 = vld [vmem:[#allocation2 + $0x98] sm:$0x1]  ;;  %v815_v41 = vsel %vm15063_vm9, %v807_v1, %v814_v27  ;;  %v438_v43 = vld [vmem:[#allocation2 + $0xbc] sm:$0x1]  ;;  %v590_v44 = vld [vmem:[%s15025_s13 + $0x70] sm:$0xf]  ;;  %v11680_v45 = vcombine.low %v1375_v61, %v1385_v33 }
  0xea   : > { %v1389_v46 = vrot.slane %v1387_v29, 4  ;;  %v1392_v48 = vrot.slane %v1390_v30, 5  ;;  %v1406_v18 = vshll.u32 %v15344_v38, 16  ;;  %1006 = vst [vmem:[#allocation2 + $0xa0] sm:$0xf] %v815_v41  ;;  %v1403_v49 = vor.u32 %v1402_v40, %v1398_v39 }
  0xeb   : > { %v1008_v37 = vsel %vm15036_vm3, %v816_v31, %v1007_v47  ;;  %v820_v50 = vrot.slane %v818_v17, 7  ;;  %v826_v51 = vshrl.u32 %v589_v16, 16  ;;  %v591_v52 = vld [vmem:[%s15025_s13 + $0x74] sm:$0xf]  ;;  %12900 = vmatmul.mubr.bf16.gmra.mrb[20].mxu0 %v11680_v45  ;;  %v829_v55 = vshll.u32 %v589_v16, 16 }
  0xec   : > { %v1393_v53 = vor.u32 %v1392_v48, %v1389_v46  ;;  %v1408_v54 = vrot.slane %v1406_v18, 5  ;;  %1009 = vst [vmem:[#allocation2 + $0xa4] sm:$0x1] %v1008_v37  ;;  %v383_v56 = vsel %vm15036_vm3, 0, %v382_v28  ;;  %v1404_v57 = vrot.slane %v1403_v49, 4 }
  0xed   : > { %v823_v35 = vor.u32 %v821_v20, %v820_v50  ;;  %v824_v59 = vrot.slane %v820_v50, 4  ;;  %v828_v60 = vrot.slane %v826_v51, 7  ;;  %v1010_v62 = vld [vmem:[#allocation2 + $0xa8] sm:$0xf]  ;;  %384 = vst [vmem:[#allocation2 + $0xb4] sm:$0x1] %v383_v56 }
  0xee   : > { %v1394_v0 = vrot.slane %v1393_v53, 4  ;;  %v439_v1 = vsel %vm15041_vm4, 0, %v438_v43  ;;  %v835_v2 = vshrl.u32 %v590_v44, 16  ;;  %v838_v8 = vshll.u32 %v590_v44, 16  ;;  %v1014_v47 = vld [vmem:[#allocation2 + $0xb0] sm:$0x1] }
  0xef   : > { %v1409_v9 = vsel %vm15087_vm11, %v1404_v57, %v1408_v54  ;;  %v831_v10 = vor.u32 %v829_v55, %v828_v60  ;;  %v833_v12 = vrot.slane %v828_v60, 4  ;;  %v1011_v61 = vsel %vm15072_vm10, %v823_v35, %v1010_v62  ;;  %440 = vst [vmem:[#allocation2 + $0xbc] sm:$0x1] %v439_v1  ;;  %v15363_v16 = vld [vmem:[#allocation2 + $0x9c] sm:$0xf] }
  0xf0   : > { %v1399_v15 = vsel %vm15087_vm11, %v1394_v0, %v1398_v39  ;;  %1012 = vst [vmem:[#allocation2 + $0xa8] sm:$0xf] %v1011_v61  ;;  %v837_v17 = vrot.slane %v835_v2, 7  ;;  %v843_v20 = vshrl.u32 %v591_v52, 16  ;;  %v846_v21 = vshll.u32 %v591_v52, 16 }
  0xf1   : > { %v11681_v24 = vcombine.low %v1399_v15, %v1409_v9  ;;  %v15365_v25 = vld [vmem:[#allocation2 + $0xa0] sm:$0xf]  ;;  %v1411_v27 = vshrl.u32 %v15363_v16, 16  ;;  %v1414_v28 = vshll.u32 %v15363_v16, 16  ;;  %v832_v29 = vsel %vm15063_vm9, %v824_v59, %v831_v10 }
  0xf2   : > { %v1420_v30 = vshll.u32 %v15365_v25, 16  ;;  %v1424_v31 = vshrl.u32 %v15365_v25, 16  ;;  %1013 = vst [vmem:[#allocation2 + $0xac] sm:$0xf] %v832_v29  ;;  %v1015_v32 = vsel %vm15036_vm3, %v833_v12, %v1014_v47  ;;  %v840_v33 = vor.u32 %v838_v8, %v837_v17 }
  0xf3   : > { %12903 = vmatprep.mubr.bf16.mxu0 %v11681_v24  ;;  %v15375_v39 = vld [vmem:[#allocation2 + $0xa4] sm:$0x1]  ;;  %v1413_v40 = vrot.slane %v1411_v27, 4  ;;  %v1416_v41 = vrot.slane %v1414_v28, 5  ;;  %1016 = vst [vmem:[#allocation2 + $0xb0] sm:$0x1] %v1015_v32  ;;  %v11702_v59 = vcombine.low %v15247_v11, %v15245_v7  ;;  %v11703_v1 = vcombine.low %v15281_v58, %v15288_v63 }
  0xf4   : > { %v841_v43 = vrot.slane %v837_v17, 4  ;;  %v845_v44 = vrot.slane %v843_v20, 7  ;;  %v1422_v45 = vrot.slane %v1420_v30, 5  ;;  %v1426_v46 = vrot.slane %v1424_v31, 4  ;;  %v1017_v18 = vld [vmem:[#allocation2 + $0xb4] sm:$0xf] }
  0xf5   : > { %v1430_v48 = vshll.u32 %v15375_v39, 16  ;;  %v1417_v49 = vor.u32 %v1416_v41, %v1413_v40  ;;  %v1018_v51 = vsel %vm15072_vm10, %v840_v33, %v1017_v18  ;;  %v11704_v9 = vcombine.low %v15297_v23, %v15306_v36 }
  0xf6   : > { %v848_v37 = vor.u32 %v846_v21, %v845_v44  ;;  %v850_v50 = vrot.slane %v845_v44, 4  ;;  %v1427_v52 = vor.u32 %v1426_v46, %v1422_v45  ;;  %1019 = vst [vmem:[#allocation2 + $0xb4] sm:$0xf] %v1018_v51  ;;  %v1021_v54 = vld [vmem:[#allocation2 + $0xbc] sm:$0x1]  ;;  %v11705_v10 = vcombine.low %v15334_v22, %v15327_v14 }
  0xf7   : > { %v1432_v53 = vrot.slane %v1430_v48, 5  ;;  %v1418_v55 = vrot.slane %v1417_v49, 4  ;;  %v15380_v56 = vld [vmem:[#allocation2 + $0xa8] sm:$0xf]  ;;  %v11706_v12 = vcombine.low %v15363_v16, %v15365_v25  ;;  %vm2126_vm13 = vcmask 1046532  }
  0xf8   : > { %v849_v57 = vsel %vm15063_vm9, %v841_v43, %v848_v37  ;;  %v1022_v35 = vsel %vm15036_vm3, %v850_v50, %v1021_v54  ;;  %v1428_v60 = vrot.slane %v1427_v52, 4  ;;  %v1435_v62 = vshrl.u32 %v15380_v56, 16  ;;  %vm15442_vm14 = vmor %vm2125_vm12, %vm2126_vm13  ;;  %v2079_v22 = vld [vmem:[#allocation2 + $0x18] sm:$0xe] }
  0xf9   : > { %v1438_v0 = vshll.u32 %v15380_v56, 16  ;;  %1020 = vst [vmem:[#allocation2 + $0xb8] sm:$0xf] %v849_v57  ;;  %1023 = vst [vmem:[#allocation2 + $0xbc] sm:$0x1] %v1022_v35  ;;  %v1423_v2 = vsel %vm15087_vm11, %v1418_v55, %v1422_v45 }
  0xfa   : > { %v15394_v8 = vld [vmem:[#allocation2 + $0xac] sm:$0xf]  ;;  %v1433_v61 = vsel %vm15087_vm11, %v1428_v60, %v1432_v53  ;;  %v15404_v47 = vld [vmem:[#allocation2 + $0xb0] sm:$0x1]  ;;  %v1437_v15 = vrot.slane %v1435_v62, 4 }
  0xfb   : > { %v1440_v17 = vrot.slane %v1438_v0, 5  ;;  %v1444_v20 = vshll.u32 %v15394_v8, 16  ;;  %v11682_v21 = vcombine.low %v1423_v2, %v1433_v61  ;;  %v1448_v24 = vshrl.u32 %v15394_v8, 16 }
  0xfc   : > { %v1454_v27 = vshll.u32 %v15404_v47, 16  ;;  %v11707_v28 = vcombine.low %v15380_v56, %v15394_v8 }
  0xfd   : > { %v1441_v29 = vor.u32 %v1440_v17, %v1437_v15  ;;  %v1446_v30 = vrot.slane %v1444_v20, 5  ;;  %12904 = vmatmul.mubr.bf16.gmra.mrb[24].mxu0 %v11682_v21  ;;  %v1450_v31 = vrot.slane %v1448_v24, 4  ;;  %v15411_v32 = vld [vmem:[#allocation2 + $0xb4] sm:$0xf]  ;;  %v15432_v20 = vld [vmem:[#allocation2 + $0x4] sm:$0xf] }
  0xfe   : > { %v1459_v40 = vshrl.u32 %v15411_v32, 16  ;;  %v1462_v41 = vshll.u32 %v15411_v32, 16  ;;  %v1456_v44 = vrot.slane %v1454_v27, 5  ;;  %v14552_v21 = vld [vmem:[#allocation2] sm:$0xf] }
  0xff   : > { %v1442_v33 = vrot.slane %v1441_v29, 4  ;;  %v1451_v43 = vor.u32 %v1450_v31, %v1446_v30  ;;  %v11693_v24 = vcombine.low %v14552_v21, %v15432_v20  ;;  %v2086_v29 = vld [vmem:[#allocation2 + $0x6c] sm:$0xe]  ;;  %v15458_v21 = vld [vmem:[#allocation2 + $0x34] sm:$0xf] }
 0x100   : > { %v15415_v45 = vld [vmem:[#allocation2 + $0xb8] sm:$0xf]  ;;  %v15417_v46 = vld [vmem:[#allocation2 + $0xbc] sm:$0x1]  ;;  %v1461_v18 = vrot.slane %v1459_v40, 4  ;;  %v1464_v49 = vrot.slane %v1462_v41, 5 }
 0x101   : > { %v1447_v48 = vsel %vm15087_vm11, %v1442_v33, %v1446_v30  ;;  %v1468_v37 = vshll.u32 %v15415_v45, 16  ;;  %v1452_v50 = vrot.slane %v1451_v43, 4  ;;  %v1472_v51 = vshrl.u32 %v15415_v45, 16  ;;  %v2087_v30 = vld [vmem:[#allocation2 + $0x78] sm:$0xe] }
 0x102   : > { %v1478_v52 = vshll.u32 %v15417_v46, 16  ;;  %v11708_v53 = vcombine.low %v15411_v32, %v15415_v45  ;;  %v1465_v54 = vor.u32 %v1464_v49, %v1461_v18  ;;  %v14553_v31 = vld [vmem:[#allocation2 + $0xc] sm:$0xf]  ;;  %v15435_v33 = vld [vmem:[#allocation2 + $0x10] sm:$0xf]  ;;  %v14332_v41 = vld [vmem:[#allocation7 + $0x88] sm:$0xff]  }
 0x103   : > { %v1470_v55 = vrot.slane %v1468_v37, 5  ;;  %v1457_v57 = vsel %vm15087_vm11, %v1452_v50, %v1456_v44  ;;  %v1474_v35 = vrot.slane %v1472_v51, 4  ;;  %v11694_v40 = vcombine.low %v14553_v31, %v15435_v33  ;;  %v2088_v43 = vld [vmem:[#allocation2 + $0x84] sm:$0xe]  ;;  %v14555_v44 = vld [vmem:[#allocation2 + $0x18] sm:$0xf] }
 0x104   : > { %v11683_v60 = vcombine.low %v1447_v48, %v1457_v57  ;;  %v1466_v62 = vrot.slane %v1465_v54, 4  ;;  %v1480_v2 = vrot.slane %v1478_v52, 5  ;;  %v15438_v48 = vld [vmem:[#allocation2 + $0x1c] sm:$0xf]  ;;  %v11726_v49 = vrot.slane %v2086_v29, 9 }
 0x105   : > { %v1475_v0 = vor.u32 %v1474_v35, %v1470_v55  ;;  %v11695_v18 = vcombine.low %v14555_v44, %v15438_v48  ;;  %v2193_v37 = vrot.slane %v15245_v7, 5  ;;  %v2196_v51 = vrot.slane %v15253_v19, 5  ;;  %v2089_v52 = vld [vmem:[#allocation2 + $0x90] sm:$0xe]  ;;  %v2091_v31 = vld [vmem:[#allocation2 + $0xa8] sm:$0xe] }
 0x106   : > { %12907 = vmatprep.mubr.bf16.mxu0 %v11683_v60  ;;  %v1471_v61 = vsel %vm15087_vm11, %v1466_v62, %v1470_v55  ;;  %v11727_v57 = vrot.slane %v2087_v30, 9  ;;  %v2200_v35 = vrot.slane %v15288_v63, 5  ;;  %v2090_v60 = vld [vmem:[#allocation2 + $0x9c] sm:$0xe]  ;;  %v14557_v62 = vld [vmem:[#allocation2 + $0x24] sm:$0xf] }
 0x107   : > { %v1476_v15 = vrot.slane %v1475_v0, 4  ;;  %v15449_v54 = vsel %vm15442_vm14, %v11726_v49, %v2193_v37  ;;  %v2195_v55 = vrot.slane %v2193_v37, 4  ;;  %v15452_v0 = vld [vmem:[#allocation2 + $0x28] sm:$0xf]  ;;  %v2207_v19 = vrot.slane %v15306_v36, 5 }
 0x108   : > { %v15467_v30 = vsel %vm15442_vm14, %v11727_v57, %v2200_v35  ;;  %v2210_v44 = vrot.slane %v15299_v26, 5  ;;  %v11729_v37 = vrot.slane %v2089_v52, 9  ;;  %v2221_v26 = vrot.slane %v15365_v25, 5 }
 0x109   : > { %v1481_v17 = vsel %vm15087_vm11, %v1476_v15, %v1480_v2  ;;  %v11696_v2 = vcombine.low %v14557_v62, %v15452_v0  ;;  %v11728_v15 = vrot.slane %v2088_v43, 9  ;;  %v15463_v29 = vsel %vm15442_vm14, %v2195_v55, %v2196_v51 }
 0x10a   : > { %v11684_v27 = vcombine.low %v1471_v61, %v1481_v17  ;;  %v2203_v61 = vrot.slane %v15294_v13, 5  ;;  %v14559_v17 = vld [vmem:[#allocation2 + $0x30] sm:$0xf]  ;;  %v2202_v13 = vrot.slane %v2200_v35, 4  ;;  %v2209_v43 = vrot.slane %v2207_v19, 4 }
 0x10b   : > { %v2214_v51 = vrot.slane %v15327_v14, 5  ;;  %v2217_v55 = vrot.slane %v15344_v38, 5  ;;  %v11730_v62 = vrot.slane %v2090_v60, 9  ;;  %v2224_v38 = vrot.slane %v15375_v39, 5  ;;  %v14567_v39 = vld [vmem:[#allocation2 + $0x60] sm:$0xf] }
 0x10c   : > { %12908 = vmatmul.mubr.bf16.gmra.mrb[28].mxu0 %v11684_v27  ;;  %v14335_v27 = vld [vmem:[#allocation7 + $0x90] sm:$0xff]   ;;  %v15478_v49 = vsel %vm15442_vm14, %v2202_v13, %v2203_v61  ;;  %v15486_v35 = vsel %vm15442_vm14, %v2209_v43, %v2210_v44  ;;  %v2223_v60 = vrot.slane %v2221_v26, 4  ;;  %v11731_v13 = vrot.slane %v2091_v31, 9  ;;  %v2078_v14 = vld [vmem:[#allocation2 + $0xc] sm:$0xe] }
 0x10d   : > { %12927 = vmatprep.mubr.bf16.mxu0 %v11693_v24  ;;  %v11697_v24 = vcombine.low %v14559_v17, %v15458_v21  ;;  %v11743_v57 = vcombine.low %v15467_v30, %v15478_v49  ;;  %v15493_v52 = vsel %vm15442_vm14, %v11729_v37, %v2214_v51  ;;  %v15498_v17 = vsel %vm15442_vm14, %v11730_v62, %v2221_v26  ;;  %v14359_v49 = vld [vmem:[#allocation2 + $0xc] sm:$0xff]  }
 0x10e   : > { %v2231_v44 = vrot.slane %v15404_v47, 5  ;;  %v15511_v62 = vsel %vm15442_vm14, %v2223_v60, %v2224_v38  ;;  %v14561_v60 = vld [vmem:[#allocation2 + $0x3c] sm:$0xf]  ;;  %v15539_v47 = vld [vmem:[#allocation2 + $0x4c] sm:$0xf]  ;;  %v11718_v25 = vrot.slane %v2078_v14, 9 }
 0x10f   : > { %v2158_v32 = vrot.slane %v15458_v21, 5 }
 0x114   : > { %12928 = vmatmul.mubr.bf16.vlgmr.msra.gmra.mrb[0].mxu0 %v11694_v40  ;;  %v15473_v40 = vsel %vm15442_vm14, %v11728_v15, %v2207_v19  ;;  %v2216_v15 = vrot.slane %v2214_v51, 4  ;;  %v14338_v19 = vld [vmem:[#allocation7 + $0x98] sm:$0xff]   ;;  %v2235_v51 = vrot.slane %v15415_v45, 5 }
 0x115   : > { %12960 = vmatpush3.bf16.msra.mxu0 %v15198_v6  ;;  %12931 = vmatprep.mubr.bf16.mxu0 %v11695_v18  ;;  %v11742_v6 = vcombine.low %v15449_v54, %v15463_v29  ;;  %v2092_v18 = vld [vmem:[#allocation2 + $0xb4] sm:$0xe]  ;;  %v2949_v29 = vld [vmem:[#allocation2 + $0x10] sm:$0xf] }
 0x116   : > { %12961 = vmatprep.subr.bf16.mxu0 %v14332_v41  ;;  %v15503_v43 = vsel %vm15442_vm14, %v2216_v15, %v2217_v55  ;;  %v11732_v37 = vrot.slane %v2092_v18, 9  ;;  %v14341_v55 = vld [vmem:[#allocation7 + $0xa0] sm:$0xff]   ;;  %v2237_v18 = vrot.slane %v2235_v51, 4  ;;  %v2238_v15 = vrot.slane %v15417_v46, 5  ;;  %v15545_v46 = vld [vmem:[#allocation2 + $0x64] sm:$0xf] }
 0x117   : > { %v11701_v61 = vcombine.low %v14567_v39, %v15545_v46  ;;  %v2077_v39 = vld [vmem:[#allocation2] sm:$0xe] }
 0x118   : > { %v11717_v58 = vrot.slane %v2077_v39, 9  ;;  %v2144_v39 = vrot.slane %v15438_v48, 5 }
 0x119   : > { %12962 = vmatpush3.bf16.msra.mxu0 %v14332_v41  ;;  %v2228_v41 = vrot.slane %v15394_v8, 5  ;;  %v2080_v8 = vld [vmem:[#allocation2 + $0x24] sm:$0xe] }
 0x11a   : > { %12963 = vmatprep.subr.bf16.mxu0 %v14335_v27 }
 0x11b   : > { %v15515_v31 = vsel %vm15442_vm14, %v11731_v13, %v2228_v41  ;;  %v2230_v26 = vrot.slane %v2228_v41, 4  ;;  %v15534_v13 = vld [vmem:[#allocation2 + $0x40] sm:$0xf] }
 0x11c   : > { %12932 = vmatmul.mubr.bf16.gmra.mrb[4].mxu0 %v11696_v2  ;;  %v15521_v2 = vsel %vm15442_vm14, %v11732_v37, %v2235_v51  ;;  %v11698_v41 = vcombine.low %v14561_v60, %v15534_v13  ;;  %v14344_v37 = vld [vmem:[#allocation7 + $0xa8] sm:$0xff]   ;;  %v14563_v51 = vld [vmem:[#allocation2 + $0x48] sm:$0xf]  ;;  %v2165_v14 = vrot.slane %v15534_v13, 5 }
 0x11d   : > { %12935 = vmatprep.mubr.bf16.mxu0 %v11697_v24  ;;  %12964 = vmatpush3.bf16.msra.mxu0 %v14335_v27  ;;  %v15526_v38 = vsel %vm15442_vm14, %v2230_v26, %v2231_v44  ;;  %v15532_v27 = vsel %vm15442_vm14, %v2237_v18, %v2238_v15  ;;  %v11699_v44 = vcombine.low %v14563_v51, %v15539_v47  ;;  %v14347_v26 = vld [vmem:[#allocation7 + $0xb0] sm:$0xff]   ;;  %v14565_v18 = vld [vmem:[#allocation2 + $0x54] sm:$0xf]  ;;  %v15542_v15 = vld [vmem:[#allocation2 + $0x58] sm:$0xf] }
 0x11e   : > { %12965 = vmatprep.subr.bf16.mxu0 %v14338_v19  ;;  %v11700_v60 = vcombine.low %v14565_v18, %v15542_v15  ;;  %v14350_v24 = vld [vmem:[#allocation7 + $0xb8] sm:$0xff]   ;;  %v18434_v54 = vcombine.low %v15515_v31, %v15526_v38 }
 0x121   : > { %12966 = vmatpush3.bf16.msra.mxu0 %v14338_v19  ;;  %v15548_v19 = vld [vmem:[#allocation7 + $0xc0] sm:$0xff]  }
 0x122   : > { %12967 = vmatprep.subr.bf16.mxu0 %v14341_v55 }
 0x124   : > { %12936 = vmatmul.mubr.bf16.gmra.mrb[8].mxu0 %v11698_v41  ;;  %v592_v41 = vld [vmem:[%s15025_s13 + $0x78] sm:$0xf] }
 0x125   : > { %12939 = vmatprep.mubr.bf16.mxu0 %v11699_v44  ;;  %12968 = vmatpush3.bf16.msra.mxu0 %v14341_v55  ;;  %v385_v55 = vld [vmem:[#allocation2 + $0xc0] sm:$0x1]  ;;  %v852_v7 = vshrl.u32 %v592_v41, 16 }
 0x126   : > { %12969 = vmatprep.subr.bf16.mxu0 %v14344_v37 }
 0x127   : > { %v854_v63 = vrot.slane %v852_v7, 7 }
 0x129   : > { %12970 = vmatpush3.bf16.msra.mxu0 %v14344_v37  ;;  %v593_v37 = vld [vmem:[%s15025_s13 + $0x7c] sm:$0xf]  ;;  %v858_v23 = vrot.slane %v854_v63, 4 }
 0x12a   : > { %12971 = vmatprep.subr.bf16.mxu0 %v14347_v26  ;;  %v860_v11 = vshrl.u32 %v593_v37, 16 }
 0x12c   : > { %12940 = vmatmul.mubr.bf16.gmra.mrb[12].mxu0 %v11700_v60  ;;  %v15568_v44 = vrot.slane %v860_v11, 7  ;;  %v11719_v11 = vrot.slane %v2079_v22, 9 }
 0x12d   : > { %12943 = vmatprep.mubr.bf16.mxu0 %v11701_v61  ;;  %12972 = vmatpush3.bf16.msra.mxu0 %v14347_v26  ;;  %v386_v61 = vsel %vm15036_vm3, 0, %v385_v55  ;;  %v863_v26 = vshll.u32 %v593_v37, 16  ;;  %v14570_v37 = vld [vmem:[#allocation2 + $0x14] sm:$0x1] }
 0x12e   : > { %12973 = vmatprep.subr.bf16.mxu0 %v14350_v24  ;;  %387 = vst [vmem:[#allocation2 + $0xc0] sm:$0x1] %v386_v61  ;;  %v2140_v7 = vrot.slane %v14570_v37, 5  ;;  %v867_v30 = vrot.slane %v15568_v44, 4 }
 0x12f   : > { %v865_v36 = vor.u32 %v863_v26, %v15568_v44  ;;  %v18435_v44 = vcombine.low %v15521_v2, %v15532_v27  ;;  %v14364_v27 = vld [vmem:[#allocation7 + $0x108] sm:$0xff]  }
 0x131   : > { %12974 = vmatpush3.bf16.msra.mxu0 %v14350_v24  ;;  %v2130_v24 = vrot.slane %v15432_v20, 5  ;;  %v866_v20 = vsel %vm15063_vm9, %v858_v23, %v865_v36  ;;  %v14352_v23 = vld [vmem:[#allocation7 + $0xc8] sm:$0xff]  }
 0x132   : > { %13007 = vmatprep.subr.bf16.mxu0 %v15548_v19  ;;  %1027 = vst [vmem:[#allocation2 + $0xc4] sm:$0xf] %v866_v20  ;;  %v14573_v20 = vld [vmem:[#allocation2 + $0x38] sm:$0x1] }
 0x133   : > { %v2132_v18 = vrot.slane %v2130_v24, 4  ;;  %v2131_v61 = vsel %vm15442_vm14, %v11717_v58, %v2130_v24  ;;  %v2151_v24 = vrot.slane %v15452_v0, 5 }
 0x134   : > { %12944 = vmatmul.mubr.bf16.gmra.mrb[16].mxu0 %v11702_v59  ;;  %v14569_v59 = vld [vmem:[#allocation2 + $0x8] sm:$0x1] }
 0x135   : > { %12947 = vmatprep.mubr.bf16.mxu0 %v11703_v1  ;;  %v2133_v51 = vrot.slane %v14569_v59, 5  ;;  %v855_v1 = vshll.u32 %v592_v41, 16  ;;  %v2146_v59 = vrot.slane %v2144_v39, 4  ;;  %v2153_v26 = vrot.slane %v2151_v24, 4 }
 0x137   : > { %v857_v60 = vor.u32 %v855_v1, %v854_v63  ;;  %v2134_v41 = vsel %vm15442_vm14, %v2132_v18, %v2133_v51  ;;  %v14571_v63 = vld [vmem:[#allocation2 + $0x20] sm:$0x1]  ;;  %v2145_v51 = vsel %vm15442_vm14, %v11719_v11, %v2144_v39  ;;  %v14572_v18 = vld [vmem:[#allocation2 + $0x2c] sm:$0x1]  ;;  %v2082_v39 = vld [vmem:[#allocation2 + $0x3c] sm:$0xe] }
 0x138   : > { %v11733_v16 = vcombine.low %v2131_v61, %v2134_v41  ;;  %v2147_v56 = vrot.slane %v14571_v63, 5  ;;  %v14353_v61 = vld [vmem:[#allocation7 + $0xd0] sm:$0xff]   ;;  %v2083_v41 = vld [vmem:[#allocation2 + $0x48] sm:$0xe]  ;;  %v14575_v63 = vld [vmem:[#allocation2 + $0x50] sm:$0x1] }
 0x139   : > { %v11723_v13 = vrot.slane %v2083_v41, 9  ;;  %v18431_v41 = vcombine.low %v15473_v40, %v15486_v35 }
 0x13a   : > { %v2148_v58 = vsel %vm15442_vm14, %v2146_v59, %v2147_v56  ;;  %v2175_v56 = vrot.slane %v14575_v63, 5 }
 0x13b   : > { %v11735_v1 = vcombine.low %v2145_v51, %v2148_v58  ;;  %v2186_v58 = vrot.slane %v15545_v46, 5 }
 0x13c   : > { %12948 = vmatmul.mubr.bf16.gmra.mrb[20].mxu0 %v11704_v9  ;;  %v1024_v9 = vld [vmem:[#allocation2 + $0xc0] sm:$0xf] }
 0x13d   : > { %12951 = vmatprep.mubr.bf16.mxu0 %v11705_v10  ;;  %v1025_v55 = vsel %vm15072_vm10, %v857_v60, %v1024_v9  ;;  %v2137_v10 = vrot.slane %v15435_v33, 5  ;;  %v2154_v60 = vrot.slane %v14572_v18, 5  ;;  %v2160_v9 = vrot.slane %v2158_v32, 4 }
 0x13e   : > { %1026 = vst [vmem:[#allocation2 + $0xc0] sm:$0xf] %v1025_v55  ;;  %v2161_v55 = vrot.slane %v14573_v20, 5 }
 0x13f   : > { %v2138_v33 = vsel %vm15442_vm14, %v11718_v25, %v2137_v10  ;;  %v2155_v21 = vsel %vm15442_vm14, %v2153_v26, %v2154_v60  ;;  %v2167_v25 = vrot.slane %v2165_v14, 4  ;;  %v14576_v60 = vld [vmem:[#allocation2 + $0x5c] sm:$0x1] }
 0x144   : > { %12952 = vmatmul.mubr.bf16.gmra.mrb[24].mxu0 %v11706_v12  ;;  %v2139_v12 = vrot.slane %v2137_v10, 4  ;;  %v2162_v10 = vsel %vm15442_vm14, %v2160_v9, %v2161_v55  ;;  %v14577_v9 = vld [vmem:[#allocation2 + $0x68] sm:$0x1]  ;;  %v14356_v55 = vld [vmem:[#allocation7 + $0xe8] sm:$0xff]  }
 0x145   : > { %12955 = vmatprep.mubr.bf16.mxu0 %v11707_v28  ;;  %v2081_v28 = vld [vmem:[#allocation2 + $0x30] sm:$0xe]  ;;  %v2189_v20 = vrot.slane %v14577_v9, 5  ;;  %v14367_v9 = vld [vmem:[#allocation7 + $0x110] sm:$0xff]  }
 0x146   : > { %v2141_v48 = vsel %vm15442_vm14, %v2139_v12, %v2140_v7  ;;  %v11721_v36 = vrot.slane %v2081_v28, 9  ;;  %v14574_v12 = vld [vmem:[#allocation2 + $0x44] sm:$0x1] }
 0x147   : > { %v11734_v45 = vcombine.low %v2138_v33, %v2141_v48  ;;  %v2168_v11 = vrot.slane %v14574_v12, 5  ;;  %v2084_v33 = vld [vmem:[#allocation2 + $0x54] sm:$0xe]  ;;  %v2179_v48 = vrot.slane %v15542_v15, 5  ;;  %v2188_v15 = vrot.slane %v2186_v58, 4 }
 0x148   : > { %v2159_v22 = vsel %vm15442_vm14, %v11721_v36, %v2158_v32  ;;  %v14355_v32 = vld [vmem:[#allocation7 + $0xe0] sm:$0xff]   ;;  %v11724_v26 = vrot.slane %v2084_v33, 9 }
 0x149   : > { %v11737_v7 = vcombine.low %v2159_v22, %v2162_v10  ;;  %v2181_v18 = vrot.slane %v2179_v48, 4  ;;  %v14357_v22 = vld [vmem:[#allocation7 + $0xf0] sm:$0xff]  }
 0x14a   : > { %v2180_v46 = vsel %vm15442_vm14, %v11724_v26, %v2179_v48 }
 0x14c   : > { %12956 = vmatmul.mubr.bf16.gmra.mrb[28].mxu0 %v11708_v53  ;;  %v11720_v53 = vrot.slane %v2080_v8, 9  ;;  %v14354_v8 = vld [vmem:[#allocation7 + $0xd8] sm:$0xff]  }
 0x14d   : > { %12975 = vmatprep.mubr.bf16.mxu0 %v11733_v16  ;;  %v11722_v16 = vrot.slane %v2082_v39, 9 }
 0x14e   : > { %v2152_v0 = vsel %vm15442_vm14, %v11720_v53, %v2151_v24 }
 0x14f   : > { %v11736_v37 = vcombine.low %v2152_v0, %v2155_v21  ;;  %v2166_v28 = vsel %vm15442_vm14, %v11722_v16, %v2165_v14  ;;  %v2190_v14 = vsel %vm15442_vm14, %v2188_v15, %v2189_v20  ;;  %v18433_v16 = vcombine.low %v15498_v17, %v15511_v62  ;;  %v2952_v17 = vld [vmem:[#allocation2 + $0x1c] sm:$0xf]  ;;  %v2950_v62 = vld [vmem:[#allocation2 + $0x14] sm:$0x1] }
 0x150   : > { %v3030_v31 = vshll.u32 %v2952_v17, 16  ;;  %v3034_v38 = vshrl.u32 %v2952_v17, 16  ;;  %v3016_v33 = vshll.u32 %v2950_v62, 16  ;;  %v14366_v62 = vld [vmem:[#allocation2 + $0x48] sm:$0xff]  }
 0x152   : > { %v15661_v20 = vrot.slane %v3016_v33, 5 }
 0x154   : > { %12976 = vmatmul.mubr.bf16.vlgmr.msra.gmra.mrb[0].mxu0 %v11734_v45  ;;  %v2085_v45 = vld [vmem:[#allocation2 + $0x60] sm:$0xe] }
 0x155   : > { %13008 = vmatpush3.bf16.msra.mxu0 %v15548_v19  ;;  %12979 = vmatprep.mubr.bf16.mxu0 %v11735_v1  ;;  %v2172_v19 = vrot.slane %v15539_v47, 5  ;;  %v2169_v47 = vsel %vm15442_vm14, %v2167_v25, %v2168_v11  ;;  %v11725_v36 = vrot.slane %v2085_v45, 9  ;;  %v2948_v25 = vld [vmem:[#allocation2 + $0xc] sm:$0xf]  ;;  %v15655_v45 = vrot.slane %v3030_v31, 5 }
 0x156   : > { %13009 = vmatprep.subr.bf16.mxu0 %v14352_v23  ;;  %v11738_v53 = vcombine.low %v2166_v28, %v2169_v47  ;;  %v3000_v35 = vshll.u32 %v2948_v25, 16  ;;  %v2954_v28 = vld [vmem:[#allocation2 + $0x24] sm:$0xf]  ;;  %v14360_v47 = vld [vmem:[#allocation2 + $0x18] sm:$0xff]  }
 0x157   : > { %v2174_v59 = vrot.slane %v2172_v19, 4  ;;  %v2173_v24 = vsel %vm15442_vm14, %v11723_v13, %v2172_v19  ;;  %v2187_v21 = vsel %vm15442_vm14, %v11725_v36, %v2186_v58  ;;  %v14361_v19 = vld [vmem:[#allocation7 + $0x100] sm:$0xff]   ;;  %v2953_v13 = vld [vmem:[#allocation2 + $0x20] sm:$0x1]  ;;  %v3048_v26 = vshll.u32 %v2954_v28, 16 }
 0x158   : > { %v11741_v39 = vcombine.low %v2187_v21, %v2190_v14  ;;  %v3002_v63 = vrot.slane %v3000_v35, 5 }
 0x159   : > { %13010 = vmatpush3.bf16.msra.mxu0 %v14352_v23  ;;  %v2176_v51 = vsel %vm15442_vm14, %v2174_v59, %v2175_v56  ;;  %v2182_v23 = vrot.slane %v14576_v60, 5 }
 0x15a   : > { %13011 = vmatprep.subr.bf16.mxu0 %v14353_v61  ;;  %v11739_v1 = vcombine.low %v2173_v24, %v2176_v51  ;;  %v3040_v51 = vshll.u32 %v2953_v13, 16  ;;  %v14368_v13 = vld [vmem:[#allocation2 + $0x54] sm:$0xff]  }
 0x15b   : > { %v2183_v0 = vsel %vm15442_vm14, %v2181_v18, %v2182_v23  ;;  %v2955_v18 = vld [vmem:[#allocation2 + $0x28] sm:$0xf] }
 0x15c   : > { %12980 = vmatmul.mubr.bf16.gmra.mrb[4].mxu0 %v11736_v37  ;;  %v11740_v10 = vcombine.low %v2180_v46, %v2183_v0  ;;  %v18432_v37 = vcombine.low %v15493_v52, %v15503_v43  ;;  %v3006_v52 = vshll.u32 %v2949_v29, 16  ;;  %v3010_v43 = vshrl.u32 %v2949_v29, 16  ;;  %v14373_v29 = vld [vmem:[#allocation7 + $0x120] sm:$0xff]  }
 0x15d   : > { %12983 = vmatprep.mubr.bf16.mxu0 %v11737_v7  ;;  %13012 = vmatpush3.bf16.msra.mxu0 %v14353_v61  ;;  %v14358_v61 = vld [vmem:[#allocation7 + $0xf8] sm:$0xff]   ;;  %v15667_v21 = vrot.slane %v3040_v51, 5  ;;  %v3054_v14 = vshll.u32 %v2955_v18, 16 }
 0x15e   : > { %13013 = vmatprep.subr.bf16.mxu0 %v14354_v8  ;;  %v441_v7 = vld [vmem:[#allocation2 + $0xc8] sm:$0x1]  ;;  %v15653_v56 = vrot.slane %v3006_v52, 5  ;;  %v3707_v52 = vld [vmem:[#allocation2 + $0x48] sm:$0xe] }
 0x15f   : > { %v442_v40 = vsel %vm15041_vm4, 0, %v441_v7  ;;  %v2956_v7 = vld [vmem:[#allocation2 + $0x2c] sm:$0x1]  ;;  %v15697_v51 = vld [vmem:[#allocation2 + $0x68] sm:$0x1] }
 0x160   : > { %443 = vst [vmem:[#allocation2 + $0xc8] sm:$0x1] %v442_v40  ;;  %v15675_v40 = vld [vmem:[#allocation2 + $0x4c] sm:$0xf] }
 0x161   : > { %13014 = vmatpush3.bf16.msra.mxu0 %v14354_v8  ;;  %v3012_v8 = vrot.slane %v3010_v43, 4  ;;  %v3803_v43 = vrot.slane %v15675_v40, 5 }
 0x162   : > { %13015 = vmatprep.subr.bf16.mxu0 %v14355_v32 }
 0x163   : > { %v3013_v23 = vor.u32 %v3012_v8, %v15653_v56 }
 0x164   : > { %12984 = vmatmul.mubr.bf16.gmra.mrb[8].mxu0 %v11738_v53  ;;  %v3036_v53 = vrot.slane %v3034_v38, 4  ;;  %v3805_v38 = vrot.slane %v3803_v43, 4 }
 0x165   : > { %12987 = vmatprep.mubr.bf16.mxu0 %v11739_v1  ;;  %13016 = vmatpush3.bf16.msra.mxu0 %v14355_v32  ;;  %v14362_v32 = vld [vmem:[#allocation2 + $0x24] sm:$0xff]   ;;  %v3045_v1 = vshrl.u32 %v2954_v28, 16  ;;  %v15665_v0 = vrot.slane %v3013_v23, 4  ;;  %v15707_v23 = vld [vmem:[#allocation2 + $0x38] sm:$0x1] }
 0x166   : > { %13017 = vmatprep.subr.bf16.mxu0 %v14356_v55  ;;  %v3037_v15 = vor.u32 %v3036_v53, %v15655_v45  ;;  %v3709_v53 = vld [vmem:[#allocation2 + $0x60] sm:$0xe]  ;;  %v3715_v28 = vld [vmem:[#allocation2 + $0xa8] sm:$0xe] }
 0x167   : > { %v1028_v58 = vld [vmem:[#allocation2 + $0xc8] sm:$0x1] }
 0x168   : > { %v1029_v2 = vsel %vm15036_vm3, %v867_v30, %v1028_v58  ;;  %v3064_v30 = vshll.u32 %v2956_v7, 16  ;;  %v3088_v7 = vshll.u32 %v15707_v23, 16 }
 0x169   : > { %13018 = vmatpush3.bf16.msra.mxu0 %v14356_v55  ;;  %1030 = vst [vmem:[#allocation2 + $0xc8] sm:$0x1] %v1029_v2  ;;  %v14363_v55 = vld [vmem:[#allocation2 + $0x30] sm:$0xff]  }
 0x16a   : > { %13019 = vmatprep.subr.bf16.mxu0 %v14357_v22  ;;  %v15699_v58 = vrot.slane %v3064_v30, 5 }
 0x16c   : > { %12988 = vmatmul.mubr.bf16.gmra.mrb[12].mxu0 %v11740_v10 }
 0x16d   : > { %12991 = vmatprep.mubr.bf16.mxu0 %v11741_v39  ;;  %13020 = vmatpush3.bf16.msra.mxu0 %v14357_v22  ;;  %v14365_v22 = vld [vmem:[#allocation2 + $0x3c] sm:$0xff]   ;;  %v15671_v39 = vrot.slane %v3037_v15, 4 }
 0x16e   : > { %13021 = vmatprep.subr.bf16.mxu0 %v14358_v61  ;;  %v2960_v15 = vld [vmem:[#allocation2 + $0x3c] sm:$0xf] }
 0x171   : > { %13022 = vmatpush3.bf16.msra.mxu0 %v14358_v61  ;;  %v3047_v61 = vrot.slane %v3045_v1, 4  ;;  %v14369_v1 = vld [vmem:[#allocation2 + $0x60] sm:$0xff]  }
 0x172   : > { %13055 = vmatprep.subr.bf16.mxu0 %v14361_v19 }
 0x174   : > { %12992 = vmatmul.mubr.bf16.gmra.mrb[16].mxu0 %v11742_v6  ;;  %v2951_v6 = vld [vmem:[#allocation2 + $0x18] sm:$0xf] }
 0x175   : > { %12995 = vmatprep.mubr.bf16.mxu0 %v11743_v57  ;;  %v2997_v57 = vshrl.u32 %v2948_v25, 16  ;;  %v3021_v12 = vshrl.u32 %v2951_v6, 16  ;;  %v3024_v11 = vshll.u32 %v2951_v6, 16  ;;  %v15673_v25 = vrot.slane %v3054_v14, 5 }
 0x177   : > { %v2999_v59 = vrot.slane %v2997_v57, 4  ;;  %v3023_v48 = vrot.slane %v3021_v12, 4  ;;  %v3026_v24 = vrot.slane %v3024_v11, 5  ;;  %v11810_v11 = vrot.slane %v3707_v52, 9 }
 0x179   : > { %v3003_v60 = vor.u32 %v3002_v63, %v2999_v59  ;;  %v3027_v36 = vor.u32 %v3026_v24, %v3023_v48  ;;  %v15683_v63 = vsel %vm15442_vm14, %v11810_v11, %v3803_v43  ;;  %v15695_v24 = vld [vmem:[#allocation2 + $0x64] sm:$0xf]  ;;  %v14372_v43 = vld [vmem:[#allocation2 + $0x78] sm:$0xff]  }
 0x17a   : > { %v3817_v2 = vrot.slane %v15695_v24, 5 }
 0x17b   : > { %v15663_v46 = vrot.slane %v3003_v60, 4  ;;  %v15669_v10 = vrot.slane %v3027_v36, 4  ;;  %v14371_v60 = vld [vmem:[#allocation2 + $0x6c] sm:$0xff]  }
 0x17c   : > { %12996 = vmatmul.mubr.bf16.gmra.mrb[20].mxu0 %v18431_v41  ;;  %v2957_v41 = vld [vmem:[#allocation2 + $0x30] sm:$0xf] }
 0x17d   : > { %12999 = vmatprep.mubr.bf16.mxu0 %v18432_v37  ;;  %v14370_v37 = vld [vmem:[#allocation7 + $0x118] sm:$0xff]   ;;  %v3069_v6 = vshrl.u32 %v2957_v41, 16  ;;  %v3072_v57 = vshll.u32 %v2957_v41, 16 }
 0x17f   : > { %v15693_v48 = vrot.slane %v3069_v6, 4  ;;  %v3096_v6 = vshll.u32 %v2960_v15, 16 }
 0x184   : > { %13000 = vmatmul.mubr.bf16.gmra.mrb[24].mxu0 %v18433_v16  ;;  %v2958_v16 = vld [vmem:[#allocation2 + $0x34] sm:$0xf] }
 0x185   : > { %13003 = vmatprep.mubr.bf16.mxu0 %v18434_v54  ;;  %v3058_v54 = vshrl.u32 %v2955_v18, 16  ;;  %v3078_v35 = vshll.u32 %v2958_v16, 16  ;;  %v3082_v31 = vshrl.u32 %v2958_v16, 16  ;;  %v11812_v18 = vrot.slane %v3709_v53, 9 }
 0x186   : > { %v3093_v16 = vshrl.u32 %v2960_v15, 16 }
 0x187   : > { %v3060_v12 = vrot.slane %v3058_v54, 4  ;;  %v15709_v36 = vrot.slane %v3082_v31, 4  ;;  %v15713_v14 = vsel %vm15442_vm14, %v11812_v18, %v3817_v2  ;;  %v15727_v54 = vld [vmem:[#allocation2 + $0x7c] sm:$0xf] }
 0x188   : > { %v15752_v53 = vrot.slane %v3093_v16, 4  ;;  %v14377_v16 = vld [vmem:[#allocation2 + $0x9c] sm:$0xff]  }
 0x18c   : > { %13004 = vmatmul.mubr.bf16.gmra.mrb[28].mxu0 %v18435_v44  ;;  %v14376_v44 = vld [vmem:[#allocation7 + $0x128] sm:$0xff]  }
 0x18d   : > { %13023 = vmatprep.mubr.bf16.mxu0 %v14359_v49  ;;  %v15677_v49 = vld [vmem:[#allocation2 + $0x50] sm:$0x1] }
 0x18e   : > { %v3806_v17 = vrot.slane %v15677_v49, 5 }
 0x190   : > { %v15687_v8 = vsel %vm15442_vm14, %v3805_v38, %v3806_v17  ;;  %v15741_v38 = vld [vmem:[#allocation2 + $0x48] sm:$0xf] }
 0x191   : > { %v3120_v42 = vshll.u32 %v15741_v38, 16 }
 0x194   : > { %13024 = vmatmul.mubr.bf16.vlgmr.msra.gmra.mrb[0].mxu0 %v14360_v47  ;;  %v14379_v47 = vld [vmem:[#allocation7 + $0x130] sm:$0xff]  }
 0x195   : > { %13056 = vmatpush3.bf16.msra.mxu0 %v14361_v19  ;;  %13027 = vmatprep.mubr.bf16.mxu0 %v14362_v32  ;;  %v3050_v19 = vrot.slane %v3048_v26, 5  ;;  %v15701_v32 = vrot.slane %v3072_v57, 5  ;;  %v15705_v26 = vrot.slane %v3078_v35, 5  ;;  %v3711_v57 = vld [vmem:[#allocation2 + $0x78] sm:$0xe]  ;;  %v3831_v35 = vrot.slane %v15727_v54, 5 }
 0x196   : > { %13057 = vmatprep.subr.bf16.mxu0 %v14364_v27 }
 0x197   : > { %v3051_v59 = vor.u32 %v3050_v19, %v3047_v61  ;;  %v15716_v61 = vld [vmem:[#allocation2 + $0x40] sm:$0xf] }
 0x198   : > { %v3102_v17 = vshll.u32 %v15716_v61, 16  ;;  %v3106_v11 = vshrl.u32 %v15716_v61, 16 }
 0x199   : > { %13058 = vmatpush3.bf16.msra.mxu0 %v14364_v27  ;;  %v15691_v33 = vrot.slane %v3051_v59, 4  ;;  %v3820_v27 = vrot.slane %v15697_v51, 5 }
 0x19a   : > { %13059 = vmatprep.subr.bf16.mxu0 %v14367_v9  ;;  %v15760_v18 = vrot.slane %v3102_v17, 5  ;;  %v15775_v17 = vld [vmem:[#allocation2 + $0xa4] sm:$0x1] }
 0x19c   : > { %13028 = vmatmul.mubr.bf16.gmra.mrb[4].mxu0 %v14363_v55  ;;  %v14382_v55 = vld [vmem:[#allocation7 + $0x138] sm:$0xff]  }
 0x19d   : > { %13031 = vmatprep.mubr.bf16.mxu0 %v14365_v22  ;;  %13060 = vmatpush3.bf16.msra.mxu0 %v14367_v9  ;;  %v3819_v9 = vrot.slane %v3817_v2, 4  ;;  %v3061_v22 = vor.u32 %v3060_v12, %v15673_v25  ;;  %v14374_v12 = vld [vmem:[#allocation2 + $0x84] sm:$0xff]   ;;  %v15754_v2 = vld [vmem:[#allocation2 + $0x94] sm:$0xf] }
 0x19e   : > { %13061 = vmatprep.subr.bf16.mxu0 %v14370_v37  ;;  %v3845_v15 = vrot.slane %v15754_v2, 5 }
 0x19f   : > { %v15720_v19 = vsel %vm15442_vm14, %v3819_v9, %v3820_v27  ;;  %v15731_v30 = vrot.slane %v3061_v22, 4  ;;  %v15756_v27 = vld [vmem:[#allocation2 + $0x98] sm:$0x1]  ;;  %v14378_v22 = vld [vmem:[#allocation2 + $0xa8] sm:$0xff]  }
 0x1a0   : > { %v3848_v9 = vrot.slane %v15756_v27, 5 }
 0x1a1   : > { %13062 = vmatpush3.bf16.msra.mxu0 %v14370_v37  ;;  %v15724_v37 = vld [vmem:[#allocation7 + $0x140] sm:$0xff]  }
 0x1a2   : > { %13063 = vmatprep.subr.bf16.mxu0 %v14373_v29 }
 0x1a4   : > { %13032 = vmatmul.mubr.bf16.gmra.mrb[8].mxu0 %v14366_v62  ;;  %v11814_v62 = vrot.slane %v3711_v57, 9  ;;  %v15765_v57 = vrot.slane %v3106_v11, 4  ;;  %v11818_v11 = vrot.slane %v3715_v28, 9 }
 0x1a5   : > { %13035 = vmatprep.mubr.bf16.mxu0 %v14368_v13  ;;  %13064 = vmatpush3.bf16.msra.mxu0 %v14373_v29  ;;  %v15729_v29 = vld [vmem:[#allocation2 + $0x80] sm:$0x1]  ;;  %v3833_v13 = vrot.slane %v3831_v35, 4 }
 0x1a6   : > { %13065 = vmatprep.subr.bf16.mxu0 %v14376_v44  ;;  %v3834_v52 = vrot.slane %v15729_v29, 5  ;;  %v15739_v31 = vsel %vm15442_vm14, %v11814_v62, %v3831_v35  ;;  %v3847_v35 = vrot.slane %v3845_v15, 4 }
 0x1a8   : > { %v15779_v62 = vsel %vm15442_vm14, %v3847_v35, %v3848_v9 }
 0x1a9   : > { %13066 = vmatpush3.bf16.msra.mxu0 %v14376_v44  ;;  %v15745_v44 = vsel %vm15442_vm14, %v3833_v13, %v3834_v52  ;;  %v15767_v52 = vld [vmem:[#allocation2 + $0x44] sm:$0x1]  ;;  %18438 = vst [vmem:[#allocation19_spill] sm:$0xff] %v15779_v62  ;;  %v15785_v13 = vld [vmem:[#allocation2 + $0xb0] sm:$0x1] }
 0x1aa   : > { %13067 = vmatprep.subr.bf16.mxu0 %v14379_v47  ;;  %18436 = vst [vmem:[#allocation17_spill] sm:$0xff] %v15745_v44  ;;  %v3862_v35 = vrot.slane %v15785_v13, 5 }
 0x1ac   : > { %13036 = vmatmul.mubr.bf16.gmra.mrb[12].mxu0 %v14369_v1  ;;  %v15758_v1 = vrot.slane %v3096_v6, 5 }
 0x1ad   : > { %13039 = vmatprep.mubr.bf16.mxu0 %v14371_v60  ;;  %13068 = vmatpush3.bf16.msra.mxu0 %v14379_v47  ;;  %v15750_v47 = vrot.slane %v3088_v7, 5  ;;  %v3713_v60 = vld [vmem:[#allocation2 + $0x90] sm:$0xe] }
 0x1ae   : > { %13069 = vmatprep.subr.bf16.mxu0 %v14382_v55  ;;  %v11816_v7 = vrot.slane %v3713_v60, 9  ;;  %v3714_v60 = vld [vmem:[#allocation2 + $0x9c] sm:$0xe] }
 0x1af   : > { %v11817_v41 = vrot.slane %v3714_v60, 9  ;;  %v3019_v60 = vsel %vm15087_vm11, %v15665_v0, %v15661_v20  ;;  %v15823_v20 = vld [vmem:[#allocation2 + $0xc4] sm:$0xf] }
 0x1b0   : > { %v15771_v6 = vsel %vm15442_vm14, %v11816_v7, %v3845_v15  ;;  %v3855_v7 = vrot.slane %v15775_v17, 5 }
 0x1b1   : > { %13070 = vmatpush3.bf16.msra.mxu0 %v14382_v55  ;;  %v14375_v55 = vld [vmem:[#allocation2 + $0x90] sm:$0xff]   ;;  %18437 = vst [vmem:[#allocation18_spill] sm:$0xff] %v15771_v6  ;;  %v3130_v6 = vshrl.u32 %v15675_v40, 16 }
 0x1b2   : > { %13103 = vmatprep.subr.bf16.mxu0 %v15724_v37 }
 0x1b4   : > { %13040 = vmatmul.mubr.bf16.gmra.mrb[16].mxu0 %v14372_v43  ;;  %v15773_v43 = vld [vmem:[#allocation2 + $0xa0] sm:$0xf] }
 0x1b5   : > { %13043 = vmatprep.mubr.bf16.mxu0 %v14374_v12  ;;  %v15781_v12 = vld [vmem:[#allocation2 + $0xac] sm:$0xf]  ;;  %v3852_v15 = vrot.slane %v15773_v43, 5 }
 0x1b6   : > { %v3859_v9 = vrot.slane %v15781_v12, 5 }
 0x1b7   : > { %v3854_v34 = vrot.slane %v3852_v15, 4  ;;  %v15795_v5 = vsel %vm15442_vm14, %v11817_v41, %v3852_v15  ;;  %v15813_v41 = vld [vmem:[#allocation2 + $0xb8] sm:$0xf]  ;;  %v15815_v15 = vld [vmem:[#allocation2 + $0xbc] sm:$0x1] }
 0x1b8   : > { %18439 = vst [vmem:[#allocation20_spill] sm:$0xff] %v15795_v5  ;;  %v3861_v62 = vrot.slane %v3859_v9, 4  ;;  %v15811_v59 = vsel %vm15442_vm14, %v11818_v11, %v3859_v9  ;;  %v3033_v11 = vsel %vm15087_vm11, %v15669_v10, %v15655_v45  ;;  %v2966_v9 = vld [vmem:[#allocation2 + $0x54] sm:$0xf]  ;;  %v3717_v45 = vld [vmem:[#allocation2 + $0xc0] sm:$0xe] }
 0x1b9   : > { %v15807_v28 = vsel %vm15442_vm14, %v3854_v34, %v3855_v7  ;;  %18441 = vst [vmem:[#allocation22_spill] sm:$0xff] %v15811_v59  ;;  %v3043_v7 = vsel %vm15087_vm11, %v15671_v39, %v15667_v21  ;;  %v3869_v34 = vrot.slane %v15815_v15, 5  ;;  %v3873_v10 = vrot.slane %v15823_v20, 5  ;;  %v14381_v21 = vld [vmem:[#allocation2 + $0xc0] sm:$0xff]  }
 0x1ba   : > { %18440 = vst [vmem:[#allocation21_spill] sm:$0xff] %v15807_v28  ;;  %v3075_v39 = vor.u32 %v15701_v32, %v15693_v48  ;;  %v3085_v59 = vor.u32 %v15709_v36, %v15705_v26  ;;  %v11820_v5 = vrot.slane %v3717_v45, 9  ;;  %v3057_v48 = vsel %vm15087_vm11, %v15691_v33, %v15673_v25 }
 0x1bb   : > { %v3875_v44 = vrot.slane %v3873_v10, 4  ;;  %v3109_v32 = vor.u32 %v15765_v57, %v15760_v18  ;;  %v18448_v45 = vshll.u32 %v15767_v52, 16 }
 0x1bc   : > { %13044 = vmatmul.mubr.bf16.gmra.mrb[20].mxu0 %v14375_v55  ;;  %v14380_v55 = vld [vmem:[#allocation2 + $0xb4] sm:$0xff]   ;;  %v15875_v25 = vrot.slane %v3075_v39, 4  ;;  %v3122_v39 = vrot.slane %v3120_v42, 5 }
 0x1bd   : > { %13047 = vmatprep.mubr.bf16.mxu0 %v14377_v16  ;;  %v3009_v16 = vsel %vm15087_vm11, %v15663_v46, %v15653_v56  ;;  %v15821_v46 = vsel %vm15442_vm14, %v3861_v62, %v3862_v35  ;;  %v15835_v62 = vld [vmem:[#allocation2 + $0xc8] sm:$0x1]  ;;  %v3716_v35 = vld [vmem:[#allocation2 + $0xb4] sm:$0xe]  ;;  %v3866_v56 = vrot.slane %v15813_v41, 5 }
 0x1be   : > { %18442 = vst [vmem:[#allocation23_spill] sm:$0xff] %v15821_v46  ;;  %v11781_v0 = vcombine.low %v3009_v16, %v3019_v60  ;;  %v15840_v16 = vld [vmem:[#allocation2 + $0x58] sm:$0xf]  ;;  %v11819_v60 = vrot.slane %v3716_v35, 9  ;;  %v3876_v46 = vrot.slane %v15835_v62, 5 }
 0x1bf   : > { %v3868_v28 = vrot.slane %v3866_v56, 4  ;;  %v3150_v33 = vshll.u32 %v15840_v16, 16  ;;  %v3154_v57 = vshrl.u32 %v15840_v16, 16 }
 0x1c0   : > { %v15853_v35 = vsel %vm15442_vm14, %v11819_v60, %v3866_v56  ;;  %v15873_v60 = vsel %vm15442_vm14, %v3875_v44, %v3876_v46  ;;  %v18447_v44 = vshrl.u32 %v15741_v38, 16 }
 0x1c1   : > { %18443 = vst [vmem:[#allocation24_spill] sm:$0xff] %v15853_v35  ;;  %v15863_v36 = vsel %vm15442_vm14, %v3868_v28, %v3869_v34  ;;  %18446 = vst [vmem:[#allocation27_spill] sm:$0xff] %v15873_v60  ;;  %v15885_v34 = vrot.slane %v3085_v59, 4  ;;  %v3132_v28 = vrot.slane %v3130_v6, 4  ;;  %v2969_v60 = vld [vmem:[#allocation2 + $0x60] sm:$0xf] }
 0x1c2   : > { %18444 = vst [vmem:[#allocation25_spill] sm:$0xff] %v15863_v36  ;;  %v3119_v46 = vrot.slane %v18447_v44, 4  ;;  %v15896_v35 = vld [vmem:[#allocation2 + $0x5c] sm:$0x1]  ;;  %v15898_v38 = vrot.slane %v3150_v33, 5  ;;  %v3168_v42 = vshll.u32 %v2969_v60, 16 }
 0x1c3   : > { %v2972_v44 = vld [vmem:[#allocation2 + $0x6c] sm:$0xf]  ;;  %v3178_v6 = vshrl.u32 %v15695_v24, 16 }
 0x1c4   : > { %13048 = vmatmul.mubr.bf16.gmra.mrb[24].mxu0 %v14378_v22  ;;  %v3126_v22 = vshll.u32 %v15675_v40, 16  ;;  %v15867_v40 = vsel %vm15442_vm14, %v11820_v5, %v3873_v10  ;;  %v3067_v5 = vsel %vm15087_vm11, %v15731_v30, %v15699_v58  ;;  %v3114_v10 = vrot.slane %v18448_v45, 5 }
 0x1c5   : > { %13051 = vmatprep.mubr.bf16.mxu0 %v14380_v55  ;;  %v3099_v55 = vor.u32 %v15758_v1, %v15752_v53  ;;  %18445 = vst [vmem:[#allocation26_spill] sm:$0xff] %v15867_v40  ;;  %v3141_v53 = vshrl.u32 %v2966_v9, 16  ;;  %v3144_v1 = vshll.u32 %v2966_v9, 16  ;;  %v3110_v40 = vrot.slane %v3109_v32, 4 }
 0x1c6   : > { %v15893_v56 = vrot.slane %v3126_v22, 5  ;;  %v3136_v58 = vshll.u32 %v15677_v49, 16  ;;  %v11783_v36 = vcombine.low %v3057_v48, %v3067_v5  ;;  %v3165_v45 = vshrl.u32 %v2969_v60, 16  ;;  %v14384_v60 = vld [vmem:[#allocation7 + $0x148] sm:$0xff]  }
 0x1c7   : > { %v15887_v9 = vrot.slane %v3099_v55, 4  ;;  %v3143_v30 = vrot.slane %v3141_v53, 4  ;;  %v3146_v59 = vrot.slane %v3144_v1, 5  ;;  %v11782_v55 = vcombine.low %v3033_v11, %v3043_v7  ;;  %v15912_v53 = vld [vmem:[#allocation2 + $0x70] sm:$0xf] }
 0x1c8   : > { %v3174_v22 = vshll.u32 %v15695_v24, 16  ;;  %v3081_v49 = vsel %vm15087_vm11, %v15875_v25, %v15705_v26  ;;  %v3123_v11 = vor.u32 %v3122_v39, %v3119_v46  ;;  %v3133_v7 = vor.u32 %v3132_v28, %v15893_v56  ;;  %v2975_v46 = vld [vmem:[#allocation2 + $0x78] sm:$0xf] }
 0x1c9   : > { %v3147_v48 = vor.u32 %v3146_v59, %v3143_v30  ;;  %v3160_v32 = vshll.u32 %v15896_v35, 16  ;;  %v3189_v1 = vshrl.u32 %v2972_v44, 16  ;;  %v3192_v24 = vshll.u32 %v2972_v44, 16 }
 0x1ca   : > { %v3105_v26 = vsel %vm15087_vm11, %v15887_v9, %v15760_v18  ;;  %v3115_v25 = vsel %vm15087_vm11, %v3110_v40, %v3114_v10  ;;  %v3170_v28 = vrot.slane %v3168_v42, 5  ;;  %v15923_v5 = vrot.slane %v3174_v22, 5 }
 0x1cb   : > { %v3124_v39 = vrot.slane %v3123_v11, 4  ;;  %v3134_v30 = vrot.slane %v3133_v7, 4  ;;  %v3198_v59 = vshll.u32 %v15912_v53, 16  ;;  %v3202_v18 = vshrl.u32 %v15912_v53, 16 }
 0x1cc   : > { %13052 = vmatmul.mubr.bf16.gmra.mrb[28].mxu0 %v14381_v21  ;;  %v3156_v21 = vrot.slane %v3154_v57, 4  ;;  %v3167_v57 = vrot.slane %v3165_v45, 4  ;;  %v3148_v40 = vrot.slane %v3147_v48, 4  ;;  %v3162_v9 = vrot.slane %v3160_v32, 5 }
 0x1cd   : > { %13071 = vmatprep.mubr.bf16.mxu0 %v11781_v0  ;;  %v3091_v0 = vsel %vm15087_vm11, %v15885_v34, %v15750_v47  ;;  %v15920_v47 = vrot.slane %v3136_v58, 5  ;;  %v3180_v34 = vrot.slane %v3178_v6, 4  ;;  %v3191_v10 = vrot.slane %v3189_v1, 4 }
 0x1ce   : > { %v3157_v33 = vor.u32 %v3156_v21, %v15898_v38  ;;  %v3194_v58 = vrot.slane %v3192_v24, 5  ;;  %v14385_v21 = vld [vmem:[#allocation7 + $0x150] sm:$0xff]   ;;  %v3213_v44 = vshrl.u32 %v2975_v46, 16  ;;  %v3216_v45 = vshll.u32 %v2975_v46, 16 }
 0x1cf   : > { %v3222_v42 = vshll.u32 %v15727_v54, 16  ;;  %v3171_v6 = vor.u32 %v3170_v28, %v3167_v57  ;;  %v3181_v11 = vor.u32 %v3180_v34, %v15923_v5  ;;  %v3184_v7 = vshll.u32 %v15697_v51, 16  ;;  %v15943_v51 = vld [vmem:[#allocation2 + $0x74] sm:$0x1] }
 0x1d0   : > { %v3158_v22 = vrot.slane %v3157_v33, 4  ;;  %v15932_v48 = vrot.slane %v3198_v59, 5  ;;  %v3204_v32 = vrot.slane %v3202_v18, 4  ;;  %v3129_v1 = vsel %vm15087_vm11, %v3124_v39, %v15893_v56  ;;  %v14386_v33 = vld [vmem:[#allocation7 + $0x158] sm:$0xff]  }
 0x1d1   : > { %v3153_v24 = vsel %vm15087_vm11, %v3148_v40, %v15898_v38  ;;  %v15947_v56 = vld [vmem:[#allocation2 + $0x88] sm:$0xf]  ;;  %v3172_v28 = vrot.slane %v3171_v6, 4  ;;  %v3182_v34 = vrot.slane %v3181_v11, 4  ;;  %v3186_v46 = vrot.slane %v3184_v7, 5 }
 0x1d2   : > { %v3205_v38 = vor.u32 %v3204_v32, %v15932_v48  ;;  %v3208_v39 = vshll.u32 %v15943_v51, 16  ;;  %v3246_v18 = vshll.u32 %v15947_v56, 16  ;;  %v3250_v40 = vshrl.u32 %v15947_v56, 16  ;;  %v2984_v32 = vld [vmem:[#allocation2 + $0x9c] sm:$0xf] }
 0x1d3   : > { %v3177_v6 = vsel %vm15087_vm11, %v3172_v28, %v15923_v5  ;;  %v3285_v28 = vshrl.u32 %v2984_v32, 16 }
 0x1d4   : > { %13072 = vmatmul.mubr.bf16.vlgmr.msra.gmra.mrb[0].mxu0 %v11782_v55  ;;  %v3226_v55 = vshrl.u32 %v15727_v54, 16  ;;  %v3139_v54 = vsel %vm15087_vm11, %v3134_v30, %v15920_v47  ;;  %v3163_v47 = vsel %vm15087_vm11, %v3158_v22, %v3162_v9  ;;  %v3206_v11 = vrot.slane %v3205_v38, 4 }
 0x1d5   : > { %13104 = vmatpush3.bf16.msra.mxu0 %v15724_v37  ;;  %13075 = vmatprep.mubr.bf16.mxu0 %v11783_v36  ;;  %v11784_v37 = vcombine.low %v3081_v49, %v3091_v0  ;;  %v11785_v36 = vcombine.low %v3105_v26, %v3115_v25  ;;  %v3195_v49 = vor.u32 %v3194_v58, %v3191_v10  ;;  %v2978_v0 = vld [vmem:[#allocation2 + $0x84] sm:$0xf]  ;;  %v3215_v26 = vrot.slane %v3213_v44, 4 }
 0x1d6   : > { %13105 = vmatprep.subr.bf16.mxu0 %v14384_v60  ;;  %v15945_v25 = vrot.slane %v3222_v42, 5  ;;  %v3228_v57 = vrot.slane %v3226_v55, 4  ;;  %v3237_v30 = vshrl.u32 %v2978_v0, 16  ;;  %v3240_v59 = vshll.u32 %v2978_v0, 16  ;;  %v2981_v42 = vld [vmem:[#allocation2 + $0x90] sm:$0xf] }
 0x1d7   : > { %v3196_v10 = vrot.slane %v3195_v49, 4  ;;  %v3232_v44 = vshll.u32 %v15729_v29, 16  ;;  %v11786_v55 = vcombine.low %v3129_v1, %v3139_v54  ;;  %v11787_v22 = vcombine.low %v3153_v24, %v3163_v47  ;;  %v15962_v49 = vld [vmem:[#allocation2 + $0x8c] sm:$0x1] }
 0x1d8   : > { %v3229_v9 = vor.u32 %v3228_v57, %v15945_v25  ;;  %v3210_v7 = vrot.slane %v3208_v39, 5  ;;  %v15964_v29 = vrot.slane %v3246_v18, 5  ;;  %v3252_v0 = vrot.slane %v3250_v40, 4  ;;  %v14388_v57 = vld [vmem:[#allocation7 + $0x168] sm:$0xff]  }
 0x1d9   : > { %13106 = vmatpush3.bf16.msra.mxu0 %v14384_v60  ;;  %v3218_v60 = vrot.slane %v3216_v45, 5  ;;  %v14387_v45 = vld [vmem:[#allocation7 + $0x160] sm:$0xff]   ;;  %v3261_v1 = vshrl.u32 %v2981_v42, 16  ;;  %v3264_v54 = vshll.u32 %v2981_v42, 16  ;;  %v3201_v5 = vsel %vm15087_vm11, %v3196_v10, %v15932_v48 }
 0x1da   : > { %13107 = vmatprep.subr.bf16.mxu0 %v14385_v21  ;;  %v3270_v47 = vshll.u32 %v15754_v2, 16  ;;  %v3256_v38 = vshll.u32 %v15962_v49, 16  ;;  %v3294_v39 = vshll.u32 %v15773_v43, 16  ;;  %v3298_v48 = vshrl.u32 %v15773_v43, 16 }
 0x1db   : > { %v3219_v58 = vor.u32 %v3218_v60, %v3215_v26  ;;  %v3230_v26 = vrot.slane %v3229_v9, 4  ;;  %v3234_v60 = vrot.slane %v3232_v44, 5  ;;  %v3263_v18 = vrot.slane %v3261_v1, 4  ;;  %v14389_v9 = vld [vmem:[#allocation7 + $0x170] sm:$0xff]  }
 0x1dc   : > { %13076 = vmatmul.mubr.bf16.gmra.mrb[4].mxu0 %v11784_v37  ;;  %v3239_v37 = vrot.slane %v3237_v30, 4  ;;  %v3266_v40 = vrot.slane %v3264_v54, 5  ;;  %v15982_v44 = vrot.slane %v3270_v47, 5  ;;  %v3287_v42 = vrot.slane %v3285_v28, 4 }
 0x1dd   : > { %13079 = vmatprep.mubr.bf16.mxu0 %v11785_v36  ;;  %13108 = vmatpush3.bf16.msra.mxu0 %v14385_v21  ;;  %v3187_v21 = vsel %vm15087_vm11, %v3182_v34, %v3186_v46  ;;  %v3242_v36 = vrot.slane %v3240_v59, 5  ;;  %v3220_v24 = vrot.slane %v3219_v58, 4  ;;  %v3288_v34 = vshll.u32 %v2984_v32, 16 }
 0x1de   : > { %13109 = vmatprep.subr.bf16.mxu0 %v14386_v33  ;;  %v3211_v46 = vsel %vm15087_vm11, %v3206_v11, %v3210_v7  ;;  %v3253_v59 = vor.u32 %v3252_v0, %v15964_v29  ;;  %v3235_v58 = vsel %vm15087_vm11, %v3230_v26, %v3234_v60  ;;  %v15984_v11 = vrot.slane %v3294_v39, 5  ;;  %v14390_v0 = vld [vmem:[#allocation7 + $0x178] sm:$0xff]   ;;  %v2990_v26 = vld [vmem:[#allocation2 + $0xb4] sm:$0xf] }
 0x1df   : > { %v3243_v30 = vor.u32 %v3242_v36, %v3239_v37  ;;  %v3225_v10 = vsel %vm15087_vm11, %v3220_v24, %v15945_v25  ;;  %v3300_v7 = vrot.slane %v3298_v48, 4  ;;  %v3267_v36 = vor.u32 %v3266_v40, %v3263_v18 }
 0x1e0   : > { %v3254_v37 = vrot.slane %v3253_v59, 4  ;;  %v3280_v25 = vshll.u32 %v15756_v27, 16  ;;  %v11790_v32 = vcombine.low %v3225_v10, %v3235_v58  ;;  %v3304_v24 = vshll.u32 %v15775_v17, 16 }
 0x1e1   : > { %13110 = vmatpush3.bf16.msra.mxu0 %v14386_v33  ;;  %v3274_v33 = vshrl.u32 %v15754_v2, 16  ;;  %v11788_v2 = vcombine.low %v3177_v6, %v3187_v21  ;;  %v2987_v6 = vld [vmem:[#allocation2 + $0xa8] sm:$0xf]  ;;  %v3244_v21 = vrot.slane %v3243_v30, 4  ;;  %v3301_v60 = vor.u32 %v3300_v7, %v15984_v11  ;;  %v15999_v30 = vld [vmem:[#allocation7 + $0x180] sm:$0xff]  }
 0x1e2   : > { %13111 = vmatprep.subr.bf16.mxu0 %v14387_v45  ;;  %v3312_v47 = vshll.u32 %v2987_v6, 16  ;;  %v3322_v28 = vshrl.u32 %v15781_v12, 16  ;;  %v3282_v17 = vrot.slane %v3280_v25, 5  ;;  %v3342_v39 = vshll.u32 %v15813_v41, 16 }
 0x1e3   : > { %v3276_v43 = vrot.slane %v3274_v33, 4  ;;  %v3318_v33 = vshll.u32 %v15781_v12, 16  ;;  %v3249_v27 = vsel %vm15087_vm11, %v3244_v21, %v15964_v29  ;;  %v3346_v48 = vshrl.u32 %v15813_v41, 16 }
 0x1e4   : > { %13080 = vmatmul.mubr.bf16.gmra.mrb[8].mxu0 %v11786_v55  ;;  %v11789_v55 = vcombine.low %v3201_v5, %v3211_v46  ;;  %v3309_v5 = vshrl.u32 %v2987_v6, 16  ;;  %v3333_v46 = vshrl.u32 %v2990_v26, 16  ;;  %v3306_v18 = vrot.slane %v3304_v24, 5 }
 0x1e5   : > { %13083 = vmatprep.mubr.bf16.mxu0 %v11787_v22  ;;  %13112 = vmatpush3.bf16.msra.mxu0 %v14387_v45  ;;  %v3290_v45 = vrot.slane %v3288_v34, 5  ;;  %v3258_v22 = vrot.slane %v3256_v38, 5  ;;  %v3277_v1 = vor.u32 %v3276_v43, %v15982_v44  ;;  %v3268_v34 = vrot.slane %v3267_v36, 4 }
 0x1e6   : > { %13113 = vmatprep.subr.bf16.mxu0 %v14388_v57  ;;  %v3336_v38 = vshll.u32 %v2990_v26, 16  ;;  %v3311_v40 = vrot.slane %v3309_v5, 4  ;;  %v3302_v29 = vrot.slane %v3301_v60, 4  ;;  %v3320_v10 = vrot.slane %v3318_v33, 5 }
 0x1e7   : > { %v3291_v54 = vor.u32 %v3290_v45, %v3287_v42  ;;  %v3278_v12 = vrot.slane %v3277_v1, 4  ;;  %v3324_v58 = vrot.slane %v3322_v28, 4  ;;  %v3344_v45 = vrot.slane %v3342_v39, 5 }
 0x1e8   : > { %v3338_v42 = vrot.slane %v3336_v38, 5  ;;  %v3273_v41 = vsel %vm15087_vm11, %v3268_v34, %v15982_v44  ;;  %v3328_v6 = vshll.u32 %v15785_v13, 16  ;;  %v3366_v44 = vshll.u32 %v15823_v20, 16 }
 0x1e9   : > { %13114 = vmatpush3.bf16.msra.mxu0 %v14388_v57  ;;  %v3259_v57 = vsel %vm15087_vm11, %v3254_v37, %v3258_v22  ;;  %v3292_v59 = vrot.slane %v3291_v54, 4  ;;  %v2993_v22 = vld [vmem:[#allocation2 + $0xc0] sm:$0xf]  ;;  %v3283_v7 = vsel %vm15087_vm11, %v3278_v12, %v3282_v17  ;;  %v3307_v37 = vsel %vm15087_vm11, %v3302_v29, %v3306_v18  ;;  %v14578_v18 = vld [vmem:[#allocation2 + $0x10] sm:$0xf] }
 0x1ea   : > { %13115 = vmatprep.subr.bf16.mxu0 %v14389_v9  ;;  %v11791_v43 = vcombine.low %v3249_v27, %v3259_v57  ;;  %v3325_v25 = vor.u32 %v3324_v58, %v3320_v10  ;;  %v3360_v1 = vshll.u32 %v2993_v22, 16  ;;  %v3370_v54 = vshrl.u32 %v15823_v20, 16  ;;  %v3702_v29 = vld [vmem:[#allocation2 + $0xc] sm:$0xe] }
 0x1eb   : > { %v3297_v21 = vsel %vm15087_vm11, %v3292_v59, %v15984_v11  ;;  %v3352_v13 = vshll.u32 %v15815_v15, 16  ;;  %v3368_v27 = vrot.slane %v3366_v44, 5 }
 0x1ec   : > { %13084 = vmatmul.mubr.bf16.gmra.mrb[12].mxu0 %v11788_v2  ;;  %v3314_v2 = vrot.slane %v3312_v47, 5  ;;  %v11793_v26 = vcombine.low %v3297_v21, %v3307_v37  ;;  %v3326_v11 = vrot.slane %v3325_v25, 4  ;;  %v3330_v47 = vrot.slane %v3328_v6, 5  ;;  %v14580_v21 = vld [vmem:[#allocation2 + $0x1c] sm:$0xf] }
 0x1ed   : > { %13087 = vmatprep.mubr.bf16.mxu0 %v11789_v55  ;;  %13116 = vmatpush3.bf16.msra.mxu0 %v14389_v9  ;;  %v3335_v9 = vrot.slane %v3333_v46, 4  ;;  %v3348_v55 = vrot.slane %v3346_v48, 4  ;;  %v3362_v28 = vrot.slane %v3360_v1, 5  ;;  %v3372_v57 = vrot.slane %v3370_v54, 4  ;;  %v14581_v1 = vld [vmem:[#allocation2 + $0x28] sm:$0xf] }
 0x1ee   : > { %13117 = vmatprep.subr.bf16.mxu0 %v14390_v0  ;;  %v3315_v36 = vor.u32 %v3314_v2, %v3311_v40  ;;  %v3354_v46 = vrot.slane %v3352_v13, 5  ;;  %v3331_v15 = vsel %vm15087_vm11, %v3326_v11, %v3330_v47  ;;  %v3376_v48 = vshll.u32 %v15835_v62, 16  ;;  %v3704_v54 = vld [vmem:[#allocation2 + $0x24] sm:$0xe] }
 0x1ef   : > { %v3339_v24 = vor.u32 %v3338_v42, %v3335_v9  ;;  %v3349_v5 = vor.u32 %v3348_v55, %v3344_v45  ;;  %v3373_v39 = vor.u32 %v3372_v57, %v3368_v27  ;;  %v3768_v40 = vrot.slane %v14578_v18, 5  ;;  %v388_v42 = vld [vmem:[#allocation2 + $0xcc] sm:$0x1] }
 0x1f0   : > { %v3316_v60 = vrot.slane %v3315_v36, 4  ;;  %v3378_v9 = vrot.slane %v3376_v48, 5  ;;  %v11805_v55 = vrot.slane %v3702_v29, 9  ;;  %v389_v62 = vsel %vm15036_vm3, 0, %v388_v42  ;;  %v14392_v29 = vld [vmem:[#allocation7 + $0x188] sm:$0xff]   ;;  %v14393_v42 = vld [vmem:[#allocation7 + $0x190] sm:$0xff]  }
 0x1f1   : > { %13118 = vmatpush3.bf16.msra.mxu0 %v14390_v0  ;;  %v3357_v0 = vshrl.u32 %v2993_v22, 16  ;;  %v3340_v34 = vrot.slane %v3339_v24, 4  ;;  %v3350_v17 = vrot.slane %v3349_v5, 4  ;;  %v3770_v22 = vrot.slane %v3768_v40, 4  ;;  %390 = vst [vmem:[#allocation2 + $0xcc] sm:$0x1] %v389_v62 }
 0x1f2   : > { %13151 = vmatprep.subr.bf16.mxu0 %v15999_v30  ;;  %v3321_v20 = vsel %vm15087_vm11, %v3316_v60, %v3320_v10  ;;  %v3775_v37 = vrot.slane %v14580_v21, 5  ;;  %v3769_v36 = vsel %vm15442_vm14, %v11805_v55, %v3768_v40  ;;  %v3782_v44 = vrot.slane %v14581_v1, 5  ;;  %v3708_v55 = vld [vmem:[#allocation2 + $0x54] sm:$0xe] }
 0x1f3   : > { %v3359_v33 = vrot.slane %v3357_v0, 4  ;;  %v3345_v12 = vsel %vm15087_vm11, %v3340_v34, %v3344_v45  ;;  %v3355_v59 = vsel %vm15087_vm11, %v3350_v17, %v3354_v46  ;;  %v11794_v2 = vcombine.low %v3321_v20, %v3331_v15  ;;  %v3703_v0 = vld [vmem:[#allocation2 + $0x18] sm:$0xe]  ;;  %v14584_v34 = vld [vmem:[#allocation2 + $0x34] sm:$0xf] }
 0x1f4   : > { %13088 = vmatmul.mubr.bf16.gmra.mrb[16].mxu0 %v11790_v32  ;;  %v11792_v32 = vcombine.low %v3273_v41, %v3283_v7  ;;  %v11795_v58 = vcombine.low %v3345_v12, %v3355_v59  ;;  %v14579_v41 = vld [vmem:[#allocation2 + $0x14] sm:$0x1]  ;;  %v11806_v13 = vrot.slane %v3703_v0, 9  ;;  %v11807_v11 = vrot.slane %v3704_v54, 9  ;;  %v3705_v15 = vld [vmem:[#allocation2 + $0x30] sm:$0xe] }
 0x1f5   : > { %13091 = vmatprep.mubr.bf16.mxu0 %v11791_v43  ;;  %v3363_v38 = vor.u32 %v3362_v28, %v3359_v33  ;;  %v3374_v43 = vrot.slane %v3373_v39, 4  ;;  %v3771_v7 = vrot.slane %v14579_v41, 5  ;;  %v3784_v47 = vrot.slane %v3782_v44, 4  ;;  %v14583_v33 = vld [vmem:[#allocation2 + $0x2c] sm:$0x1] }
 0x1f6   : > { %v3785_v28 = vrot.slane %v14583_v33, 5  ;;  %v3789_v17 = vrot.slane %v14584_v34, 5  ;;  %v3783_v46 = vsel %vm15442_vm14, %v11807_v11, %v3782_v44  ;;  %v3706_v39 = vld [vmem:[#allocation2 + $0x3c] sm:$0xe]  ;;  %v11808_v59 = vrot.slane %v3705_v15, 9  ;;  %v14401_v33 = vld [vmem:[#allocation7 + $0x1c0] sm:$0xff]  }
 0x1f7   : > { %v3364_v10 = vrot.slane %v3363_v38, 4  ;;  %v3379_v6 = vsel %vm15087_vm11, %v3374_v43, %v3378_v9  ;;  %v3772_v25 = vsel %vm15442_vm14, %v3770_v22, %v3771_v7  ;;  %v3796_v38 = vrot.slane %v15716_v61, 5  ;;  %v14396_v44 = vld [vmem:[#allocation7 + $0x1a8] sm:$0xff]   ;;  %v18456_v34 = vld [vmem:[#allocation20_spill] sm:$0xff] }
 0x1f8   : > { %v11821_v5 = vcombine.low %v3769_v36, %v3772_v25  ;;  %v3786_v20 = vsel %vm15442_vm14, %v3784_v47, %v3785_v28  ;;  %v3791_v18 = vrot.slane %v3789_v17, 4  ;;  %v3792_v40 = vrot.slane %v15707_v23, 5  ;;  %v3710_v36 = vld [vmem:[#allocation2 + $0x6c] sm:$0xe]  ;;  %v18460_v15 = vld [vmem:[#allocation23_spill] sm:$0xff] }
 0x1f9   : > { %v3369_v45 = vsel %vm15087_vm11, %v3364_v10, %v3368_v27  ;;  %v3776_v27 = vsel %vm15442_vm14, %v11806_v13, %v3775_v37  ;;  %v11823_v12 = vcombine.low %v3783_v46, %v3786_v20  ;;  %v3799_v10 = vrot.slane %v15767_v52, 5  ;;  %v14397_v13 = vld [vmem:[#allocation7 + $0x1b0] sm:$0xff]   ;;  %v18459_v20 = vld [vmem:[#allocation22_spill] sm:$0xff] }
 0x1fa   : > { %v11796_v24 = vcombine.low %v3369_v45, %v3379_v6  ;;  %v3790_v43 = vsel %vm15442_vm14, %v11808_v59, %v3789_v17  ;;  %v3793_v61 = vsel %vm15442_vm14, %v3791_v18, %v3792_v40  ;;  %v3810_v52 = vrot.slane %v15840_v16, 5  ;;  %v14394_v45 = vld [vmem:[#allocation7 + $0x198] sm:$0xff]   ;;  %v14399_v40 = vld [vmem:[#allocation2 + $0x18] sm:$0xff]  }
 0x1fb   : > { %v11824_v22 = vcombine.low %v3790_v43, %v3793_v61  ;;  %v11811_v41 = vrot.slane %v3708_v55, 9  ;;  %v3813_v62 = vrot.slane %v15896_v35, 5  ;;  %v3824_v16 = vrot.slane %v15912_v53, 5  ;;  %v18457_v17 = vld [vmem:[#allocation21_spill] sm:$0xff]  ;;  %v14402_v43 = vld [vmem:[#allocation2 + $0x30] sm:$0xff]   ;;  %v14404_v61 = vld [vmem:[#allocation7 + $0x1c8] sm:$0xff]  }
 0x1fc   : > { %13092 = vmatmul.mubr.bf16.gmra.mrb[20].mxu0 %v11792_v32  ;;  %v3777_v32 = vrot.slane %v3775_v37, 4  ;;  %v3812_v7 = vrot.slane %v3810_v52, 4  ;;  %v14395_v37 = vld [vmem:[#allocation7 + $0x1a0] sm:$0xff]   ;;  %v11813_v0 = vrot.slane %v3710_v36, 9  ;;  %v3827_v35 = vrot.slane %v15943_v51, 5 }
 0x1fd   : > { %13095 = vmatprep.mubr.bf16.mxu0 %v11793_v26  ;;  %v14582_v26 = vld [vmem:[#allocation2 + $0x20] sm:$0x1]  ;;  %v3811_v6 = vsel %vm15442_vm14, %v11811_v41, %v3810_v52  ;;  %v3826_v1 = vrot.slane %v3824_v16, 4  ;;  %v18449_v54 = vcombine.low %v15683_v63, %v15687_v8  ;;  %v3841_v63 = vrot.slane %v15962_v49, 5  ;;  %v14398_v8 = vld [vmem:[#allocation7 + $0x1b8] sm:$0xff]  }
 0x1fe   : > { %v3778_v60 = vrot.slane %v14582_v26, 5  ;;  %v3814_v21 = vsel %vm15442_vm14, %v3812_v7, %v3813_v62  ;;  %v18450_v11 = vcombine.low %v15713_v14, %v15720_v19  ;;  %v18451_v49 = vld [vmem:[#allocation17_spill] sm:$0xff]  ;;  %v18453_v14 = vld [vmem:[#allocation18_spill] sm:$0xff]  ;;  %v18454_v19 = vld [vmem:[#allocation19_spill] sm:$0xff]  ;;  %v18458_v46 = vcombine.low %v18456_v34, %v18457_v17 }
 0x1ff   : > { %v11827_v25 = vcombine.low %v3811_v6, %v3814_v21  ;;  %v3828_v53 = vsel %vm15442_vm14, %v3826_v1, %v3827_v35  ;;  %v14410_v52 = vld [vmem:[#allocation7 + $0x1d8] sm:$0xff]   ;;  %v16099_v55 = vld [vmem:[#allocation2 + $0x58] sm:$0xf]  ;;  %v14413_v62 = vld [vmem:[#allocation7 + $0x1e0] sm:$0xff]  }
 0x200   : > { %v3779_v57 = vsel %vm15442_vm14, %v3777_v32, %v3778_v60  ;;  %v3712_v32 = vld [vmem:[#allocation2 + $0x84] sm:$0xe]  ;;  %v5442_v41 = vrot.slane %v16099_v55, 5  ;;  %v14406_v21 = vld [vmem:[#allocation2 + $0x54] sm:$0xff]   ;;  %v16115_v1 = vld [vmem:[#allocation2 + $0x70] sm:$0xf] }
 0x201   : > { %v11822_v48 = vcombine.low %v3776_v27, %v3779_v57  ;;  %v11815_v26 = vrot.slane %v3712_v32, 9  ;;  %v18452_v27 = vcombine.low %v15739_v31, %v18451_v49  ;;  %v18455_v57 = vcombine.low %v18453_v14, %v18454_v19  ;;  %v16117_v35 = vld [vmem:[#allocation2 + $0x74] sm:$0x1]  ;;  %v16135_v14 = vld [vmem:[#allocation2 + $0x28] sm:$0xf] }
 0x202   : > { %v5444_v6 = vrot.slane %v5442_v41, 4  ;;  %v16137_v34 = vld [vmem:[#allocation2 + $0x88] sm:$0xf]  ;;  %v16139_v17 = vld [vmem:[#allocation2 + $0x8c] sm:$0x1] }
 0x204   : > { %13096 = vmatmul.mubr.bf16.gmra.mrb[24].mxu0 %v11794_v2  ;;  %v11809_v2 = vrot.slane %v3706_v39, 9  ;;  %v444_v39 = vld [vmem:[#allocation2 + $0xd4] sm:$0x1] }
 0x205   : > { %13099 = vmatprep.mubr.bf16.mxu0 %v11795_v58  ;;  %v3798_v58 = vrot.slane %v3796_v38, 4  ;;  %v445_v18 = vsel %vm15041_vm4, 0, %v444_v39  ;;  %v5473_v39 = vrot.slane %v16139_v17, 5 }
 0x206   : > { %v3797_v9 = vsel %vm15442_vm14, %v11809_v2, %v3796_v38  ;;  %v18461_v38 = vcombine.low %v18459_v20, %v18460_v15  ;;  %446 = vst [vmem:[#allocation2 + $0xd4] sm:$0x1] %v445_v18  ;;  %v18467_v2 = vld [vmem:[#allocation27_spill] sm:$0xff]  ;;  %v5350_v15 = vld [vmem:[#allocation2 + $0x84] sm:$0xe] }
 0x207   : > { %v3800_v23 = vsel %vm15442_vm14, %v3798_v58, %v3799_v10  ;;  %v14400_v10 = vld [vmem:[#allocation2 + $0x24] sm:$0xff]  }
 0x208   : > { %v14412_v18 = vld [vmem:[#allocation2 + $0x84] sm:$0xff]  }
 0x20c   : > { %13100 = vmatmul.mubr.bf16.gmra.mrb[28].mxu0 %v11796_v24  ;;  %v3825_v24 = vsel %vm15442_vm14, %v11813_v0, %v3824_v16  ;;  %v14418_v0 = vld [vmem:[#allocation2 + $0xb4] sm:$0xff]  }
 0x20d   : > { %13119 = vmatprep.mubr.bf16.mxu0 %v11821_v5  ;;  %v3838_v5 = vrot.slane %v15947_v56, 5  ;;  %v11829_v51 = vcombine.low %v3825_v24, %v3828_v53  ;;  %v5459_v24 = vrot.slane %v16117_v35, 5  ;;  %v14419_v53 = vld [vmem:[#allocation7 + $0x1f0] sm:$0xff]  }
 0x20f   : > { %v3840_v60 = vrot.slane %v3838_v5, 4  ;;  %v3839_v56 = vsel %vm15442_vm14, %v11815_v26, %v3838_v5  ;;  %v4587_v5 = vld [vmem:[#allocation2 + $0x18] sm:$0xf]  ;;  %v16121_v26 = vld [vmem:[#allocation2 + $0x1c] sm:$0xf] }
 0x210   : > { %v4645_v49 = vshll.u32 %v16121_v26, 16 }
 0x211   : > { %v3842_v47 = vsel %vm15442_vm14, %v3840_v60, %v3841_v63  ;;  %v14411_v63 = vld [vmem:[#allocation2 + $0x78] sm:$0xff]  }
 0x212   : > { %v11831_v28 = vcombine.low %v3839_v56, %v3842_v47  ;;  %v4590_v56 = vld [vmem:[#allocation2 + $0x24] sm:$0xf] }
 0x213   : > { %v4660_v19 = vshrl.u32 %v4590_v56, 16 }
 0x214   : > { %13120 = vmatmul.mubr.bf16.vlgmr.msra.gmra.mrb[0].mxu0 %v11822_v48  ;;  %v18462_v48 = vld [vmem:[#allocation24_spill] sm:$0xff] }
 0x215   : > { %13152 = vmatpush3.bf16.msra.mxu0 %v15999_v30  ;;  %13123 = vmatprep.mubr.bf16.mxu0 %v11823_v12  ;;  %v11825_v30 = vcombine.low %v3797_v9, %v3800_v23  ;;  %v18463_v12 = vld [vmem:[#allocation25_spill] sm:$0xff]  ;;  %v14407_v9 = vld [vmem:[#allocation7 + $0x1d0] sm:$0xff]  }
 0x216   : > { %13153 = vmatprep.subr.bf16.mxu0 %v14392_v29  ;;  %v18464_v59 = vcombine.low %v18462_v48, %v18463_v12  ;;  %v14403_v23 = vld [vmem:[#allocation2 + $0x3c] sm:$0xff]   ;;  %v4669_v48 = vshll.u32 %v16135_v14, 16  ;;  %v16144_v12 = vld [vmem:[#allocation7 + $0x200] sm:$0xff]  }
 0x219   : > { %13154 = vmatpush3.bf16.msra.mxu0 %v14392_v29  ;;  %v18466_v29 = vld [vmem:[#allocation26_spill] sm:$0xff] }
 0x21a   : > { %13155 = vmatprep.subr.bf16.mxu0 %v14393_v42  ;;  %v18468_v58 = vcombine.low %v18466_v29, %v18467_v2  ;;  %v16148_v29 = vrot.slane %v4645_v49, 5 }
 0x21c   : > { %13124 = vmatmul.mubr.bf16.gmra.mrb[4].mxu0 %v11824_v22  ;;  %v16101_v22 = vld [vmem:[#allocation2 + $0x5c] sm:$0x1] }
 0x21d   : > { %13127 = vmatprep.mubr.bf16.mxu0 %v11825_v30  ;;  %13156 = vmatpush3.bf16.msra.mxu0 %v14393_v42  ;;  %v14405_v42 = vld [vmem:[#allocation2 + $0x48] sm:$0xff]   ;;  %v5346_v30 = vld [vmem:[#allocation2 + $0x54] sm:$0xe]  ;;  %v5445_v7 = vrot.slane %v16101_v22, 5 }
 0x21e   : > { %13157 = vmatprep.subr.bf16.mxu0 %v14394_v45 }
 0x21f   : > { %v16111_v36 = vsel %vm15442_vm14, %v5444_v6, %v5445_v7  ;;  %v4673_v6 = vshrl.u32 %v16135_v14, 16 }
 0x220   : > { %18470 = vst [vmem:[#allocation18_spill] sm:$0xff] %v16111_v36  ;;  %v14421_v36 = vld [vmem:[#allocation2 + $0xcc] sm:$0xff]  }
 0x221   : > { %13158 = vmatpush3.bf16.msra.mxu0 %v14394_v45  ;;  %v11898_v45 = vrot.slane %v5346_v30, 9  ;;  %v4596_v30 = vld [vmem:[#allocation2 + $0x3c] sm:$0xf] }
 0x222   : > { %13159 = vmatprep.subr.bf16.mxu0 %v14395_v37 }
 0x223   : > { %v16107_v16 = vsel %vm15442_vm14, %v11898_v45, %v5442_v41  ;;  %v16163_v45 = vrot.slane %v4669_v48, 5  ;;  %v14415_v48 = vld [vmem:[#allocation2 + $0x9c] sm:$0xff]  }
 0x224   : > { %13128 = vmatmul.mubr.bf16.gmra.mrb[8].mxu0 %v18449_v54  ;;  %18469 = vst [vmem:[#allocation17_spill] sm:$0xff] %v16107_v16  ;;  %v5456_v54 = vrot.slane %v16115_v1, 5 }
 0x225   : > { %13131 = vmatprep.mubr.bf16.mxu0 %v11827_v25  ;;  %13160 = vmatpush3.bf16.msra.mxu0 %v14395_v37  ;;  %v14408_v37 = vld [vmem:[#allocation2 + $0x60] sm:$0xff]   ;;  %v14416_v25 = vld [vmem:[#allocation7 + $0x1e8] sm:$0xff]  }
 0x226   : > { %13161 = vmatprep.subr.bf16.mxu0 %v14396_v44  ;;  %v5458_v32 = vrot.slane %v5456_v54, 4 }
 0x228   : > { %v16129_v47 = vsel %vm15442_vm14, %v5458_v32, %v5459_v24  ;;  %v16171_v24 = vld [vmem:[#allocation2 + $0x40] sm:$0xf]  ;;  %v4711_v32 = vshll.u32 %v4596_v30, 16 }
 0x229   : > { %13162 = vmatpush3.bf16.msra.mxu0 %v14396_v44  ;;  %v5348_v44 = vld [vmem:[#allocation2 + $0x6c] sm:$0xe]  ;;  %18472 = vst [vmem:[#allocation20_spill] sm:$0xff] %v16129_v47 }
 0x22a   : > { %13163 = vmatprep.subr.bf16.mxu0 %v14397_v13 }
 0x22c   : > { %13132 = vmatmul.mubr.bf16.gmra.mrb[12].mxu0 %v18450_v11  ;;  %v4639_v11 = vshll.u32 %v4587_v5, 16 }
 0x22d   : > { %13135 = vmatprep.mubr.bf16.mxu0 %v11829_v51  ;;  %13164 = vmatpush3.bf16.msra.mxu0 %v14397_v13  ;;  %v11900_v13 = vrot.slane %v5348_v44, 9  ;;  %v14409_v51 = vld [vmem:[#allocation2 + $0x6c] sm:$0xff]  }
 0x22e   : > { %13165 = vmatprep.subr.bf16.mxu0 %v14398_v8  ;;  %v4641_v20 = vrot.slane %v4639_v11, 5 }
 0x22f   : > { %v16125_v60 = vsel %vm15442_vm14, %v11900_v13, %v5456_v54  ;;  %v4708_v13 = vshrl.u32 %v4596_v30, 16  ;;  %v4599_v30 = vld [vmem:[#allocation2 + $0x48] sm:$0xf] }
 0x230   : > { %18471 = vst [vmem:[#allocation19_spill] sm:$0xff] %v16125_v60  ;;  %v4769_v60 = vshrl.u32 %v16099_v55, 16 }
 0x231   : > { %13166 = vmatpush3.bf16.msra.mxu0 %v14398_v8  ;;  %v4636_v8 = vshrl.u32 %v4587_v5, 16 }
 0x232   : > { %13199 = vmatprep.subr.bf16.mxu0 %v14401_v33 }
 0x234   : > { %13136 = vmatmul.mubr.bf16.gmra.mrb[16].mxu0 %v18452_v27  ;;  %v4649_v27 = vshrl.u32 %v16121_v26, 16 }
 0x235   : > { %13139 = vmatprep.mubr.bf16.mxu0 %v11831_v28 }
 0x236   : > { %v4651_v2 = vrot.slane %v4649_v27, 4  ;;  %v4675_v27 = vrot.slane %v4673_v6, 4 }
 0x23c   : > { %13140 = vmatmul.mubr.bf16.gmra.mrb[20].mxu0 %v18455_v57  ;;  %v4663_v57 = vshll.u32 %v4590_v56, 16  ;;  %v5352_v56 = vld [vmem:[#allocation2 + $0x9c] sm:$0xe] }
 0x23d   : > { %13143 = vmatprep.mubr.bf16.mxu0 %v18458_v46  ;;  %v4638_v46 = vrot.slane %v4636_v8, 4 }
 0x244   : > { %13144 = vmatmul.mubr.bf16.gmra.mrb[24].mxu0 %v18461_v38  ;;  %v5470_v38 = vrot.slane %v16137_v34, 5 }
 0x245   : > { %13147 = vmatprep.mubr.bf16.mxu0 %v18464_v59  ;;  %v11902_v59 = vrot.slane %v5350_v15, 9 }
 0x24c   : > { %13148 = vmatmul.mubr.bf16.gmra.mrb[28].mxu0 %v18468_v58  ;;  %v5472_v58 = vrot.slane %v5470_v38, 4 }
 0x24d   : > { %13167 = vmatprep.mubr.bf16.mxu0 %v14399_v40  ;;  %v16146_v40 = vld [vmem:[#allocation2 + $0x20] sm:$0x1] }
 0x24e   : > { %v16158_v41 = vsel %vm15442_vm14, %v5472_v58, %v5473_v39  ;;  %v4655_v7 = vshll.u32 %v16146_v40, 16  ;;  %v4713_v58 = vrot.slane %v4711_v32, 5 }
 0x24f   : > { %18474 = vst [vmem:[#allocation22_spill] sm:$0xff] %v16158_v41 }
 0x254   : > { %13168 = vmatmul.mubr.bf16.vlgmr.msra.gmra.mrb[0].mxu0 %v14400_v10  ;;  %v4662_v10 = vrot.slane %v4660_v19, 4  ;;  %v4717_v19 = vshll.u32 %v16171_v24, 16 }
 0x255   : > { %13200 = vmatpush3.bf16.msra.mxu0 %v14401_v33  ;;  %13171 = vmatprep.mubr.bf16.mxu0 %v14402_v43  ;;  %v14422_v33 = vld [vmem:[#allocation7 + $0x1f8] sm:$0xff]   ;;  %v4665_v43 = vrot.slane %v4663_v57, 5  ;;  %v4721_v57 = vshrl.u32 %v16171_v24, 16 }
 0x256   : > { %13201 = vmatprep.subr.bf16.mxu0 %v14404_v61 }
 0x257   : > { %v4666_v5 = vor.u32 %v4665_v43, %v4662_v10  ;;  %v14417_v43 = vld [vmem:[#allocation2 + $0xa8] sm:$0xff]  }
 0x259   : > { %13202 = vmatpush3.bf16.msra.mxu0 %v14404_v61  ;;  %v4593_v61 = vld [vmem:[#allocation2 + $0x30] sm:$0xf] }
 0x25a   : > { %13203 = vmatprep.subr.bf16.mxu0 %v14407_v9 }
 0x25c   : > { %13172 = vmatmul.mubr.bf16.gmra.mrb[4].mxu0 %v14403_v23  ;;  %v16154_v23 = vsel %vm15442_vm14, %v11902_v59, %v5470_v38  ;;  %v16187_v59 = vld [vmem:[#allocation2 + $0x38] sm:$0x1] }
 0x25d   : > { %13175 = vmatprep.mubr.bf16.mxu0 %v14405_v42  ;;  %13204 = vmatpush3.bf16.msra.mxu0 %v14407_v9  ;;  %v16150_v9 = vld [vmem:[#allocation2 + $0x34] sm:$0xf]  ;;  %18473 = vst [vmem:[#allocation21_spill] sm:$0xff] %v16154_v23  ;;  %v4703_v32 = vshll.u32 %v16187_v59, 16 }
 0x25e   : > { %13205 = vmatprep.subr.bf16.mxu0 %v14410_v52  ;;  %v14414_v42 = vld [vmem:[#allocation2 + $0x90] sm:$0xff]   ;;  %v4693_v44 = vshll.u32 %v16150_v9, 16  ;;  %v4697_v54 = vshrl.u32 %v16150_v9, 16 }
 0x260   : > { %v16185_v38 = vrot.slane %v4693_v44, 5  ;;  %v4723_v44 = vrot.slane %v4721_v57, 4  ;;  %v16214_v57 = vld [vmem:[#allocation2 + $0xbc] sm:$0x1] }
 0x261   : > { %13206 = vmatpush3.bf16.msra.mxu0 %v14410_v52  ;;  %v4642_v52 = vor.u32 %v4641_v20, %v4638_v46  ;;  %v11904_v46 = vrot.slane %v5352_v56, 9 }
 0x262   : > { %13207 = vmatprep.subr.bf16.mxu0 %v14413_v62 }
 0x263   : > { %v16178_v8 = vrot.slane %v4642_v52, 4  ;;  %v16193_v52 = vrot.slane %v4666_v5, 4 }
 0x264   : > { %13176 = vmatmul.mubr.bf16.gmra.mrb[8].mxu0 %v14406_v21  ;;  %v4602_v21 = vld [vmem:[#allocation2 + $0x54] sm:$0xf] }
 0x265   : > { %13179 = vmatprep.mubr.bf16.mxu0 %v14408_v37  ;;  %13208 = vmatpush3.bf16.msra.mxu0 %v14413_v62  ;;  %v16161_v62 = vld [vmem:[#allocation2 + $0x2c] sm:$0x1]  ;;  %v4684_v37 = vshrl.u32 %v4593_v61, 16  ;;  %v4759_v47 = vshll.u32 %v4602_v21, 16 }
 0x266   : > { %13209 = vmatprep.subr.bf16.mxu0 %v14416_v25  ;;  %v4679_v11 = vshll.u32 %v16161_v62, 16 }
 0x267   : > { %v4686_v20 = vrot.slane %v4684_v37, 4  ;;  %v16199_v37 = vld [vmem:[#allocation2 + $0x44] sm:$0x1] }
 0x268   : > { %18477 = vst [vmem:[#allocation25_spill] sm:$0xff] %v16199_v37 }
 0x269   : > { %13210 = vmatpush3.bf16.msra.mxu0 %v14416_v25  ;;  %v4687_v25 = vshll.u32 %v4593_v61, 16 }
 0x26a   : > { %13211 = vmatprep.subr.bf16.mxu0 %v14419_v53 }
 0x26b   : > { %v4689_v15 = vrot.slane %v4687_v25, 5  ;;  %v16201_v25 = vrot.slane %v4717_v19, 5  ;;  %v4735_v19 = vshll.u32 %v4599_v30, 16 }
 0x26c   : > { %13180 = vmatmul.mubr.bf16.gmra.mrb[12].mxu0 %v14409_v51  ;;  %v16174_v51 = vld [vmem:[#allocation2 + $0xa0] sm:$0xf] }
 0x26d   : > { %13183 = vmatprep.mubr.bf16.mxu0 %v14411_v63  ;;  %13212 = vmatpush3.bf16.msra.mxu0 %v14419_v53  ;;  %v4652_v53 = vor.u32 %v4651_v2, %v16148_v29  ;;  %v16176_v63 = vld [vmem:[#allocation2 + $0xa4] sm:$0x1]  ;;  %v4710_v2 = vrot.slane %v4708_v13, 4  ;;  %v4690_v5 = vor.u32 %v4689_v15, %v4686_v20  ;;  %v5501_v15 = vrot.slane %v16214_v57, 5 }
 0x26e   : > { %13213 = vmatprep.subr.bf16.mxu0 %v14422_v33  ;;  %v5487_v49 = vrot.slane %v16176_v63, 5  ;;  %v16231_v13 = vrot.slane %v4703_v32, 5  ;;  %v16251_v32 = vld [vmem:[#allocation2 + $0x50] sm:$0x1] }
 0x26f   : > { %v4653_v61 = vrot.slane %v4652_v53, 4  ;;  %v4676_v53 = vor.u32 %v4675_v27, %v16163_v45  ;;  %18480 = vst [vmem:[#allocation28_spill] sm:$0xff] %v16251_v32 }
 0x271   : > { %13214 = vmatpush3.bf16.msra.mxu0 %v14422_v33  ;;  %v5484_v33 = vrot.slane %v16174_v51, 5 }
 0x272   : > { %13247 = vmatprep.subr.bf16.mxu0 %v16144_v12 }
 0x273   : > { %v5486_v39 = vrot.slane %v5484_v33, 4  ;;  %v16191_v10 = vsel %vm15442_vm14, %v11904_v46, %v5484_v33  ;;  %v4714_v33 = vor.u32 %v4713_v58, %v4710_v2  ;;  %v16212_v46 = vld [vmem:[#allocation2 + $0xb8] sm:$0xf]  ;;  %v4724_v2 = vor.u32 %v4723_v44, %v16201_v25 }
 0x274   : > { %13184 = vmatmul.mubr.bf16.gmra.mrb[16].mxu0 %v14412_v18  ;;  %v4699_v18 = vrot.slane %v4697_v54, 4  ;;  %18475 = vst [vmem:[#allocation23_spill] sm:$0xff] %v16191_v10  ;;  %v16203_v54 = vld [vmem:[#allocation2 + $0x4c] sm:$0xf]  ;;  %v5498_v20 = vrot.slane %v16212_v46, 5  ;;  %v4737_v10 = vrot.slane %v4735_v19, 5 }
 0x275   : > { %13187 = vmatprep.mubr.bf16.mxu0 %v14414_v42  ;;  %v4657_v42 = vrot.slane %v4655_v7, 5  ;;  %v16197_v6 = vsel %vm15442_vm14, %v5486_v39, %v5487_v49  ;;  %v16208_v7 = vrot.slane %v4679_v11, 5  ;;  %v4732_v49 = vshrl.u32 %v4599_v30, 16  ;;  %v5354_v11 = vld [vmem:[#allocation2 + $0xb4] sm:$0xe] }
 0x276   : > { %18476 = vst [vmem:[#allocation24_spill] sm:$0xff] %v16197_v6  ;;  %v4700_v56 = vor.u32 %v4699_v18, %v16185_v38  ;;  %v4727_v39 = vshll.u32 %v16199_v37, 16  ;;  %v4741_v27 = vshll.u32 %v16203_v54, 16  ;;  %v11906_v58 = vrot.slane %v5354_v11, 9  ;;  %v16260_v11 = vld [vmem:[#allocation2 + $0xc4] sm:$0xf] }
 0x277   : > { %v4658_v18 = vsel %vm15087_vm11, %v4653_v61, %v4657_v42  ;;  %v16229_v30 = vrot.slane %v4690_v5, 4  ;;  %v5500_v28 = vrot.slane %v5498_v20, 4  ;;  %v4734_v6 = vrot.slane %v4732_v49, 4 }
 0x278   : > { %v16233_v31 = vrot.slane %v4700_v56, 4  ;;  %v16239_v61 = vrot.slane %v4714_v33, 4  ;;  %v16241_v42 = vrot.slane %v4727_v39, 5  ;;  %v16243_v44 = vrot.slane %v4741_v27, 5  ;;  %v4605_v27 = vld [vmem:[#allocation2 + $0x60] sm:$0xf] }
 0x279   : > { %v16249_v5 = vrot.slane %v4724_v2, 4  ;;  %v4745_v56 = vshrl.u32 %v16203_v54, 16  ;;  %v4756_v49 = vshrl.u32 %v4602_v21, 16  ;;  %v4738_v2 = vor.u32 %v4737_v10, %v4734_v6 }
 0x27a   : > { %v4751_v39 = vshll.u32 %v16251_v32, 16  ;;  %v4780_v16 = vshrl.u32 %v4605_v27, 16  ;;  %v4783_v32 = vshll.u32 %v4605_v27, 16 }
 0x27b   : > { %v4747_v23 = vrot.slane %v4745_v56, 4  ;;  %v4758_v37 = vrot.slane %v4756_v49, 4  ;;  %v4608_v49 = vld [vmem:[#allocation2 + $0x6c] sm:$0xf] }
 0x27c   : > { %13188 = vmatmul.mubr.bf16.gmra.mrb[20].mxu0 %v14415_v48  ;;  %v4648_v48 = vsel %vm15087_vm11, %v16178_v8, %v16148_v29  ;;  %v16237_v29 = vsel %vm15442_vm14, %v11906_v58, %v5498_v20  ;;  %v14420_v8 = vld [vmem:[#allocation2 + $0xc0] sm:$0xff]   ;;  %v16264_v20 = vld [vmem:[#allocation2 + $0xd0] sm:$0xf]  ;;  %v5505_v58 = vrot.slane %v16260_v11, 5 }
 0x27d   : > { %13191 = vmatprep.mubr.bf16.mxu0 %v14417_v43  ;;  %v16227_v43 = vrot.slane %v4676_v53, 4  ;;  %18478 = vst [vmem:[#allocation26_spill] sm:$0xff] %v16237_v29  ;;  %v16247_v53 = vsel %vm15442_vm14, %v5500_v28, %v5501_v15  ;;  %v11869_v33 = vcombine.low %v4648_v48, %v4658_v18  ;;  %v16262_v28 = vld [vmem:[#allocation2 + $0xc8] sm:$0x1]  ;;  %v16270_v48 = vld [vmem:[#allocation2 + $0xd4] sm:$0x1]  ;;  %v4748_v27 = vor.u32 %v4747_v23, %v16243_v44 }
 0x27e   : > { %18479 = vst [vmem:[#allocation27_spill] sm:$0xff] %v16247_v53  ;;  %v5355_v18 = vld [vmem:[#allocation2 + $0xc0] sm:$0xe]  ;;  %v5508_v19 = vrot.slane %v16262_v28, 5  ;;  %v5356_v29 = vld [vmem:[#allocation2 + $0xcc] sm:$0xe]  ;;  %v4730_v23 = vsel %vm15087_vm11, %v16249_v5, %v16241_v42 }
 0x27f   : > { %v4682_v15 = vsel %vm15087_vm11, %v16227_v43, %v16208_v7  ;;  %v11907_v53 = vrot.slane %v5355_v18, 9  ;;  %v5515_v41 = vrot.slane %v16270_v48, 5  ;;  %v16277_v7 = vld [vmem:[#allocation2 + $0x64] sm:$0xf]  ;;  %v5507_v10 = vrot.slane %v5505_v58, 4 }
 0x280   : > { %v11908_v6 = vrot.slane %v5356_v29, 9  ;;  %v4765_v43 = vshll.u32 %v16099_v55, 16  ;;  %v4789_v29 = vshll.u32 %v16277_v7, 16  ;;  %v4793_v55 = vshrl.u32 %v16277_v7, 16 }
 0x281   : > { %v16287_v56 = vsel %vm15442_vm14, %v5507_v10, %v5508_v19  ;;  %v4761_v19 = vrot.slane %v4759_v47, 5  ;;  %v4720_v47 = vsel %vm15087_vm11, %v16239_v61, %v16201_v25  ;;  %v4753_v10 = vrot.slane %v4751_v39, 5 }
 0x282   : > { %v4775_v61 = vshll.u32 %v16101_v22, 16  ;;  %v4813_v42 = vshll.u32 %v16115_v1, 16  ;;  %v4817_v5 = vshrl.u32 %v16115_v1, 16  ;;  %v11872_v39 = vcombine.low %v4720_v47, %v4730_v23 }
 0x283   : > { %v4762_v25 = vor.u32 %v4761_v19, %v4758_v37  ;;  %v4611_v19 = vld [vmem:[#allocation2 + $0x78] sm:$0xf] }
 0x284   : > { %13192 = vmatmul.mubr.bf16.gmra.mrb[24].mxu0 %v14418_v0  ;;  %v5512_v0 = vrot.slane %v16264_v20, 5  ;;  %v16346_v47 = vrot.slane %v4813_v42, 5  ;;  %v4819_v23 = vrot.slane %v4817_v5, 4  ;;  %v4865_v42 = vshrl.u32 %v16137_v34, 16 }
 0x285   : > { %13195 = vmatprep.mubr.bf16.mxu0 %v14420_v8  ;;  %v16283_v8 = vsel %vm15442_vm14, %v11907_v53, %v5505_v58  ;;  %v4739_v53 = vrot.slane %v4738_v2, 4  ;;  %v4795_v2 = vrot.slane %v4793_v55, 4 }
 0x286   : > { %v5514_v18 = vrot.slane %v5512_v0, 4  ;;  %v16291_v21 = vsel %vm15442_vm14, %v11908_v6, %v5512_v0  ;;  %v4696_v0 = vsel %vm15087_vm11, %v16229_v30, %v16185_v38  ;;  %v4706_v6 = vsel %vm15087_vm11, %v16233_v31, %v16231_v13 }
 0x287   : > { %v4771_v38 = vrot.slane %v4769_v60, 4  ;;  %v4782_v30 = vrot.slane %v4780_v16, 4  ;;  %v4785_v31 = vrot.slane %v4783_v32, 5  ;;  %v16322_v13 = vrot.slane %v4789_v29, 5 }
 0x288   : > { %v16299_v58 = vsel %vm15442_vm14, %v5514_v18, %v5515_v41  ;;  %v16312_v41 = vrot.slane %v4765_v43, 5  ;;  %v460_v18 = vld [vmem:[#allocation3 + $0x18] sm:$0x1]  ;;  %v4749_v43 = vrot.slane %v4748_v27, 4  ;;  %v4804_v60 = vshrl.u32 %v4608_v49, 16 }
 0x289   : > { %18481 = vst [vmem:[#allocation29_spill] sm:$0xff] %v16299_v58  ;;  %v16327_v58 = vld [vmem:[#allocation2 + $0x68] sm:$0x1]  ;;  %v4807_v16 = vshll.u32 %v4608_v49, 16  ;;  %v18482_v32 = vsel %vm15087_vm11, %v16193_v52, %v16163_v45  ;;  %v11871_v29 = vcombine.low %v4696_v0, %v4706_v6  ;;  %v4786_v22 = vor.u32 %v4785_v31, %v4782_v30  ;;  %v16339_v49 = vld [vmem:[#allocation2 + $0x7c] sm:$0xf] }
 0x28a   : > { %v4772_v37 = vor.u32 %v4771_v38, %v16312_v41  ;;  %v4796_v55 = vor.u32 %v4795_v2, %v16322_v13  ;;  %v4799_v27 = vshll.u32 %v16327_v58, 16  ;;  %v4744_v1 = vsel %vm15087_vm11, %v4739_v53, %v16243_v44  ;;  %v4614_v38 = vld [vmem:[#allocation2 + $0x84] sm:$0xf] }
 0x28b   : > { %v4754_v45 = vsel %vm15087_vm11, %v4749_v43, %v4753_v10  ;;  %v4763_v52 = vrot.slane %v4762_v25, 4  ;;  %v4806_v0 = vrot.slane %v4804_v60, 4  ;;  %v4809_v6 = vrot.slane %v4807_v16, 5  ;;  %v14425_v25 = vld [vmem:[#allocation7 + $0x210] sm:$0xff]  }
 0x28c   : > { %13196 = vmatmul.mubr.bf16.gmra.mrb[28].mxu0 %v14421_v36  ;;  %v461_v36 = vsel %vm15036_vm3, 0, %v460_v18  ;;  %v14424_v18 = vld [vmem:[#allocation7 + $0x208] sm:$0xff]   ;;  %v4828_v30 = vshrl.u32 %v4611_v19, 16  ;;  %v4831_v31 = vshll.u32 %v4611_v19, 16  ;;  %v4837_v2 = vshll.u32 %v16339_v49, 16 }
 0x28d   : > { %13215 = vmatprep.mubr.bf16.mxu0 %v11869_v33  ;;  %462 = vst [vmem:[#allocation3 + $0x18] sm:$0x1] %v461_v36  ;;  %v11870_v33 = vcombine.low %v18482_v32, %v4682_v15  ;;  %v4777_v15 = vrot.slane %v4775_v61, 5  ;;  %v4841_v36 = vshrl.u32 %v16339_v49, 16  ;;  %v4773_v44 = vrot.slane %v4772_v37, 4 }
 0x28e   : > { %v4787_v53 = vrot.slane %v4786_v22, 4  ;;  %v4797_v10 = vrot.slane %v4796_v55, 4  ;;  %v4801_v43 = vrot.slane %v4799_v27, 5  ;;  %v4852_v61 = vshrl.u32 %v4614_v38, 16 }
 0x28f   : > { %v4855_v60 = vshll.u32 %v4614_v38, 16  ;;  %v4861_v16 = vshll.u32 %v16137_v34, 16  ;;  %v11873_v5 = vcombine.low %v4744_v1, %v4754_v45  ;;  %v4810_v32 = vor.u32 %v4809_v6, %v4806_v0  ;;  %v14426_v45 = vld [vmem:[#allocation7 + $0x218] sm:$0xff]   ;;  %v4617_v0 = vld [vmem:[#allocation2 + $0x90] sm:$0xf] }
 0x290   : > { %v4823_v19 = vshll.u32 %v16117_v35, 16  ;;  %v4833_v37 = vrot.slane %v4831_v31, 5  ;;  %v16357_v22 = vrot.slane %v4837_v2, 5  ;;  %v4843_v55 = vrot.slane %v4841_v36, 4 }
 0x291   : > { %v4768_v27 = vsel %vm15087_vm11, %v4763_v52, %v16312_v41  ;;  %v4778_v34 = vsel %vm15087_vm11, %v4773_v44, %v4777_v15  ;;  %v4792_v1 = vsel %vm15087_vm11, %v4787_v53, %v16322_v13  ;;  %v4802_v35 = vsel %vm15087_vm11, %v4797_v10, %v4801_v43 }
 0x292   : > { %v4854_v6 = vrot.slane %v4852_v61, 4  ;;  %v4867_v38 = vrot.slane %v4865_v42, 4  ;;  %v16373_v41 = vrot.slane %v4810_v32, 4  ;;  %v16377_v15 = vrot.slane %v4823_v19, 5  ;;  %v14427_v42 = vld [vmem:[#allocation7 + $0x220] sm:$0xff]  }
 0x293   : > { %v4844_v2 = vor.u32 %v4843_v55, %v16357_v22  ;;  %v4876_v36 = vshrl.u32 %v4617_v0, 16  ;;  %v4879_v44 = vshll.u32 %v4617_v0, 16  ;;  %v11874_v43 = vcombine.low %v4768_v27, %v4778_v34  ;;  %v16393_v19 = vld [vmem:[#allocation2 + $0x98] sm:$0x1]  ;;  %v4623_v27 = vld [vmem:[#allocation2 + $0xa8] sm:$0xf] }
 0x294   : > { %13216 = vmatmul.mubr.bf16.vlgmr.msra.gmra.mrb[0].mxu0 %v11870_v33  ;;  %v4820_v33 = vor.u32 %v4819_v23, %v16346_v47  ;;  %v4857_v23 = vrot.slane %v4855_v60, 5  ;;  %v11875_v32 = vcombine.low %v4792_v1, %v4802_v35 }
 0x295   : > { %13248 = vmatpush3.bf16.msra.mxu0 %v16144_v12  ;;  %13219 = vmatprep.mubr.bf16.mxu0 %v11871_v29  ;;  %v16355_v12 = vld [vmem:[#allocation2 + $0x80] sm:$0x1]  ;;  %v4830_v29 = vrot.slane %v4828_v30, 4  ;;  %v16371_v30 = vld [vmem:[#allocation2 + $0x94] sm:$0xf]  ;;  %v4878_v55 = vrot.slane %v4876_v36, 4 }
 0x296   : > { %13249 = vmatprep.subr.bf16.mxu0 %v14424_v18  ;;  %v16375_v52 = vrot.slane %v4820_v33, 4  ;;  %v4847_v13 = vshll.u32 %v16355_v12, 16  ;;  %v4885_v53 = vshll.u32 %v16371_v30, 16  ;;  %v4889_v10 = vshrl.u32 %v16371_v30, 16 }
 0x297   : > { %v4834_v31 = vor.u32 %v4833_v37, %v4830_v29  ;;  %v4858_v61 = vor.u32 %v4857_v23, %v4854_v6  ;;  %v4845_v37 = vrot.slane %v4844_v2, 4 }
 0x298   : > { %v4849_v33 = vrot.slane %v4847_v13, 5  ;;  %v16395_v34 = vrot.slane %v4885_v53, 5  ;;  %v4891_v1 = vrot.slane %v4889_v10, 4  ;;  %v4913_v13 = vshrl.u32 %v16174_v51, 16 }
 0x299   : > { %13250 = vmatpush3.bf16.msra.mxu0 %v14424_v18  ;;  %v16369_v18 = vrot.slane %v4861_v16, 5  ;;  %v4871_v16 = vshll.u32 %v16139_v17, 16  ;;  %v4835_v29 = vrot.slane %v4834_v31, 4  ;;  %v4881_v17 = vrot.slane %v4879_v44, 5 }
 0x29a   : > { %13251 = vmatprep.subr.bf16.mxu0 %v14425_v25  ;;  %v4859_v6 = vrot.slane %v4858_v61, 4  ;;  %v4924_v31 = vshrl.u32 %v4623_v27, 16  ;;  %v4850_v36 = vsel %vm15087_vm11, %v4845_v37, %v4849_v33  ;;  %v4892_v61 = vor.u32 %v4891_v1, %v16395_v34 }
 0x29b   : > { %v4868_v60 = vor.u32 %v4867_v38, %v16369_v18  ;;  %v4873_v38 = vrot.slane %v4871_v16, 5  ;;  %v4840_v2 = vsel %vm15087_vm11, %v4835_v29, %v16357_v22  ;;  %v4882_v10 = vor.u32 %v4881_v17, %v4878_v55  ;;  %v16417_v17 = vld [vmem:[#allocation2 + $0xb0] sm:$0x1] }
 0x29c   : > { %13220 = vmatmul.mubr.bf16.gmra.mrb[4].mxu0 %v11872_v39  ;;  %v4620_v39 = vld [vmem:[#allocation2 + $0x9c] sm:$0xf]  ;;  %v4915_v29 = vrot.slane %v4913_v13, 4  ;;  %v11877_v55 = vcombine.low %v4840_v2, %v4850_v36  ;;  %v4957_v36 = vshll.u32 %v16212_v46, 16 }
 0x29d   : > { %13223 = vmatprep.mubr.bf16.mxu0 %v11873_v5  ;;  %13252 = vmatpush3.bf16.msra.mxu0 %v14425_v25  ;;  %v4816_v5 = vsel %vm15087_vm11, %v16373_v41, %v16346_v47  ;;  %v4826_v25 = vsel %vm15087_vm11, %v16375_v52, %v16377_v15  ;;  %v4900_v35 = vshrl.u32 %v4620_v39, 16  ;;  %v4903_v0 = vshll.u32 %v4620_v39, 16  ;;  %v16397_v47 = vld [vmem:[#allocation2 + $0xac] sm:$0xf]  ;;  %v14428_v52 = vld [vmem:[#allocation7 + $0x228] sm:$0xff]   ;;  %v14429_v39 = vld [vmem:[#allocation7 + $0x230] sm:$0xff]  }
 0x29e   : > { %13253 = vmatprep.subr.bf16.mxu0 %v14426_v45  ;;  %v4869_v23 = vrot.slane %v4868_v60, 4  ;;  %v4895_v41 = vshll.u32 %v16393_v19, 16  ;;  %v4909_v15 = vshll.u32 %v16174_v51, 16  ;;  %v4933_v44 = vshll.u32 %v16397_v47, 16 }
 0x29f   : > { %v4937_v53 = vshrl.u32 %v16397_v47, 16  ;;  %v4902_v51 = vrot.slane %v4900_v35, 4  ;;  %v4905_v60 = vrot.slane %v4903_v0, 5  ;;  %v11876_v37 = vcombine.low %v4816_v5, %v4826_v25  ;;  %v4626_v35 = vld [vmem:[#allocation2 + $0xb4] sm:$0xf] }
 0x2a0   : > { %v4874_v22 = vsel %vm15087_vm11, %v4869_v23, %v4873_v38  ;;  %v4897_v16 = vrot.slane %v4895_v41, 5  ;;  %v16415_v33 = vrot.slane %v4909_v15, 5  ;;  %v4893_v0 = vrot.slane %v4892_v61, 4  ;;  %v14430_v41 = vld [vmem:[#allocation7 + $0x238] sm:$0xff]  }
 0x2a1   : > { %13254 = vmatpush3.bf16.msra.mxu0 %v14426_v45  ;;  %v4927_v45 = vshll.u32 %v4623_v27, 16  ;;  %v16419_v27 = vrot.slane %v4933_v44, 5  ;;  %v4939_v1 = vrot.slane %v4937_v53, 4  ;;  %v4919_v23 = vshll.u32 %v16176_v63, 16 }
 0x2a2   : > { %13255 = vmatprep.subr.bf16.mxu0 %v14427_v42  ;;  %v4916_v15 = vor.u32 %v4915_v29, %v16415_v33  ;;  %v4943_v5 = vshll.u32 %v16417_v17, 16  ;;  %v4948_v25 = vshrl.u32 %v4626_v35, 16  ;;  %v4951_v2 = vshll.u32 %v4626_v35, 16 }
 0x2a3   : > { %v4961_v44 = vshrl.u32 %v16212_v46, 16 }
 0x2a4   : > { %13224 = vmatmul.mubr.bf16.gmra.mrb[8].mxu0 %v11874_v43  ;;  %v4864_v43 = vsel %vm15087_vm11, %v4859_v6, %v16369_v18  ;;  %v4883_v18 = vrot.slane %v4882_v10, 4  ;;  %v4906_v6 = vor.u32 %v4905_v60, %v4902_v51  ;;  %v4921_v10 = vrot.slane %v4919_v23, 5 }
 0x2a5   : > { %13227 = vmatprep.mubr.bf16.mxu0 %v11875_v32  ;;  %13256 = vmatpush3.bf16.msra.mxu0 %v14427_v42  ;;  %v4926_v32 = vrot.slane %v4924_v31, 4  ;;  %v4929_v42 = vrot.slane %v4927_v45, 5  ;;  %v11878_v38 = vcombine.low %v4864_v43, %v4874_v22  ;;  %v4629_v31 = vld [vmem:[#allocation2 + $0xc0] sm:$0xf]  ;;  %v4940_v45 = vor.u32 %v4939_v1, %v16419_v27 }
 0x2a6   : > { %13257 = vmatprep.subr.bf16.mxu0 %v14428_v52  ;;  %v4888_v63 = vsel %vm15087_vm11, %v4883_v18, %v16395_v34  ;;  %v4907_v53 = vrot.slane %v4906_v6, 4  ;;  %v4972_v61 = vshrl.u32 %v4629_v31, 16  ;;  %v4975_v51 = vshll.u32 %v4629_v31, 16 }
 0x2a7   : > { %v4930_v13 = vor.u32 %v4929_v42, %v4926_v32  ;;  %v4981_v60 = vshll.u32 %v16260_v11, 16  ;;  %v4985_v43 = vshrl.u32 %v16260_v11, 16  ;;  %v4917_v22 = vrot.slane %v4916_v15, 4 }
 0x2a8   : > { %v4945_v29 = vrot.slane %v4943_v5, 5  ;;  %v4950_v32 = vrot.slane %v4948_v25, 4  ;;  %v4941_v42 = vrot.slane %v4940_v45, 4  ;;  %v4959_v34 = vrot.slane %v4957_v36, 5 }
 0x2a9   : > { %13258 = vmatpush3.bf16.msra.mxu0 %v14428_v52  ;;  %v4898_v52 = vsel %vm15087_vm11, %v4893_v0, %v4897_v16  ;;  %v4931_v46 = vrot.slane %v4930_v13, 4  ;;  %v4974_v16 = vrot.slane %v4972_v61, 4  ;;  %v4977_v35 = vrot.slane %v4975_v51, 5  ;;  %v4632_v0 = vld [vmem:[#allocation2 + $0xcc] sm:$0xf] }
 0x2aa   : > { %13259 = vmatprep.subr.bf16.mxu0 %v14429_v39  ;;  %v11879_v1 = vcombine.low %v4888_v63, %v4898_v52  ;;  %v4987_v18 = vrot.slane %v4985_v43, 4  ;;  %v4912_v11 = vsel %vm15087_vm11, %v4907_v53, %v16415_v33  ;;  %v4922_v6 = vsel %vm15087_vm11, %v4917_v22, %v4921_v10 }
 0x2ab   : > { %v4967_v23 = vshll.u32 %v16214_v57, 16  ;;  %v4936_v15 = vsel %vm15087_vm11, %v4931_v46, %v16419_v27  ;;  %v4996_v25 = vshrl.u32 %v4632_v0, 16  ;;  %v4999_v31 = vshll.u32 %v4632_v0, 16 }
 0x2ac   : > { %13228 = vmatmul.mubr.bf16.gmra.mrb[12].mxu0 %v11876_v37  ;;  %v4953_v37 = vrot.slane %v4951_v2, 5  ;;  %v5005_v33 = vshll.u32 %v16264_v20, 16  ;;  %v5009_v45 = vshrl.u32 %v16264_v20, 16  ;;  %v4978_v2 = vor.u32 %v4977_v35, %v4974_v16 }
 0x2ad   : > { %13231 = vmatprep.mubr.bf16.mxu0 %v11877_v55  ;;  %13260 = vmatpush3.bf16.msra.mxu0 %v14429_v39  ;;  %v4963_v55 = vrot.slane %v4961_v44, 4  ;;  %v4983_v39 = vrot.slane %v4981_v60, 5  ;;  %v4991_v57 = vshll.u32 %v16262_v28, 16  ;;  %v4969_v52 = vrot.slane %v4967_v23, 5 }
 0x2ae   : > { %13261 = vmatprep.subr.bf16.mxu0 %v14430_v41  ;;  %v4954_v13 = vor.u32 %v4953_v37, %v4950_v32  ;;  %v4998_v53 = vrot.slane %v4996_v25, 4  ;;  %v5001_v10 = vrot.slane %v4999_v31, 5  ;;  %v5007_v61 = vrot.slane %v5005_v33, 5 }
 0x2af   : > { %v4964_v5 = vor.u32 %v4963_v55, %v4959_v34  ;;  %v4988_v36 = vor.u32 %v4987_v18, %v4983_v39  ;;  %v5011_v51 = vrot.slane %v5009_v45, 4  ;;  %v4979_v60 = vrot.slane %v4978_v2, 4 }
 0x2b0   : > { %v4955_v63 = vrot.slane %v4954_v13, 4  ;;  %v4993_v22 = vrot.slane %v4991_v57, 5  ;;  %v5002_v46 = vor.u32 %v5001_v10, %v4998_v53  ;;  %v5015_v32 = vshll.u32 %v16270_v48, 16  ;;  %v5342_v13 = vld [vmem:[#allocation2 + $0x24] sm:$0xe] }
 0x2b1   : > { %13262 = vmatpush3.bf16.msra.mxu0 %v14430_v41  ;;  %v4946_v41 = vsel %vm15087_vm11, %v4941_v42, %v4945_v29  ;;  %v4965_v27 = vrot.slane %v4964_v5, 4  ;;  %v4989_v43 = vrot.slane %v4988_v36, 4  ;;  %v5012_v29 = vor.u32 %v5011_v51, %v5007_v61 }
 0x2b2   : > { %v11881_v44 = vcombine.low %v4936_v15, %v4946_v41  ;;  %v4960_v20 = vsel %vm15087_vm11, %v4955_v63, %v4959_v34  ;;  %v4984_v42 = vsel %vm15087_vm11, %v4979_v60, %v4983_v39  ;;  %v5407_v55 = vrot.slane %v16121_v26, 5  ;;  %v18483_v60 = vld [vmem:[#allocation25_spill] sm:$0xff] }
 0x2b3   : > { %v4970_v28 = vsel %vm15087_vm11, %v4965_v27, %v4969_v52  ;;  %v4994_v37 = vsel %vm15087_vm11, %v4989_v43, %v4993_v22  ;;  %v5003_v34 = vrot.slane %v5002_v46, 4  ;;  %v5013_v18 = vrot.slane %v5012_v29, 4  ;;  %v5344_v27 = vld [vmem:[#allocation2 + $0x3c] sm:$0xe] }
 0x2b4   : > { %13232 = vmatmul.mubr.bf16.gmra.mrb[16].mxu0 %v11878_v38  ;;  %v11880_v38 = vcombine.low %v4912_v11, %v4922_v6  ;;  %v11882_v16 = vcombine.low %v4960_v20, %v4970_v28  ;;  %v11883_v35 = vcombine.low %v4984_v42, %v4994_v37  ;;  %v5017_v0 = vrot.slane %v5015_v32, 5  ;;  %v18484_v28 = vld [vmem:[#allocation28_spill] sm:$0xff] }
 0x2b5   : > { %13235 = vmatprep.mubr.bf16.mxu0 %v11879_v1  ;;  %v5341_v1 = vld [vmem:[#allocation2 + $0x18] sm:$0xe]  ;;  %v5409_v6 = vrot.slane %v5407_v55, 4  ;;  %v5410_v23 = vrot.slane %v16146_v40, 5  ;;  %v5008_v48 = vsel %vm15087_vm11, %v5003_v34, %v5007_v61  ;;  %v5414_v26 = vrot.slane %v16135_v14, 5 }
 0x2b6   : > { %v11893_v11 = vrot.slane %v5341_v1, 9  ;;  %v5018_v39 = vsel %vm15087_vm11, %v5013_v18, %v5017_v0  ;;  %v5421_v5 = vrot.slane %v16150_v9, 5  ;;  %v5343_v40 = vld [vmem:[#allocation2 + $0x30] sm:$0xe]  ;;  %v11894_v33 = vrot.slane %v5342_v13, 9 }
 0x2b7   : > { %v5411_v41 = vsel %vm15442_vm14, %v5409_v6, %v5410_v23  ;;  %v11884_v25 = vcombine.low %v5008_v48, %v5018_v39  ;;  %v5416_v45 = vrot.slane %v5414_v26, 4  ;;  %v5417_v2 = vrot.slane %v16161_v62, 5  ;;  %v5347_v37 = vld [vmem:[#allocation2 + $0x60] sm:$0xe]  ;;  %v5349_v6 = vld [vmem:[#allocation2 + $0x78] sm:$0xe] }
 0x2b8   : > { %v5408_v15 = vsel %vm15442_vm14, %v11893_v11, %v5407_v55  ;;  %v11895_v36 = vrot.slane %v5343_v40, 9  ;;  %v5423_v57 = vrot.slane %v5421_v5, 4  ;;  %v5424_v14 = vrot.slane %v16187_v59, 5  ;;  %v5345_v59 = vld [vmem:[#allocation2 + $0x48] sm:$0xe] }
 0x2b9   : > { %v11909_v31 = vcombine.low %v5408_v15, %v5411_v41  ;;  %v5428_v9 = vrot.slane %v16171_v24, 5  ;;  %v5435_v52 = vrot.slane %v16203_v54, 5  ;;  %v11896_v61 = vrot.slane %v5344_v27, 9  ;;  %v18486_v15 = vld [vmem:[#allocation18_spill] sm:$0xff] }
 0x2ba   : > { %v5422_v63 = vsel %vm15442_vm14, %v11895_v36, %v5421_v5  ;;  %v5425_v62 = vsel %vm15442_vm14, %v5423_v57, %v5424_v14  ;;  %v5431_v43 = vrot.slane %v18483_v60, 5  ;;  %v11897_v22 = vrot.slane %v5345_v59, 9  ;;  %v18498_v60 = vld [vmem:[#allocation27_spill] sm:$0xff] }
 0x2bb   : > { %v11911_v10 = vcombine.low %v5422_v63, %v5425_v62  ;;  %v5430_v51 = vrot.slane %v5428_v9, 4  ;;  %v5437_v20 = vrot.slane %v5435_v52, 4  ;;  %v5438_v24 = vrot.slane %v18484_v28, 5  ;;  %v18492_v62 = vld [vmem:[#allocation22_spill] sm:$0xff] }
 0x2bc   : > { %13236 = vmatmul.mubr.bf16.gmra.mrb[20].mxu0 %v11880_v38  ;;  %v5415_v38 = vsel %vm15442_vm14, %v11894_v33, %v5414_v26  ;;  %v5429_v46 = vsel %vm15442_vm14, %v11896_v61, %v5428_v9  ;;  %v5436_v54 = vsel %vm15442_vm14, %v11897_v22, %v5435_v52  ;;  %v5449_v42 = vrot.slane %v16277_v7, 5  ;;  %v18485_v26 = vld [vmem:[#allocation17_spill] sm:$0xff]  ;;  %v14431_v28 = vld [vmem:[#allocation9 + $0x40] sm:$0xff]  }
 0x2bd   : > { %13239 = vmatprep.mubr.bf16.mxu0 %v11881_v44  ;;  %v5418_v44 = vsel %vm15442_vm14, %v5416_v45, %v5417_v2  ;;  %v5432_v29 = vsel %vm15442_vm14, %v5430_v51, %v5431_v43  ;;  %v5439_v32 = vsel %vm15442_vm14, %v5437_v20, %v5438_v24  ;;  %v5452_v34 = vrot.slane %v16327_v58, 5  ;;  %v18489_v45 = vld [vmem:[#allocation20_spill] sm:$0xff]  ;;  %v18497_v51 = vld [vmem:[#allocation26_spill] sm:$0xff]  ;;  %v18501_v22 = vld [vmem:[#allocation29_spill] sm:$0xff]  ;;  %13295 = vmatprep.subr.bf16.mxu1 %v14431_v28 }
 0x2be   : > { %v11910_v53 = vcombine.low %v5415_v38, %v5418_v44  ;;  %v11912_v55 = vcombine.low %v5429_v46, %v5432_v29  ;;  %v11913_v1 = vcombine.low %v5436_v54, %v5439_v32  ;;  %v5463_v11 = vrot.slane %v16339_v49, 5  ;;  %v5351_v49 = vld [vmem:[#allocation2 + $0x90] sm:$0xe]  ;;  %v457_v24 = vld [vmem:[#allocation3 + $0xc] sm:$0x1]  ;;  %13296 = vmatpush3.bf16.msra.mxu1 %v14431_v28 }
 0x2bf   : > { %v11901_v7 = vrot.slane %v5349_v6, 9  ;;  %v5466_v39 = vrot.slane %v16355_v12, 5  ;;  %v18487_v41 = vcombine.low %v18485_v26, %v18486_v15  ;;  %v5477_v5 = vrot.slane %v16371_v30, 5  ;;  %v18488_v12 = vld [vmem:[#allocation19_spill] sm:$0xff]  ;;  %v5353_v30 = vld [vmem:[#allocation2 + $0xa8] sm:$0xe] }
 0x2c0   : > { %v5465_v48 = vrot.slane %v5463_v11, 4  ;;  %v5480_v33 = vrot.slane %v16393_v19, 5  ;;  %v18490_v2 = vcombine.low %v18488_v12, %v18489_v45  ;;  %v5491_v14 = vrot.slane %v16397_v47, 5  ;;  %v18491_v19 = vld [vmem:[#allocation21_spill] sm:$0xff]  ;;  %v18495_v47 = vld [vmem:[#allocation24_spill] sm:$0xff]  ;;  %v14435_v6 = vld [vmem:[#allocation9 + $0x60] sm:$0xff]  }
 0x2c1   : > { %v5464_v58 = vsel %vm15442_vm14, %v11901_v7, %v5463_v11  ;;  %v11905_v44 = vrot.slane %v5353_v30, 9  ;;  %v5494_v63 = vrot.slane %v16417_v17, 5  ;;  %v18493_v27 = vcombine.low %v18491_v19, %v18492_v62  ;;  %v514_v29 = vld [vmem:[#allocation3 + $0x20] sm:$0x1]  ;;  %v475_v12 = vld [vmem:[#allocation3 + $0x54] sm:$0x1] }
 0x2c2   : > { %v5467_v13 = vsel %vm15442_vm14, %v5465_v48, %v5466_v39  ;;  %v5493_v9 = vrot.slane %v5491_v14, 4  ;;  %v18499_v17 = vcombine.low %v18497_v51, %v18498_v60  ;;  %v18500_v43 = vcombine.low %v16283_v8, %v16287_v56  ;;  %v466_v56 = vld [vmem:[#allocation3 + $0x30] sm:$0x1]  ;;  %v454_v7 = vld [vmem:[#allocation3] sm:$0x1]  ;;  %v14437_v45 = vld [vmem:[#allocation9 + $0x70] sm:$0xff]  }
 0x2c3   : > { %v11917_v40 = vcombine.low %v5464_v58, %v5467_v13  ;;  %v5492_v52 = vsel %vm15442_vm14, %v11905_v44, %v5491_v14  ;;  %v18502_v20 = vcombine.low %v16291_v21, %v18501_v22  ;;  %v458_v46 = vsel %vm15036_vm3, 0, %v457_v24  ;;  %v469_v39 = vld [vmem:[#allocation3 + $0x3c] sm:$0x1]  ;;  %v523_v13 = vld [vmem:[#allocation3 + $0x44] sm:$0x1] }
 0x2c4   : > { %13240 = vmatmul.mubr.bf16.gmra.mrb[24].mxu0 %v11882_v16  ;;  %v11899_v16 = vrot.slane %v5347_v37, 9  ;;  %v5495_v59 = vsel %vm15442_vm14, %v5493_v9, %v5494_v63  ;;  %459 = vst [vmem:[#allocation3 + $0xc] sm:$0x1] %v458_v46  ;;  %v515_v32 = vsel %vm15041_vm4, 0, %v514_v29  ;;  %v467_v21 = vsel %vm15036_vm3, 0, %v466_v56 }
 0x2c5   : > { %13243 = vmatprep.mubr.bf16.mxu0 %v11883_v35  ;;  %v5451_v35 = vrot.slane %v5449_v42, 4  ;;  %516 = vst [vmem:[#allocation3 + $0x20] sm:$0x1] %v515_v32  ;;  %v463_v37 = vld [vmem:[#allocation3 + $0x24] sm:$0x1]  ;;  %v455_v26 = vsel %vm15036_vm3, 0, %v454_v7 }
 0x2c6   : > { %v5450_v18 = vsel %vm15442_vm14, %v11899_v16, %v5449_v42  ;;  %v511_v42 = vld [vmem:[#allocation3 + $0x14] sm:$0x1]  ;;  %468 = vst [vmem:[#allocation3 + $0x30] sm:$0x1] %v467_v21  ;;  %v470_v15 = vsel %vm15036_vm3, 0, %v469_v39 }
 0x2c7   : > { %v5453_v0 = vsel %vm15442_vm14, %v5451_v35, %v5452_v34  ;;  %v512_v8 = vsel %vm15041_vm4, 0, %v511_v42  ;;  %v14432_v35 = vld [vmem:[#allocation9 + $0x48] sm:$0xff]   ;;  %v14433_v34 = vld [vmem:[#allocation9 + $0x50] sm:$0xff]   ;;  %456 = vst [vmem:[#allocation3] sm:$0x1] %v455_v26 }
 0x2c8   : > { %v11915_v23 = vcombine.low %v5450_v18, %v5453_v0  ;;  %513 = vst [vmem:[#allocation3 + $0x14] sm:$0x1] %v512_v8  ;;  %13297 = vmatprep.subr.bf16.mxu1 %v14432_v35  ;;  %v517_v18 = vld [vmem:[#allocation3 + $0x2c] sm:$0x1]  ;;  %v14434_v0 = vld [vmem:[#allocation9 + $0x58] sm:$0xff]  }
 0x2c9   : > { %13298 = vmatpush3.bf16.msra.mxu1 %v14432_v35  ;;  %v518_v11 = vsel %vm15041_vm4, 0, %v517_v18  ;;  %471 = vst [vmem:[#allocation3 + $0x3c] sm:$0x1] %v470_v15  ;;  %v6479_v30 = vld [vmem:[#allocation3 + $0x4] sm:$0xf] }
 0x2ca   : > { %13299 = vmatprep.subr.bf16.mxu1 %v14433_v34  ;;  %519 = vst [vmem:[#allocation3 + $0x2c] sm:$0x1] %v518_v11  ;;  %v529_v9 = vld [vmem:[#allocation3 + $0x5c] sm:$0x1]  ;;  %v6552_v19 = vshll.u32 %v6479_v30, 16  ;;  %v6556_v62 = vshrl.u32 %v6479_v30, 16 }
 0x2cb   : > { %v481_v28 = vld [vmem:[#allocation3 + $0x6c] sm:$0x1]  ;;  %v538_v29 = vld [vmem:[#allocation3 + $0x80] sm:$0x1]  ;;  %v535_v21 = vld [vmem:[#allocation3 + $0x74] sm:$0x1] }
 0x2cc   : > { %13244 = vmatmul.mubr.bf16.gmra.mrb[28].mxu0 %v11884_v25  ;;  %v11903_v25 = vrot.slane %v5351_v49, 9  ;;  %v508_v49 = vld [vmem:[#allocation3 + $0x8] sm:$0x1]  ;;  %v482_v46 = vsel %vm15036_vm3, 0, %v481_v28  ;;  %v539_v42 = vsel %vm15041_vm4, 0, %v538_v29 }
 0x2cd   : > { %13263 = vmatprep.mubr.bf16.mxu0 %v11909_v31  ;;  %v5479_v31 = vrot.slane %v5477_v5, 4  ;;  %13300 = vmatpush3.bf16.msra.mxu1 %v14433_v34  ;;  %483 = vst [vmem:[#allocation3 + $0x6c] sm:$0x1] %v482_v46  ;;  %540 = vst [vmem:[#allocation3 + $0x80] sm:$0x1] %v539_v42 }
 0x2ce   : > { %v5478_v36 = vsel %vm15442_vm14, %v11903_v25, %v5477_v5  ;;  %13301 = vmatprep.subr.bf16.mxu1 %v14434_v0  ;;  %v524_v5 = vsel %vm15041_vm4, 0, %v523_v13  ;;  %v509_v25 = vsel %vm15041_vm4, 0, %v508_v49  ;;  %v6478_v14 = vld [vmem:[#allocation3] sm:$0xf]  ;;  %v487_v35 = vld [vmem:[#allocation3 + $0x84] sm:$0x1] }
 0x2cf   : > { %v5481_v57 = vsel %vm15442_vm14, %v5479_v31, %v5480_v33  ;;  %525 = vst [vmem:[#allocation3 + $0x44] sm:$0x1] %v524_v5  ;;  %510 = vst [vmem:[#allocation3 + $0x8] sm:$0x1] %v509_v25  ;;  %v478_v31 = vld [vmem:[#allocation3 + $0x60] sm:$0x1] }
 0x2d0   : > { %v11919_v38 = vcombine.low %v5478_v36, %v5481_v57  ;;  %v479_v33 = vsel %vm15036_vm3, 0, %v478_v31  ;;  %v532_v36 = vld [vmem:[#allocation3 + $0x68] sm:$0x1]  ;;  %v6546_v44 = vshll.u32 %v6478_v14, 16  ;;  %v544_v34 = vld [vmem:[#allocation3 + $0x98] sm:$0x1] }
 0x2d1   : > { %13302 = vmatpush3.bf16.msra.mxu1 %v14434_v0  ;;  %480 = vst [vmem:[#allocation3 + $0x60] sm:$0x1] %v479_v33  ;;  %v533_v57 = vsel %vm15041_vm4, 0, %v532_v36  ;;  %v488_v18 = vsel %vm15036_vm3, 0, %v487_v35  ;;  %v545_v0 = vsel %vm15041_vm4, 0, %v544_v34 }
 0x2d2   : > { %13303 = vmatprep.subr.bf16.mxu1 %v14435_v6  ;;  %534 = vst [vmem:[#allocation3 + $0x68] sm:$0x1] %v533_v57  ;;  %v541_v11 = vld [vmem:[#allocation3 + $0x8c] sm:$0x1]  ;;  %489 = vst [vmem:[#allocation3 + $0x84] sm:$0x1] %v488_v18 }
 0x2d3   : > { %546 = vst [vmem:[#allocation3 + $0x98] sm:$0x1] %v545_v0  ;;  %v550_v26 = vld [vmem:[#allocation3 + $0xb0] sm:$0x1]  ;;  %v547_v15 = vld [vmem:[#allocation3 + $0xa4] sm:$0x1] }
 0x2d4   : > { %13264 = vmatmul.mubr.bf16.vlgmr.msra.gmra.mrb[0].mxu0 %v11910_v53  ;;  %v11921_v53 = vcombine.low %v5492_v52, %v5495_v59  ;;  %v6548_v59 = vrot.slane %v6546_v44, 5  ;;  %v502_v13 = vld [vmem:[#allocation3 + $0xc0] sm:$0x1]  ;;  %v499_v49 = vld [vmem:[#allocation3 + $0xb4] sm:$0x1] }
 0x2d5   : > { %13267 = vmatprep.mubr.bf16.mxu0 %v11911_v10  ;;  %v18494_v10 = vld [vmem:[#allocation23_spill] sm:$0xff]  ;;  %13304 = vmatpush3.bf16.msra.mxu1 %v14435_v6  ;;  %v542_v6 = vsel %vm15041_vm4, 0, %v541_v11  ;;  %v503_v5 = vsel %vm15036_vm3, 0, %v502_v13  ;;  %v500_v25 = vsel %vm15036_vm3, 0, %v499_v49  ;;  %v553_v33 = vld [vmem:[#allocation3 + $0xbc] sm:$0x1] }
 0x2d6   : > { %v18496_v61 = vcombine.low %v18494_v10, %v18495_v47  ;;  %v6526_v63 = vld [vmem:[#allocation3 + $0x8] sm:$0x1]  ;;  %v14438_v10 = vld [vmem:[#allocation9 + $0x78] sm:$0xff]   ;;  %v6554_v47 = vrot.slane %v6552_v19, 5  ;;  %543 = vst [vmem:[#allocation3 + $0x8c] sm:$0x1] %v542_v6 }
 0x2d7   : > { %504 = vst [vmem:[#allocation3 + $0xc0] sm:$0x1] %v503_v5  ;;  %501 = vst [vmem:[#allocation3 + $0xb4] sm:$0x1] %v500_v25  ;;  %v16617_v36 = vld [vmem:[%s18304_s3] ss:$0 sm:$0xff] }
 0x2d8   : > { %v6370_v25 = vld [vmem:[#allocation3 + $0x14] sm:$0x1] }
 0x2dc   : > { %13268 = vmatmul.mubr.bf16.gmra.mrb[4].mxu0 %v11912_v55  ;;  %v464_v55 = vsel %vm15036_vm3, 0, %v463_v37  ;;  %v536_v37 = vsel %vm15041_vm4, 0, %v535_v21 }
 0x2dd   : > { %13271 = vmatprep.mubr.bf16.mxu0 %v11913_v1  ;;  %v520_v1 = vld [vmem:[#allocation3 + $0x38] sm:$0x1]  ;;  %465 = vst [vmem:[#allocation3 + $0x24] sm:$0x1] %v464_v55  ;;  %537 = vst [vmem:[#allocation3 + $0x74] sm:$0x1] %v536_v37 }
 0x2de   : > { %v521_v16 = vsel %vm15041_vm4, 0, %v520_v1  ;;  %v16582_v55 = vld [vmem:[#allocation9] sm:$0xff]   ;;  %v490_v1 = vld [vmem:[#allocation3 + $0x90] sm:$0x1] }
 0x2df   : > { %522 = vst [vmem:[#allocation3 + $0x38] sm:$0x1] %v521_v16  ;;  %v491_v16 = vsel %vm15036_vm3, 0, %v490_v1 }
 0x2e0   : > { %492 = vst [vmem:[#allocation3 + $0x90] sm:$0x1] %v491_v16  ;;  %v6373_v16 = vld [vmem:[#allocation3 + $0x18] sm:$0xf] }
 0x2e4   : > { %13272 = vmatmul.mubr.bf16.gmra.mrb[8].mxu0 %v18487_v41  ;;  %v526_v41 = vld [vmem:[#allocation3 + $0x50] sm:$0x1] }
 0x2e5   : > { %13275 = vmatprep.mubr.bf16.mxu0 %v11915_v23  ;;  %v472_v23 = vld [vmem:[#allocation3 + $0x48] sm:$0x1]  ;;  %v527_v58 = vsel %vm15041_vm4, 0, %v526_v41  ;;  %v551_v41 = vsel %vm15041_vm4, 0, %v550_v26 }
 0x2e6   : > { %v473_v48 = vsel %vm15036_vm3, 0, %v472_v23  ;;  %528 = vst [vmem:[#allocation3 + $0x50] sm:$0x1] %v527_v58  ;;  %v496_v23 = vld [vmem:[#allocation3 + $0xa8] sm:$0x1]  ;;  %v548_v58 = vsel %vm15041_vm4, 0, %v547_v15 }
 0x2e7   : > { %474 = vst [vmem:[#allocation3 + $0x48] sm:$0x1] %v473_v48  ;;  %v497_v7 = vsel %vm15036_vm3, 0, %v496_v23  ;;  %v493_v48 = vld [vmem:[#allocation3 + $0x9c] sm:$0x1] }
 0x2e8   : > { %498 = vst [vmem:[#allocation3 + $0xa8] sm:$0x1] %v497_v7  ;;  %v494_v39 = vsel %vm15036_vm3, 0, %v493_v48  ;;  %552 = vst [vmem:[#allocation3 + $0xb0] sm:$0x1] %v551_v41 }
 0x2e9   : > { %495 = vst [vmem:[#allocation3 + $0x9c] sm:$0x1] %v494_v39  ;;  %549 = vst [vmem:[#allocation3 + $0xa4] sm:$0x1] %v548_v58  ;;  %v6366_v23 = vld [vmem:[#allocation3 + $0xc] sm:$0xf] }
 0x2ea   : > { %v6377_v15 = vld [vmem:[#allocation3 + $0x20] sm:$0x1] }
 0x2ec   : > { %13276 = vmatmul.mubr.bf16.gmra.mrb[12].mxu0 %v18490_v2  ;;  %v476_v2 = vsel %vm15036_vm3, 0, %v475_v12  ;;  %v554_v12 = vsel %vm15041_vm4, 0, %v553_v33 }
 0x2ed   : > { %13279 = vmatprep.mubr.bf16.mxu0 %v11917_v40  ;;  %v14436_v40 = vld [vmem:[#allocation9 + $0x68] sm:$0xff]   ;;  %477 = vst [vmem:[#allocation3 + $0x54] sm:$0x1] %v476_v2  ;;  %555 = vst [vmem:[#allocation3 + $0xbc] sm:$0x1] %v554_v12 }
 0x2ee   : > { %13305 = vmatprep.subr.bf16.mxu1 %v14436_v40 }
 0x2ef   : > { %13306 = vmatpush3.bf16.msra.mxu1 %v14436_v40  ;;  %v556_v40 = vld [vmem:[#allocation3 + $0xc8] sm:$0x1] }
 0x2f0   : > { %13307 = vmatprep.subr.bf16.mxu1 %v14437_v45  ;;  %v557_v31 = vsel %vm15041_vm4, 0, %v556_v40 }
 0x2f1   : > { %558 = vst [vmem:[#allocation3 + $0xc8] sm:$0x1] %v557_v31 }
 0x2f3   : > { %13308 = vmatpush3.bf16.msra.mxu1 %v14437_v45  ;;  %v16612_v45 = vld [vmem:[%s18303_s2] ss:$0 sm:$0xff] }
 0x2f4   : > { %13280 = vmatmul.mubr.bf16.gmra.mrb[16].mxu0 %v18493_v27  ;;  %v530_v27 = vsel %vm15041_vm4, 0, %v529_v9  ;;  %13309 = vmatprep.subr.bf16.mxu1 %v14438_v10 }
 0x2f5   : > { %13283 = vmatprep.mubr.bf16.mxu0 %v11919_v38  ;;  %v6543_v38 = vshrl.u32 %v6478_v14, 16  ;;  %531 = vst [vmem:[#allocation3 + $0x5c] sm:$0x1] %v530_v27 }
 0x2f7   : > { %v6545_v52 = vrot.slane %v6543_v38, 4  ;;  %13310 = vmatpush3.bf16.msra.mxu1 %v14438_v10 }
 0x2f8   : > { %13343 = vmatprep.subr.bf16.mxu1 %v16582_v55 }
 0x2f9   : > { %v6549_v51 = vor.u32 %v6548_v59, %v6545_v52 }
 0x2fb   : > { %v6550_v22 = vrot.slane %v6549_v51, 4 }
 0x2fc   : > { %13284 = vmatmul.mubr.bf16.gmra.mrb[20].mxu0 %v18496_v61  ;;  %v6558_v61 = vrot.slane %v6556_v62, 4 }
 0x2fd   : > { %13287 = vmatprep.mubr.bf16.mxu0 %v11921_v53  ;;  %v6562_v53 = vshll.u32 %v6526_v63, 16  ;;  %v6555_v32 = vsel %vm15087_vm11, %v6550_v22, %v6554_v47 }
 0x2fe   : > { %v6559_v60 = vor.u32 %v6558_v61, %v6554_v47 }
 0x300   : > { %v6560_v24 = vrot.slane %v6559_v60, 4 }
 0x304   : > { %13288 = vmatmul.mubr.bf16.gmra.mrb[24].mxu0 %v18499_v17  ;;  %v6564_v17 = vrot.slane %v6562_v53, 5 }
 0x305   : > { %13291 = vmatprep.mubr.bf16.mxu0 %v18500_v43  ;;  %v484_v43 = vld [vmem:[#allocation3 + $0x78] sm:$0x1] }
 0x306   : > { %v6565_v8 = vsel %vm15087_vm11, %v6560_v24, %v6564_v17 }
 0x307   : > { %v11967_v56 = vcombine.low %v6555_v32, %v6565_v8 }
 0x309   : > { %13311 = vmatprep.mubr.bf16.mxu1 %v11967_v56 }
 0x30c   : > { %13292 = vmatmul.mubr.bf16.gmra.mrb[28].mxu0 %v18502_v20  ;;  %v485_v20 = vsel %vm15036_vm3, 0, %v484_v43 }
 0x30d   : > { %486 = vst [vmem:[#allocation3 + $0x78] sm:$0x1] %v485_v20 }
 0x3a7   : > { %v13265_v2 = vpop.f32.mrb[0].mxu0 }
 0x3a8   : > { %v5848_v57 = vmul.f32 %v13265_v2, %v16612_v45  ;;  %v5680_v14 = vpop.f32.mrb[1].mxu0 }
 0x3a9   : > { %v5846_v30 = vmul.f32 %v16612_v45, %v5680_v14  ;;  %v13266_v38 = vpop.f32.mrb[2].mxu0 }
 0x3aa   : > { %v5887_v44 = vadd.f32 %v16617_v36, %v5848_v57  ;;  %v5849_v9 = vmul.f32 %v13266_v38, %v16612_v45  ;;  %v5683_v63 = vpop.f32.mrb[3].mxu0 }
 0x3ab   : > { %v5885_v19 = vadd.f32 %v16617_v36, %v5846_v30  ;;  %v5847_v62 = vmul.f32 %v16612_v45, %v5683_v63 }
 0x3ac   : > { %v5919_v27 = vmax.f32 %v5887_v44, 0.0  ;;  %v5888_v52 = vadd.f32 %v16617_v36, %v5849_v9 }
 0x3ad   : > { %v5917_v59 = vmax.f32 %v5885_v19, 0.0  ;;  %v5886_v53 = vadd.f32 %v16617_v36, %v5847_v62 }
 0x3ae   : > { %v12273_v10 = vpack.c.bf16 %v5919_v27, %v5919_v27  ;;  %v5920_v47 = vmax.f32 %v5888_v52, 0.0 }
 0x3af   : > { %v12271_v61 = vpack.c.bf16 %v5917_v59, %v5917_v59  ;;  %v5918_v51 = vmax.f32 %v5886_v53, 0.0  ;;  %v13269_v60 = vpop.f32.mrb[4].mxu0 }
 0x3b0   : > { %v6063_v17 = vshrl.u32 %v12273_v10, 16  ;;  %v6066_v43 = vshll.u32 %v12273_v10, 16  ;;  %v12274_v22 = vpack.c.bf16 %v5920_v47, %v5920_v47  ;;  %v5852_v20 = vmul.f32 %v13269_v60, %v16612_v45  ;;  %v5696_v28 = vpop.f32.mrb[5].mxu0 }
 0x3b1   : > { %v6046_v24 = vshrl.u32 %v12271_v61, 16  ;;  %v6049_v46 = vshll.u32 %v12271_v61, 16  ;;  %v12272_v29 = vpack.c.bf16 %v5918_v51, %v5918_v51  ;;  %v5850_v32 = vmul.f32 %v16612_v45, %v5696_v28  ;;  %v13270_v42 = vpop.f32.mrb[6].mxu0 }
 0x3b2   : > { %v6065_v8 = vrot.slane %v6063_v17, 7  ;;  %v6071_v56 = vshrl.u32 %v12274_v22, 16  ;;  %v6074_v21 = vshll.u32 %v12274_v22, 16  ;;  %v5891_v37 = vadd.f32 %v16617_v36, %v5852_v20  ;;  %v5699_v1 = vpop.f32.mrb[7].mxu0  ;;  %v6387_v17 = vld [vmem:[#allocation3 + $0x30] sm:$0xf] }
 0x3b3   : > { %v6048_v35 = vrot.slane %v6046_v24, 7  ;;  %v6054_v34 = vshrl.u32 %v12272_v29, 16  ;;  %v6057_v18 = vshll.u32 %v12272_v29, 16  ;;  %v5889_v0 = vadd.f32 %v16617_v36, %v5850_v32  ;;  %v6380_v29 = vld [vmem:[#allocation3 + $0x24] sm:$0xf] }
 0x3b4   : > { %v6068_v11 = vor.u32 %v6066_v43, %v6065_v8  ;;  %v6069_v6 = vrot.slane %v6065_v8, 4  ;;  %v6073_v7 = vrot.slane %v6071_v56, 7  ;;  %v5923_v48 = vmax.f32 %v5891_v37, 0.0 }
 0x3b5   : > { %v6051_v39 = vor.u32 %v6049_v46, %v6048_v35  ;;  %v6052_v26 = vrot.slane %v6048_v35, 4  ;;  %v6056_v41 = vrot.slane %v6054_v34, 7  ;;  %v5921_v58 = vmax.f32 %v5889_v0, 0.0 }
 0x3b6   : > { %v6374_v5 = vsel %vm15072_vm10, %v6068_v11, %v6373_v16  ;;  %v6076_v49 = vor.u32 %v6074_v21, %v6073_v7  ;;  %v6078_v40 = vrot.slane %v6073_v7, 4  ;;  %v12277_v31 = vpack.c.bf16 %v5923_v48, %v5923_v48 }
 0x3b7   : > { %6375 = vst [vmem:[#allocation3 + $0x18] sm:$0xf] %v6374_v5  ;;  %v6367_v33 = vsel %vm15072_vm10, %v6051_v39, %v6366_v23  ;;  %v6059_v12 = vor.u32 %v6057_v18, %v6056_v41  ;;  %v6061_v2 = vrot.slane %v6056_v41, 4  ;;  %v12275_v57 = vpack.c.bf16 %v5921_v58, %v5921_v58  ;;  %v13273_v14 = vpop.f32.mrb[8].mxu0 }
 0x3b8   : > { %6368 = vst [vmem:[#allocation3 + $0xc] sm:$0xf] %v6367_v33  ;;  %v6077_v38 = vsel %vm15063_vm9, %v6069_v6, %v6076_v49  ;;  %v6378_v44 = vsel %vm15036_vm3, %v6078_v40, %v6377_v15  ;;  %v6097_v9 = vshrl.u32 %v12277_v31, 16  ;;  %v6100_v63 = vshll.u32 %v12277_v31, 16  ;;  %v5712_v19 = vpop.f32.mrb[9].mxu0 }
 0x3b9   : > { %6376 = vst [vmem:[#allocation3 + $0x1c] sm:$0xf] %v6077_v38  ;;  %6379 = vst [vmem:[#allocation3 + $0x20] sm:$0x1] %v6378_v44  ;;  %v6060_v62 = vsel %vm15063_vm9, %v6052_v26, %v6059_v12  ;;  %v6371_v27 = vsel %vm15036_vm3, %v6061_v2, %v6370_v25  ;;  %v6080_v52 = vshrl.u32 %v12275_v57, 16  ;;  %v6083_v59 = vshll.u32 %v12275_v57, 16 }
 0x3ba   : > { %v13274_v53 = vpop.f32.mrb[10].mxu0  ;;  %6369 = vst [vmem:[#allocation3 + $0x10] sm:$0xf] %v6060_v62  ;;  %6372 = vst [vmem:[#allocation3 + $0x14] sm:$0x1] %v6371_v27  ;;  %v16643_v10 = vrot.slane %v6097_v9, 7  ;;  %v5853_v47 = vmul.f32 %v13270_v42, %v16612_v45  ;;  %v5851_v61 = vmul.f32 %v16612_v45, %v5699_v1  ;;  %v5856_v51 = vmul.f32 %v13273_v14, %v16612_v45 }
 0x3bb   : > { %v5715_v60 = vpop.f32.mrb[11].mxu0  ;;  %v16648_v43 = vrot.slane %v6080_v52, 7  ;;  %v5854_v22 = vmul.f32 %v16612_v45, %v5712_v19  ;;  %v5857_v20 = vmul.f32 %v13274_v53, %v16612_v45  ;;  %v6391_v57 = vld [vmem:[#allocation3 + $0x38] sm:$0x1]  ;;  %v6384_v62 = vld [vmem:[#allocation3 + $0x2c] sm:$0x1] }
 0x3bc   : > { %v5855_v28 = vmul.f32 %v16612_v45, %v5715_v60  ;;  %v6102_v24 = vor.u32 %v6100_v63, %v16643_v10  ;;  %v6103_v46 = vrot.slane %v16643_v10, 4  ;;  %v5892_v32 = vadd.f32 %v16617_v36, %v5853_v47 }
 0x3bd   : > { %v5890_v42 = vadd.f32 %v16617_v36, %v5851_v61  ;;  %v6085_v8 = vor.u32 %v6083_v59, %v16648_v43  ;;  %v6086_v56 = vrot.slane %v16648_v43, 4  ;;  %v5895_v21 = vadd.f32 %v16617_v36, %v5856_v51  ;;  %v6401_v43 = vld [vmem:[#allocation3 + $0x48] sm:$0xf] }
 0x3be   : > { %v5893_v37 = vadd.f32 %v16617_v36, %v5854_v22  ;;  %v6388_v1 = vsel %vm15072_vm10, %v6102_v24, %v6387_v17  ;;  %v5924_v16 = vmax.f32 %v5892_v32, 0.0  ;;  %v5896_v34 = vadd.f32 %v16617_v36, %v5857_v20  ;;  %v6394_v22 = vld [vmem:[#allocation3 + $0x3c] sm:$0xf] }
 0x3bf   : > { %v5922_v35 = vmax.f32 %v5890_v42, 0.0  ;;  %6389 = vst [vmem:[#allocation3 + $0x30] sm:$0xf] %v6388_v1  ;;  %v6381_v18 = vsel %vm15072_vm10, %v6085_v8, %v6380_v29  ;;  %v5927_v0 = vmax.f32 %v5895_v21, 0.0  ;;  %v5894_v6 = vadd.f32 %v16617_v36, %v5855_v28  ;;  %v13277_v23 = vpop.f32.mrb[12].mxu0 }
 0x3c0   : > { %v5925_v11 = vmax.f32 %v5893_v37, 0.0  ;;  %6382 = vst [vmem:[#allocation3 + $0x24] sm:$0xf] %v6381_v18  ;;  %v12278_v7 = vpack.c.bf16 %v5924_v16, %v5924_v16  ;;  %v5928_v39 = vmax.f32 %v5896_v34, 0.0  ;;  %v5860_v26 = vmul.f32 %v13277_v23, %v16612_v45  ;;  %v5728_v15 = vpop.f32.mrb[13].mxu0 }
 0x3c1   : > { %v12276_v48 = vpack.c.bf16 %v5922_v35, %v5922_v35  ;;  %v12281_v41 = vpack.c.bf16 %v5927_v0, %v5927_v0  ;;  %v5926_v5 = vmax.f32 %v5894_v6, 0.0  ;;  %v5858_v49 = vmul.f32 %v16612_v45, %v5728_v15  ;;  %v13278_v40 = vpop.f32.mrb[14].mxu0  ;;  %v6405_v15 = vld [vmem:[#allocation3 + $0x50] sm:$0x1] }
 0x3c2   : > { %v12279_v58 = vpack.c.bf16 %v5925_v11, %v5925_v11  ;;  %v6105_v25 = vshrl.u32 %v12278_v7, 16  ;;  %v6108_v31 = vshll.u32 %v12278_v7, 16  ;;  %v5731_v2 = vpop.f32.mrb[15].mxu0  ;;  %v12282_v27 = vpack.c.bf16 %v5928_v39, %v5928_v39 }
 0x3c3   : > { %v6088_v33 = vshrl.u32 %v12276_v48, 16  ;;  %v6091_v12 = vshll.u32 %v12276_v48, 16  ;;  %v6131_v14 = vshrl.u32 %v12281_v41, 16  ;;  %v6134_v38 = vshll.u32 %v12281_v41, 16 }
 0x3c4   : > { %v6114_v44 = vshrl.u32 %v12279_v58, 16  ;;  %v6117_v9 = vshll.u32 %v12279_v58, 16  ;;  %v6107_v63 = vrot.slane %v6105_v25, 7  ;;  %v12280_v52 = vpack.c.bf16 %v5926_v5, %v5926_v5 }
 0x3c5   : > { %v6090_v19 = vrot.slane %v6088_v33, 7  ;;  %v6133_v59 = vrot.slane %v6131_v14, 7  ;;  %v5899_v10 = vadd.f32 %v16617_v36, %v5860_v26  ;;  %v5897_v47 = vadd.f32 %v16617_v36, %v5858_v49  ;;  %v6398_v33 = vld [vmem:[#allocation3 + $0x44] sm:$0x1] }
 0x3c6   : > { %v6116_v53 = vrot.slane %v6114_v44, 7  ;;  %v6110_v61 = vor.u32 %v6108_v31, %v6107_v63  ;;  %v6112_v51 = vrot.slane %v6107_v63, 4  ;;  %v6139_v35 = vshrl.u32 %v12282_v27, 16 }
 0x3c7   : > { %v6093_v60 = vor.u32 %v6091_v12, %v6090_v19  ;;  %v6095_v17 = vrot.slane %v6090_v19, 4  ;;  %v6136_v20 = vor.u32 %v6134_v38, %v6133_v59  ;;  %v6137_v28 = vrot.slane %v6133_v59, 4  ;;  %v13281_v32 = vpop.f32.mrb[16].mxu0 }
 0x3c8   : > { %v6119_v24 = vor.u32 %v6117_v9, %v6116_v53  ;;  %v6120_v29 = vrot.slane %v6116_v53, 4  ;;  %v6111_v42 = vsel %vm15063_vm9, %v6103_v46, %v6110_v61  ;;  %v6392_v8 = vsel %vm15036_vm3, %v6112_v51, %v6391_v57  ;;  %v5744_v1 = vpop.f32.mrb[17].mxu0 }
 0x3c9   : > { %v6094_v21 = vsel %vm15063_vm9, %v6086_v56, %v6093_v60  ;;  %v6385_v37 = vsel %vm15036_vm3, %v6095_v17, %v6384_v62  ;;  %6390 = vst [vmem:[#allocation3 + $0x34] sm:$0xf] %v6111_v42  ;;  %6393 = vst [vmem:[#allocation3 + $0x38] sm:$0x1] %v6392_v8  ;;  %v6402_v16 = vsel %vm15072_vm10, %v6136_v20, %v6401_v43  ;;  %v6142_v34 = vshll.u32 %v12282_v27, 16  ;;  %v13282_v18 = vpop.f32.mrb[18].mxu0 }
 0x3ca   : > { %6383 = vst [vmem:[#allocation3 + $0x28] sm:$0xf] %v6094_v21  ;;  %6386 = vst [vmem:[#allocation3 + $0x2c] sm:$0x1] %v6385_v37  ;;  %v6395_v46 = vsel %vm15072_vm10, %v6119_v24, %v6394_v22  ;;  %v6122_v56 = vshrl.u32 %v12280_v52, 16  ;;  %v6125_v0 = vshll.u32 %v12280_v52, 16  ;;  %v5861_v48 = vmul.f32 %v13278_v40, %v16612_v45 }
 0x3cb   : > { %6403 = vst [vmem:[#allocation3 + $0x48] sm:$0xf] %v6402_v16  ;;  %6396 = vst [vmem:[#allocation3 + $0x3c] sm:$0xf] %v6395_v46  ;;  %v5931_v11 = vmax.f32 %v5899_v10, 0.0  ;;  %v5929_v6 = vmax.f32 %v5897_v47, 0.0  ;;  %v5859_v39 = vmul.f32 %v16612_v45, %v5731_v2  ;;  %v5864_v26 = vmul.f32 %v13281_v32, %v16612_v45 }
 0x3cc   : > { %v16683_v23 = vpop.f32.mrb[19].mxu0  ;;  %v6141_v7 = vrot.slane %v6139_v35, 7  ;;  %v6124_v41 = vrot.slane %v6122_v56, 7  ;;  %v5862_v49 = vmul.f32 %v16612_v45, %v5744_v1  ;;  %v5900_v12 = vadd.f32 %v16617_v36, %v5861_v48  ;;  %v6415_v47 = vld [vmem:[#allocation3 + $0x60] sm:$0xf] }
 0x3cd   : > { %v12285_v58 = vpack.c.bf16 %v5931_v11, %v5931_v11  ;;  %v12283_v5 = vpack.c.bf16 %v5929_v6, %v5929_v6  ;;  %v5898_v57 = vadd.f32 %v16617_v36, %v5859_v39  ;;  %v5903_v60 = vadd.f32 %v16617_v36, %v5864_v26 }
 0x3ce   : > { %v6144_v25 = vor.u32 %v6142_v34, %v6141_v7  ;;  %v6146_v31 = vrot.slane %v6141_v7, 4  ;;  %v6127_v14 = vor.u32 %v6125_v0, %v6124_v41  ;;  %v6129_v38 = vrot.slane %v6124_v41, 4  ;;  %v6480_v34 = vld [vmem:[#allocation3 + $0xc] sm:$0xf]  ;;  %v6419_v0 = vld [vmem:[#allocation3 + $0x68] sm:$0x1] }
 0x3cf   : > { %v6165_v40 = vshrl.u32 %v12285_v58, 16  ;;  %v6168_v44 = vshll.u32 %v12285_v58, 16  ;;  %v6148_v63 = vshrl.u32 %v12283_v5, 16  ;;  %v6151_v19 = vshll.u32 %v12283_v5, 16  ;;  %v16695_v62 = vpop.f32.mrb[20].mxu0 }
 0x3d0   : > { %v6145_v2 = vsel %vm15063_vm9, %v6137_v28, %v6144_v25  ;;  %v6406_v9 = vsel %vm15036_vm3, %v6146_v31, %v6405_v15  ;;  %v6128_v27 = vsel %vm15063_vm9, %v6120_v29, %v6127_v14  ;;  %v6399_v52 = vsel %vm15036_vm3, %v6129_v38, %v6398_v33  ;;  %v16701_v10 = vpop.f32.mrb[21].mxu0  ;;  %v6408_v28 = vld [vmem:[#allocation3 + $0x54] sm:$0xf]  ;;  %v6412_v33 = vld [vmem:[#allocation3 + $0x5c] sm:$0x1] }
 0x3d1   : > { %6404 = vst [vmem:[#allocation3 + $0x4c] sm:$0xf] %v6145_v2  ;;  %6407 = vst [vmem:[#allocation3 + $0x50] sm:$0x1] %v6406_v9  ;;  %v6167_v59 = vrot.slane %v6165_v40, 7  ;;  %v5932_v53 = vmax.f32 %v5900_v12, 0.0  ;;  %v5901_v17 = vadd.f32 %v16617_v36, %v5862_v49  ;;  %v5865_v29 = vmul.f32 %v13282_v18, %v16612_v45 }
 0x3d2   : > { %6397 = vst [vmem:[#allocation3 + $0x40] sm:$0xf] %v6128_v27  ;;  %6400 = vst [vmem:[#allocation3 + $0x44] sm:$0x1] %v6399_v52  ;;  %v6150_v61 = vrot.slane %v6148_v63, 7  ;;  %v5930_v51 = vmax.f32 %v5898_v57, 0.0  ;;  %v5863_v26 = vmul.f32 %v16612_v45, %v16683_v23 }
 0x3d3   : > { %v16705_v43 = vpop.f32.mrb[22].mxu0  ;;  %v6170_v22 = vor.u32 %v6168_v44, %v6167_v59  ;;  %v6171_v20 = vrot.slane %v6167_v59, 4  ;;  %v12286_v24 = vpack.c.bf16 %v5932_v53, %v5932_v53  ;;  %v5935_v37 = vmax.f32 %v5903_v60, 0.0  ;;  %v6481_v59 = vld [vmem:[#allocation3 + $0x10] sm:$0xf] }
 0x3d4   : > { %v16708_v32 = vpop.f32.mrb[23].mxu0  ;;  %v6153_v42 = vor.u32 %v6151_v19, %v6150_v61  ;;  %v6154_v8 = vrot.slane %v6150_v61, 4  ;;  %v12284_v21 = vpack.c.bf16 %v5930_v51, %v5930_v51  ;;  %v5933_v35 = vmax.f32 %v5901_v17, 0.0  ;;  %v6429_v19 = vld [vmem:[#allocation3 + $0x78] sm:$0xf] }
 0x3d5   : > { %v6416_v1 = vsel %vm15072_vm10, %v6170_v22, %v6415_v47  ;;  %v6173_v16 = vshrl.u32 %v12286_v24, 16  ;;  %v6176_v46 = vshll.u32 %v12286_v24, 16  ;;  %v12289_v6 = vpack.c.bf16 %v5935_v37, %v5935_v37  ;;  %v6422_v60 = vld [vmem:[#allocation3 + $0x6c] sm:$0xf]  ;;  %v6527_v24 = vld [vmem:[#allocation3 + $0x14] sm:$0x1] }
 0x3d6   : > { %6417 = vst [vmem:[#allocation3 + $0x60] sm:$0xf] %v6416_v1  ;;  %v6409_v56 = vsel %vm15072_vm10, %v6153_v42, %v6408_v28  ;;  %v6156_v11 = vshrl.u32 %v12284_v21, 16  ;;  %v6159_v18 = vshll.u32 %v12284_v21, 16  ;;  %v12287_v48 = vpack.c.bf16 %v5933_v35, %v5933_v35  ;;  %v6482_v37 = vld [vmem:[#allocation3 + $0x18] sm:$0xf] }
 0x3d7   : > { %6410 = vst [vmem:[#allocation3 + $0x54] sm:$0xf] %v6409_v56  ;;  %v6175_v7 = vrot.slane %v6173_v16, 7  ;;  %v5904_v39 = vadd.f32 %v16617_v36, %v5865_v29  ;;  %v6199_v41 = vshrl.u32 %v12289_v6, 16  ;;  %v6202_v58 = vshll.u32 %v12289_v6, 16  ;;  %v16717_v49 = vpop.f32.mrb[24].mxu0 }
 0x3d8   : > { %v6158_v15 = vrot.slane %v6156_v11, 7  ;;  %v6567_v5 = vshrl.u32 %v6480_v34, 16  ;;  %v6182_v12 = vshrl.u32 %v12287_v48, 16  ;;  %v6185_v57 = vshll.u32 %v12287_v48, 16  ;;  %v16719_v14 = vpop.f32.mrb[25].mxu0 }
 0x3d9   : > { %v6178_v25 = vor.u32 %v6176_v46, %v6175_v7  ;;  %v6180_v31 = vrot.slane %v6175_v7, 4  ;;  %v16721_v44 = vrot.slane %v6199_v41, 7  ;;  %v5936_v2 = vmax.f32 %v5904_v39, 0.0  ;;  %v16723_v9 = vpop.f32.mrb[26].mxu0  ;;  %v6483_v56 = vld [vmem:[#allocation3 + $0x1c] sm:$0xf] }
 0x3da   : > { %v6161_v38 = vor.u32 %v6159_v18, %v6158_v15  ;;  %v6163_v40 = vrot.slane %v6158_v15, 4  ;;  %v16729_v27 = vrot.slane %v6182_v12, 7  ;;  %v5902_v52 = vadd.f32 %v16617_v36, %v5863_v26  ;;  %v16732_v53 = vpop.f32.mrb[27].mxu0 }
 0x3db   : > { %v6179_v23 = vsel %vm15063_vm9, %v6171_v20, %v6178_v25  ;;  %v6420_v63 = vsel %vm15036_vm3, %v6180_v31, %v6419_v0  ;;  %v6204_v51 = vor.u32 %v6202_v58, %v16721_v44  ;;  %v6205_v17 = vrot.slane %v16721_v44, 4  ;;  %v6433_v0 = vld [vmem:[#allocation3 + $0x80] sm:$0x1] }
 0x3dc   : > { %6418 = vst [vmem:[#allocation3 + $0x64] sm:$0xf] %v6179_v23  ;;  %6421 = vst [vmem:[#allocation3 + $0x68] sm:$0x1] %v6420_v63  ;;  %v6162_v47 = vsel %vm15063_vm9, %v6154_v8, %v6161_v38  ;;  %v6413_v61 = vsel %vm15036_vm3, %v6163_v40, %v6412_v33  ;;  %v6187_v22 = vor.u32 %v6185_v57, %v16729_v27  ;;  %v5934_v28 = vmax.f32 %v5902_v52, 0.0 }
 0x3dd   : > { %6411 = vst [vmem:[#allocation3 + $0x58] sm:$0xf] %v6162_v47  ;;  %6414 = vst [vmem:[#allocation3 + $0x5c] sm:$0x1] %v6413_v61  ;;  %v12290_v20 = vpack.c.bf16 %v5936_v2, %v5936_v2  ;;  %v6430_v29 = vsel %vm15072_vm10, %v6204_v51, %v6429_v19  ;;  %v6569_v42 = vrot.slane %v6567_v5, 4  ;;  %v6570_v8 = vshll.u32 %v6480_v34, 16 }
 0x3de   : > { %v6576_v21 = vshll.u32 %v6481_v59, 16  ;;  %6431 = vst [vmem:[#allocation3 + $0x78] sm:$0xf] %v6430_v29  ;;  %v6188_v1 = vrot.slane %v16729_v27, 4  ;;  %v6423_v16 = vsel %vm15072_vm10, %v6187_v22, %v6422_v60  ;;  %v12288_v35 = vpack.c.bf16 %v5934_v28, %v5934_v28  ;;  %v6426_v40 = vld [vmem:[#allocation3 + $0x74] sm:$0x1] }
 0x3df   : > { %v6207_v46 = vshrl.u32 %v12290_v20, 16  ;;  %6424 = vst [vmem:[#allocation3 + $0x6c] sm:$0xf] %v6423_v16  ;;  %v6572_v11 = vrot.slane %v6570_v8, 5  ;;  %v6580_v6 = vshrl.u32 %v6481_v59, 16  ;;  %v6586_v7 = vshll.u32 %v6527_v24, 16 }
 0x3e0   : > { %v6578_v18 = vrot.slane %v6576_v21, 5  ;;  %v16746_v48 = vpop.f32.mrb[28].mxu0  ;;  %v6210_v39 = vshll.u32 %v12290_v20, 16  ;;  %v6190_v26 = vshrl.u32 %v12288_v35, 16  ;;  %v6193_v15 = vshll.u32 %v12288_v35, 16  ;;  %v14440_v35 = vld [vmem:[#allocation9 + $0x8] sm:$0xff]  }
 0x3e1   : > { %v6209_v34 = vrot.slane %v6207_v46, 7  ;;  %v16748_v41 = vpop.f32.mrb[29].mxu0  ;;  %v6573_v58 = vor.u32 %v6572_v11, %v6569_v42  ;;  %v6582_v5 = vrot.slane %v6580_v6, 4  ;;  %v6588_v25 = vrot.slane %v6586_v7, 5  ;;  %v6528_v19 = vld [vmem:[#allocation3 + $0x20] sm:$0x1] }
 0x3e2   : > { %v6591_v31 = vshrl.u32 %v6482_v37, 16  ;;  %v16750_v33 = vpop.f32.mrb[30].mxu0  ;;  %v6192_v38 = vrot.slane %v6190_v26, 7  ;;  %v6594_v44 = vshll.u32 %v6482_v37, 16  ;;  %v6600_v52 = vshll.u32 %v6483_v56, 16 }
 0x3e3   : > { %v6212_v12 = vor.u32 %v6210_v39, %v6209_v34  ;;  %v6214_v57 = vrot.slane %v6209_v34, 4  ;;  %v16752_v2 = vpop.f32.mrb[31].mxu0  ;;  %v6574_v23 = vrot.slane %v6573_v58, 4  ;;  %v6583_v63 = vor.u32 %v6582_v5, %v6578_v18  ;;  %v6484_v46 = vld [vmem:[#allocation3 + $0x24] sm:$0xf] }
 0x3e4   : > { %v6593_v27 = vrot.slane %v6591_v31, 4  ;;  %v6195_v61 = vor.u32 %v6193_v15, %v6192_v38  ;;  %v6197_v51 = vrot.slane %v6192_v38, 4  ;;  %v6596_v20 = vrot.slane %v6594_v44, 5  ;;  %v6485_v39 = vld [vmem:[#allocation3 + $0x28] sm:$0xf] }
 0x3e5   : > { %v6213_v59 = vsel %vm15063_vm9, %v6205_v17, %v6212_v12  ;;  %v6434_v47 = vsel %vm15036_vm3, %v6214_v57, %v6433_v0  ;;  %v6579_v60 = vsel %vm15087_vm11, %v6574_v23, %v6578_v18  ;;  %v6584_v22 = vrot.slane %v6583_v63, 4  ;;  %v14441_v38 = vld [vmem:[#allocation9 + $0x10] sm:$0xff]  }
 0x3e6   : > { %6432 = vst [vmem:[#allocation3 + $0x7c] sm:$0xf] %v6213_v59  ;;  %6435 = vst [vmem:[#allocation3 + $0x80] sm:$0x1] %v6434_v47  ;;  %v6602_v28 = vrot.slane %v6600_v52, 5  ;;  %v6196_v24 = vsel %vm15063_vm9, %v6188_v1, %v6195_v61  ;;  %v6427_v29 = vsel %vm15036_vm3, %v6197_v51, %v6426_v40  ;;  %v6604_v17 = vshrl.u32 %v6483_v56, 16 }
 0x3e7   : > { %v6610_v42 = vshll.u32 %v6528_v19, 16  ;;  %6425 = vst [vmem:[#allocation3 + $0x70] sm:$0xf] %v6196_v24  ;;  %6428 = vst [vmem:[#allocation3 + $0x74] sm:$0x1] %v6427_v29  ;;  %v6589_v8 = vsel %vm15087_vm11, %v6584_v22, %v6588_v25  ;;  %v6597_v21 = vor.u32 %v6596_v20, %v6593_v27  ;;  %v5868_v37 = vmul.f32 %v16695_v62, %v16612_v45  ;;  %v14442_v29 = vld [vmem:[#allocation9 + $0x18] sm:$0xff]  }
 0x3e8   : > { %v5866_v16 = vmul.f32 %v16612_v45, %v16701_v10  ;;  %v11968_v1 = vcombine.low %v6579_v60, %v6589_v8  ;;  %v6606_v0 = vrot.slane %v6604_v17, 4  ;;  %v5869_v56 = vmul.f32 %v16705_v43, %v16612_v45  ;;  %v6443_v60 = vld [vmem:[#allocation3 + $0x90] sm:$0xf]  ;;  %v6436_v8 = vld [vmem:[#allocation3 + $0x84] sm:$0xf] }
 0x3e9   : > { %v6612_v11 = vrot.slane %v6610_v42, 5  ;;  %v6598_v18 = vrot.slane %v6597_v21, 4  ;;  %v5907_v6 = vadd.f32 %v16617_v36, %v5868_v37  ;;  %v5867_v34 = vmul.f32 %v16612_v45, %v16708_v32 }
 0x3ea   : > { %v5905_v7 = vadd.f32 %v16617_v36, %v5866_v16  ;;  %13312 = vmatmul.mubr.bf16.vlgmr.msra.gmra.mrb[0].mxu1 %v11968_v1  ;;  %v6607_v62 = vor.u32 %v6606_v0, %v6602_v28  ;;  %v5908_v10 = vadd.f32 %v16617_v36, %v5869_v56  ;;  %v6615_v26 = vshrl.u32 %v6484_v46, 16  ;;  %v6529_v0 = vld [vmem:[#allocation3 + $0x2c] sm:$0x1] }
 0x3eb   : > { %v6618_v15 = vshll.u32 %v6484_v46, 16  ;;  %v6603_v58 = vsel %vm15087_vm11, %v6598_v18, %v6602_v28  ;;  %13344 = vmatpush3.bf16.msra.mxu1 %v16582_v55  ;;  %v5939_v43 = vmax.f32 %v5907_v6, 0.0  ;;  %v5906_v25 = vadd.f32 %v16617_v36, %v5867_v34 }
 0x3ec   : > { %v5937_v5 = vmax.f32 %v5905_v7, 0.0  ;;  %v6608_v31 = vrot.slane %v6607_v62, 4  ;;  %v5940_v12 = vmax.f32 %v5908_v10, 0.0  ;;  %v6617_v57 = vrot.slane %v6615_v26, 4  ;;  %13345 = vmatprep.subr.bf16.mxu1 %v14440_v35  ;;  %v6447_v7 = vld [vmem:[#allocation3 + $0x98] sm:$0x1] }
 0x3ed   : > { %v6620_v32 = vrot.slane %v6618_v15, 5  ;;  %v12293_v40 = vpack.c.bf16 %v5939_v43, %v5939_v43  ;;  %v5938_v23 = vmax.f32 %v5906_v25, 0.0  ;;  %v6624_v63 = vshll.u32 %v6485_v39, 16  ;;  %v16785_v26 = vld [vmem:[#allocation3 + $0x30] sm:$0xf]  ;;  %v14443_v15 = vld [vmem:[#allocation9 + $0x20] sm:$0xff]  }
 0x3ee   : > { %v12291_v44 = vpack.c.bf16 %v5937_v5, %v5937_v5  ;;  %v6613_v19 = vsel %vm15087_vm11, %v6608_v31, %v6612_v11  ;;  %v12294_v27 = vpack.c.bf16 %v5940_v12, %v5940_v12  ;;  %v6628_v55 = vshrl.u32 %v6485_v39, 16  ;;  %v6440_v5 = vld [vmem:[#allocation3 + $0x8c] sm:$0x1]  ;;  %v16791_v12 = vld [vmem:[#allocation3 + $0x34] sm:$0xf] }
 0x3ef   : > { %v6621_v52 = vor.u32 %v6620_v32, %v6617_v57  ;;  %v11969_v59 = vcombine.low %v6603_v58, %v6613_v19  ;;  %v6233_v47 = vshrl.u32 %v12293_v40, 16  ;;  %v6236_v61 = vshll.u32 %v12293_v40, 16  ;;  %13346 = vmatpush3.bf16.msra.mxu1 %v14440_v35 }
 0x3f0   : > { %v6216_v51 = vshrl.u32 %v12291_v44, 16  ;;  %v6219_v22 = vshll.u32 %v12291_v44, 16  ;;  %v6241_v20 = vshrl.u32 %v12294_v27, 16  ;;  %v6244_v28 = vshll.u32 %v12294_v27, 16  ;;  %13347 = vmatprep.subr.bf16.mxu1 %v14441_v38  ;;  %v6530_v44 = vld [vmem:[#allocation3 + $0x38] sm:$0x1] }
 0x3f1   : > { %v12292_v24 = vpack.c.bf16 %v5938_v23, %v5938_v23  ;;  %13315 = vmatprep.mubr.bf16.mxu1 %v11969_v59  ;;  %v6235_v17 = vrot.slane %v6233_v47, 7  ;;  %v6622_v21 = vrot.slane %v6621_v52, 4  ;;  %v6626_v37 = vrot.slane %v6624_v63, 5  ;;  %v14444_v52 = vld [vmem:[#allocation9 + $0x28] sm:$0xff]  }
 0x3f2   : > { %v6218_v42 = vrot.slane %v6216_v51, 7  ;;  %v6243_v16 = vrot.slane %v6241_v20, 7  ;;  %v6630_v11 = vrot.slane %v6628_v55, 4  ;;  %v6634_v31 = vshll.u32 %v6529_v0, 16  ;;  %v16805_v51 = vld [vmem:[#allocation3 + $0x3c] sm:$0xf] }
 0x3f3   : > { %v6224_v46 = vshrl.u32 %v12292_v24, 16  ;;  %v6227_v1 = vshll.u32 %v12292_v24, 16  ;;  %v6238_v56 = vor.u32 %v6236_v61, %v6235_v17  ;;  %v6239_v35 = vrot.slane %v6235_v17, 4  ;;  %13348 = vmatpush3.bf16.msra.mxu1 %v14441_v38 }
 0x3f4   : > { %v6221_v18 = vor.u32 %v6219_v22, %v6218_v42  ;;  %v6222_v6 = vrot.slane %v6218_v42, 4  ;;  %v6246_v34 = vor.u32 %v6244_v28, %v6243_v16  ;;  %v6248_v62 = vrot.slane %v6243_v16, 4  ;;  %13349 = vmatprep.subr.bf16.mxu1 %v14442_v29 }
 0x3f5   : > { %v6226_v10 = vrot.slane %v6224_v46, 7  ;;  %v6627_v39 = vsel %vm15087_vm11, %v6622_v21, %v6626_v37  ;;  %v6444_v58 = vsel %vm15072_vm10, %v6238_v56, %v6443_v60  ;;  %v6631_v25 = vor.u32 %v6630_v11, %v6626_v37 }
 0x3f6   : > { %v6437_v43 = vsel %vm15072_vm10, %v6221_v18, %v6436_v8  ;;  %6445 = vst [vmem:[#allocation3 + $0x90] sm:$0xf] %v6444_v58  ;;  %v6247_v57 = vsel %vm15063_vm9, %v6239_v35, %v6246_v34  ;;  %v6448_v32 = vsel %vm15036_vm3, %v6248_v62, %v6447_v7  ;;  %v6636_v63 = vrot.slane %v6634_v31, 5  ;;  %v16821_v18 = vld [vmem:[#allocation3 + $0x40] sm:$0xf] }
 0x3f7   : > { %6438 = vst [vmem:[#allocation3 + $0x84] sm:$0xf] %v6437_v43  ;;  %v6229_v38 = vor.u32 %v6227_v1, %v6226_v10  ;;  %v6231_v40 = vrot.slane %v6226_v10, 4  ;;  %6446 = vst [vmem:[#allocation3 + $0x94] sm:$0xf] %v6247_v57  ;;  %v6632_v23 = vrot.slane %v6631_v25, 4  ;;  %13350 = vmatpush3.bf16.msra.mxu1 %v14442_v29  ;;  %v5872_v42 = vmul.f32 %v16717_v49, %v16612_v45 }
 0x3f8   : > { %6449 = vst [vmem:[#allocation3 + $0x98] sm:$0x1] %v6448_v32  ;;  %v6639_v19 = vshrl.u32 %v16785_v26, 16  ;;  %v6642_v27 = vshll.u32 %v16785_v26, 16  ;;  %v6648_v47 = vshll.u32 %v16791_v12, 16  ;;  %v6652_v61 = vshrl.u32 %v16791_v12, 16  ;;  %13351 = vmatprep.subr.bf16.mxu1 %v14443_v15 }
 0x3f9   : > { %v6230_v55 = vsel %vm15063_vm9, %v6222_v6, %v6229_v38  ;;  %v6441_v59 = vsel %vm15036_vm3, %v6231_v40, %v6440_v5  ;;  %v6637_v60 = vsel %vm15087_vm11, %v6632_v23, %v6636_v63  ;;  %v6658_v28 = vshll.u32 %v6530_v44, 16  ;;  %v14445_v49 = vld [vmem:[#allocation9 + $0x30] sm:$0xff]   ;;  %v14446_v25 = vld [vmem:[#allocation9 + $0x38] sm:$0xff]   ;;  %v6531_v32 = vld [vmem:[#allocation3 + $0x44] sm:$0x1] }
 0x3fa   : > { %6439 = vst [vmem:[#allocation3 + $0x88] sm:$0xf] %v6230_v55  ;;  %6442 = vst [vmem:[#allocation3 + $0x8c] sm:$0x1] %v6441_v59  ;;  %v6641_v22 = vrot.slane %v6639_v19, 4  ;;  %v6644_v20 = vrot.slane %v6642_v27, 5  ;;  %v11970_v24 = vcombine.low %v6627_v39, %v6637_v60  ;;  %v5870_v37 = vmul.f32 %v16612_v45, %v16719_v14 }
 0x3fb   : > { %v6650_v29 = vrot.slane %v6648_v47, 5  ;;  %v6654_v17 = vrot.slane %v6652_v61, 4  ;;  %v6660_v21 = vrot.slane %v6658_v28, 5  ;;  %v5873_v16 = vmul.f32 %v16723_v9, %v16612_v45  ;;  %13352 = vmatpush3.bf16.msra.mxu1 %v14443_v15  ;;  %v16832_v19 = vld [vmem:[#allocation9 + $0x80] sm:$0xff]  }
 0x3fc   : > { %v6645_v8 = vor.u32 %v6644_v20, %v6641_v22  ;;  %13316 = vmatmul.mubr.bf16.gmra.mrb[4].mxu1 %v11970_v24  ;;  %v5911_v1 = vadd.f32 %v16617_v36, %v5872_v42  ;;  %v5871_v0 = vmul.f32 %v16612_v45, %v16732_v53  ;;  %v6663_v11 = vshrl.u32 %v16805_v51, 16  ;;  %13353 = vmatprep.subr.bf16.mxu1 %v14444_v52  ;;  %v6457_v20 = vld [vmem:[#allocation3 + $0xa8] sm:$0xf] }
 0x3fd   : > { %v6655_v46 = vor.u32 %v6654_v17, %v6650_v29  ;;  %v5909_v35 = vadd.f32 %v16617_v36, %v5870_v37  ;;  %v5912_v14 = vadd.f32 %v16617_v36, %v5873_v16  ;;  %v6666_v9 = vshll.u32 %v16805_v51, 16  ;;  %v6461_v37 = vld [vmem:[#allocation3 + $0xb0] sm:$0x1] }
 0x3fe   : > { %v6646_v56 = vrot.slane %v6645_v8, 4  ;;  %v5943_v7 = vmax.f32 %v5911_v1, 0.0  ;;  %v5910_v34 = vadd.f32 %v16617_v36, %v5871_v0  ;;  %v6665_v62 = vrot.slane %v6663_v11, 4 }
 0x3ff   : > { %v6656_v6 = vrot.slane %v6655_v46, 4  ;;  %v5941_v53 = vmax.f32 %v5909_v35, 0.0  ;;  %v5944_v10 = vmax.f32 %v5912_v14, 0.0  ;;  %v6668_v39 = vrot.slane %v6666_v9, 5  ;;  %13354 = vmatpush3.bf16.msra.mxu1 %v14444_v52  ;;  %v16838_v35 = vld [vmem:[#allocation3 + $0x48] sm:$0xf] }
 0x400   : > { %v6651_v45 = vsel %vm15087_vm11, %v6646_v56, %v6650_v29  ;;  %v12297_v58 = vpack.c.bf16 %v5943_v7, %v5943_v7  ;;  %v5942_v43 = vmax.f32 %v5910_v34, 0.0  ;;  %v6672_v5 = vshll.u32 %v16821_v18, 16  ;;  %13355 = vmatprep.subr.bf16.mxu1 %v14445_v49  ;;  %v6454_v56 = vld [vmem:[#allocation3 + $0xa4] sm:$0x1]  ;;  %v16842_v34 = vld [vmem:[#allocation3 + $0x4c] sm:$0xf] }
 0x401   : > { %v6661_v15 = vsel %vm15087_vm11, %v6656_v6, %v6660_v21  ;;  %v12295_v57 = vpack.c.bf16 %v5941_v53, %v5941_v53  ;;  %v12298_v36 = vpack.c.bf16 %v5944_v10, %v5944_v10  ;;  %v6669_v38 = vor.u32 %v6668_v39, %v6665_v62  ;;  %v6450_v21 = vld [vmem:[#allocation3 + $0x9c] sm:$0xf]  ;;  %v16844_v62 = vld [vmem:[#allocation3 + $0x50] sm:$0x1] }
 0x402   : > { %v11971_v31 = vcombine.low %v6651_v45, %v6661_v15  ;;  %v6267_v40 = vshrl.u32 %v12297_v58, 16  ;;  %v6270_v44 = vshll.u32 %v12297_v58, 16  ;;  %v12296_v23 = vpack.c.bf16 %v5942_v43, %v5942_v43 }
 0x403   : > { %v16830_v63 = vrot.slane %v6672_v5, 5  ;;  %v6250_v27 = vshrl.u32 %v12295_v57, 16  ;;  %v6253_v52 = vshll.u32 %v12295_v57, 16  ;;  %v6275_v55 = vshrl.u32 %v12298_v36, 16  ;;  %13356 = vmatpush3.bf16.msra.mxu1 %v14445_v49 }
 0x404   : > { %13319 = vmatprep.mubr.bf16.mxu1 %v11971_v31  ;;  %v6278_v59 = vshll.u32 %v12298_v36, 16  ;;  %v6269_v47 = vrot.slane %v6267_v40, 7  ;;  %v6258_v61 = vshrl.u32 %v12296_v23, 16  ;;  %v6261_v60 = vshll.u32 %v12296_v23, 16  ;;  %13357 = vmatprep.subr.bf16.mxu1 %v14446_v25  ;;  %v14585_v40 = vld [vmem:[%s18303_s2] ss:$0 sm:$0xff] }
 0x405   : > { %v6670_v22 = vrot.slane %v6669_v38, 4  ;;  %v6252_v28 = vrot.slane %v6250_v27, 7  ;;  %v6277_v24 = vrot.slane %v6275_v55, 7  ;;  %v6676_v29 = vshrl.u32 %v16821_v18, 16 }
 0x406   : > { %v6682_v17 = vshll.u32 %v6531_v32, 16  ;;  %v6272_v42 = vor.u32 %v6270_v44, %v6269_v47  ;;  %v6273_v8 = vrot.slane %v6269_v47, 4  ;;  %v6260_v16 = vrot.slane %v6258_v61, 7  ;;  %v14586_v61 = vld [vmem:[%s18304_s3] ss:$0 sm:$0xff] }
 0x407   : > { %v6675_v46 = vsel %vm15087_vm11, %v6670_v22, %v16830_v63  ;;  %v6255_v1 = vor.u32 %v6253_v52, %v6252_v28  ;;  %v6256_v0 = vrot.slane %v6252_v28, 4  ;;  %v6280_v11 = vor.u32 %v6278_v59, %v6277_v24  ;;  %13358 = vmatpush3.bf16.msra.mxu1 %v14446_v25  ;;  %v16868_v59 = vld [vmem:[#allocation3 + $0x54] sm:$0xf] }
 0x408   : > { %v6282_v49 = vrot.slane %v6277_v24, 4  ;;  %v6458_v14 = vsel %vm15072_vm10, %v6272_v42, %v6457_v20  ;;  %v6263_v9 = vor.u32 %v6261_v60, %v6260_v16  ;;  %v6265_v6 = vrot.slane %v6260_v16, 4  ;;  %13391 = vmatprep.subr.bf16.mxu1 %v16832_v19 }
 0x409   : > { %v6678_v7 = vrot.slane %v6676_v29, 4  ;;  %6459 = vst [vmem:[#allocation3 + $0xa8] sm:$0xf] %v6458_v14  ;;  %v6451_v45 = vsel %vm15072_vm10, %v6255_v1, %v6450_v21  ;;  %v6281_v53 = vsel %vm15063_vm9, %v6273_v8, %v6280_v11  ;;  %v6684_v39 = vrot.slane %v6682_v17, 5  ;;  %v16883_v14 = vld [vmem:[#allocation3 + $0x58] sm:$0xf] }
 0x40a   : > { %v6462_v10 = vsel %vm15036_vm3, %v6282_v49, %v6461_v37  ;;  %6452 = vst [vmem:[#allocation3 + $0x9c] sm:$0xf] %v6451_v45  ;;  %6460 = vst [vmem:[#allocation3 + $0xac] sm:$0xf] %v6281_v53  ;;  %v6264_v15 = vsel %vm15063_vm9, %v6256_v0, %v6263_v9  ;;  %v6455_v58 = vsel %vm15036_vm3, %v6265_v6, %v6454_v56  ;;  %v6687_v5 = vshrl.u32 %v16838_v35, 16 }
 0x40b   : > { %6463 = vst [vmem:[#allocation3 + $0xb0] sm:$0x1] %v6462_v10  ;;  %v6679_v43 = vor.u32 %v6678_v7, %v16830_v63  ;;  %6453 = vst [vmem:[#allocation3 + $0xa0] sm:$0xf] %v6264_v15  ;;  %v6690_v25 = vshll.u32 %v16838_v35, 16  ;;  %v6696_v31 = vshll.u32 %v16842_v34, 16  ;;  %v5876_v44 = vmul.f32 %v14585_v40, %v16746_v48 }
 0x40c   : > { %6456 = vst [vmem:[#allocation3 + $0xa4] sm:$0x1] %v6455_v58  ;;  %v6700_v57 = vshrl.u32 %v16842_v34, 16  ;;  %v6706_v36 = vshll.u32 %v16844_v62, 16  ;;  %v6689_v38 = vrot.slane %v6687_v5, 4  ;;  %v5874_v23 = vmul.f32 %v14585_v40, %v16748_v41 }
 0x40d   : > { %v6680_v32 = vrot.slane %v6679_v43, 4  ;;  %v6692_v63 = vrot.slane %v6690_v25, 5  ;;  %v6698_v27 = vrot.slane %v6696_v31, 5  ;;  %v5915_v60 = vadd.f32 %v14586_v61, %v5876_v44  ;;  %v6471_v10 = vld [vmem:[#allocation3 + $0xc0] sm:$0xf] }
 0x40e   : > { %v6702_v52 = vrot.slane %v6700_v57, 4  ;;  %v6708_v55 = vrot.slane %v6706_v36, 5  ;;  %v5913_v22 = vadd.f32 %v14586_v61, %v5874_v23  ;;  %v5877_v20 = vmul.f32 %v14585_v40, %v16750_v33  ;;  %v6464_v15 = vld [vmem:[#allocation3 + $0xb4] sm:$0xf]  ;;  %v16887_v23 = vld [vmem:[#allocation3 + $0x5c] sm:$0x1] }
 0x40f   : > { %v6685_v47 = vsel %vm15087_vm11, %v6680_v32, %v6684_v39  ;;  %v6693_v28 = vor.u32 %v6692_v63, %v6689_v38  ;;  %v5875_v24 = vmul.f32 %v14585_v40, %v16752_v2  ;;  %v5947_v29 = vmax.f32 %v5915_v60, 0.0 }
 0x410   : > { %v11972_v48 = vcombine.low %v6675_v46, %v6685_v47  ;;  %v6703_v41 = vor.u32 %v6702_v52, %v6698_v27  ;;  %v5945_v17 = vmax.f32 %v5913_v22, 0.0  ;;  %v5916_v42 = vadd.f32 %v14586_v61, %v5877_v20  ;;  %v6475_v47 = vld [vmem:[#allocation3 + $0xc8] sm:$0x1] }
 0x411   : > { %v6711_v8 = vshrl.u32 %v16868_v59, 16  ;;  %v6694_v21 = vrot.slane %v6693_v28, 4  ;;  %v5914_v16 = vadd.f32 %v14586_v61, %v5875_v24  ;;  %v6714_v1 = vshll.u32 %v16868_v59, 16  ;;  %v6468_v24 = vld [vmem:[#allocation3 + $0xbc] sm:$0x1] }
 0x412   : > { %13320 = vmatmul.mubr.bf16.gmra.mrb[8].mxu1 %v11972_v48  ;;  %v6704_v37 = vrot.slane %v6703_v41, 4  ;;  %v12301_v0 = vpack.c.bf16 %v5947_v29, %v5947_v29  ;;  %v12299_v11 = vpack.c.bf16 %v5945_v17, %v5945_v17  ;;  %v5948_v49 = vmax.f32 %v5916_v42, 0.0  ;;  %v16889_v48 = vld [vmem:[#allocation3 + $0x60] sm:$0xf]  ;;  %v16896_v42 = vld [vmem:[#allocation3 + $0x64] sm:$0xf] }
 0x413   : > { %v6713_v33 = vrot.slane %v6711_v8, 4  ;;  %v6699_v46 = vsel %vm15087_vm11, %v6694_v21, %v6698_v27  ;;  %v5946_v56 = vmax.f32 %v5914_v16, 0.0  ;;  %v6716_v9 = vrot.slane %v6714_v1, 5  ;;  %v16898_v1 = vld [vmem:[#allocation3 + $0x68] sm:$0x1] }
 0x414   : > { %v6709_v2 = vsel %vm15087_vm11, %v6704_v37, %v6708_v55  ;;  %v6301_v7 = vshrl.u32 %v12301_v0, 16  ;;  %v6304_v45 = vshll.u32 %v12301_v0, 16  ;;  %v6284_v53 = vshrl.u32 %v12299_v11, 16  ;;  %v16900_v0 = vld [vmem:[#allocation3 + $0x6c] sm:$0xf] }
 0x415   : > { %v11973_v6 = vcombine.low %v6699_v46, %v6709_v2  ;;  %v6287_v39 = vshll.u32 %v12299_v11, 16  ;;  %v12302_v58 = vpack.c.bf16 %v5948_v49, %v5948_v49  ;;  %v12300_v43 = vpack.c.bf16 %v5946_v56, %v5946_v56  ;;  %v16905_v46 = vld [vmem:[#allocation3 + $0x70] sm:$0xf]  ;;  %v8429_v54 = vld [vmem:[#allocation3 + $0xac] sm:$0xf] }
 0x416   : > { %v6717_v5 = vor.u32 %v6716_v9, %v6713_v33  ;;  %v6303_v25 = vrot.slane %v6301_v7, 7  ;;  %v6286_v31 = vrot.slane %v6284_v53, 7  ;;  %v6720_v57 = vshll.u32 %v16883_v14, 16 }
 0x417   : > { %13323 = vmatprep.mubr.bf16.mxu1 %v11973_v6  ;;  %v6724_v36 = vshrl.u32 %v16883_v14, 16  ;;  %v6309_v32 = vshrl.u32 %v12302_v58, 16  ;;  %v6312_v38 = vshll.u32 %v12302_v58, 16  ;;  %v6292_v40 = vshrl.u32 %v12300_v43, 16 }
 0x418   : > { %v6295_v44 = vshll.u32 %v12300_v43, 16  ;;  %v6306_v63 = vor.u32 %v6304_v45, %v6303_v25  ;;  %v6307_v27 = vrot.slane %v6303_v25, 4  ;;  %v6289_v52 = vor.u32 %v6287_v39, %v6286_v31  ;;  %v16917_v39 = vld [vmem:[#allocation3 + $0x78] sm:$0xf] }
 0x419   : > { %v6290_v55 = vrot.slane %v6286_v31, 4  ;;  %v6311_v61 = vrot.slane %v6309_v32, 7  ;;  %v6294_v60 = vrot.slane %v6292_v40, 7  ;;  %v6718_v22 = vrot.slane %v6717_v5, 4  ;;  %v16923_v5 = vld [vmem:[#allocation3 + $0x7c] sm:$0xf] }
 0x41a   : > { %v6722_v20 = vrot.slane %v6720_v57, 5  ;;  %v6472_v28 = vsel %vm15072_vm10, %v6306_v63, %v6471_v10  ;;  %v6465_v41 = vsel %vm15072_vm10, %v6289_v52, %v6464_v15  ;;  %v6726_v29 = vrot.slane %v6724_v36, 4  ;;  %v16927_v36 = vld [vmem:[#allocation3 + $0x74] sm:$0x1] }
 0x41b   : > { %v6730_v17 = vshll.u32 %v16887_v23, 16  ;;  %6473 = vst [vmem:[#allocation3 + $0xc0] sm:$0xf] %v6472_v28  ;;  %6466 = vst [vmem:[#allocation3 + $0xb4] sm:$0xf] %v6465_v41  ;;  %v6314_v8 = vor.u32 %v6312_v38, %v6311_v61  ;;  %v6316_v21 = vrot.slane %v6311_v61, 4  ;;  %v6297_v37 = vor.u32 %v6295_v44, %v6294_v60 }
 0x41c   : > { %v6299_v16 = vrot.slane %v6294_v60, 4  ;;  %v6723_v13 = vsel %vm15087_vm11, %v6718_v22, %v6722_v20  ;;  %v6727_v11 = vor.u32 %v6726_v29, %v6722_v20  ;;  %v6735_v33 = vshrl.u32 %v16889_v48, 16  ;;  %v16932_v22 = vld [vmem:[#allocation3 + $0x80] sm:$0x1] }
 0x41d   : > { %v6732_v49 = vrot.slane %v6730_v17, 5  ;;  %v6315_v2 = vsel %vm15063_vm9, %v6307_v27, %v6314_v8  ;;  %v6476_v56 = vsel %vm15036_vm3, %v6316_v21, %v6475_v47  ;;  %v6298_v9 = vsel %vm15063_vm9, %v6290_v55, %v6297_v37 }
 0x41e   : > { %v6469_v6 = vsel %vm15036_vm3, %v6299_v16, %v6468_v24  ;;  %6474 = vst [vmem:[#allocation3 + $0xc4] sm:$0xf] %v6315_v2  ;;  %6477 = vst [vmem:[#allocation3 + $0xc8] sm:$0x1] %v6476_v56  ;;  %v6728_v7 = vrot.slane %v6727_v11, 4  ;;  %v6737_v45 = vrot.slane %v6735_v33, 4 }
 0x41f   : > { %6467 = vst [vmem:[#allocation3 + $0xb8] sm:$0xf] %v6298_v9  ;;  %6470 = vst [vmem:[#allocation3 + $0xbc] sm:$0x1] %v6469_v6  ;;  %v6738_v53 = vshll.u32 %v16889_v48, 16  ;;  %v6744_v10 = vshll.u32 %v16896_v42, 16 }
 0x420   : > { %v6748_v15 = vshrl.u32 %v16896_v42, 16  ;;  %v6754_v30 = vshll.u32 %v16898_v1, 16  ;;  %v6759_v58 = vshrl.u32 %v16900_v0, 16  ;;  %v6762_v43 = vshll.u32 %v16900_v0, 16 }
 0x421   : > { %v6733_v25 = vsel %vm15087_vm11, %v6728_v7, %v6732_v49  ;;  %v6740_v31 = vrot.slane %v6738_v53, 5  ;;  %v6746_v57 = vrot.slane %v6744_v10, 5  ;;  %v6768_v32 = vshll.u32 %v16905_v46, 16 }
 0x422   : > { %v11974_v38 = vcombine.low %v6723_v13, %v6733_v25  ;;  %v6750_v40 = vrot.slane %v6748_v15, 4  ;;  %v6756_v44 = vrot.slane %v6754_v30, 5  ;;  %v6761_v63 = vrot.slane %v6759_v58, 4  ;;  %v16937_v13 = vld [vmem:[#allocation3 + $0x84] sm:$0xf] }
 0x423   : > { %v6741_v27 = vor.u32 %v6740_v31, %v6737_v45  ;;  %v6764_v52 = vrot.slane %v6762_v43, 5  ;;  %v6770_v55 = vrot.slane %v6768_v32, 5  ;;  %v6772_v47 = vshrl.u32 %v16905_v46, 16  ;;  %v16945_v45 = vld [vmem:[#allocation3 + $0x88] sm:$0xf] }
 0x424   : > { %13324 = vmatmul.mubr.bf16.gmra.mrb[12].mxu1 %v11974_v38  ;;  %v6751_v61 = vor.u32 %v6750_v40, %v6746_v57  ;;  %v6778_v60 = vshll.u32 %v16927_v36, 16  ;;  %v6783_v20 = vshrl.u32 %v16917_v39, 16  ;;  %v6786_v28 = vshll.u32 %v16917_v39, 16  ;;  %v16950_v58 = vld [vmem:[#allocation3 + $0x90] sm:$0xf] }
 0x425   : > { %v6742_v41 = vrot.slane %v6741_v27, 4  ;;  %v6765_v24 = vor.u32 %v6764_v52, %v6761_v63  ;;  %v6774_v29 = vrot.slane %v6772_v47, 4  ;;  %v6792_v17 = vshll.u32 %v16923_v5, 16  ;;  %v16959_v27 = vld [vmem:[#allocation3 + $0x94] sm:$0xf] }
 0x426   : > { %v6752_v8 = vrot.slane %v6751_v61, 4  ;;  %v6780_v21 = vrot.slane %v6778_v60, 5  ;;  %v6785_v37 = vrot.slane %v6783_v20, 4  ;;  %v6788_v16 = vrot.slane %v6786_v28, 5 }
 0x427   : > { %v6747_v11 = vsel %vm15087_vm11, %v6742_v41, %v6746_v57  ;;  %v6766_v49 = vrot.slane %v6765_v24, 4  ;;  %v6775_v33 = vor.u32 %v6774_v29, %v6770_v55  ;;  %v6794_v2 = vrot.slane %v6792_v17, 5  ;;  %v16952_v57 = vld [vmem:[#allocation3 + $0x8c] sm:$0x1]  ;;  %v16964_v41 = vld [vmem:[#allocation3 + $0x98] sm:$0x1] }
 0x428   : > { %v6757_v56 = vsel %vm15087_vm11, %v6752_v8, %v6756_v44  ;;  %v6789_v9 = vor.u32 %v6788_v16, %v6785_v37  ;;  %v6796_v6 = vshrl.u32 %v16923_v5, 16  ;;  %v6802_v7 = vshll.u32 %v16932_v22, 16  ;;  %v16969_v37 = vld [vmem:[#allocation3 + $0x9c] sm:$0xf] }
 0x429   : > { %v11975_v53 = vcombine.low %v6747_v11, %v6757_v56  ;;  %v6771_v10 = vsel %vm15087_vm11, %v6766_v49, %v6770_v55  ;;  %v6776_v15 = vrot.slane %v6775_v33, 4  ;;  %v6807_v30 = vshrl.u32 %v16937_v13, 16 }
 0x42a   : > { %v6790_v43 = vrot.slane %v6789_v9, 4  ;;  %v6798_v25 = vrot.slane %v6796_v6, 4  ;;  %v6804_v31 = vrot.slane %v6802_v7, 5  ;;  %v6810_v32 = vshll.u32 %v16937_v13, 16 }
 0x42b   : > { %13327 = vmatprep.mubr.bf16.mxu1 %v11975_v53  ;;  %v6781_v38 = vsel %vm15087_vm11, %v6776_v15, %v6780_v21  ;;  %v6809_v40 = vrot.slane %v6807_v30, 4  ;;  %v6816_v44 = vshll.u32 %v16945_v45, 16  ;;  %v6820_v63 = vshrl.u32 %v16945_v45, 16  ;;  %v16976_v53 = vld [vmem:[#allocation3 + $0xa4] sm:$0x1] }
 0x42c   : > { %v11976_v52 = vcombine.low %v6771_v10, %v6781_v38  ;;  %v6795_v55 = vsel %vm15087_vm11, %v6790_v43, %v6794_v2  ;;  %v6799_v47 = vor.u32 %v6798_v25, %v6794_v2  ;;  %v6812_v61 = vrot.slane %v6810_v32, 5  ;;  %v16972_v2 = vld [vmem:[#allocation3 + $0xa0] sm:$0xf]  ;;  %v16979_v25 = vld [vmem:[#allocation3 + $0xa8] sm:$0xf] }
 0x42d   : > { %v6818_v60 = vrot.slane %v6816_v44, 5  ;;  %v6822_v20 = vrot.slane %v6820_v63, 4  ;;  %v6826_v28 = vshll.u32 %v16952_v57, 16  ;;  %v6831_v24 = vshrl.u32 %v16950_v58, 16 }
 0x42e   : > { %13328 = vmatmul.mubr.bf16.gmra.mrb[16].mxu1 %v11976_v52  ;;  %v6800_v29 = vrot.slane %v6799_v47, 4  ;;  %v6813_v17 = vor.u32 %v6812_v61, %v6809_v40  ;;  %v6834_v8 = vshll.u32 %v16950_v58, 16  ;;  %v6840_v21 = vshll.u32 %v16959_v27, 16  ;;  %v16988_v47 = vld [vmem:[#allocation3 + $0xac] sm:$0xf] }
 0x42f   : > { %v6823_v16 = vor.u32 %v6822_v20, %v6818_v60  ;;  %v6828_v11 = vrot.slane %v6826_v28, 5  ;;  %v6833_v49 = vrot.slane %v6831_v24, 4  ;;  %v6844_v33 = vshrl.u32 %v16959_v27, 16 }
 0x430   : > { %v6805_v56 = vsel %vm15087_vm11, %v6800_v29, %v6804_v31  ;;  %v6814_v9 = vrot.slane %v6813_v17, 4  ;;  %v6836_v6 = vrot.slane %v6834_v8, 5  ;;  %v6842_v7 = vrot.slane %v6840_v21, 5 }
 0x431   : > { %v11977_v10 = vcombine.low %v6795_v55, %v6805_v56  ;;  %v6824_v15 = vrot.slane %v6823_v16, 4  ;;  %v6846_v30 = vrot.slane %v6844_v33, 4  ;;  %v6850_v43 = vshll.u32 %v16964_v41, 16  ;;  %v16994_v16 = vld [vmem:[#allocation3 + $0xb4] sm:$0xf] }
 0x432   : > { %v6819_v32 = vsel %vm15087_vm11, %v6814_v9, %v6818_v60  ;;  %v6837_v38 = vor.u32 %v6836_v6, %v6833_v49  ;;  %v6855_v40 = vshrl.u32 %v16969_v37, 16  ;;  %v6858_v31 = vshll.u32 %v16969_v37, 16  ;;  %v16990_v60 = vld [vmem:[#allocation3 + $0xb0] sm:$0x1]  ;;  %v17000_v9 = vld [vmem:[#allocation3 + $0xb8] sm:$0xf] }
 0x433   : > { %13331 = vmatprep.mubr.bf16.mxu1 %v11977_v10  ;;  %v6829_v44 = vsel %vm15087_vm11, %v6824_v15, %v6828_v11  ;;  %v6847_v63 = vor.u32 %v6846_v30, %v6842_v7  ;;  %v6852_v52 = vrot.slane %v6850_v43, 5  ;;  %v6864_v55 = vshll.u32 %v16972_v2, 16 }
 0x434   : > { %v11978_v61 = vcombine.low %v6819_v32, %v6829_v44  ;;  %v6838_v20 = vrot.slane %v6837_v38, 4  ;;  %v6857_v28 = vrot.slane %v6855_v40, 4  ;;  %v6860_v24 = vrot.slane %v6858_v31, 5  ;;  %v17005_v31 = vld [vmem:[#allocation3 + $0xbc] sm:$0x1] }
 0x435   : > { %v6848_v29 = vrot.slane %v6847_v63, 4  ;;  %v6866_v17 = vrot.slane %v6864_v55, 5  ;;  %v6868_v8 = vshrl.u32 %v16972_v2, 16  ;;  %v6874_v21 = vshll.u32 %v16976_v53, 16 }
 0x436   : > { %13332 = vmatmul.mubr.bf16.gmra.mrb[20].mxu1 %v11978_v61  ;;  %v6843_v11 = vsel %vm15087_vm11, %v6838_v20, %v6842_v7  ;;  %v6861_v49 = vor.u32 %v6860_v24, %v6857_v28  ;;  %v6879_v33 = vshrl.u32 %v16979_v25, 16  ;;  %v6882_v56 = vshll.u32 %v16979_v25, 16 }
 0x437   : > { %v6853_v6 = vsel %vm15087_vm11, %v6848_v29, %v6852_v52  ;;  %v6870_v10 = vrot.slane %v6868_v8, 4  ;;  %v6876_v15 = vrot.slane %v6874_v21, 5  ;;  %v6888_v30 = vshll.u32 %v16988_v47, 16 }
 0x438   : > { %v11979_v43 = vcombine.low %v6843_v11, %v6853_v6  ;;  %v6862_v32 = vrot.slane %v6861_v49, 4  ;;  %v6881_v38 = vrot.slane %v6879_v33, 4  ;;  %v6884_v40 = vrot.slane %v6882_v56, 5 }
 0x439   : > { %v6871_v7 = vor.u32 %v6870_v10, %v6866_v17  ;;  %v6890_v44 = vrot.slane %v6888_v30, 5  ;;  %v6892_v63 = vshrl.u32 %v16988_v47, 16  ;;  %v6898_v55 = vshll.u32 %v16990_v60, 16 }
 0x43a   : > { %13335 = vmatprep.mubr.bf16.mxu1 %v11979_v43  ;;  %v6885_v61 = vor.u32 %v6884_v40, %v6881_v38  ;;  %v6903_v52 = vshrl.u32 %v16994_v16, 16  ;;  %v6906_v20 = vshll.u32 %v16994_v16, 16  ;;  %v6867_v28 = vsel %vm15087_vm11, %v6862_v32, %v6866_v17 }
 0x43b   : > { %v6872_v24 = vrot.slane %v6871_v7, 4  ;;  %v6894_v29 = vrot.slane %v6892_v63, 4  ;;  %v6912_v8 = vshll.u32 %v17000_v9, 16  ;;  %v6916_v33 = vshrl.u32 %v17000_v9, 16 }
 0x43c   : > { %v6886_v21 = vrot.slane %v6885_v61, 4  ;;  %v6905_v11 = vrot.slane %v6903_v52, 4  ;;  %v6908_v49 = vrot.slane %v6906_v20, 5  ;;  %v6922_v30 = vshll.u32 %v17005_v31, 16 }
 0x43d   : > { %v6877_v56 = vsel %vm15087_vm11, %v6872_v24, %v6876_v15  ;;  %v6895_v6 = vor.u32 %v6894_v29, %v6890_v44  ;;  %v6914_v10 = vrot.slane %v6912_v8, 5  ;;  %v6918_v40 = vrot.slane %v6916_v33, 4 }
 0x43e   : > { %v11980_v43 = vcombine.low %v6867_v28, %v6877_v56  ;;  %v6909_v38 = vor.u32 %v6908_v49, %v6905_v11  ;;  %v6900_v32 = vrot.slane %v6898_v55, 5  ;;  %v6891_v61 = vsel %vm15087_vm11, %v6886_v21, %v6890_v44  ;;  %v7531_v49 = vld [vmem:[#allocation3 + $0x78] sm:$0xe] }
 0x43f   : > { %v6896_v17 = vrot.slane %v6895_v6, 4  ;;  %v6919_v63 = vor.u32 %v6918_v40, %v6914_v10  ;;  %v6924_v20 = vrot.slane %v6922_v30, 5  ;;  %v11998_v28 = vcombine.low %v16868_v59, %v16883_v14  ;;  %v17042_v30 = vld [vmem:[#allocation3 + $0x4] sm:$0xf]  ;;  %v14589_v40 = vld [vmem:[#allocation3 + $0xc] sm:$0xf] }
 0x440   : > { %13336 = vmatmul.mubr.bf16.gmra.mrb[24].mxu1 %v11980_v43  ;;  %v6910_v7 = vrot.slane %v6909_v38, 4  ;;  %v11999_v55 = vcombine.low %v16889_v48, %v16896_v42  ;;  %v14455_v38 = vld [vmem:[#allocation9 + $0x90] sm:$0xff]   ;;  %v7630_v33 = vrot.slane %v16898_v1, 5  ;;  %v18508_v59 = vcombine.low %v16937_v13, %v16945_v45 }
 0x441   : > { %v6901_v52 = vsel %vm15087_vm11, %v6896_v17, %v6900_v32  ;;  %v6920_v29 = vrot.slane %v6919_v63, 4  ;;  %v17047_v17 = vld [vmem:[#allocation3 + $0x10] sm:$0xf]  ;;  %v7528_v63 = vld [vmem:[#allocation3 + $0x54] sm:$0xe]  ;;  %v7571_v48 = vrot.slane %v17042_v30, 5 }
 0x442   : > { %v11981_v15 = vcombine.low %v6891_v61, %v6901_v52  ;;  %v6915_v24 = vsel %vm15087_vm11, %v6910_v7, %v6914_v10  ;;  %v14587_v10 = vld [vmem:[#allocation3] sm:$0xf]  ;;  %v11992_v32 = vcombine.low %v14589_v40, %v17047_v17  ;;  %v14591_v61 = vld [vmem:[#allocation3 + $0x18] sm:$0xf]  ;;  %v17050_v52 = vld [vmem:[#allocation3 + $0x1c] sm:$0xf] }
 0x443   : > { %v6925_v11 = vsel %vm15087_vm11, %v6920_v29, %v6924_v20  ;;  %v11991_v43 = vcombine.low %v14587_v10, %v17042_v30  ;;  %v14452_v7 = vld [vmem:[#allocation9 + $0x88] sm:$0xff]   ;;  %v11993_v20 = vcombine.low %v14591_v61, %v17050_v52  ;;  %v12022_v29 = vrot.slane %v7528_v63, 9 }
 0x444   : > { %13339 = vmatprep.mubr.bf16.mxu1 %v11981_v15  ;;  %v11982_v6 = vcombine.low %v6915_v24, %v6925_v11  ;;  %v7529_v15 = vld [vmem:[#allocation3 + $0x60] sm:$0xe]  ;;  %v7620_v24 = vrot.slane %v16883_v14, 5  ;;  %v7627_v11 = vrot.slane %v16896_v42, 5  ;;  %v14593_v10 = vld [vmem:[#allocation3 + $0x24] sm:$0xf]  ;;  %v18509_v14 = vcombine.low %v16950_v58, %v16959_v27 }
 0x445   : > { %v7623_v61 = vrot.slane %v16887_v23, 5  ;;  %v7521_v42 = vld [vmem:[#allocation3] sm:$0xe]  ;;  %v7585_v58 = vrot.slane %v17050_v52, 5 }
 0x446   : > { %v7622_v56 = vrot.slane %v7620_v24, 4  ;;  %v7629_v63 = vrot.slane %v7627_v11, 4 }
 0x448   : > { %13340 = vmatmul.mubr.bf16.gmra.mrb[28].mxu1 %v11982_v6  ;;  %v7530_v6 = vld [vmem:[#allocation3 + $0x6c] sm:$0xe]  ;;  %v17080_v1 = vsel %vm15442_vm14, %v7629_v63, %v7630_v33 }
 0x449   : > { %13359 = vmatprep.mubr.bf16.mxu1 %v11991_v43  ;;  %v17056_v43 = vld [vmem:[#allocation3 + $0x28] sm:$0xf]  ;;  %v12024_v23 = vrot.slane %v7530_v6, 9 }
 0x44a   : > { %v11994_v40 = vcombine.low %v14593_v10, %v17056_v43  ;;  %v17069_v10 = vsel %vm15442_vm14, %v7622_v56, %v7623_v61  ;;  %v7641_v56 = vrot.slane %v16923_v5, 5  ;;  %v12025_v61 = vrot.slane %v7531_v49, 9 }
 0x44b   : > { %v7655_v49 = vrot.slane %v16959_v27, 5  ;;  %v7592_v52 = vrot.slane %v17056_v43, 5  ;;  %v14599_v43 = vld [vmem:[#allocation3 + $0x2c] sm:$0x1] }
 0x44c   : > { %v7643_v33 = vrot.slane %v7641_v56, 4 }
 0x450   : > { %13360 = vmatmul.mubr.bf16.vlgmr.msra.gmra.mrb[0].mxu1 %v11992_v32  ;;  %v12023_v32 = vrot.slane %v7529_v15, 9  ;;  %v7634_v15 = vrot.slane %v16905_v46, 5 }
 0x451   : > { %13363 = vmatprep.mubr.bf16.mxu1 %v11993_v20  ;;  %13392 = vmatpush3.bf16.msra.mxu1 %v16832_v19  ;;  %v11995_v20 = vcombine.low %v16785_v26, %v16791_v12  ;;  %v17064_v19 = vsel %vm15442_vm14, %v12022_v29, %v7620_v24  ;;  %v7532_v26 = vld [vmem:[#allocation3 + $0x84] sm:$0xe]  ;;  %v7637_v24 = vrot.slane %v16927_v36, 5  ;;  %v14458_v29 = vld [vmem:[#allocation9 + $0x98] sm:$0xff]   ;;  %v7648_v36 = vrot.slane %v16945_v45, 5 }
 0x452   : > { %13393 = vmatprep.subr.bf16.mxu1 %v14452_v7  ;;  %v17073_v21 = vsel %vm15442_vm14, %v12023_v32, %v7627_v11  ;;  %v7636_v6 = vrot.slane %v7634_v15, 4  ;;  %v7533_v32 = vld [vmem:[#allocation3 + $0x90] sm:$0xe]  ;;  %v17089_v12 = vsel %vm15442_vm14, %v12024_v23, %v7634_v15  ;;  %v12026_v63 = vrot.slane %v7532_v26, 9 }
 0x453   : > { %v17098_v11 = vsel %vm15442_vm14, %v12025_v61, %v7641_v56  ;;  %v7650_v15 = vrot.slane %v7648_v36, 4  ;;  %v12027_v26 = vrot.slane %v7533_v32, 9  ;;  %v11996_v56 = vcombine.low %v16805_v51, %v16821_v18  ;;  %v7535_v61 = vld [vmem:[#allocation3 + $0xa8] sm:$0xe]  ;;  %v14464_v32 = vld [vmem:[#allocation9 + $0xa8] sm:$0xff]  }
 0x454   : > { %v17094_v44 = vsel %vm15442_vm14, %v7636_v6, %v7637_v24  ;;  %v7534_v24 = vld [vmem:[#allocation3 + $0x9c] sm:$0xe]  ;;  %v17115_v23 = vsel %vm15442_vm14, %v12026_v63, %v7648_v36  ;;  %v7662_v18 = vrot.slane %v16972_v2, 5  ;;  %v7669_v63 = vrot.slane %v16988_v47, 5  ;;  %v7536_v36 = vld [vmem:[#allocation3 + $0xb4] sm:$0xe] }
 0x455   : > { %13394 = vmatpush3.bf16.msra.mxu1 %v14452_v7  ;;  %v7644_v7 = vrot.slane %v16932_v22, 5  ;;  %v7651_v22 = vrot.slane %v16952_v57, 5  ;;  %v14461_v6 = vld [vmem:[#allocation9 + $0xa0] sm:$0xff]   ;;  %v17123_v51 = vsel %vm15442_vm14, %v12027_v26, %v7655_v49  ;;  %v12029_v26 = vrot.slane %v7535_v61, 9 }
 0x456   : > { %13395 = vmatprep.subr.bf16.mxu1 %v14455_v38  ;;  %v11997_v57 = vcombine.low %v16838_v35, %v16842_v34  ;;  %v7671_v8 = vrot.slane %v7669_v63, 4  ;;  %v12030_v35 = vrot.slane %v7536_v36, 9  ;;  %v7578_v45 = vrot.slane %v17047_v17, 5 }
 0x458   : > { %13364 = vmatmul.mubr.bf16.gmra.mrb[4].mxu1 %v11994_v40  ;;  %v17106_v40 = vsel %vm15442_vm14, %v7643_v33, %v7644_v7  ;;  %v17119_v7 = vsel %vm15442_vm14, %v7650_v15, %v7651_v22  ;;  %v12028_v33 = vrot.slane %v7534_v24, 9  ;;  %v7664_v15 = vrot.slane %v7662_v18, 4 }
 0x459   : > { %13367 = vmatprep.mubr.bf16.mxu1 %v11995_v20  ;;  %13396 = vmatpush3.bf16.msra.mxu1 %v14455_v38  ;;  %v7657_v20 = vrot.slane %v7655_v49, 4  ;;  %v7658_v38 = vrot.slane %v16964_v41, 5  ;;  %v7665_v49 = vrot.slane %v16976_v53, 5  ;;  %v7676_v24 = vrot.slane %v17000_v9, 5 }
 0x45a   : > { %13397 = vmatprep.subr.bf16.mxu1 %v14458_v29  ;;  %v17150_v53 = vsel %vm15442_vm14, %v12029_v26, %v7669_v63  ;;  %v14467_v63 = vld [vmem:[#allocation9 + $0xb0] sm:$0xff]   ;;  %v7580_v30 = vrot.slane %v7578_v45, 4  ;;  %v14597_v26 = vld [vmem:[#allocation3 + $0x20] sm:$0x1] }
 0x45b   : > { %v17130_v41 = vsel %vm15442_vm14, %v7657_v20, %v7658_v38  ;;  %v7672_v20 = vrot.slane %v16990_v60, 5  ;;  %v17146_v38 = vsel %vm15442_vm14, %v7664_v15, %v7665_v49  ;;  %v7678_v22 = vrot.slane %v7676_v24, 4  ;;  %v7523_v49 = vld [vmem:[#allocation3 + $0x18] sm:$0xe] }
 0x45c   : > { %v7587_v15 = vrot.slane %v7585_v58, 4 }
 0x45d   : > { %13398 = vmatpush3.bf16.msra.mxu1 %v14458_v29  ;;  %v17142_v29 = vsel %vm15442_vm14, %v12028_v33, %v7662_v18  ;;  %v17156_v60 = vsel %vm15442_vm14, %v7671_v8, %v7672_v20  ;;  %v7679_v18 = vrot.slane %v17005_v31, 5  ;;  %v14470_v31 = vld [vmem:[#allocation9 + $0xb8] sm:$0xff]   ;;  %v7588_v20 = vrot.slane %v14597_v26, 5 }
 0x45e   : > { %13399 = vmatprep.subr.bf16.mxu1 %v14461_v6 }
 0x45f   : > { %v17167_v36 = vsel %vm15442_vm14, %v7678_v22, %v7679_v18  ;;  %v12015_v22 = vrot.slane %v7521_v42, 9  ;;  %v7589_v18 = vsel %vm15442_vm14, %v7587_v15, %v7588_v20  ;;  %v14474_v15 = vld [vmem:[#allocation9 + $0xd8] sm:$0xff]   ;;  %v14602_v20 = vld [vmem:[#allocation3 + $0x44] sm:$0x1] }
 0x460   : > { %13368 = vmatmul.mubr.bf16.gmra.mrb[8].mxu1 %v11996_v56  ;;  %v17163_v56 = vsel %vm15442_vm14, %v12030_v35, %v7676_v24  ;;  %v12017_v35 = vrot.slane %v7523_v49, 9  ;;  %v7526_v49 = vld [vmem:[#allocation3 + $0x3c] sm:$0xe] }
 0x461   : > { %13371 = vmatprep.mubr.bf16.mxu1 %v11997_v57  ;;  %13400 = vmatpush3.bf16.msra.mxu1 %v14461_v6  ;;  %v14471_v6 = vld [vmem:[#allocation9 + $0xc0] sm:$0xff]   ;;  %v18506_v57 = vcombine.low %v16900_v0, %v16905_v46  ;;  %v7573_v0 = vrot.slane %v7571_v48, 4  ;;  %v18510_v46 = vcombine.low %v16969_v37, %v16972_v2  ;;  %v18512_v37 = vcombine.low %v16994_v16, %v17000_v9  ;;  %v7522_v2 = vld [vmem:[#allocation3 + $0xc] sm:$0xe]  ;;  %v14598_v16 = vld [vmem:[#allocation3 + $0x34] sm:$0xf] }
 0x462   : > { %13401 = vmatprep.subr.bf16.mxu1 %v14464_v32  ;;  %v12016_v24 = vrot.slane %v7522_v2, 9  ;;  %v7599_v9 = vrot.slane %v14598_v16, 5 }
 0x464   : > { %v7601_v42 = vrot.slane %v7599_v9, 4 }
 0x465   : > { %13402 = vmatpush3.bf16.msra.mxu1 %v14464_v32  ;;  %v18507_v32 = vcombine.low %v16917_v39, %v16923_v5  ;;  %v18511_v39 = vcombine.low %v16979_v25, %v16988_v47  ;;  %v7572_v5 = vsel %vm15442_vm14, %v12015_v22, %v7571_v48  ;;  %v14596_v25 = vld [vmem:[#allocation3 + $0x14] sm:$0x1]  ;;  %v7524_v48 = vld [vmem:[#allocation3 + $0x24] sm:$0xe]  ;;  %v14600_v22 = vld [vmem:[#allocation3 + $0x38] sm:$0x1] }
 0x466   : > { %13403 = vmatprep.subr.bf16.mxu1 %v14467_v63  ;;  %v7581_v47 = vrot.slane %v14596_v25, 5 }
 0x468   : > { %13372 = vmatmul.mubr.bf16.gmra.mrb[12].mxu1 %v11998_v28  ;;  %v14595_v28 = vld [vmem:[#allocation3 + $0x8] sm:$0x1]  ;;  %v7582_v17 = vsel %vm15442_vm14, %v7580_v30, %v7581_v47  ;;  %v7613_v30 = vrot.slane %v16842_v34, 5  ;;  %v7616_v34 = vrot.slane %v16844_v62, 5  ;;  %v14476_v62 = vld [vmem:[#allocation9 + $0xe8] sm:$0xff]  }
 0x469   : > { %13375 = vmatprep.mubr.bf16.mxu1 %v11999_v55  ;;  %13404 = vmatpush3.bf16.msra.mxu1 %v14467_v63  ;;  %v7574_v55 = vrot.slane %v14595_v28, 5  ;;  %v7579_v63 = vsel %vm15442_vm14, %v12016_v24, %v7578_v45  ;;  %v7595_v28 = vrot.slane %v14599_v43, 5  ;;  %v7609_v24 = vrot.slane %v14602_v20, 5  ;;  %v9145_v43 = vld [vmem:[#allocation3 + $0x24] sm:$0xe] }
 0x46a   : > { %13405 = vmatprep.subr.bf16.mxu1 %v14470_v31  ;;  %v7615_v26 = vrot.slane %v7613_v30, 4 }
 0x46b   : > { %v7575_v13 = vsel %vm15442_vm14, %v7573_v0, %v7574_v55  ;;  %v7525_v55 = vld [vmem:[#allocation3 + $0x30] sm:$0xe]  ;;  %v7602_v0 = vrot.slane %v14600_v22, 5  ;;  %v17240_v22 = vld [vmem:[#allocation3 + $0x40] sm:$0xf] }
 0x46c   : > { %v12031_v27 = vcombine.low %v7572_v5, %v7575_v13  ;;  %v14601_v13 = vld [vmem:[#allocation3 + $0x40] sm:$0xf] }
 0x46d   : > { %13406 = vmatpush3.bf16.msra.mxu1 %v14470_v31  ;;  %v12032_v31 = vcombine.low %v7579_v63, %v7582_v17  ;;  %v7606_v45 = vrot.slane %v14601_v13, 5  ;;  %v7527_v17 = vld [vmem:[#allocation3 + $0x48] sm:$0xe]  ;;  %v18513_v13 = vcombine.low %v17064_v19, %v17069_v10  ;;  %v17259_v19 = vld [vmem:[#allocation9 + $0x100] sm:$0xff]  }
 0x46e   : > { %13439 = vmatprep.subr.bf16.mxu1 %v14471_v6  ;;  %v12021_v16 = vrot.slane %v7527_v17, 9  ;;  %v17261_v10 = vld [vmem:[#allocation3 + $0x5c] sm:$0x1]  ;;  %v9237_v17 = vrot.slane %v17240_v22, 5 }
 0x46f   : > { %v7608_v47 = vrot.slane %v7606_v45, 4 }
 0x470   : > { %13376 = vmatmul.mubr.bf16.gmra.mrb[16].mxu1 %v18506_v57  ;;  %v7586_v57 = vsel %vm15442_vm14, %v12017_v35, %v7585_v58  ;;  %v12019_v58 = vrot.slane %v7525_v55, 9  ;;  %v12020_v35 = vrot.slane %v7526_v49, 9  ;;  %v17238_v55 = vld [vmem:[#allocation3 + $0x38] sm:$0x1] }
 0x471   : > { %13379 = vmatprep.mubr.bf16.mxu1 %v18507_v32  ;;  %v14472_v32 = vld [vmem:[#allocation9 + $0xc8] sm:$0xff]  }
 0x472   : > { %v7600_v2 = vsel %vm15442_vm14, %v12019_v58, %v7599_v9  ;;  %v7617_v9 = vsel %vm15442_vm14, %v7615_v26, %v7616_v34  ;;  %v7607_v63 = vsel %vm15442_vm14, %v12020_v35, %v7606_v45  ;;  %v17250_v45 = vld [vmem:[#allocation3 + $0x50] sm:$0x1]  ;;  %v12105_v58 = vrot.slane %v9145_v43, 9  ;;  %v9149_v34 = vld [vmem:[#allocation3 + $0x54] sm:$0xe] }
 0x473   : > { %v17364_v26 = vld [vmem:[#allocation3 + $0xa0] sm:$0xf] }
 0x478   : > { %13380 = vmatmul.mubr.bf16.gmra.mrb[20].mxu1 %v18508_v59  ;;  %v12033_v59 = vcombine.low %v7586_v57, %v7589_v18  ;;  %v7610_v18 = vsel %vm15442_vm14, %v7608_v47, %v7609_v24  ;;  %v7614_v57 = vsel %vm15442_vm14, %v12021_v16, %v7613_v30 }
 0x479   : > { %13383 = vmatprep.mubr.bf16.mxu1 %v18509_v14  ;;  %v7594_v14 = vrot.slane %v7592_v52, 4 }
 0x47b   : > { %v7596_v5 = vsel %vm15442_vm14, %v7594_v14, %v7595_v28  ;;  %v17232_v14 = vld [vmem:[#allocation3 + $0x28] sm:$0xf]  ;;  %v14478_v28 = vld [vmem:[#allocation9 + $0xf8] sm:$0xff]  }
 0x480   : > { %13384 = vmatmul.mubr.bf16.gmra.mrb[24].mxu1 %v18510_v46  ;;  %v14473_v46 = vld [vmem:[#allocation9 + $0xd0] sm:$0xff]  }
 0x481   : > { %13387 = vmatprep.mubr.bf16.mxu1 %v18511_v39  ;;  %v12018_v39 = vrot.slane %v7524_v48, 9  ;;  %v17234_v48 = vld [vmem:[#allocation3 + $0x2c] sm:$0x1] }
 0x482   : > { %v9226_v30 = vrot.slane %v17234_v48, 5 }
 0x488   : > { %13388 = vmatmul.mubr.bf16.gmra.mrb[28].mxu1 %v18512_v37 }
 0x489   : > { %13407 = vmatprep.mubr.bf16.mxu1 %v12031_v27  ;;  %v7603_v27 = vsel %vm15442_vm14, %v7601_v42, %v7602_v0  ;;  %v17236_v42 = vld [vmem:[#allocation3 + $0x34] sm:$0xf]  ;;  %v9223_v0 = vrot.slane %v17232_v14, 5 }
 0x48a   : > { %v12035_v25 = vcombine.low %v7600_v2, %v7603_v27  ;;  %v17256_v2 = vld [vmem:[#allocation3 + $0x58] sm:$0xf] }
 0x48b   : > { %v9225_v27 = vrot.slane %v9223_v0, 4  ;;  %v17265_v47 = vsel %vm15442_vm14, %v12105_v58, %v9223_v0  ;;  %v12109_v0 = vrot.slane %v9149_v34, 9  ;;  %v18520_v34 = vcombine.low %v17098_v11, %v17106_v40 }
 0x48d   : > { %v17269_v49 = vsel %vm15442_vm14, %v9225_v27, %v9226_v30  ;;  %v9254_v30 = vrot.slane %v17261_v10, 5 }
 0x490   : > { %13408 = vmatmul.mubr.bf16.vlgmr.msra.gmra.mrb[0].mxu1 %v12032_v31  ;;  %v12036_v31 = vcombine.low %v7607_v63, %v7610_v18 }
 0x491   : > { %13411 = vmatprep.mubr.bf16.mxu1 %v12033_v59  ;;  %13440 = vmatpush3.bf16.msra.mxu1 %v14471_v6  ;;  %v7593_v6 = vsel %vm15442_vm14, %v12018_v39, %v7592_v52  ;;  %v14475_v52 = vld [vmem:[#allocation9 + $0xe0] sm:$0xff]   ;;  %v14477_v59 = vld [vmem:[#allocation9 + $0xf0] sm:$0xff]  }
 0x492   : > { %13441 = vmatprep.subr.bf16.mxu1 %v14472_v32  ;;  %v12034_v37 = vcombine.low %v7593_v6, %v7596_v5  ;;  %v17245_v39 = vld [vmem:[#allocation3 + $0x4c] sm:$0xf]  ;;  %v9146_v5 = vld [vmem:[#allocation3 + $0x30] sm:$0xe]  ;;  %v9147_v6 = vld [vmem:[#allocation3 + $0x3c] sm:$0xe] }
 0x493   : > { %v12107_v24 = vrot.slane %v9147_v6, 9 }
 0x495   : > { %13442 = vmatpush3.bf16.msra.mxu1 %v14472_v32  ;;  %v12037_v32 = vcombine.low %v7614_v57, %v7617_v9  ;;  %v9244_v9 = vrot.slane %v17245_v39, 5  ;;  %v9239_v57 = vrot.slane %v9237_v17, 4 }
 0x496   : > { %13443 = vmatprep.subr.bf16.mxu1 %v14473_v46 }
 0x498   : > { %13412 = vmatmul.mubr.bf16.gmra.mrb[4].mxu1 %v12034_v37  ;;  %v18514_v37 = vcombine.low %v17073_v21, %v17080_v1  ;;  %v12106_v21 = vrot.slane %v9146_v5, 9  ;;  %v9233_v1 = vrot.slane %v17238_v55, 5  ;;  %v9251_v5 = vrot.slane %v17256_v2, 5 }
 0x499   : > { %13415 = vmatprep.mubr.bf16.mxu1 %v12035_v25  ;;  %13444 = vmatpush3.bf16.msra.mxu1 %v14473_v46  ;;  %v17243_v46 = vld [vmem:[#allocation3 + $0x44] sm:$0x1]  ;;  %v9148_v25 = vld [vmem:[#allocation3 + $0x48] sm:$0xe] }
 0x49a   : > { %13445 = vmatprep.subr.bf16.mxu1 %v14474_v15  ;;  %v9240_v18 = vrot.slane %v17243_v46, 5  ;;  %v12108_v16 = vrot.slane %v9148_v25, 9  ;;  %v17313_v25 = vld [vmem:[#allocation3 + $0x7c] sm:$0xf] }
 0x49c   : > { %v17302_v58 = vsel %vm15442_vm14, %v9239_v57, %v9240_v18  ;;  %v17306_v27 = vsel %vm15442_vm14, %v12108_v16, %v9244_v9  ;;  %v17324_v18 = vld [vmem:[#allocation3 + $0x74] sm:$0x1]  ;;  %v17332_v16 = vsel %vm15442_vm14, %v12109_v0, %v9251_v5  ;;  %v17348_v0 = vld [vmem:[#allocation3 + $0x8c] sm:$0x1] }
 0x49d   : > { %13446 = vmatpush3.bf16.msra.mxu1 %v14474_v15  ;;  %v9230_v15 = vrot.slane %v17236_v42, 5  ;;  %18516 = vst [vmem:[#allocation28_spill] sm:$0xff] %v17302_v58  ;;  %18517 = vst [vmem:[#allocation17_spill] sm:$0xff] %v17306_v27  ;;  %v9268_v43 = vrot.slane %v17324_v18, 5  ;;  %v9282_v33 = vrot.slane %v17348_v0, 5 }
 0x49e   : > { %13447 = vmatprep.subr.bf16.mxu1 %v14475_v52  ;;  %18521 = vst [vmem:[#allocation19_spill] sm:$0xff] %v17332_v16  ;;  %v9156_v27 = vld [vmem:[#allocation3 + $0xa8] sm:$0xe]  ;;  %v10789_v58 = vld [vmem:[#allocation3 + $0x6c] sm:$0xe] }
 0x49f   : > { %v9232_v20 = vrot.slane %v9230_v15, 4  ;;  %v17279_v35 = vsel %vm15442_vm14, %v12106_v21, %v9230_v15  ;;  %v18518_v15 = vcombine.low %v17089_v12, %v17094_v44  ;;  %v17326_v44 = vld [vmem:[#allocation3 + $0x80] sm:$0x1]  ;;  %v8424_v21 = vld [vmem:[#allocation3 + $0x98] sm:$0x1] }
 0x4a0   : > { %13416 = vmatmul.mubr.bf16.gmra.mrb[8].mxu1 %v12036_v31  ;;  %v17289_v31 = vsel %vm15442_vm14, %v12107_v24, %v9237_v17  ;;  %v9152_v17 = vld [vmem:[#allocation3 + $0x78] sm:$0xe] }
 0x4a1   : > { %13419 = vmatprep.mubr.bf16.mxu1 %v12037_v32  ;;  %13448 = vmatpush3.bf16.msra.mxu1 %v14475_v52  ;;  %v17275_v52 = vld [vmem:[#allocation3 + $0x64] sm:$0xf]  ;;  %v17285_v63 = vsel %vm15442_vm14, %v9232_v20, %v9233_v1  ;;  %18515 = vst [vmem:[#allocation25_spill] sm:$0xff] %v17289_v31  ;;  %v9150_v32 = vld [vmem:[#allocation3 + $0x60] sm:$0xe]  ;;  %v9253_v20 = vrot.slane %v9251_v5, 4 }
 0x4a2   : > { %13449 = vmatprep.subr.bf16.mxu1 %v14476_v62  ;;  %v9258_v6 = vrot.slane %v17275_v52, 5  ;;  %v12110_v24 = vrot.slane %v9150_v32, 9  ;;  %v17337_v32 = vld [vmem:[#allocation3 + $0x94] sm:$0xf]  ;;  %v12112_v12 = vrot.slane %v9152_v17, 9 }
 0x4a3   : > { %v17341_v11 = vsel %vm15442_vm14, %v9253_v20, %v9254_v30  ;;  %v9272_v30 = vrot.slane %v17313_v25, 5  ;;  %v9153_v20 = vld [vmem:[#allocation3 + $0x84] sm:$0xe]  ;;  %v9154_v5 = vld [vmem:[#allocation3 + $0x90] sm:$0xe]  ;;  %v9286_v61 = vrot.slane %v17337_v32, 5 }
 0x4a4   : > { %18522 = vst [vmem:[#allocation20_spill] sm:$0xff] %v17341_v11  ;;  %v17345_v40 = vsel %vm15442_vm14, %v12110_v24, %v9258_v6  ;;  %v9155_v11 = vld [vmem:[#allocation3 + $0x9c] sm:$0xe]  ;;  %v10051_v31 = vld [vmem:[#allocation3 + $0x74] sm:$0x1] }
 0x4a5   : > { %13450 = vmatpush3.bf16.msra.mxu1 %v14476_v62  ;;  %v9247_v62 = vrot.slane %v17250_v45, 5  ;;  %18523 = vst [vmem:[#allocation21_spill] sm:$0xff] %v17345_v40  ;;  %v17368_v17 = vsel %vm15442_vm14, %v12112_v12, %v9272_v30  ;;  %v12114_v40 = vrot.slane %v9154_v5, 9  ;;  %v9288_v16 = vrot.slane %v9286_v61, 4 }
 0x4a6   : > { %13451 = vmatprep.subr.bf16.mxu1 %v14477_v59  ;;  %18526 = vst [vmem:[#allocation24_spill] sm:$0xff] %v17368_v17  ;;  %v18530_v12 = vcombine.low %v17123_v51, %v17130_v41 }
 0x4a8   : > { %13420 = vmatmul.mubr.bf16.gmra.mrb[12].mxu1 %v18513_v13  ;;  %v17298_v13 = vld [vmem:[#allocation3 + $0x70] sm:$0xf] }
 0x4a9   : > { %13423 = vmatprep.mubr.bf16.mxu1 %v18514_v37  ;;  %13452 = vmatpush3.bf16.msra.mxu1 %v14477_v59  ;;  %v17293_v59 = vld [vmem:[#allocation3 + $0x68] sm:$0x1]  ;;  %v9151_v37 = vld [vmem:[#allocation3 + $0x6c] sm:$0xe] }
 0x4aa   : > { %13453 = vmatprep.subr.bf16.mxu1 %v14478_v28  ;;  %v9261_v57 = vrot.slane %v17293_v59, 5 }
 0x4ad   : > { %13454 = vmatpush3.bf16.msra.mxu1 %v14478_v28  ;;  %v9246_v28 = vrot.slane %v9244_v9, 4  ;;  %v9260_v9 = vrot.slane %v9258_v6, 4  ;;  %v8427_v6 = vld [vmem:[#allocation3 + $0xa4] sm:$0x1] }
 0x4ae   : > { %13487 = vmatprep.subr.bf16.mxu1 %v17259_v19 }
 0x4af   : > { %v17319_v1 = vsel %vm15442_vm14, %v9246_v28, %v9247_v62  ;;  %v17335_v62 = vld [vmem:[#allocation3 + $0x88] sm:$0xf]  ;;  %v12111_v28 = vrot.slane %v9151_v37, 9 }
 0x4b0   : > { %13424 = vmatmul.mubr.bf16.gmra.mrb[16].mxu1 %v18518_v15  ;;  %18519 = vst [vmem:[#allocation18_spill] sm:$0xff] %v17319_v1  ;;  %v9265_v15 = vrot.slane %v17298_v13, 5  ;;  %v9279_v8 = vrot.slane %v17335_v62, 5  ;;  %v9289_v1 = vrot.slane %v8424_v21, 5  ;;  %v9293_v21 = vrot.slane %v17364_v26, 5 }
 0x4b1   : > { %13427 = vmatprep.mubr.bf16.mxu1 %v18520_v34  ;;  %v17354_v34 = vsel %vm15442_vm14, %v9260_v9, %v9261_v57  ;;  %v9274_v9 = vrot.slane %v9272_v30, 4  ;;  %v9275_v57 = vrot.slane %v17326_v44, 5 }
 0x4b2   : > { %18524 = vst [vmem:[#allocation22_spill] sm:$0xff] %v17354_v34  ;;  %v17361_v37 = vsel %vm15442_vm14, %v12111_v28, %v9265_v15  ;;  %v9267_v24 = vrot.slane %v9265_v15, 4  ;;  %v12113_v15 = vrot.slane %v9153_v20, 9  ;;  %v9281_v34 = vrot.slane %v9279_v8, 4  ;;  %v8430_v20 = vld [vmem:[#allocation3 + $0xb0] sm:$0x1] }
 0x4b3   : > { %18525 = vst [vmem:[#allocation23_spill] sm:$0xff] %v17361_v37  ;;  %v17382_v30 = vsel %vm15442_vm14, %v9274_v9, %v9275_v57  ;;  %v17392_v9 = vld [vmem:[#allocation3 + $0xb8] sm:$0xf]  ;;  %v8433_v57 = vld [vmem:[#allocation3 + $0xbc] sm:$0x1]  ;;  %v17411_v41 = vsel %vm15442_vm14, %v9288_v16, %v9289_v1  ;;  %v9303_v51 = vrot.slane %v8430_v20, 5 }
 0x4b4   : > { %v17374_v28 = vsel %vm15442_vm14, %v9267_v24, %v9268_v43  ;;  %18528 = vst [vmem:[#allocation27_spill] sm:$0xff] %v17382_v30  ;;  %v18529_v43 = vcombine.low %v17115_v23, %v17119_v7  ;;  %v17396_v5 = vsel %vm15442_vm14, %v12113_v15, %v9279_v8  ;;  %v17400_v23 = vsel %vm15442_vm14, %v9281_v34, %v9282_v33  ;;  %v8436_v24 = vld [vmem:[#allocation3 + $0xc8] sm:$0x1]  ;;  %v9158_v1 = vld [vmem:[#allocation3 + $0xc0] sm:$0xe] }
 0x4b5   : > { %18527 = vst [vmem:[#allocation26_spill] sm:$0xff] %v17374_v28  ;;  %18531 = vst [vmem:[#allocation29_spill] sm:$0xff] %v17396_v5  ;;  %v17404_v7 = vsel %vm15442_vm14, %v12114_v40, %v9286_v61  ;;  %v12115_v8 = vrot.slane %v9155_v11, 9  ;;  %v9300_v15 = vrot.slane %v8429_v54, 5  ;;  %v9295_v34 = vrot.slane %v9293_v21, 4  ;;  %v14486_v33 = vld [vmem:[#allocation3 + $0x48] sm:$0xff]  }
 0x4b6   : > { %18532 = vst [vmem:[#allocation16_spill] sm:$0xff] %v17400_v23  ;;  %18533 = vst [vmem:[#allocation15_spill] sm:$0xff] %v17404_v7  ;;  %v9296_v61 = vrot.slane %v8427_v6, 5  ;;  %v12116_v40 = vrot.slane %v9156_v27, 9  ;;  %v9307_v23 = vrot.slane %v17392_v9, 5  ;;  %v8523_v7 = vshrl.u32 %v17236_v42, 16 }
 0x4b7   : > { %18534 = vst [vmem:[#allocation30_spill] sm:$0xff] %v17411_v41  ;;  %v17417_v30 = vsel %vm15442_vm14, %v12115_v8, %v9293_v21  ;;  %v9302_v17 = vrot.slane %v9300_v15, 4  ;;  %v9310_v8 = vrot.slane %v8433_v57, 5  ;;  %v9317_v41 = vrot.slane %v8436_v24, 5  ;;  %v17468_v27 = vld [vmem:[#allocation3 + $0x14] sm:$0x1] }
 0x4b8   : > { %13428 = vmatmul.mubr.bf16.gmra.mrb[20].mxu1 %v18529_v43  ;;  %v8435_v43 = vld [vmem:[#allocation3 + $0xc4] sm:$0xf]  ;;  %18535 = vst [vmem:[#allocation31_spill] sm:$0xff] %v17417_v30  ;;  %v17422_v54 = vsel %vm15442_vm14, %v9295_v34, %v9296_v61  ;;  %v17426_v16 = vsel %vm15442_vm14, %v12116_v40, %v9300_v15  ;;  %v9309_v20 = vrot.slane %v9307_v23, 4  ;;  %v12118_v34 = vrot.slane %v9158_v1, 9  ;;  %v14487_v1 = vld [vmem:[#allocation9 + $0x110] sm:$0xff]  }
 0x4b9   : > { %13431 = vmatprep.mubr.bf16.mxu1 %v18530_v12  ;;  %v9157_v12 = vld [vmem:[#allocation3 + $0xb4] sm:$0xe]  ;;  %18536 = vst [vmem:[#allocation32_spill] sm:$0xff] %v17422_v54  ;;  %18537 = vst [vmem:[#allocation33_spill] sm:$0xff] %v17426_v16  ;;  %v9314_v6 = vrot.slane %v8435_v43, 5  ;;  %v17432_v21 = vsel %vm15442_vm14, %v9302_v17, %v9303_v51  ;;  %v18539_v15 = vcombine.low %v17142_v29, %v17146_v38  ;;  %v14482_v40 = vld [vmem:[#allocation3 + $0x24] sm:$0xff]  }
 0x4ba   : > { %v12117_v11 = vrot.slane %v9157_v12, 9  ;;  %18538 = vst [vmem:[#allocation34_spill] sm:$0xff] %v17432_v21  ;;  %v17445_v17 = vsel %vm15442_vm14, %v9309_v20, %v9310_v8  ;;  %v18542_v57 = vcombine.low %v17150_v53, %v17156_v60  ;;  %v18545_v12 = vcombine.low %v17163_v56, %v17167_v36  ;;  %v14480_v53 = vld [vmem:[#allocation3 + $0x18] sm:$0xff]   ;;  %v14484_v60 = vld [vmem:[#allocation9 + $0x108] sm:$0xff]   ;;  %v14483_v8 = vld [vmem:[#allocation3 + $0x30] sm:$0xff]  }
 0x4bb   : > { %v9316_v61 = vrot.slane %v9314_v6, 4  ;;  %18541 = vst [vmem:[#allocation36_spill] sm:$0xff] %v17445_v17  ;;  %v17454_v24 = vsel %vm15442_vm14, %v12118_v34, %v9314_v6  ;;  %v14485_v34 = vld [vmem:[#allocation3 + $0x3c] sm:$0xff]   ;;  %v14490_v56 = vld [vmem:[#allocation9 + $0x118] sm:$0xff]   ;;  %v17654_v37 = vld [vmem:[#allocation3 + $0x64] sm:$0xf] }
 0x4bc   : > { %v17441_v43 = vsel %vm15442_vm14, %v12117_v11, %v9307_v23  ;;  %18543 = vst [vmem:[#allocation37_spill] sm:$0xff] %v17454_v24  ;;  %v14479_v23 = vld [vmem:[#allocation3 + $0xc] sm:$0xff]   ;;  %v8395_v24 = vld [vmem:[#allocation3 + $0x24] sm:$0xf]  ;;  %v8401_v16 = vld [vmem:[#allocation3 + $0x3c] sm:$0xf] }
 0x4bd   : > { %18540 = vst [vmem:[#allocation35_spill] sm:$0xff] %v17441_v43  ;;  %v17458_v29 = vsel %vm15442_vm14, %v9316_v61, %v9317_v41  ;;  %v8389_v41 = vld [vmem:[#allocation3 + $0xc] sm:$0xf]  ;;  %v8390_v11 = vld [vmem:[#allocation3 + $0x10] sm:$0xf]  ;;  %v8486_v17 = vshrl.u32 %v8395_v24, 16 }
 0x4be   : > { %18544 = vst [vmem:[#allocation38_spill] sm:$0xff] %v17458_v29  ;;  %v8438_v6 = vshrl.u32 %v8389_v41, 16  ;;  %v8441_v20 = vshll.u32 %v8389_v41, 16  ;;  %v8447_v36 = vshll.u32 %v8390_v11, 16  ;;  %v8451_v61 = vshrl.u32 %v8390_v11, 16  ;;  %v14488_v29 = vld [vmem:[#allocation3 + $0x54] sm:$0xff]  }
 0x4bf   : > { %v14492_v28 = vld [vmem:[#allocation3 + $0x78] sm:$0xff]   ;;  %18561 = vst [vmem:[#allocation54_spill] sm:$0xff] %v17654_v37 }
 0x4c0   : > { %13432 = vmatmul.mubr.bf16.gmra.mrb[24].mxu1 %v18539_v15  ;;  %v8392_v15 = vld [vmem:[#allocation3 + $0x18] sm:$0xf]  ;;  %v17466_v38 = vrot.slane %v8447_v36, 5  ;;  %v8453_v41 = vrot.slane %v8451_v61, 4  ;;  %v8495_v61 = vshll.u32 %v17232_v14, 16 }
 0x4c1   : > { %13435 = vmatprep.mubr.bf16.mxu1 %v18542_v57  ;;  %v8393_v57 = vld [vmem:[#allocation3 + $0x1c] sm:$0xf] }
 0x4c2   : > { %v8475_v51 = vshrl.u32 %v8393_v57, 16  ;;  %v17480_v21 = vrot.slane %v8495_v61, 5 }
 0x4c4   : > { %v8477_v36 = vrot.slane %v8475_v51, 4 }
 0x4c8   : > { %13436 = vmatmul.mubr.bf16.gmra.mrb[28].mxu1 %v18545_v12  ;;  %v14493_v12 = vld [vmem:[#allocation9 + $0x120] sm:$0xff]  }
 0x4c9   : > { %13455 = vmatprep.mubr.bf16.mxu1 %v14479_v23  ;;  %v8440_v23 = vrot.slane %v8438_v6, 4 }
 0x4d0   : > { %13456 = vmatmul.mubr.bf16.vlgmr.msra.gmra.mrb[0].mxu1 %v14480_v53  ;;  %v8462_v53 = vshrl.u32 %v8392_v15, 16 }
 0x4d1   : > { %13459 = vmatprep.mubr.bf16.mxu1 %v14482_v40  ;;  %13488 = vmatpush3.bf16.msra.mxu1 %v17259_v19  ;;  %v8443_v19 = vrot.slane %v8441_v20, 5  ;;  %v8465_v40 = vshll.u32 %v8392_v15, 16  ;;  %v8454_v15 = vor.u32 %v8453_v41, %v17466_v38  ;;  %v8489_v41 = vshll.u32 %v8395_v24, 16 }
 0x4d2   : > { %13489 = vmatprep.subr.bf16.mxu1 %v14484_v60 }
 0x4d3   : > { %v8444_v11 = vor.u32 %v8443_v19, %v8440_v23  ;;  %v8467_v6 = vrot.slane %v8465_v40, 5  ;;  %v8457_v23 = vshll.u32 %v17468_v27, 16  ;;  %v8398_v19 = vld [vmem:[#allocation3 + $0x30] sm:$0xf]  ;;  %v8455_v51 = vrot.slane %v8454_v15, 4 }
 0x4d4   : > { %v8488_v15 = vrot.slane %v8486_v17, 4  ;;  %v8491_v30 = vrot.slane %v8489_v41, 5  ;;  %v8534_v17 = vshrl.u32 %v8401_v16, 16  ;;  %v8547_v41 = vshrl.u32 %v17240_v22, 16 }
 0x4d5   : > { %13490 = vmatpush3.bf16.msra.mxu1 %v14484_v60  ;;  %v8471_v60 = vshll.u32 %v8393_v57, 16  ;;  %v8445_v57 = vrot.slane %v8444_v11, 4  ;;  %v8459_v11 = vrot.slane %v8457_v23, 5 }
 0x4d6   : > { %13491 = vmatprep.subr.bf16.mxu1 %v14487_v1 }
 0x4d7   : > { %v17472_v20 = vrot.slane %v8471_v60, 5  ;;  %v8460_v61 = vsel %vm15087_vm11, %v8455_v51, %v8459_v11  ;;  %v8492_v11 = vor.u32 %v8491_v30, %v8488_v15  ;;  %v8536_v30 = vrot.slane %v8534_v17, 4 }
 0x4d8   : > { %13460 = vmatmul.mubr.bf16.gmra.mrb[4].mxu1 %v14483_v8  ;;  %v14496_v8 = vld [vmem:[#allocation9 + $0x128] sm:$0xff]   ;;  %v8529_v17 = vshll.u32 %v17238_v55, 16 }
 0x4d9   : > { %13463 = vmatprep.mubr.bf16.mxu1 %v14485_v34  ;;  %13492 = vmatpush3.bf16.msra.mxu1 %v14487_v1  ;;  %v17470_v34 = vld [vmem:[#allocation3 + $0x20] sm:$0x1]  ;;  %v8464_v1 = vrot.slane %v8462_v53, 4  ;;  %v14499_v53 = vld [vmem:[#allocation9 + $0x130] sm:$0xff]   ;;  %v8478_v43 = vor.u32 %v8477_v36, %v17472_v20 }
 0x4da   : > { %13493 = vmatprep.subr.bf16.mxu1 %v14490_v56  ;;  %v8481_v60 = vshll.u32 %v17470_v34, 16  ;;  %v14491_v36 = vld [vmem:[#allocation3 + $0x6c] sm:$0xff]  }
 0x4db   : > { %v8468_v40 = vor.u32 %v8467_v6, %v8464_v1  ;;  %v14489_v1 = vld [vmem:[#allocation3 + $0x60] sm:$0xff]   ;;  %v14502_v6 = vld [vmem:[#allocation9 + $0x138] sm:$0xff]  }
 0x4dc   : > { %v8483_v24 = vrot.slane %v8481_v60, 5  ;;  %v8543_v60 = vshll.u32 %v17240_v22, 16 }
 0x4dd   : > { %13494 = vmatpush3.bf16.msra.mxu1 %v14490_v56  ;;  %v8499_v56 = vshrl.u32 %v17232_v14, 16  ;;  %v8469_v54 = vrot.slane %v8468_v40, 4  ;;  %v8537_v40 = vshll.u32 %v8401_v16, 16 }
 0x4de   : > { %13495 = vmatprep.subr.bf16.mxu1 %v14493_v12  ;;  %v17506_v5 = vrot.slane %v8543_v60, 5 }
 0x4df   : > { %v8501_v14 = vrot.slane %v8499_v56, 4  ;;  %v8479_v56 = vrot.slane %v8478_v43, 4  ;;  %v8404_v43 = vld [vmem:[#allocation3 + $0x48] sm:$0xf]  ;;  %v8539_v15 = vrot.slane %v8537_v40, 5 }
 0x4e0   : > { %13464 = vmatmul.mubr.bf16.gmra.mrb[8].mxu1 %v14486_v33  ;;  %v8510_v33 = vshrl.u32 %v8398_v19, 16 }
 0x4e1   : > { %13467 = vmatprep.mubr.bf16.mxu1 %v14488_v29  ;;  %13496 = vmatpush3.bf16.msra.mxu1 %v14493_v12  ;;  %v8513_v29 = vshll.u32 %v8398_v19, 16  ;;  %v8450_v12 = vsel %vm15087_vm11, %v8445_v57, %v17466_v38  ;;  %v8519_v19 = vshll.u32 %v17236_v42, 16  ;;  %v8505_v38 = vshll.u32 %v17234_v48, 16 }
 0x4e2   : > { %13497 = vmatprep.subr.bf16.mxu1 %v14496_v8  ;;  %v8512_v57 = vrot.slane %v8510_v33, 4  ;;  %v17493_v51 = vcombine.low %v8450_v12, %v8460_v61  ;;  %v8567_v48 = vshll.u32 %v17245_v39, 16  ;;  %v8571_v33 = vshrl.u32 %v17245_v39, 16 }
 0x4e3   : > { %v8515_v23 = vrot.slane %v8513_v29, 5  ;;  %v8474_v42 = vsel %vm15087_vm11, %v8469_v54, %v17472_v20  ;;  %v8484_v16 = vsel %vm15087_vm11, %v8479_v56, %v8483_v24  ;;  %v17504_v22 = vrot.slane %v8519_v19, 5  ;;  %v8407_v29 = vld [vmem:[#allocation3 + $0x54] sm:$0xf] }
 0x4e4   : > { %v8561_v61 = vshll.u32 %v8404_v43, 16  ;;  %v8549_v39 = vrot.slane %v8547_v41, 4  ;;  %v17509_v54 = vrot.slane %v8567_v48, 5  ;;  %v8573_v20 = vrot.slane %v8571_v33, 4 }
 0x4e5   : > { %13498 = vmatpush3.bf16.msra.mxu1 %v14496_v8  ;;  %v8502_v8 = vor.u32 %v8501_v14, %v17480_v21  ;;  %v17495_v14 = vld [vmem:[#allocation9 + $0x140] sm:$0xff]   ;;  %v8516_v12 = vor.u32 %v8515_v23, %v8512_v57  ;;  %v8582_v24 = vshrl.u32 %v8407_v29, 16  ;;  %v8585_v56 = vshll.u32 %v8407_v29, 16 }
 0x4e6   : > { %13499 = vmatprep.subr.bf16.mxu1 %v14499_v53  ;;  %v8493_v19 = vrot.slane %v8492_v11, 4  ;;  %v8507_v57 = vrot.slane %v8505_v38, 5  ;;  %v8563_v60 = vrot.slane %v8561_v61, 5  ;;  %v17515_v41 = vcombine.low %v8474_v42, %v8484_v16  ;;  %v8410_v16 = vld [vmem:[#allocation3 + $0x60] sm:$0xf] }
 0x4e7   : > { %v8540_v48 = vor.u32 %v8539_v15, %v8536_v30  ;;  %v8550_v33 = vor.u32 %v8549_v39, %v17506_v5  ;;  %v8574_v11 = vor.u32 %v8573_v20, %v17509_v54  ;;  %v8553_v29 = vshll.u32 %v17243_v46, 16 }
 0x4e8   : > { %13468 = vmatmul.mubr.bf16.gmra.mrb[12].mxu1 %v14489_v1  ;;  %v8525_v1 = vrot.slane %v8523_v7, 4  ;;  %v8591_v7 = vshll.u32 %v17256_v2, 16  ;;  %v8498_v55 = vsel %vm15087_vm11, %v8493_v19, %v17480_v21  ;;  %v8577_v30 = vshll.u32 %v17250_v45, 16  ;;  %v14495_v21 = vld [vmem:[#allocation3 + $0x90] sm:$0xff]   ;;  %v8413_v19 = vld [vmem:[#allocation3 + $0x6c] sm:$0xf] }
 0x4e9   : > { %13471 = vmatprep.mubr.bf16.mxu1 %v14491_v36  ;;  %13500 = vmatpush3.bf16.msra.mxu1 %v14499_v53  ;;  %v8503_v53 = vrot.slane %v8502_v8, 4  ;;  %v8558_v36 = vshrl.u32 %v8404_v43, 16  ;;  %v14494_v8 = vld [vmem:[#allocation3 + $0x84] sm:$0xff]   ;;  %v8517_v43 = vrot.slane %v8516_v12, 4  ;;  %v8541_v39 = vrot.slane %v8540_v48, 4 }
 0x4ea   : > { %13501 = vmatprep.subr.bf16.mxu1 %v14502_v6  ;;  %v8526_v23 = vor.u32 %v8525_v1, %v17504_v22  ;;  %v17525_v1 = vrot.slane %v8591_v7, 5  ;;  %v8551_v20 = vrot.slane %v8550_v33, 4  ;;  %v8555_v7 = vrot.slane %v8553_v29, 5 }
 0x4eb   : > { %v8560_v40 = vrot.slane %v8558_v36, 4  ;;  %v8508_v38 = vsel %vm15087_vm11, %v8503_v53, %v8507_v57  ;;  %v8531_v36 = vrot.slane %v8529_v17, 5  ;;  %v8522_v15 = vsel %vm15087_vm11, %v8517_v43, %v17504_v22  ;;  %v14497_v57 = vld [vmem:[#allocation3 + $0x9c] sm:$0xff]  }
 0x4ec   : > { %v8527_v12 = vrot.slane %v8526_v23, 4  ;;  %v17528_v53 = vcombine.low %v8498_v55, %v8508_v38  ;;  %v8615_v45 = vshll.u32 %v17275_v52, 16  ;;  %v8619_v23 = vshrl.u32 %v17275_v52, 16 }
 0x4ed   : > { %13502 = vmatpush3.bf16.msra.mxu1 %v14502_v6  ;;  %v8595_v6 = vshrl.u32 %v17256_v2, 16  ;;  %v8584_v2 = vrot.slane %v8582_v24, 4  ;;  %v8564_v61 = vor.u32 %v8563_v60, %v8560_v40  ;;  %v8575_v24 = vrot.slane %v8574_v11, 4 }
 0x4ee   : > { %13535 = vmatprep.subr.bf16.mxu1 %v17495_v14  ;;  %v8532_v22 = vsel %vm15087_vm11, %v8527_v12, %v8531_v36  ;;  %v8579_v40 = vrot.slane %v8577_v30, 5  ;;  %v8601_v60 = vshll.u32 %v17261_v10, 16  ;;  %v8546_v43 = vsel %vm15087_vm11, %v8541_v39, %v17506_v5  ;;  %v17552_v10 = vld [vmem:[#allocation3 + $0x78] sm:$0xf]  ;;  %v17572_v39 = vld [vmem:[#allocation3 + $0x20] sm:$0x1] }
 0x4ef   : > { %v8597_v42 = vrot.slane %v8595_v6, 4  ;;  %v8565_v17 = vrot.slane %v8564_v61, 4  ;;  %v8556_v48 = vsel %vm15087_vm11, %v8551_v20, %v8555_v7  ;;  %v8630_v33 = vshrl.u32 %v8413_v19, 16  ;;  %18547 = vst [vmem:[#allocation40_spill] sm:$0xff] %v17572_v39  ;;  %v10782_v20 = vld [vmem:[#allocation3 + $0x18] sm:$0xe] }
 0x4f0   : > { %13472 = vmatmul.mubr.bf16.gmra.mrb[16].mxu1 %v14492_v28  ;;  %v8587_v28 = vrot.slane %v8585_v56, 5  ;;  %v8606_v56 = vshrl.u32 %v8410_v16, 16  ;;  %v8633_v38 = vshll.u32 %v8413_v19, 16  ;;  %v8580_v52 = vsel %vm15087_vm11, %v8575_v24, %v8579_v40  ;;  %v14500_v19 = vld [vmem:[#allocation3 + $0xb4] sm:$0xff]   ;;  %v17600_v40 = vld [vmem:[#allocation3 + $0x2c] sm:$0x1] }
 0x4f1   : > { %13475 = vmatprep.mubr.bf16.mxu1 %v14494_v8  ;;  %v8609_v8 = vshll.u32 %v8410_v16, 16  ;;  %v8598_v6 = vor.u32 %v8597_v42, %v17525_v1  ;;  %v17556_v29 = vrot.slane %v8615_v45, 5  ;;  %v17558_v5 = vrot.slane %v8619_v23, 4  ;;  %v17561_v16 = vld [vmem:[#allocation3 + $0x1c] sm:$0xf]  ;;  %18549 = vst [vmem:[#allocation42_spill] sm:$0xff] %v17600_v40 }
 0x4f2   : > { %v8588_v46 = vor.u32 %v8587_v28, %v8584_v2  ;;  %v17548_v2 = vrot.slane %v8606_v56, 4  ;;  %v8639_v42 = vshll.u32 %v17298_v13, 16  ;;  %18546 = vst [vmem:[#allocation39_spill] sm:$0xff] %v17561_v16  ;;  %v17563_v12 = vcombine.low %v8522_v15, %v8532_v22  ;;  %v17581_v56 = vld [vmem:[#allocation3 + $0x28] sm:$0xf] }
 0x4f3   : > { %v17550_v28 = vrot.slane %v8609_v8, 5  ;;  %v17554_v55 = vrot.slane %v8598_v6, 4  ;;  %v17565_v36 = vcombine.low %v8546_v43, %v8556_v48  ;;  %v8570_v61 = vsel %vm15087_vm11, %v8565_v17, %v17509_v54  ;;  %18548 = vst [vmem:[#allocation41_spill] sm:$0xff] %v17581_v56  ;;  %v14498_v8 = vld [vmem:[#allocation3 + $0xa8] sm:$0xff]   ;;  %v10783_v45 = vld [vmem:[#allocation3 + $0x24] sm:$0xe] }
 0x4f4   : > { %v17546_v11 = vrot.slane %v8588_v46, 4  ;;  %v17570_v30 = vrot.slane %v8601_v60, 5  ;;  %v17576_v24 = vrot.slane %v8630_v33, 4  ;;  %v17578_v46 = vrot.slane %v8633_v38, 5  ;;  %v17602_v60 = vld [vmem:[#allocation3 + $0x34] sm:$0xf] }
 0x4f5   : > { %v8643_v15 = vshrl.u32 %v17298_v13, 16  ;;  %v10848_v6 = vrot.slane %v17561_v16, 5  ;;  %v17597_v22 = vrot.slane %v8639_v42, 5  ;;  %18550 = vst [vmem:[#allocation43_spill] sm:$0xff] %v17602_v60  ;;  %v17604_v43 = vld [vmem:[#allocation3 + $0x38] sm:$0x1] }
 0x4f6   : > { %18551 = vst [vmem:[#allocation44_spill] sm:$0xff] %v17604_v43  ;;  %v17606_v48 = vld [vmem:[#allocation3 + $0x40] sm:$0xf]  ;;  %v12191_v33 = vrot.slane %v10782_v20, 9  ;;  %v12192_v13 = vrot.slane %v10783_v45, 9 }
 0x4f7   : > { %18552 = vst [vmem:[#allocation45_spill] sm:$0xff] %v17606_v48  ;;  %v10850_v38 = vrot.slane %v10848_v6, 4  ;;  %v17612_v7 = vrot.slane %v8643_v15, 4  ;;  %v17615_v23 = vld [vmem:[#allocation3 + $0x4c] sm:$0xf]  ;;  %v10869_v15 = vrot.slane %v17606_v48, 5 }
 0x4f8   : > { %13476 = vmatmul.mubr.bf16.gmra.mrb[20].mxu1 %v14495_v21  ;;  %v17574_v21 = vcombine.low %v8570_v61, %v8580_v52  ;;  %v10851_v52 = vrot.slane %v17572_v39, 5  ;;  %v10855_v61 = vrot.slane %v17581_v56, 5  ;;  %18553 = vst [vmem:[#allocation46_spill] sm:$0xff] %v17615_v23  ;;  %v17619_v20 = vsel %vm15442_vm14, %v12191_v33, %v10848_v6  ;;  %v10785_v42 = vld [vmem:[#allocation3 + $0x3c] sm:$0xe]  ;;  %v14501_v56 = vld [vmem:[#allocation3 + $0xc0] sm:$0xff]  }
 0x4f9   : > { %13479 = vmatprep.mubr.bf16.mxu1 %v14497_v57  ;;  %18554 = vst [vmem:[#allocation47_spill] sm:$0xff] %v17619_v20  ;;  %v10858_v57 = vrot.slane %v17600_v40, 5  ;;  %v17628_v45 = vld [vmem:[#allocation3 + $0x44] sm:$0x1]  ;;  %v10862_v6 = vrot.slane %v17602_v60, 5  ;;  %v10865_v20 = vrot.slane %v17604_v43, 5 }
 0x4fa   : > { %v17623_v17 = vsel %vm15442_vm14, %v10850_v38, %v10851_v52  ;;  %18556 = vst [vmem:[#allocation49_spill] sm:$0xff] %v17628_v45  ;;  %v10042_v33 = vld [vmem:[#allocation3 + $0x50] sm:$0x1]  ;;  %v17635_v38 = vsel %vm15442_vm14, %v12192_v13, %v10855_v61  ;;  %v10786_v54 = vld [vmem:[#allocation3 + $0x48] sm:$0xe]  ;;  %v12194_v60 = vrot.slane %v10785_v42, 9 }
 0x4fb   : > { %18555 = vst [vmem:[#allocation48_spill] sm:$0xff] %v17623_v17  ;;  %18557 = vst [vmem:[#allocation50_spill] sm:$0xff] %v17635_v38  ;;  %v17642_v16 = vld [vmem:[#allocation3 + $0x58] sm:$0xf]  ;;  %v10864_v17 = vrot.slane %v10862_v6, 4  ;;  %v12195_v13 = vrot.slane %v10786_v54, 9 }
 0x4fc   : > { %18559 = vst [vmem:[#allocation52_spill] sm:$0xff] %v17642_v16  ;;  %v10787_v48 = vld [vmem:[#allocation3 + $0x54] sm:$0xe]  ;;  %v17662_v42 = vsel %vm15442_vm14, %v12194_v60, %v10869_v15  ;;  %v10788_v38 = vld [vmem:[#allocation3 + $0x60] sm:$0xe] }
 0x4fd   : > { %v17658_v39 = vsel %vm15442_vm14, %v10864_v17, %v10865_v20  ;;  %18563 = vst [vmem:[#allocation56_spill] sm:$0xff] %v17662_v42  ;;  %v10879_v17 = vrot.slane %v10042_v33, 5  ;;  %v10883_v20 = vrot.slane %v17642_v16, 5  ;;  %v10053_v60 = vld [vmem:[#allocation3 + $0x7c] sm:$0xf]  ;;  %v10890_v33 = vrot.slane %v17654_v37, 5 }
 0x4fe   : > { %18562 = vst [vmem:[#allocation55_spill] sm:$0xff] %v17658_v39  ;;  %v10054_v39 = vld [vmem:[#allocation3 + $0x80] sm:$0x1]  ;;  %v10056_v42 = vld [vmem:[#allocation3 + $0x88] sm:$0xf]  ;;  %v12198_v37 = vrot.slane %v10789_v58, 9 }
 0x4ff   : > { %v14504_v16 = vld [vmem:[#allocation9 + $0x148] sm:$0xff]  }
 0x500   : > { %13480 = vmatmul.mubr.bf16.gmra.mrb[24].mxu1 %v14498_v8  ;;  %v10784_v8 = vld [vmem:[#allocation3 + $0x30] sm:$0xe] }
 0x501   : > { %13483 = vmatprep.mubr.bf16.mxu1 %v14500_v19  ;;  %v10857_v19 = vrot.slane %v10855_v61, 4  ;;  %v12193_v40 = vrot.slane %v10784_v8, 9  ;;  %v10045_v61 = vld [vmem:[#allocation3 + $0x5c] sm:$0x1]  ;;  %v10871_v8 = vrot.slane %v10869_v15, 4 }
 0x503   : > { %v17639_v52 = vsel %vm15442_vm14, %v10857_v19, %v10858_v57  ;;  %v17651_v57 = vsel %vm15442_vm14, %v12193_v40, %v10862_v6  ;;  %v10872_v19 = vrot.slane %v17628_v45, 5  ;;  %v10048_v40 = vld [vmem:[#allocation3 + $0x68] sm:$0x1]  ;;  %v10050_v6 = vld [vmem:[#allocation3 + $0x70] sm:$0xf] }
 0x504   : > { %18558 = vst [vmem:[#allocation51_spill] sm:$0xff] %v17639_v52  ;;  %18560 = vst [vmem:[#allocation53_spill] sm:$0xff] %v17651_v57  ;;  %v10876_v52 = vrot.slane %v17615_v23, 5  ;;  %v10886_v23 = vrot.slane %v10045_v61, 5  ;;  %v10897_v61 = vrot.slane %v10050_v6, 5 }
 0x505   : > { %v17669_v43 = vsel %vm15442_vm14, %v10871_v8, %v10872_v19  ;;  %v10885_v8 = vrot.slane %v10883_v20, 4  ;;  %v12197_v19 = vrot.slane %v10788_v38, 9  ;;  %v10059_v57 = vld [vmem:[#allocation3 + $0x94] sm:$0xf] }
 0x506   : > { %18564 = vst [vmem:[#allocation57_spill] sm:$0xff] %v17669_v43  ;;  %v10878_v15 = vrot.slane %v10876_v52, 4  ;;  %v17677_v45 = vsel %vm15442_vm14, %v12195_v13, %v10876_v52  ;;  %v10790_v43 = vld [vmem:[#allocation3 + $0x78] sm:$0xe]  ;;  %v10892_v13 = vrot.slane %v10890_v33, 4  ;;  %v10899_v6 = vrot.slane %v10897_v61, 4 }
 0x507   : > { %v17692_v38 = vsel %vm15442_vm14, %v10885_v8, %v10886_v23  ;;  %v17706_v23 = vsel %vm15442_vm14, %v12198_v37, %v10897_v61  ;;  %v12199_v58 = vrot.slane %v10790_v43, 9  ;;  %v10904_v8 = vrot.slane %v10053_v60, 5  ;;  %v10068_v37 = vld [vmem:[#allocation3 + $0xb8] sm:$0xf] }
 0x508   : > { %13484 = vmatmul.mubr.bf16.gmra.mrb[28].mxu1 %v14501_v56  ;;  %v12196_v56 = vrot.slane %v10787_v48, 9  ;;  %v10893_v48 = vrot.slane %v10048_v40, 5  ;;  %18567 = vst [vmem:[#allocation60_spill] sm:$0xff] %v17692_v38  ;;  %v17698_v40 = vsel %vm15442_vm14, %v12197_v19, %v10890_v33  ;;  %18569 = vst [vmem:[#allocation62_spill] sm:$0xff] %v17706_v23  ;;  %v10062_v38 = vld [vmem:[#allocation3 + $0xa0] sm:$0xf] }
 0x509   : > { %13503 = vmatprep.mubr.bf16.mxu1 %v17493_v51  ;;  %v17682_v51 = vsel %vm15442_vm14, %v10878_v15, %v10879_v17  ;;  %v10057_v17 = vld [vmem:[#allocation3 + $0x8c] sm:$0x1]  ;;  %v10060_v15 = vld [vmem:[#allocation3 + $0x98] sm:$0x1]  ;;  %v10907_v33 = vrot.slane %v10054_v39, 5  ;;  %v10906_v43 = vrot.slane %v10904_v8, 4 }
 0x50a   : > { %18565 = vst [vmem:[#allocation58_spill] sm:$0xff] %v17682_v51  ;;  %v17686_v54 = vsel %vm15442_vm14, %v12196_v56, %v10883_v20  ;;  %v10900_v20 = vrot.slane %v10051_v31, 5  ;;  %v10791_v56 = vld [vmem:[#allocation3 + $0x84] sm:$0xe]  ;;  %v17702_v52 = vsel %vm15442_vm14, %v10892_v13, %v10893_v48  ;;  %v10792_v51 = vld [vmem:[#allocation3 + $0x90] sm:$0xe] }
 0x50b   : > { %18566 = vst [vmem:[#allocation59_spill] sm:$0xff] %v17686_v54  ;;  %18568 = vst [vmem:[#allocation61_spill] sm:$0xff] %v17702_v52  ;;  %v10911_v54 = vrot.slane %v10056_v42, 5  ;;  %v10065_v48 = vld [vmem:[#allocation3 + $0xac] sm:$0xf]  ;;  %v12200_v60 = vrot.slane %v10791_v56, 9  ;;  %v17725_v56 = vsel %vm15442_vm14, %v10906_v43, %v10907_v33 }
 0x50c   : > { %v17712_v31 = vsel %vm15442_vm14, %v10899_v6, %v10900_v20  ;;  %v10914_v61 = vrot.slane %v10057_v17, 5  ;;  %v10793_v13 = vld [vmem:[#allocation3 + $0x9c] sm:$0xe]  ;;  %v10063_v19 = vld [vmem:[#allocation3 + $0xa4] sm:$0x1]  ;;  %v17721_v6 = vsel %vm15442_vm14, %v12199_v58, %v10904_v8  ;;  %v12201_v42 = vrot.slane %v10792_v51, 9 }
 0x50d   : > { %18570 = vst [vmem:[#allocation63_spill] sm:$0xff] %v17712_v31  ;;  %v10913_v39 = vrot.slane %v10911_v54, 4  ;;  %v14505_v20 = vld [vmem:[#allocation9 + $0x150] sm:$0xff]   ;;  %v10066_v52 = vld [vmem:[#allocation3 + $0xb0] sm:$0x1]  ;;  %18571 = vst [vmem:[#allocation64_spill] sm:$0xff] %v17725_v56 }
 0x50e   : > { %v10925_v17 = vrot.slane %v10062_v38, 5  ;;  %v12202_v8 = vrot.slane %v10793_v13, 9  ;;  %v10794_v31 = vld [vmem:[#allocation3 + $0xa8] sm:$0xe]  ;;  %v18574_v33 = vshll.u32 %v17313_v25, 16  ;;  %v10928_v38 = vrot.slane %v10063_v19, 5 }
 0x50f   : > { %v10069_v23 = vld [vmem:[#allocation3 + $0xbc] sm:$0x1]  ;;  %v10071_v58 = vld [vmem:[#allocation3 + $0xc4] sm:$0xf] }
 0x510   : > { %13504 = vmatmul.mubr.bf16.vlgmr.msra.gmra.mrb[0].mxu1 %v17515_v41  ;;  %v10918_v41 = vrot.slane %v10059_v57, 5  ;;  %v17735_v57 = vsel %vm15442_vm14, %v10913_v39, %v10914_v61  ;;  %v17739_v43 = vrot.slane %v18574_v33, 5  ;;  %v17753_v39 = vsel %vm15442_vm14, %v12202_v8, %v10925_v17 }
 0x511   : > { %13507 = vmatprep.mubr.bf16.mxu1 %v17528_v53  ;;  %13536 = vmatpush3.bf16.msra.mxu1 %v17495_v14  ;;  %v17729_v53 = vsel %vm15442_vm14, %v12200_v60, %v10911_v54  ;;  %v10921_v14 = vrot.slane %v10060_v15, 5  ;;  %18573 = vst [vmem:[#allocation66_spill] sm:$0xff] %v17735_v57  ;;  %v10927_v15 = vrot.slane %v10925_v17, 4  ;;  %v10795_v60 = vld [vmem:[#allocation3 + $0xb4] sm:$0xe]  ;;  %v10932_v33 = vrot.slane %v10065_v48, 5 }
 0x512   : > { %13537 = vmatprep.subr.bf16.mxu1 %v14504_v16  ;;  %18572 = vst [vmem:[#allocation65_spill] sm:$0xff] %v17729_v53  ;;  %v10920_v51 = vrot.slane %v10918_v41, 4  ;;  %v17745_v61 = vsel %vm15442_vm14, %v12201_v42, %v10918_v41  ;;  %v14506_v54 = vld [vmem:[#allocation9 + $0x158] sm:$0xff]   ;;  %v12203_v42 = vrot.slane %v10794_v31, 9  ;;  %v10939_v41 = vrot.slane %v10068_v37, 5  ;;  %v18649_v3 = vld [vmem:[#allocation58_spill] sm:$0xff] }
 0x513   : > { %18575 = vst [vmem:[#allocation67_spill] sm:$0xff] %v17745_v61  ;;  %v17759_v19 = vsel %vm15442_vm14, %v10927_v15, %v10928_v38  ;;  %v10796_v57 = vld [vmem:[#allocation3 + $0xc0] sm:$0xe]  ;;  %v10072_v53 = vld [vmem:[#allocation3 + $0xc8] sm:$0x1]  ;;  %v10935_v17 = vrot.slane %v10066_v52, 5  ;;  %v18578_v38 = vor.u32 %v17550_v28, %v17548_v2 }
 0x514   : > { %v17749_v13 = vsel %vm15442_vm14, %v10920_v51, %v10921_v14  ;;  %v12218_v14 = vcombine.low %v17753_v39, %v17759_v19  ;;  %v10934_v51 = vrot.slane %v10932_v33, 4  ;;  %v12204_v8 = vrot.slane %v10795_v60, 9  ;;  %v14507_v52 = vld [vmem:[#allocation9 + $0x160] sm:$0xff]   ;;  %v18164_v39 = vld [vmem:[%s18307_s6] ss:$0 sm:$0xff] }
 0x515   : > { %13538 = vmatpush3.bf16.msra.mxu1 %v14504_v16  ;;  %18576 = vst [vmem:[#allocation68_spill] sm:$0xff] %v17749_v13  ;;  %v18577_v48 = vshrl.u32 %v17313_v25, 16  ;;  %v10941_v16 = vrot.slane %v10939_v41, 4  ;;  %v10942_v13 = vrot.slane %v10069_v23, 5  ;;  %v10946_v61 = vrot.slane %v10071_v58, 5 }
 0x516   : > { %13539 = vmatprep.subr.bf16.mxu1 %v14505_v20  ;;  %v17769_v31 = vsel %vm15442_vm14, %v12203_v42, %v10932_v33  ;;  %v17773_v37 = vsel %vm15442_vm14, %v10934_v51, %v10935_v17  ;;  %v12205_v25 = vrot.slane %v10796_v57, 9  ;;  %v8419_v23 = vld [vmem:[#allocation3 + $0x84] sm:$0xf]  ;;  %v10949_v15 = vrot.slane %v10072_v53, 5 }
 0x517   : > { %v8669_v56 = vrot.slane %v18577_v48, 4  ;;  %v10948_v58 = vrot.slane %v10946_v61, 4  ;;  %v8613_v60 = vrot.slane %v18578_v38, 4  ;;  %v8649_v33 = vshll.u32 %v17324_v18, 16 }
 0x518   : > { %13508 = vmatmul.mubr.bf16.gmra.mrb[4].mxu1 %v17563_v12  ;;  %v17777_v12 = vsel %vm15442_vm14, %v12204_v8, %v10939_v41  ;;  %v18579_v57 = vshrl.u32 %v17552_v10, 16  ;;  %v8687_v51 = vshll.u32 %v17335_v62, 16  ;;  %v8691_v17 = vshrl.u32 %v17335_v62, 16 }
 0x519   : > { %13511 = vmatprep.mubr.bf16.mxu1 %v17565_v36  ;;  %13540 = vmatpush3.bf16.msra.mxu1 %v14505_v20  ;;  %v12219_v36 = vcombine.low %v17769_v31, %v17773_v37  ;;  %v17783_v20 = vsel %vm15442_vm14, %v10941_v16, %v10942_v13  ;;  %v17797_v13 = vsel %vm15442_vm14, %v12205_v25, %v10946_v61  ;;  %v18580_v18 = vshll.u32 %v17552_v10, 16 }
 0x51a   : > { %13541 = vmatprep.subr.bf16.mxu1 %v14506_v54  ;;  %v8656_v42 = vrot.slane %v18579_v57, 4  ;;  %v12220_v41 = vcombine.low %v17777_v12, %v17783_v20  ;;  %v17801_v2 = vsel %vm15442_vm14, %v10948_v58, %v10949_v15  ;;  %v8678_v53 = vshrl.u32 %v8419_v23, 16  ;;  %v14508_v15 = vld [vmem:[#allocation9 + $0x168] sm:$0xff]  }
 0x51b   : > { %v8659_v28 = vrot.slane %v18580_v18, 5  ;;  %v8681_v16 = vshll.u32 %v8419_v23, 16  ;;  %v12221_v8 = vcombine.low %v17797_v13, %v17801_v2  ;;  %v18581_v62 = vor.u32 %v17558_v5, %v17556_v29 }
 0x51c   : > { %v18582_v61 = vor.u32 %v17578_v46, %v17576_v24  ;;  %v18583_v58 = vor.u32 %v17612_v7, %v17597_v22  ;;  %v8670_v10 = vor.u32 %v8669_v56, %v17739_v43  ;;  %v18584_v23 = vsel %vm15087_vm11, %v17554_v55, %v17570_v30 }
 0x51d   : > { %13542 = vmatpush3.bf16.msra.mxu1 %v14506_v54  ;;  %v8623_v48 = vrot.slane %v18581_v62, 4  ;;  %v18585_v5 = vsel %vm15087_vm11, %v17546_v11, %v17525_v1  ;;  %v18586_v46 = vshll.u32 %v17293_v59, 16  ;;  %v8651_v7 = vrot.slane %v8649_v33, 5  ;;  %v8422_v62 = vld [vmem:[#allocation3 + $0x90] sm:$0xf] }
 0x51e   : > { %v8637_v25 = vrot.slane %v18582_v61, 4  ;;  %v8647_v54 = vrot.slane %v18583_v58, 4  ;;  %13543 = vmatprep.subr.bf16.mxu1 %v14507_v52  ;;  %v12085_v24 = vcombine.low %v18585_v5, %v18584_v23  ;;  %v8673_v56 = vshll.u32 %v17326_v44, 16  ;;  %v14510_v5 = vld [vmem:[#allocation9 + $0x178] sm:$0xff]  }
 0x51f   : > { %v8627_v38 = vrot.slane %v18586_v46, 5  ;;  %v17831_v57 = vrot.slane %v8687_v51, 5  ;;  %v8693_v18 = vrot.slane %v8691_v17, 4  ;;  %v8618_v55 = vsel %vm15087_vm11, %v8613_v60, %v17556_v29  ;;  %v14509_v51 = vld [vmem:[#allocation9 + $0x170] sm:$0xff]  }
 0x520   : > { %13512 = vmatmul.mubr.bf16.gmra.mrb[8].mxu1 %v17574_v21  ;;  %v8660_v30 = vor.u32 %v8659_v28, %v8656_v42  ;;  %v8680_v1 = vrot.slane %v8678_v53, 4  ;;  %v8683_v11 = vrot.slane %v8681_v16, 5  ;;  %v8642_v44 = vsel %vm15087_vm11, %v8637_v25, %v17597_v22 }
 0x521   : > { %13515 = vmatprep.mubr.bf16.mxu1 %v12085_v24  ;;  %13544 = vmatpush3.bf16.msra.mxu1 %v14507_v52  ;;  %v8628_v59 = vsel %vm15087_vm11, %v8623_v48, %v8627_v38  ;;  %v8652_v21 = vsel %vm15087_vm11, %v8647_v54, %v8651_v7  ;;  %v8671_v33 = vrot.slane %v8670_v10, 4  ;;  %v8702_v17 = vshrl.u32 %v8422_v62, 16  ;;  %v8425_v52 = vld [vmem:[#allocation3 + $0x9c] sm:$0xf] }
 0x522   : > { %13545 = vmatprep.subr.bf16.mxu1 %v14508_v15  ;;  %v8705_v61 = vshll.u32 %v8422_v62, 16  ;;  %v8711_v29 = vshll.u32 %v17337_v32, 16  ;;  %v8715_v60 = vshrl.u32 %v17337_v32, 16  ;;  %v8675_v42 = vrot.slane %v8673_v56, 5 }
 0x523   : > { %v8694_v28 = vor.u32 %v8693_v18, %v17831_v57  ;;  %v8735_v53 = vshll.u32 %v17364_v26, 16  ;;  %v8739_v22 = vshrl.u32 %v17364_v26, 16  ;;  %v12086_v16 = vcombine.low %v8618_v55, %v8628_v59  ;;  %v17858_v59 = vld [vmem:[#allocation9 + $0x180] sm:$0xff]  }
 0x524   : > { %v12087_v48 = vcombine.low %v8642_v44, %v8652_v21  ;;  %v8661_v25 = vrot.slane %v8660_v30, 4  ;;  %v8684_v58 = vor.u32 %v8683_v11, %v8680_v1  ;;  %v8676_v54 = vsel %vm15087_vm11, %v8671_v33, %v8675_v42  ;;  %v8428_v11 = vld [vmem:[#allocation3 + $0xa8] sm:$0xf]  ;;  %v14603_v33 = vld [vmem:[#allocation3 + $0xac] sm:$0xf] }
 0x525   : > { %13546 = vmatpush3.bf16.msra.mxu1 %v14508_v15  ;;  %v8697_v10 = vshll.u32 %v17348_v0, 16  ;;  %v8726_v23 = vshrl.u32 %v8425_v52, 16  ;;  %v8729_v32 = vshll.u32 %v8425_v52, 16  ;;  %v8704_v24 = vrot.slane %v8702_v17, 4 }
 0x526   : > { %13547 = vmatprep.subr.bf16.mxu1 %v14509_v51  ;;  %v8707_v46 = vrot.slane %v8705_v61, 5  ;;  %v17851_v38 = vrot.slane %v8711_v29, 5  ;;  %v8717_v7 = vrot.slane %v8715_v60, 4  ;;  %v8695_v26 = vrot.slane %v8694_v28, 4  ;;  %v8431_v29 = vld [vmem:[#allocation3 + $0xb4] sm:$0xf] }
 0x527   : > { %v17853_v56 = vrot.slane %v8735_v53, 5  ;;  %v8741_v18 = vrot.slane %v8739_v22, 4  ;;  %v8666_v15 = vsel %vm15087_vm11, %v8661_v25, %v17739_v43  ;;  %v8685_v0 = vrot.slane %v8684_v58, 4  ;;  %v14604_v28 = vld [vmem:[#allocation3 + $0x98] sm:$0x1] }
 0x528   : > { %13516 = vmatmul.mubr.bf16.gmra.mrb[12].mxu1 %v12086_v16  ;;  %v12088_v62 = vcombine.low %v8666_v15, %v8676_v54  ;;  %v8699_v55 = vrot.slane %v8697_v10, 5  ;;  %v8728_v30 = vrot.slane %v8726_v23, 4  ;;  %v8731_v1 = vrot.slane %v8729_v32, 5  ;;  %v14605_v25 = vld [vmem:[#allocation3 + $0xa4] sm:$0x1] }
 0x529   : > { %13519 = vmatprep.mubr.bf16.mxu1 %v12087_v48  ;;  %13548 = vmatpush3.bf16.msra.mxu1 %v14509_v51  ;;  %v8708_v44 = vor.u32 %v8707_v46, %v8704_v24  ;;  %v8718_v21 = vor.u32 %v8717_v7, %v17851_v38  ;;  %v8759_v17 = vshll.u32 %v14603_v33, 16  ;;  %v8763_v61 = vshrl.u32 %v14603_v33, 16 }
 0x52a   : > { %13549 = vmatprep.subr.bf16.mxu1 %v14510_v5  ;;  %v8700_v43 = vsel %vm15087_vm11, %v8695_v26, %v8699_v55  ;;  %v8742_v51 = vor.u32 %v8741_v18, %v17853_v56  ;;  %v8783_v60 = vshll.u32 %v17392_v9, 16  ;;  %v8787_v52 = vshrl.u32 %v17392_v9, 16 }
 0x52b   : > { %v8690_v42 = vsel %vm15087_vm11, %v8685_v0, %v17831_v57  ;;  %v8721_v53 = vshll.u32 %v14604_v28, 16  ;;  %v8750_v22 = vshrl.u32 %v8428_v11, 16  ;;  %v8753_v16 = vshll.u32 %v8428_v11, 16  ;;  %v8434_v11 = vld [vmem:[#allocation3 + $0xc0] sm:$0xf] }
 0x52c   : > { %v8732_v48 = vor.u32 %v8731_v1, %v8728_v30  ;;  %v8745_v58 = vshll.u32 %v14605_v25, 16  ;;  %v8774_v54 = vshrl.u32 %v8431_v29, 16  ;;  %v8777_v10 = vshll.u32 %v8431_v29, 16 }
 0x52d   : > { %13550 = vmatpush3.bf16.msra.mxu1 %v14510_v5  ;;  %v12089_v23 = vcombine.low %v8690_v42, %v8700_v43  ;;  %v8719_v32 = vrot.slane %v8718_v21, 4  ;;  %v8761_v24 = vrot.slane %v8759_v17, 5  ;;  %v8765_v9 = vrot.slane %v8763_v61, 4  ;;  %v14606_v17 = vld [vmem:[#allocation3 + $0xc4] sm:$0xf] }
 0x52e   : > { %13583 = vmatprep.subr.bf16.mxu1 %v17858_v59  ;;  %v8709_v46 = vrot.slane %v8708_v44, 4  ;;  %v8743_v7 = vrot.slane %v8742_v51, 4  ;;  %v8785_v57 = vrot.slane %v8783_v60, 5  ;;  %v8789_v26 = vrot.slane %v8787_v52, 4  ;;  %v14607_v60 = vld [vmem:[#allocation3 + $0xb0] sm:$0x1] }
 0x52f   : > { %v8723_v18 = vrot.slane %v8721_v53, 5  ;;  %v8752_v15 = vrot.slane %v8750_v22, 4  ;;  %v8755_v5 = vrot.slane %v8753_v16, 5  ;;  %v8733_v0 = vrot.slane %v8732_v48, 4  ;;  %v14608_v48 = vld [vmem:[#allocation3 + $0xbc] sm:$0x1] }
 0x530   : > { %13520 = vmatmul.mubr.bf16.gmra.mrb[16].mxu1 %v12088_v62  ;;  %v8747_v55 = vrot.slane %v8745_v58, 5  ;;  %v8776_v30 = vrot.slane %v8774_v54, 4  ;;  %v8779_v1 = vrot.slane %v8777_v10, 5  ;;  %v8766_v21 = vor.u32 %v8765_v9, %v8761_v24 }
 0x531   : > { %13523 = vmatprep.mubr.bf16.mxu1 %v12089_v23  ;;  %v8724_v33 = vsel %vm15087_vm11, %v8719_v32, %v8723_v18  ;;  %v8807_v61 = vshll.u32 %v14606_v17, 16  ;;  %v8811_v62 = vshrl.u32 %v14606_v17, 16  ;;  %v8714_v44 = vsel %vm15087_vm11, %v8709_v46, %v17851_v38 }
 0x532   : > { %v8748_v29 = vsel %vm15087_vm11, %v8743_v7, %v8747_v55  ;;  %v8790_v43 = vor.u32 %v8789_v26, %v8785_v57  ;;  %v8756_v51 = vor.u32 %v8755_v5, %v8752_v15  ;;  %v8769_v52 = vshll.u32 %v14607_v60, 16  ;;  %v505_v60 = vld [vmem:[#allocation3 + $0xcc] sm:$0x1] }
 0x533   : > { %v8798_v42 = vshrl.u32 %v8434_v11, 16  ;;  %v8801_v28 = vshll.u32 %v8434_v11, 16  ;;  %v12090_v53 = vcombine.low %v8714_v44, %v8724_v33  ;;  %v8738_v22 = vsel %vm15087_vm11, %v8733_v0, %v17853_v56  ;;  %v14609_v0 = vld [vmem:[#allocation3 + $0x10] sm:$0xf]  ;;  %v14610_v11 = vld [vmem:[#allocation3 + $0xc8] sm:$0x1] }
 0x534   : > { %v8780_v16 = vor.u32 %v8779_v1, %v8776_v30  ;;  %v8793_v25 = vshll.u32 %v14608_v48, 16  ;;  %v12091_v58 = vcombine.low %v8738_v22, %v8748_v29  ;;  %v8767_v54 = vrot.slane %v8766_v21, 4 }
 0x535   : > { %v8809_v38 = vrot.slane %v8807_v61, 5  ;;  %v8813_v10 = vrot.slane %v8811_v62, 4  ;;  %v8791_v23 = vrot.slane %v8790_v43, 4  ;;  %v8757_v32 = vrot.slane %v8756_v51, 4  ;;  %v9143_v51 = vld [vmem:[#allocation3 + $0xc] sm:$0xe] }
 0x536   : > { %v8771_v9 = vrot.slane %v8769_v52, 5  ;;  %v8800_v46 = vrot.slane %v8798_v42, 4  ;;  %v8803_v7 = vrot.slane %v8801_v28, 5  ;;  %v8781_v26 = vrot.slane %v8780_v16, 4  ;;  %v14611_v28 = vld [vmem:[#allocation3 + $0x1c] sm:$0xf] }
 0x537   : > { %v8795_v18 = vrot.slane %v8793_v25, 5  ;;  %v8814_v56 = vor.u32 %v8813_v10, %v8809_v38  ;;  %v9209_v55 = vrot.slane %v14609_v0, 5  ;;  %v8762_v30 = vsel %vm15087_vm11, %v8757_v32, %v8761_v24 }
 0x538   : > { %13524 = vmatmul.mubr.bf16.gmra.mrb[20].mxu1 %v12090_v53  ;;  %v8772_v15 = vsel %vm15087_vm11, %v8767_v54, %v8771_v9  ;;  %v8804_v1 = vor.u32 %v8803_v7, %v8800_v46  ;;  %v8817_v33 = vshll.u32 %v14610_v11, 16  ;;  %v8786_v17 = vsel %vm15087_vm11, %v8781_v26, %v8785_v57  ;;  %v14513_v7 = vld [vmem:[#allocation9 + $0x190] sm:$0xff]   ;;  %v18598_v11 = vld [vmem:[#allocation21_spill] sm:$0xff] }
 0x539   : > { %13527 = vmatprep.mubr.bf16.mxu1 %v12091_v58  ;;  %v8796_v5 = vsel %vm15087_vm11, %v8791_v23, %v8795_v18  ;;  %v12092_v21 = vcombine.low %v8762_v30, %v8772_v15  ;;  %v8815_v62 = vrot.slane %v8814_v56, 4  ;;  %v9211_v44 = vrot.slane %v9209_v55, 4  ;;  %v9144_v58 = vld [vmem:[#allocation3 + $0x18] sm:$0xe]  ;;  %v18589_v18 = vld [vmem:[#allocation25_spill] sm:$0xff]  ;;  %v18590_v15 = vld [vmem:[#allocation28_spill] sm:$0xff] }
 0x53a   : > { %v12093_v61 = vcombine.low %v8786_v17, %v8796_v5  ;;  %v8805_v29 = vrot.slane %v8804_v1, 4  ;;  %v8819_v43 = vrot.slane %v8817_v33, 5  ;;  %v9212_v52 = vrot.slane %v17468_v27, 5  ;;  %v14515_v5 = vld [vmem:[#allocation9 + $0x1a0] sm:$0xff]   ;;  %v18596_v30 = vld [vmem:[#allocation20_spill] sm:$0xff]  ;;  %v18601_v17 = vld [vmem:[#allocation23_spill] sm:$0xff] }
 0x53b   : > { %v506_v24 = vsel %vm15036_vm3, 0, %v505_v60  ;;  %v9216_v53 = vrot.slane %v14611_v28, 5  ;;  %v12103_v57 = vrot.slane %v9143_v51, 9  ;;  %v9219_v54 = vrot.slane %v17470_v34, 5  ;;  %v14514_v34 = vld [vmem:[#allocation9 + $0x198] sm:$0xff]   ;;  %v18599_v33 = vld [vmem:[#allocation22_spill] sm:$0xff] }
 0x53c   : > { %v8820_v42 = vsel %vm15087_vm11, %v8815_v62, %v8819_v43  ;;  %507 = vst [vmem:[#allocation3 + $0xcc] sm:$0x1] %v506_v24  ;;  %v9213_v22 = vsel %vm15442_vm14, %v9211_v44, %v9212_v52  ;;  %v8810_v16 = vsel %vm15087_vm11, %v8805_v29, %v8809_v38  ;;  %v12104_v10 = vrot.slane %v9144_v58, 9  ;;  %v14512_v38 = vld [vmem:[#allocation9 + $0x188] sm:$0xff]   ;;  %v14521_v44 = vld [vmem:[#allocation9 + $0x1c0] sm:$0xff]   ;;  %v18604_v29 = vld [vmem:[#allocation24_spill] sm:$0xff] }
 0x53d   : > { %v12094_v48 = vcombine.low %v8810_v16, %v8820_v42  ;;  %v9210_v27 = vsel %vm15442_vm14, %v12103_v57, %v9209_v55  ;;  %v9218_v4 = vrot.slane %v9216_v53, 4  ;;  %v18587_v46 = vcombine.low %v17265_v47, %v17269_v49  ;;  %v14516_v47 = vld [vmem:[#allocation9 + $0x1a8] sm:$0xff]   ;;  %v18592_v49 = vld [vmem:[#allocation17_spill] sm:$0xff]  ;;  %v18608_v52 = vld [vmem:[#allocation16_spill] sm:$0xff] }
 0x53e   : > { %v12119_v25 = vcombine.low %v9210_v27, %v9213_v22  ;;  %v9217_v32 = vsel %vm15442_vm14, %v12104_v10, %v9216_v53  ;;  %v18588_v26 = vcombine.low %v17279_v35, %v17285_v63  ;;  %v18591_v56 = vcombine.low %v18589_v18, %v18590_v15  ;;  %v18595_v55 = vld [vmem:[#allocation19_spill] sm:$0xff]  ;;  %v14517_v35 = vld [vmem:[#allocation9 + $0x1b0] sm:$0xff]   ;;  %v14518_v63 = vld [vmem:[#allocation9 + $0x1b8] sm:$0xff]  }
 0x53f   : > { %v9220_v23 = vsel %vm15442_vm14, %v9218_v4, %v9219_v54  ;;  %v18597_v1 = vcombine.low %v18595_v55, %v18596_v30  ;;  %v18605_v43 = vld [vmem:[#allocation27_spill] sm:$0xff]  ;;  %v18607_v60 = vld [vmem:[#allocation29_spill] sm:$0xff]  ;;  %v18611_v28 = vld [vmem:[#allocation30_spill] sm:$0xff] }
 0x540   : > { %13528 = vmatmul.mubr.bf16.gmra.mrb[24].mxu1 %v12092_v21  ;;  %v12120_v9 = vcombine.low %v9217_v32, %v9220_v23  ;;  %v18600_v21 = vcombine.low %v18598_v11, %v18599_v33  ;;  %v18606_v51 = vcombine.low %v18604_v29, %v18605_v43  ;;  %v18609_v24 = vcombine.low %v18607_v60, %v18608_v52  ;;  %v18610_v42 = vld [vmem:[#allocation15_spill] sm:$0xff]  ;;  %v18614_v22 = vld [vmem:[#allocation32_spill] sm:$0xff]  ;;  %v18617_v27 = vld [vmem:[#allocation34_spill] sm:$0xff] }
 0x541   : > { %13531 = vmatprep.mubr.bf16.mxu1 %v12093_v61  ;;  %v18602_v61 = vld [vmem:[#allocation26_spill] sm:$0xff]  ;;  %v18612_v53 = vcombine.low %v18610_v42, %v18611_v28  ;;  %v18613_v57 = vld [vmem:[#allocation31_spill] sm:$0xff]  ;;  %v18620_v58 = vld [vmem:[#allocation36_spill] sm:$0xff] }
 0x542   : > { %v18603_v62 = vcombine.low %v18601_v17, %v18602_v61  ;;  %v18615_v16 = vcombine.low %v18613_v57, %v18614_v22  ;;  %v18619_v4 = vld [vmem:[#allocation35_spill] sm:$0xff]  ;;  %v559_v10 = vld [vmem:[#allocation3 + $0xd4] sm:$0x1]  ;;  %v14527_v15 = vld [vmem:[#allocation9 + $0x1d0] sm:$0xff]  }
 0x543   : > { %v18621_v54 = vcombine.low %v18619_v4, %v18620_v58  ;;  %v560_v32 = vsel %vm15041_vm4, 0, %v559_v10  ;;  %v14522_v18 = vld [vmem:[#allocation3 + $0x30] sm:$0xff]   ;;  %v14528_v55 = vld [vmem:[#allocation3 + $0x60] sm:$0xff]   ;;  %v14539_v30 = vld [vmem:[#allocation9 + $0x1f0] sm:$0xff]  }
 0x544   : > { %561 = vst [vmem:[#allocation3 + $0xd4] sm:$0x1] %v560_v32  ;;  %v17949_v11 = vld [vmem:[#allocation9 + $0x200] sm:$0xff]   ;;  %v18627_v57 = vld [vmem:[#allocation41_spill] sm:$0xff]  ;;  %v18628_v10 = vld [vmem:[#allocation40_spill] sm:$0xff] }
 0x545   : > { %v10028_v33 = vld [vmem:[#allocation3 + $0x18] sm:$0xf]  ;;  %v10110_v22 = vshll.u32 %v18627_v57, 16  ;;  %v10034_v4 = vld [vmem:[#allocation3 + $0x30] sm:$0xf]  ;;  %v14535_v58 = vld [vmem:[#allocation3 + $0x9c] sm:$0xff]  }
 0x546   : > { %v10077_v29 = vshrl.u32 %v10028_v33, 16  ;;  %v10080_v43 = vshll.u32 %v10028_v33, 16  ;;  %v10096_v23 = vshll.u32 %v18628_v10, 16  ;;  %v14537_v32 = vld [vmem:[#allocation3 + $0xa8] sm:$0xff]  }
 0x547   : > { %v10797_v10 = vld [vmem:[#allocation3 + $0xcc] sm:$0xe] }
 0x548   : > { %13532 = vmatmul.mubr.bf16.gmra.mrb[28].mxu1 %v12094_v48  ;;  %v18616_v48 = vld [vmem:[#allocation33_spill] sm:$0xff]  ;;  %v10079_v28 = vrot.slane %v10077_v29, 4 }
 0x549   : > { %13551 = vmatprep.mubr.bf16.mxu1 %v12119_v25  ;;  %v18618_v25 = vcombine.low %v18616_v48, %v18617_v27 }
 0x550   : > { %13552 = vmatmul.mubr.bf16.vlgmr.msra.gmra.mrb[0].mxu1 %v12120_v9  ;;  %v14519_v9 = vld [vmem:[#allocation3 + $0x18] sm:$0xff]  }
 0x551   : > { %13555 = vmatprep.mubr.bf16.mxu1 %v18587_v46  ;;  %13584 = vmatpush3.bf16.msra.mxu1 %v17858_v59  ;;  %v18593_v59 = vld [vmem:[#allocation18_spill] sm:$0xff] }
 0x552   : > { %13585 = vmatprep.subr.bf16.mxu1 %v14512_v38  ;;  %v18594_v0 = vcombine.low %v18592_v49, %v18593_v59  ;;  %v18624_v46 = vld [vmem:[#allocation38_spill] sm:$0xff] }
 0x553   : > { %v14533_v49 = vld [vmem:[#allocation9 + $0x1e0] sm:$0xff]  }
 0x554   : > { %v14526_v59 = vld [vmem:[#allocation3 + $0x54] sm:$0xff]  }
 0x555   : > { %13586 = vmatpush3.bf16.msra.mxu1 %v14512_v38  ;;  %v18623_v38 = vld [vmem:[#allocation37_spill] sm:$0xff] }
 0x556   : > { %13587 = vmatprep.subr.bf16.mxu1 %v14513_v7 }
 0x558   : > { %13556 = vmatmul.mubr.bf16.gmra.mrb[4].mxu1 %v18588_v26  ;;  %v14524_v26 = vld [vmem:[#allocation9 + $0x1c8] sm:$0xff]  }
 0x559   : > { %13559 = vmatprep.mubr.bf16.mxu1 %v18591_v56  ;;  %13588 = vmatpush3.bf16.msra.mxu1 %v14513_v7  ;;  %v18625_v7 = vcombine.low %v18623_v38, %v18624_v46  ;;  %v14523_v56 = vld [vmem:[#allocation3 + $0x3c] sm:$0xff]   ;;  %v10125_v38 = vshrl.u32 %v10034_v4, 16 }
 0x55a   : > { %13589 = vmatprep.subr.bf16.mxu1 %v14514_v34 }
 0x55d   : > { %13590 = vmatpush3.bf16.msra.mxu1 %v14514_v34  ;;  %v14520_v34 = vld [vmem:[#allocation3 + $0x24] sm:$0xff]  }
 0x55e   : > { %13591 = vmatprep.subr.bf16.mxu1 %v14515_v5 }
 0x560   : > { %13560 = vmatmul.mubr.bf16.gmra.mrb[8].mxu1 %v18594_v0  ;;  %v14536_v0 = vld [vmem:[#allocation9 + $0x1e8] sm:$0xff]  }
 0x561   : > { %13563 = vmatprep.mubr.bf16.mxu1 %v18597_v1  ;;  %13592 = vmatpush3.bf16.msra.mxu1 %v14515_v5  ;;  %v14530_v5 = vld [vmem:[#allocation9 + $0x1d8] sm:$0xff]  }
 0x562   : > { %13593 = vmatprep.subr.bf16.mxu1 %v14516_v47  ;;  %v14529_v1 = vld [vmem:[#allocation3 + $0x6c] sm:$0xff]  }
 0x565   : > { %13594 = vmatpush3.bf16.msra.mxu1 %v14516_v47  ;;  %v14525_v47 = vld [vmem:[#allocation3 + $0x48] sm:$0xff]  }
 0x566   : > { %13595 = vmatprep.subr.bf16.mxu1 %v14517_v35 }
 0x568   : > { %13564 = vmatmul.mubr.bf16.gmra.mrb[12].mxu1 %v18600_v21  ;;  %v18626_v21 = vld [vmem:[#allocation39_spill] sm:$0xff] }
 0x569   : > { %13567 = vmatprep.mubr.bf16.mxu1 %v18603_v62  ;;  %13596 = vmatpush3.bf16.msra.mxu1 %v14517_v35  ;;  %v14542_v35 = vld [vmem:[#allocation9 + $0x1f8] sm:$0xff]   ;;  %v10086_v17 = vshll.u32 %v18626_v21, 16  ;;  %v10090_v61 = vshrl.u32 %v18626_v21, 16  ;;  %v10031_v62 = vld [vmem:[#allocation3 + $0x24] sm:$0xf] }
 0x56a   : > { %13597 = vmatprep.subr.bf16.mxu1 %v14518_v63  ;;  %v10104_v42 = vshll.u32 %v10031_v62, 16 }
 0x56b   : > { %v10088_v60 = vrot.slane %v10086_v17, 5  ;;  %v10092_v52 = vrot.slane %v10090_v61, 4  ;;  %v14538_v17 = vld [vmem:[#allocation3 + $0xb4] sm:$0xff]  }
 0x56c   : > { %v10106_v27 = vrot.slane %v10104_v42, 5  ;;  %v18632_v42 = vld [vmem:[#allocation45_spill] sm:$0xff] }
 0x56d   : > { %13598 = vmatpush3.bf16.msra.mxu1 %v14518_v63  ;;  %v14531_v63 = vld [vmem:[#allocation3 + $0x78] sm:$0xff]  }
 0x56e   : > { %13631 = vmatprep.subr.bf16.mxu1 %v14521_v44 }
 0x570   : > { %13568 = vmatmul.mubr.bf16.gmra.mrb[16].mxu1 %v18606_v51  ;;  %v14534_v51 = vld [vmem:[#allocation3 + $0x90] sm:$0xff]  }
 0x571   : > { %13571 = vmatprep.mubr.bf16.mxu1 %v18609_v24  ;;  %v10101_v24 = vshrl.u32 %v10031_v62, 16 }
 0x573   : > { %v10103_v48 = vrot.slane %v10101_v24, 4 }
 0x578   : > { %13572 = vmatmul.mubr.bf16.gmra.mrb[20].mxu1 %v18612_v53  ;;  %v10082_v53 = vrot.slane %v10080_v43, 5 }
 0x579   : > { %13575 = vmatprep.mubr.bf16.mxu1 %v18615_v16  ;;  %v10093_v16 = vor.u32 %v10092_v52, %v10088_v60 }
 0x57b   : > { %v10094_v46 = vrot.slane %v10093_v16, 4 }
 0x580   : > { %13576 = vmatmul.mubr.bf16.gmra.mrb[24].mxu1 %v18618_v25  ;;  %v10114_v25 = vshrl.u32 %v18627_v57, 16  ;;  %v10040_v57 = vld [vmem:[#allocation3 + $0x48] sm:$0xf] }
 0x581   : > { %13579 = vmatprep.mubr.bf16.mxu1 %v18621_v54  ;;  %v10083_v54 = vor.u32 %v10082_v53, %v10079_v28  ;;  %v10158_v28 = vshll.u32 %v18632_v42, 16  ;;  %v10162_v53 = vshrl.u32 %v18632_v42, 16 }
 0x588   : > { %13580 = vmatmul.mubr.bf16.gmra.mrb[28].mxu1 %v18625_v7  ;;  %v10107_v7 = vor.u32 %v10106_v27, %v10103_v48  ;;  %v18633_v48 = vld [vmem:[#allocation46_spill] sm:$0xff] }
 0x589   : > { %13599 = vmatprep.mubr.bf16.mxu1 %v14519_v9  ;;  %v17957_v9 = vrot.slane %v10110_v22, 5  ;;  %v10182_v27 = vshll.u32 %v18633_v48, 16 }
 0x590   : > { %13600 = vmatmul.mubr.bf16.vlgmr.msra.gmra.mrb[0].mxu1 %v14520_v34  ;;  %v10116_v34 = vrot.slane %v10114_v25, 4  ;;  %v17981_v25 = vld [vmem:[#allocation3 + $0xd0] sm:$0xf] }
 0x591   : > { %13603 = vmatprep.mubr.bf16.mxu1 %v14522_v18  ;;  %13632 = vmatpush3.bf16.msra.mxu1 %v14521_v44  ;;  %v14532_v44 = vld [vmem:[#allocation3 + $0x84] sm:$0xff]  }
 0x592   : > { %13633 = vmatprep.subr.bf16.mxu1 %v14524_v26  ;;  %v18629_v18 = vld [vmem:[#allocation43_spill] sm:$0xff] }
 0x595   : > { %13634 = vmatpush3.bf16.msra.mxu1 %v14524_v26  ;;  %v10128_v26 = vshll.u32 %v10034_v4, 16  ;;  %v17983_v4 = vld [vmem:[#allocation3 + $0xd4] sm:$0x1] }
 0x596   : > { %13635 = vmatprep.subr.bf16.mxu1 %v14527_v15 }
 0x598   : > { %13604 = vmatmul.mubr.bf16.gmra.mrb[4].mxu1 %v14523_v56  ;;  %v10138_v56 = vshrl.u32 %v18629_v18, 16 }
 0x599   : > { %13607 = vmatprep.mubr.bf16.mxu1 %v14525_v47  ;;  %13636 = vmatpush3.bf16.msra.mxu1 %v14527_v15  ;;  %v10134_v15 = vshll.u32 %v18629_v18, 16  ;;  %v10098_v47 = vrot.slane %v10096_v23, 5  ;;  %v10953_v23 = vrot.slane %v17981_v25, 5 }
 0x59a   : > { %13637 = vmatprep.subr.bf16.mxu1 %v14530_v5  ;;  %v10140_v21 = vrot.slane %v10138_v56, 4  ;;  %v10164_v56 = vrot.slane %v10162_v53, 4 }
 0x59b   : > { %v17967_v33 = vrot.slane %v10134_v15, 5  ;;  %v17991_v15 = vrot.slane %v10158_v28, 5  ;;  %v18635_v28 = vld [vmem:[#allocation49_spill] sm:$0xff] }
 0x59c   : > { %v10168_v53 = vshll.u32 %v18635_v28, 16 }
 0x59d   : > { %13638 = vmatpush3.bf16.msra.mxu1 %v14530_v5  ;;  %v10084_v5 = vrot.slane %v10083_v54, 4  ;;  %v10186_v54 = vshrl.u32 %v18633_v48, 16 }
 0x59e   : > { %13639 = vmatprep.subr.bf16.mxu1 %v14533_v49 }
 0x59f   : > { %v10089_v61 = vsel %vm15087_vm11, %v10084_v5, %v10088_v60  ;;  %v10955_v5 = vrot.slane %v10953_v23, 4 }
 0x5a0   : > { %13608 = vmatmul.mubr.bf16.gmra.mrb[8].mxu1 %v14526_v59 }
 0x5a1   : > { %13611 = vmatprep.mubr.bf16.mxu1 %v14528_v55  ;;  %13640 = vmatpush3.bf16.msra.mxu1 %v14533_v49  ;;  %v18630_v49 = vld [vmem:[#allocation42_spill] sm:$0xff] }
 0x5a2   : > { %13641 = vmatprep.subr.bf16.mxu1 %v14536_v0  ;;  %v10120_v59 = vshll.u32 %v18630_v49, 16  ;;  %v10037_v55 = vld [vmem:[#allocation3 + $0x3c] sm:$0xf]  ;;  %v10173_v49 = vshrl.u32 %v10040_v57, 16 }
 0x5a3   : > { %v10149_v43 = vshrl.u32 %v10037_v55, 16  ;;  %v10152_v24 = vshll.u32 %v10037_v55, 16 }
 0x5a4   : > { %v17971_v62 = vrot.slane %v10120_v59, 5  ;;  %v10176_v59 = vshll.u32 %v10040_v57, 16  ;;  %v10165_v57 = vor.u32 %v10164_v56, %v17991_v15  ;;  %v14613_v56 = vld [vmem:[#allocation3 + $0x5c] sm:$0x1] }
 0x5a5   : > { %13642 = vmatpush3.bf16.msra.mxu1 %v14536_v0  ;;  %v10127_v0 = vrot.slane %v10125_v38, 4  ;;  %v10151_v38 = vrot.slane %v10149_v43, 4  ;;  %v10154_v18 = vrot.slane %v10152_v24, 5 }
 0x5a6   : > { %13643 = vmatprep.subr.bf16.mxu1 %v14539_v30  ;;  %v10178_v48 = vrot.slane %v10176_v59, 5 }
 0x5a7   : > { %v10155_v50 = vor.u32 %v10154_v18, %v10151_v38  ;;  %v10170_v18 = vrot.slane %v10168_v53, 5 }
 0x5a8   : > { %13612 = vmatmul.mubr.bf16.gmra.mrb[12].mxu1 %v14529_v1  ;;  %v17964_v1 = vrot.slane %v10107_v7, 4 }
 0x5a9   : > { %13615 = vmatprep.mubr.bf16.mxu1 %v14531_v63  ;;  %13644 = vmatpush3.bf16.msra.mxu1 %v14539_v30  ;;  %v10099_v30 = vsel %vm15087_vm11, %v10094_v46, %v10098_v47  ;;  %v10130_v63 = vrot.slane %v10128_v26, 5  ;;  %v18634_v46 = vld [vmem:[#allocation52_spill] sm:$0xff]  ;;  %v12206_v26 = vrot.slane %v10797_v10, 9 }
 0x5aa   : > { %13645 = vmatprep.subr.bf16.mxu1 %v14542_v35  ;;  %v12167_v52 = vcombine.low %v10089_v61, %v10099_v30  ;;  %v10113_v22 = vsel %vm15087_vm11, %v17964_v1, %v17957_v9  ;;  %v10206_v7 = vshll.u32 %v18634_v46, 16  ;;  %v14541_v47 = vld [vmem:[#allocation3 + $0xcc] sm:$0xff]   ;;  %v10188_v30 = vrot.slane %v10186_v54, 4 }
 0x5ab   : > { %v10131_v16 = vor.u32 %v10130_v63, %v10127_v0  ;;  %v17993_v0 = vrot.slane %v10182_v27, 5  ;;  %v17997_v55 = vsel %vm15442_vm14, %v12206_v26, %v10953_v23  ;;  %v10166_v26 = vrot.slane %v10165_v57, 4 }
 0x5ad   : > { %13646 = vmatpush3.bf16.msra.mxu1 %v14542_v35  ;;  %v10117_v35 = vor.u32 %v10116_v34, %v17957_v9  ;;  %v10043_v9 = vld [vmem:[#allocation3 + $0x54] sm:$0xf]  ;;  %v10210_v34 = vshrl.u32 %v18634_v46, 16  ;;  %v10132_v24 = vrot.slane %v10131_v16, 4  ;;  %v10189_v27 = vor.u32 %v10188_v30, %v17993_v0  ;;  %v14612_v46 = vld [vmem:[#allocation3 + $0x50] sm:$0x1] }
 0x5ae   : > { %13679 = vmatprep.subr.bf16.mxu1 %v17949_v11  ;;  %v10197_v1 = vshrl.u32 %v10043_v9, 16 }
 0x5af   : > { %v10118_v60 = vrot.slane %v10117_v35, 4  ;;  %v10200_v35 = vshll.u32 %v10043_v9, 16  ;;  %v10212_v61 = vrot.slane %v10210_v34, 4  ;;  %v10137_v38 = vsel %vm15087_vm11, %v10132_v24, %v17967_v33  ;;  %v14614_v24 = vld [vmem:[#allocation3 + $0x70] sm:$0xf] }
 0x5b0   : > { %13616 = vmatmul.mubr.bf16.gmra.mrb[16].mxu1 %v14532_v44  ;;  %v18631_v44 = vld [vmem:[#allocation44_spill] sm:$0xff]  ;;  %v10199_v54 = vrot.slane %v10197_v1, 4  ;;  %v10156_v34 = vrot.slane %v10155_v50, 4  ;;  %v10258_v28 = vshrl.u32 %v14614_v24, 16 }
 0x5b1   : > { %13619 = vmatprep.mubr.bf16.mxu1 %v14534_v51  ;;  %v10144_v29 = vshll.u32 %v18631_v44, 16  ;;  %v14540_v51 = vld [vmem:[#allocation3 + $0xc0] sm:$0xff]   ;;  %v10202_v10 = vrot.slane %v10200_v35, 5  ;;  %v10049_v1 = vld [vmem:[#allocation3 + $0x6c] sm:$0xf] }
 0x5b2   : > { %v10046_v44 = vld [vmem:[#allocation3 + $0x60] sm:$0xf]  ;;  %v10161_v53 = vsel %vm15087_vm11, %v10156_v34, %v17991_v15  ;;  %v10245_v57 = vshrl.u32 %v10049_v1, 16  ;;  %v14545_v15 = vld [vmem:[#allocation9 + $0x210] sm:$0xff]   ;;  %v14616_v34 = vld [vmem:[#allocation3 + $0x7c] sm:$0xf] }
 0x5b3   : > { %v10221_v23 = vshrl.u32 %v10046_v44, 16  ;;  %v10224_v9 = vshll.u32 %v10046_v44, 16  ;;  %v10203_v59 = vor.u32 %v10202_v10, %v10199_v54 }
 0x5b5   : > { %v10223_v30 = vrot.slane %v10221_v23, 4  ;;  %v10204_v23 = vrot.slane %v10203_v59, 4 }
 0x5b8   : > { %13620 = vmatmul.mubr.bf16.gmra.mrb[20].mxu1 %v14535_v58  ;;  %v10141_v58 = vor.u32 %v10140_v21, %v17967_v33  ;;  %v10146_v21 = vrot.slane %v10144_v29, 5  ;;  %v10175_v29 = vrot.slane %v10173_v49, 4  ;;  %v10190_v49 = vrot.slane %v10189_v27, 4 }
 0x5b9   : > { %13623 = vmatprep.mubr.bf16.mxu1 %v14537_v32  ;;  %v10956_v32 = vrot.slane %v17983_v4, 5  ;;  %v10171_v27 = vsel %vm15087_vm11, %v10166_v26, %v10170_v18  ;;  %v10278_v26 = vshll.u32 %v14616_v34, 16  ;;  %v10282_v18 = vshrl.u32 %v14616_v34, 16 }
 0x5ba   : > { %v10142_v42 = vrot.slane %v10141_v58, 4 }
 0x5bb   : > { %v18001_v63 = vsel %vm15442_vm14, %v10955_v5, %v10956_v32  ;;  %v10216_v5 = vshll.u32 %v14613_v56, 16  ;;  %v12170_v56 = vcombine.low %v10161_v53, %v10171_v27  ;;  %v18043_v53 = vrot.slane %v10278_v26, 5 }
 0x5bc   : > { %v12222_v43 = vcombine.low %v17997_v55, %v18001_v63 }
 0x5bd   : > { %v10218_v50 = vrot.slane %v10216_v5, 5 }
 0x5c0   : > { %13624 = vmatmul.mubr.bf16.gmra.mrb[24].mxu1 %v14538_v17  ;;  %v18003_v17 = vrot.slane %v10206_v7, 5  ;;  %v10192_v7 = vshll.u32 %v14612_v46, 16  ;;  %v10247_v46 = vrot.slane %v10245_v57, 4 }
 0x5c1   : > { %13627 = vmatprep.mubr.bf16.mxu1 %v14540_v51  ;;  %v10123_v51 = vsel %vm15087_vm11, %v10118_v60, %v17971_v62  ;;  %v18636_v62 = vld [vmem:[#allocation54_spill] sm:$0xff] }
 0x5c2   : > { %v10213_v32 = vor.u32 %v10212_v61, %v18003_v17  ;;  %v10230_v60 = vshll.u32 %v18636_v62, 16  ;;  %v10234_v16 = vshrl.u32 %v18636_v62, 16  ;;  %v12168_v58 = vcombine.low %v10113_v22, %v10123_v51  ;;  %v14544_v22 = vld [vmem:[#allocation9 + $0x208] sm:$0xff]  }
 0x5c3   : > { %v10226_v61 = vrot.slane %v10224_v9, 5 }
 0x5c4   : > { %v10214_v35 = vrot.slane %v10213_v32, 4  ;;  %v18021_v44 = vrot.slane %v10230_v60, 5  ;;  %v10236_v33 = vrot.slane %v10234_v16, 4  ;;  %v14615_v60 = vld [vmem:[#allocation3 + $0x68] sm:$0x1] }
 0x5c5   : > { %v10227_v9 = vor.u32 %v10226_v61, %v10223_v30  ;;  %v10240_v16 = vshll.u32 %v14615_v60, 16  ;;  %v10055_v61 = vld [vmem:[#allocation3 + $0x84] sm:$0xf] }
 0x5c6   : > { %v10219_v32 = vsel %vm15087_vm11, %v10214_v35, %v10218_v50  ;;  %v10237_v62 = vor.u32 %v10236_v33, %v18021_v44  ;;  %v14546_v35 = vld [vmem:[#allocation9 + $0x218] sm:$0xff]   ;;  %v10293_v50 = vshrl.u32 %v10055_v61, 16  ;;  %v10296_v57 = vshll.u32 %v10055_v61, 16  ;;  %v14548_v61 = vld [vmem:[#allocation9 + $0x228] sm:$0xff]  }
 0x5c7   : > { %v10228_v30 = vrot.slane %v10227_v9, 4 }
 0x5c8   : > { %13628 = vmatmul.mubr.bf16.gmra.mrb[28].mxu1 %v14541_v47  ;;  %v10179_v47 = vor.u32 %v10178_v48, %v10175_v29  ;;  %v10248_v29 = vshll.u32 %v10049_v1, 16  ;;  %v10052_v48 = vld [vmem:[#allocation3 + $0x78] sm:$0xf]  ;;  %v10242_v1 = vrot.slane %v10240_v16, 5  ;;  %v10238_v33 = vrot.slane %v10237_v62, 4 }
 0x5c9   : > { %13647 = vmatprep.mubr.bf16.mxu1 %v12167_v52  ;;  %v10147_v52 = vsel %vm15087_vm11, %v10142_v42, %v10146_v21  ;;  %v10194_v21 = vrot.slane %v10192_v7, 5  ;;  %v10254_v42 = vshll.u32 %v14614_v24, 16  ;;  %v10233_v60 = vsel %vm15087_vm11, %v10228_v30, %v18021_v44 }
 0x5ca   : > { %v12169_v51 = vcombine.low %v10137_v38, %v10147_v52  ;;  %v10180_v54 = vrot.slane %v10179_v47, 4  ;;  %v10269_v38 = vshrl.u32 %v10052_v48, 16  ;;  %v10272_v52 = vshll.u32 %v10052_v48, 16 }
 0x5cb   : > { %v10195_v10 = vsel %vm15087_vm11, %v10190_v49, %v10194_v21  ;;  %v10250_v7 = vrot.slane %v10248_v29, 5  ;;  %v10209_v47 = vsel %vm15087_vm11, %v10204_v23, %v18003_v17  ;;  %v10284_v17 = vrot.slane %v10282_v18, 4  ;;  %v14618_v29 = vld [vmem:[#allocation3 + $0x88] sm:$0xf] }
 0x5cc   : > { %v10185_v5 = vsel %vm15087_vm11, %v10180_v54, %v17993_v0  ;;  %v12172_v59 = vcombine.low %v10209_v47, %v10219_v32  ;;  %v10271_v21 = vrot.slane %v10269_v38, 4  ;;  %v10274_v24 = vrot.slane %v10272_v52, 5  ;;  %v14547_v54 = vld [vmem:[#allocation9 + $0x220] sm:$0xff]   ;;  %v14619_v32 = vld [vmem:[#allocation3 + $0x94] sm:$0xf] }
 0x5cd   : > { %v12171_v49 = vcombine.low %v10185_v5, %v10195_v10  ;;  %v10251_v0 = vor.u32 %v10250_v7, %v10247_v46  ;;  %v10302_v48 = vshll.u32 %v14618_v29, 16  ;;  %v10306_v27 = vshrl.u32 %v14618_v29, 16  ;;  %v14620_v7 = vld [vmem:[#allocation3 + $0x80] sm:$0x1]  ;;  %v10061_v47 = vld [vmem:[#allocation3 + $0x9c] sm:$0xf] }
 0x5ce   : > { %v10326_v9 = vshll.u32 %v14619_v32, 16  ;;  %v10330_v62 = vshrl.u32 %v14619_v32, 16  ;;  %v10243_v16 = vsel %vm15087_vm11, %v10238_v33, %v10242_v1  ;;  %v10285_v46 = vor.u32 %v10284_v17, %v18043_v53 }
 0x5cf   : > { %v10252_v38 = vrot.slane %v10251_v0, 4  ;;  %v10288_v34 = vshll.u32 %v14620_v7, 16  ;;  %v10295_v26 = vrot.slane %v10293_v50, 4  ;;  %v10298_v18 = vrot.slane %v10296_v57, 5 }
 0x5d0   : > { %13648 = vmatmul.mubr.bf16.vlgmr.msra.gmra.mrb[0].mxu1 %v12168_v58  ;;  %v18034_v58 = vrot.slane %v10254_v42, 5  ;;  %v10058_v42 = vld [vmem:[#allocation3 + $0x90] sm:$0xf]  ;;  %v10308_v5 = vrot.slane %v10306_v27, 4  ;;  %v18053_v30 = vrot.slane %v10326_v9, 5  ;;  %v10332_v1 = vrot.slane %v10330_v62, 4 }
 0x5d1   : > { %13651 = vmatprep.mubr.bf16.mxu1 %v12169_v51  ;;  %13680 = vmatpush3.bf16.msra.mxu1 %v17949_v11  ;;  %v10260_v11 = vrot.slane %v10258_v28, 4  ;;  %v10317_v10 = vshrl.u32 %v10058_v42, 16  ;;  %v10320_v23 = vshll.u32 %v10058_v42, 16  ;;  %v12173_v33 = vcombine.low %v10233_v60, %v10243_v16  ;;  %v10064_v9 = vld [vmem:[#allocation3 + $0xa8] sm:$0xf] }
 0x5d2   : > { %13681 = vmatprep.subr.bf16.mxu1 %v14544_v22  ;;  %v10299_v42 = vor.u32 %v10298_v18, %v10295_v26  ;;  %v10290_v50 = vrot.slane %v10288_v34, 5  ;;  %v10333_v29 = vor.u32 %v10332_v1, %v18053_v30  ;;  %v14623_v62 = vld [vmem:[#allocation3 + $0x98] sm:$0x1]  ;;  %v14624_v16 = vld [vmem:[#allocation3 + $0xac] sm:$0xf]  ;;  %v10365_v26 = vshrl.u32 %v10064_v9, 16 }
 0x5d3   : > { %v10261_v51 = vor.u32 %v10260_v11, %v18034_v58  ;;  %v10275_v11 = vor.u32 %v10274_v24, %v10271_v21  ;;  %v10319_v44 = vrot.slane %v10317_v10, 4  ;;  %v10286_v24 = vrot.slane %v10285_v46, 4  ;;  %v14622_v10 = vld [vmem:[#allocation3 + $0xa0] sm:$0xf] }
 0x5d4   : > { %v10354_v32 = vshrl.u32 %v14622_v10, 16  ;;  %v10336_v60 = vshll.u32 %v14623_v62, 16  ;;  %v10334_v34 = vrot.slane %v10333_v29, 4  ;;  %v10368_v18 = vshll.u32 %v10064_v9, 16 }
 0x5d5   : > { %13682 = vmatpush3.bf16.msra.mxu1 %v14544_v22  ;;  %v14617_v22 = vld [vmem:[#allocation3 + $0x74] sm:$0x1]  ;;  %v10276_v21 = vrot.slane %v10275_v11, 4  ;;  %v10378_v11 = vshrl.u32 %v14624_v16, 16 }
 0x5d6   : > { %13683 = vmatprep.subr.bf16.mxu1 %v14545_v15  ;;  %v10264_v28 = vshll.u32 %v14617_v22, 16  ;;  %v10341_v22 = vshrl.u32 %v10061_v47, 16  ;;  %v10356_v1 = vrot.slane %v10354_v32, 4  ;;  %v14627_v32 = vld [vmem:[#allocation3 + $0xc4] sm:$0xf] }
 0x5d7   : > { %v10422_v9 = vshll.u32 %v14627_v32, 16 }
 0x5d8   : > { %13652 = vmatmul.mubr.bf16.gmra.mrb[4].mxu1 %v12170_v56  ;;  %v10266_v52 = vrot.slane %v10264_v28, 5  ;;  %v18051_v56 = vrot.slane %v10302_v48, 5  ;;  %v10344_v28 = vshll.u32 %v10061_v47, 16  ;;  %v14549_v48 = vld [vmem:[#allocation9 + $0x230] sm:$0xff]   ;;  %v10343_v46 = vrot.slane %v10341_v22, 4 }
 0x5d9   : > { %13655 = vmatprep.mubr.bf16.mxu1 %v12171_v49  ;;  %13684 = vmatpush3.bf16.msra.mxu1 %v14545_v15  ;;  %v10262_v15 = vrot.slane %v10261_v51, 4  ;;  %v10322_v49 = vrot.slane %v10320_v23, 5  ;;  %v10350_v23 = vshll.u32 %v14622_v10, 16  ;;  %v10070_v10 = vld [vmem:[#allocation3 + $0xc0] sm:$0xf] }
 0x5da   : > { %13685 = vmatprep.subr.bf16.mxu1 %v14546_v35  ;;  %v10309_v0 = vor.u32 %v10308_v5, %v18051_v56  ;;  %v10346_v7 = vrot.slane %v10344_v28, 5  ;;  %v14550_v5 = vld [vmem:[#allocation9 + $0x238] sm:$0xff]  }
 0x5db   : > { %v10267_v51 = vsel %vm15087_vm11, %v10262_v15, %v10266_v52  ;;  %v10323_v57 = vor.u32 %v10322_v49, %v10319_v44  ;;  %v10374_v15 = vshll.u32 %v14624_v16, 16  ;;  %v18067_v49 = vrot.slane %v10350_v23, 5 }
 0x5dc   : > { %v10310_v52 = vrot.slane %v10309_v0, 4  ;;  %v14625_v0 = vld [vmem:[#allocation3 + $0xa4] sm:$0x1] }
 0x5dd   : > { %13686 = vmatpush3.bf16.msra.mxu1 %v14546_v35  ;;  %v10257_v35 = vsel %vm15087_vm11, %v10252_v38, %v18034_v58  ;;  %v14621_v58 = vld [vmem:[#allocation3 + $0x8c] sm:$0x1]  ;;  %v10300_v38 = vrot.slane %v10299_v42, 4  ;;  %v10347_v42 = vor.u32 %v10346_v7, %v10343_v46  ;;  %v10360_v22 = vshll.u32 %v14625_v0, 16 }
 0x5de   : > { %13687 = vmatprep.subr.bf16.mxu1 %v14547_v54  ;;  %v12174_v17 = vcombine.low %v10257_v35, %v10267_v51  ;;  %v10312_v27 = vshll.u32 %v14621_v58, 16  ;;  %v18069_v51 = vrot.slane %v10374_v15, 5  ;;  %v10067_v35 = vld [vmem:[#allocation3 + $0xb4] sm:$0xf]  ;;  %v10357_v29 = vor.u32 %v10356_v1, %v18067_v49  ;;  %v10073_v7 = vld [vmem:[#allocation3 + $0xcc] sm:$0xf] }
 0x5df   : > { %v10362_v16 = vrot.slane %v10360_v22, 5  ;;  %v10416_v46 = vshll.u32 %v10070_v10, 16  ;;  %v10424_v1 = vrot.slane %v10422_v9, 5  ;;  %v14630_v9 = vld [vmem:[#allocation3 + $0xc8] sm:$0x1] }
 0x5e0   : > { %13656 = vmatmul.mubr.bf16.gmra.mrb[8].mxu1 %v12172_v59  ;;  %v10281_v59 = vsel %vm15087_vm11, %v10276_v21, %v18043_v53  ;;  %v10324_v53 = vrot.slane %v10323_v57, 4  ;;  %v10314_v44 = vrot.slane %v10312_v27, 5  ;;  %v10380_v21 = vrot.slane %v10378_v11, 4  ;;  %v14628_v11 = vld [vmem:[#allocation3 + $0xb0] sm:$0x1] }
 0x5e1   : > { %13659 = vmatprep.mubr.bf16.mxu1 %v12173_v33  ;;  %13688 = vmatpush3.bf16.msra.mxu1 %v14547_v54  ;;  %v10291_v54 = vsel %vm15087_vm11, %v10286_v24, %v10290_v50  ;;  %v10338_v33 = vrot.slane %v10336_v60, 5  ;;  %v10367_v50 = vrot.slane %v10365_v26, 4  ;;  %v10370_v57 = vrot.slane %v10368_v18, 5 }
 0x5e2   : > { %13689 = vmatprep.subr.bf16.mxu1 %v14548_v61  ;;  %v12175_v47 = vcombine.low %v10281_v59, %v10291_v54  ;;  %v10315_v24 = vsel %vm15087_vm11, %v10310_v52, %v10314_v44  ;;  %v10329_v28 = vsel %vm15087_vm11, %v10324_v53, %v18053_v30  ;;  %v14626_v59 = vld [vmem:[#allocation3 + $0xb8] sm:$0xf]  ;;  %v10381_v23 = vor.u32 %v10380_v21, %v18069_v51 }
 0x5e3   : > { %v10398_v58 = vshll.u32 %v14626_v59, 16  ;;  %v10402_v27 = vshrl.u32 %v14626_v59, 16  ;;  %v10426_v54 = vshrl.u32 %v14627_v32, 16  ;;  %v10348_v60 = vrot.slane %v10347_v42, 4 }
 0x5e4   : > { %v10371_v15 = vor.u32 %v10370_v57, %v10367_v50  ;;  %v10413_v52 = vshrl.u32 %v10070_v10, 16  ;;  %v10358_v53 = vrot.slane %v10357_v29, 4  ;;  %v10437_v21 = vshrl.u32 %v10073_v7, 16 }
 0x5e5   : > { %13690 = vmatpush3.bf16.msra.mxu1 %v14548_v61  ;;  %v10305_v61 = vsel %vm15087_vm11, %v10300_v38, %v18051_v56  ;;  %v10389_v56 = vshrl.u32 %v10067_v35, 16  ;;  %v10384_v38 = vshll.u32 %v14628_v11, 16  ;;  %v10400_v26 = vrot.slane %v10398_v58, 5 }
 0x5e6   : > { %13691 = vmatprep.subr.bf16.mxu1 %v14549_v48  ;;  %v12176_v30 = vcombine.low %v10305_v61, %v10315_v24  ;;  %v10404_v18 = vrot.slane %v10402_v27, 4  ;;  %v10450_v61 = vshrl.u32 %v17981_v25, 16  ;;  %v10372_v24 = vrot.slane %v10371_v15, 4 }
 0x5e7   : > { %v10386_v42 = vrot.slane %v10384_v38, 5  ;;  %v10415_v0 = vrot.slane %v10413_v52, 4  ;;  %v10418_v22 = vrot.slane %v10416_v46, 5  ;;  %v10456_v52 = vshll.u32 %v17983_v4, 16 }
 0x5e8   : > { %13660 = vmatmul.mubr.bf16.gmra.mrb[12].mxu1 %v12174_v17  ;;  %v10339_v17 = vsel %vm15087_vm11, %v10334_v34, %v10338_v33  ;;  %v10391_v34 = vrot.slane %v10389_v56, 4  ;;  %v10428_v33 = vrot.slane %v10426_v54, 4  ;;  %v10405_v50 = vor.u32 %v10404_v18, %v10400_v26  ;;  %v14629_v56 = vld [vmem:[#allocation3 + $0xbc] sm:$0x1] }
 0x5e9   : > { %13663 = vmatprep.mubr.bf16.mxu1 %v12175_v47  ;;  %13692 = vmatpush3.bf16.msra.mxu1 %v14549_v48  ;;  %v10392_v48 = vshll.u32 %v10067_v35, 16  ;;  %v12177_v62 = vcombine.low %v10329_v28, %v10339_v17  ;;  %v10382_v47 = vrot.slane %v10381_v23, 4  ;;  %v10440_v35 = vshll.u32 %v10073_v7, 16 }
 0x5ea   : > { %13693 = vmatprep.subr.bf16.mxu1 %v14550_v5  ;;  %v10353_v28 = vsel %vm15087_vm11, %v10348_v60, %v18067_v49  ;;  %v10363_v17 = vsel %vm15087_vm11, %v10358_v53, %v10362_v16  ;;  %v10408_v59 = vshll.u32 %v14629_v56, 16  ;;  %v10429_v58 = vor.u32 %v10428_v33, %v10424_v1 }
 0x5eb   : > { %v10394_v44 = vrot.slane %v10392_v48, 5  ;;  %v10387_v57 = vsel %vm15087_vm11, %v10382_v47, %v10386_v42  ;;  %v10442_v27 = vrot.slane %v10440_v35, 5  ;;  %v10452_v23 = vrot.slane %v10450_v61, 4 }
 0x5ec   : > { %v12178_v48 = vcombine.low %v10353_v28, %v10363_v17  ;;  %v10377_v49 = vsel %vm15087_vm11, %v10372_v24, %v18069_v51  ;;  %v10419_v32 = vor.u32 %v10418_v22, %v10415_v0  ;;  %v10432_v54 = vshll.u32 %v14630_v9, 16  ;;  %v18637_v24 = vld [vmem:[#allocation47_spill] sm:$0xff]  ;;  %v18640_v0 = vld [vmem:[#allocation50_spill] sm:$0xff]  ;;  %v18659_v9 = vld [vmem:[#allocation64_spill] sm:$0xff] }
 0x5ed   : > { %13694 = vmatpush3.bf16.msra.mxu1 %v14550_v5  ;;  %v10446_v5 = vshll.u32 %v17981_v25, 16  ;;  %v10395_v29 = vor.u32 %v10394_v44, %v10391_v34  ;;  %v10439_v25 = vrot.slane %v10437_v21, 4  ;;  %v10410_v60 = vrot.slane %v10408_v59, 5  ;;  %v18641_v22 = vld [vmem:[#allocation51_spill] sm:$0xff] }
 0x5ee   : > { %v10430_v16 = vrot.slane %v10429_v58, 4  ;;  %v10420_v46 = vrot.slane %v10419_v32, 4  ;;  %v10434_v7 = vrot.slane %v10432_v54, 5  ;;  %v10458_v44 = vrot.slane %v10456_v52, 5  ;;  %v18644_v17 = vld [vmem:[#allocation55_spill] sm:$0xff] }
 0x5ef   : > { %v10448_v10 = vrot.slane %v10446_v5, 5  ;;  %v10396_v15 = vrot.slane %v10395_v29, 4  ;;  %v10443_v11 = vor.u32 %v10442_v27, %v10439_v25  ;;  %v18642_v28 = vcombine.low %v18640_v0, %v18641_v22  ;;  %v18647_v29 = vld [vmem:[#allocation57_spill] sm:$0xff]  ;;  %v18651_v58 = vld [vmem:[#allocation59_spill] sm:$0xff]  ;;  %v18652_v25 = vld [vmem:[#allocation60_spill] sm:$0xff] }
 0x5f0   : > { %13664 = vmatmul.mubr.bf16.gmra.mrb[16].mxu1 %v12176_v30  ;;  %v12179_v30 = vcombine.low %v10377_v49, %v10387_v57  ;;  %v10435_v51 = vsel %vm15087_vm11, %v10430_v16, %v10434_v7  ;;  %v10425_v21 = vsel %vm15087_vm11, %v10420_v46, %v10424_v1  ;;  %v18643_v1 = vld [vmem:[#allocation53_spill] sm:$0xff]  ;;  %v18646_v57 = vld [vmem:[#allocation56_spill] sm:$0xff]  ;;  %v18650_v59 = vcombine.low %v17677_v45, %v18649_v3  ;;  %v18657_v49 = vld [vmem:[#allocation63_spill] sm:$0xff] }
 0x5f1   : > { %13667 = vmatprep.mubr.bf16.mxu1 %v12177_v62  ;;  %v10406_v62 = vrot.slane %v10405_v50, 4  ;;  %v10453_v38 = vor.u32 %v10452_v23, %v10448_v10  ;;  %v10401_v34 = vsel %vm15087_vm11, %v10396_v15, %v10400_v26  ;;  %v10444_v18 = vrot.slane %v10443_v11, 4  ;;  %v18638_v26 = vld [vmem:[#allocation48_spill] sm:$0xff] }
 0x5f2   : > { %v12181_v35 = vcombine.low %v10425_v21, %v10435_v51  ;;  %v18639_v42 = vcombine.low %v18637_v24, %v18638_v26  ;;  %v18645_v50 = vcombine.low %v18643_v1, %v18644_v17  ;;  %v18648_v56 = vcombine.low %v18646_v57, %v18647_v29  ;;  %v18665_v16 = vld [vmem:[#allocation68_spill] sm:$0xff] }
 0x5f3   : > { %v10411_v53 = vsel %vm15087_vm11, %v10406_v62, %v10410_v60  ;;  %v10454_v47 = vrot.slane %v10453_v38, 4  ;;  %v10449_v4 = vsel %vm15087_vm11, %v10444_v18, %v10448_v10  ;;  %v18653_v27 = vcombine.low %v18651_v58, %v18652_v25  ;;  %v18654_v10 = vld [vmem:[#allocation61_spill] sm:$0xff]  ;;  %v18662_v62 = vld [vmem:[#allocation66_spill] sm:$0xff]  ;;  %v18664_v60 = vld [vmem:[#allocation67_spill] sm:$0xff] }
 0x5f4   : > { %v12180_v33 = vcombine.low %v10401_v34, %v10411_v53  ;;  %v18655_v23 = vcombine.low %v17698_v40, %v18654_v10  ;;  %v18660_v54 = vcombine.low %v17721_v6, %v18659_v9  ;;  %v18666_v15 = vcombine.low %v18664_v60, %v18665_v16  ;;  %v18159_v40 = vld [vmem:[%s18306_s5] ss:$0 sm:$0xff] }
 0x5f5   : > { %v10459_v5 = vsel %vm15087_vm11, %v10454_v47, %v10458_v44 }
 0x5f6   : > { %v12182_v61 = vcombine.low %v10449_v4, %v10459_v5 }
 0x5f8   : > { %13668 = vmatmul.mubr.bf16.gmra.mrb[20].mxu1 %v12178_v48  ;;  %v18656_v48 = vld [vmem:[#allocation62_spill] sm:$0xff] }
 0x5f9   : > { %13671 = vmatprep.mubr.bf16.mxu1 %v12179_v30  ;;  %v18658_v32 = vcombine.low %v18656_v48, %v18657_v49  ;;  %v18661_v30 = vld [vmem:[#allocation65_spill] sm:$0xff] }
 0x5fa   : > { %v18663_v45 = vcombine.low %v18661_v30, %v18662_v62 }
 0x600   : > { %13672 = vmatmul.mubr.bf16.gmra.mrb[24].mxu1 %v12180_v33 }
 0x601   : > { %13675 = vmatprep.mubr.bf16.mxu1 %v12181_v35 }
 0x608   : > { %13676 = vmatmul.mubr.bf16.gmra.mrb[28].mxu1 %v12182_v61 }
 0x609   : > { %13695 = vmatprep.mubr.bf16.mxu1 %v18639_v42 }
 0x610   : > { %13696 = vmatmul.mubr.bf16.vlgmr.msra.gmra.mrb[0].mxu1 %v18642_v28 }
 0x611   : > { %13699 = vmatprep.mubr.bf16.mxu1 %v18645_v50 }
 0x618   : > { %13700 = vmatmul.mubr.bf16.gmra.mrb[4].mxu1 %v18648_v56 }
 0x619   : > { %13703 = vmatprep.mubr.bf16.mxu1 %v18650_v59 }
 0x620   : > { %13704 = vmatmul.mubr.bf16.gmra.mrb[8].mxu1 %v18653_v27 }
 0x621   : > { %13707 = vmatprep.mubr.bf16.mxu1 %v18655_v23 }
 0x628   : > { %13708 = vmatmul.mubr.bf16.gmra.mrb[12].mxu1 %v18658_v32 }
 0x629   : > { %13711 = vmatprep.mubr.bf16.mxu1 %v18660_v54 }
 0x630   : > { %13712 = vmatmul.mubr.bf16.gmra.mrb[16].mxu1 %v18663_v45 }
 0x631   : > { %13715 = vmatprep.mubr.bf16.mxu1 %v18666_v15 }
 0x638   : > { %13716 = vmatmul.mubr.bf16.gmra.mrb[20].mxu1 %v12218_v14 }
 0x639   : > { %13719 = vmatprep.mubr.bf16.mxu1 %v12219_v36 }
 0x640   : > { %13720 = vmatmul.mubr.bf16.gmra.mrb[24].mxu1 %v12220_v41 }
 0x641   : > { %13723 = vmatprep.mubr.bf16.mxu1 %v12221_v8 }
 0x648   : > { %13724 = vmatmul.mubr.bf16.gmra.mrb[28].mxu1 %v12222_v43 }
 0x6e3   : > { %v13697_v6 = vpop.f32.mrb[0].mxu1 }
 0x6e4   : > { %v11289_v19 = vmul.f32 %v13697_v6, %v18159_v40  ;;  %v11121_v14 = vpop.f32.mrb[1].mxu1 }
 0x6e5   : > { %v11287_v31 = vmul.f32 %v18159_v40, %v11121_v14  ;;  %v13698_v37 = vpop.f32.mrb[2].mxu1 }
 0x6e6   : > { %v11328_v12 = vadd.f32 %v18164_v39, %v11289_v19  ;;  %v11290_v36 = vmul.f32 %v13698_v37, %v18159_v40  ;;  %v11124_v20 = vpop.f32.mrb[3].mxu1 }
 0x6e7   : > { %v11326_v41 = vadd.f32 %v18164_v39, %v11287_v31  ;;  %v11288_v13 = vmul.f32 %v18159_v40, %v11124_v20 }
 0x6e8   : > { %v11329_v2 = vadd.f32 %v18164_v39, %v11290_v36  ;;  %v11360_v55 = vmax.f32 %v11328_v12, 0.0 }
 0x6e9   : > { %v11327_v8 = vadd.f32 %v18164_v39, %v11288_v13  ;;  %v11358_v43 = vmax.f32 %v11326_v41, 0.0 }
 0x6ea   : > { %v11361_v63 = vmax.f32 %v11329_v2, 0.0 }
 0x6eb   : > { %v11359_v11 = vmax.f32 %v11327_v8, 0.0  ;;  %v13701_v38 = vpop.f32.mrb[4].mxu1 }
 0x6ec   : > { %v12344_v52 = vpack.c.bf16 %v11361_v63, %v11360_v55  ;;  %v11293_v46 = vmul.f32 %v13701_v38, %v18159_v40  ;;  %v11137_v7 = vpop.f32.mrb[5].mxu1 }
 0x6ed   : > { %v12339_v53 = vpack.c.bf16 %v11359_v11, %v11358_v43  ;;  %v11291_v51 = vmul.f32 %v18159_v40, %v11137_v7  ;;  %v13702_v34 = vpop.f32.mrb[6].mxu1 }
 0x6ee   : > { %12416 = vst [vmem:[%s18178_s30 + $0x8] sm:$0xff] %v12344_v52   ;;  %v11332_v18 = vadd.f32 %v18164_v39, %v11293_v46  ;;  %v11294_v47 = vmul.f32 %v13702_v34, %v18159_v40  ;;  %v11140_v44 = vpop.f32.mrb[7].mxu1 }
 0x6ef   : > { %12340 = vst [vmem:[%s18178_s30] sm:$0xff] %v12339_v53   ;;  %v11330_v33 = vadd.f32 %v18164_v39, %v11291_v51  ;;  %v11292_v21 = vmul.f32 %v18159_v40, %v11140_v44 }
 0x6f0   : > { %v11333_v35 = vadd.f32 %v18164_v39, %v11294_v47  ;;  %v11364_v5 = vmax.f32 %v11332_v18, 0.0 }
 0x6f1   : > { %v11331_v4 = vadd.f32 %v18164_v39, %v11292_v21  ;;  %v11362_v24 = vmax.f32 %v11330_v33, 0.0 }
 0x6f2   : > { %v11365_v61 = vmax.f32 %v11333_v35, 0.0 }
 0x6f3   : > { %v11363_v26 = vmax.f32 %v11331_v4, 0.0  ;;  %v13705_v42 = vpop.f32.mrb[8].mxu1 }
 0x6f4   : > { %v12354_v0 = vpack.c.bf16 %v11365_v61, %v11364_v5  ;;  %v11297_v22 = vmul.f32 %v13705_v42, %v18159_v40  ;;  %v11153_v28 = vpop.f32.mrb[9].mxu1 }
 0x6f5   : > { %v12349_v1 = vpack.c.bf16 %v11363_v26, %v11362_v24  ;;  %v11295_v17 = vmul.f32 %v18159_v40, %v11153_v28  ;;  %v13706_v50 = vpop.f32.mrb[10].mxu1 }
 0x6f6   : > { %12418 = vst [vmem:[%s18178_s30 + $0x18] sm:$0xff] %v12354_v0   ;;  %v11336_v57 = vadd.f32 %v18164_v39, %v11297_v22  ;;  %v11298_v29 = vmul.f32 %v13706_v50, %v18159_v40  ;;  %v11156_v56 = vpop.f32.mrb[11].mxu1 }
 0x6f7   : > { %12417 = vst [vmem:[%s18178_s30 + $0x10] sm:$0xff] %v12349_v1   ;;  %v11334_v3 = vadd.f32 %v18164_v39, %v11295_v17  ;;  %v11296_v59 = vmul.f32 %v18159_v40, %v11156_v56 }
 0x6f8   : > { %v11337_v58 = vadd.f32 %v18164_v39, %v11298_v29  ;;  %v11368_v27 = vmax.f32 %v11336_v57, 0.0 }
 0x6f9   : > { %v11335_v25 = vadd.f32 %v18164_v39, %v11296_v59  ;;  %v11366_v23 = vmax.f32 %v11334_v3, 0.0 }
 0x6fa   : > { %v11369_v10 = vmax.f32 %v11337_v58, 0.0 }
 0x6fb   : > { %v11367_v48 = vmax.f32 %v11335_v25, 0.0  ;;  %v13709_v49 = vpop.f32.mrb[12].mxu1 }
 0x6fc   : > { %v12364_v32 = vpack.c.bf16 %v11369_v10, %v11368_v27  ;;  %v11301_v9 = vmul.f32 %v13709_v49, %v18159_v40  ;;  %v11169_v54 = vpop.f32.mrb[13].mxu1 }
 0x6fd   : > { %v12359_v30 = vpack.c.bf16 %v11367_v48, %v11366_v23  ;;  %v11299_v62 = vmul.f32 %v18159_v40, %v11169_v54  ;;  %v13710_v45 = vpop.f32.mrb[14].mxu1 }
 0x6fe   : > { %12420 = vst [vmem:[%s18178_s30 + $0x28] sm:$0xff] %v12364_v32   ;;  %v11340_v60 = vadd.f32 %v18164_v39, %v11301_v9  ;;  %v11302_v16 = vmul.f32 %v13710_v45, %v18159_v40  ;;  %v11172_v15 = vpop.f32.mrb[15].mxu1 }
 0x6ff   : > { %12419 = vst [vmem:[%s18178_s30 + $0x20] sm:$0xff] %v12359_v30   ;;  %v11338_v6 = vadd.f32 %v18164_v39, %v11299_v62  ;;  %v11300_v19 = vmul.f32 %v18159_v40, %v11172_v15 }
 0x700   : > { %v11341_v14 = vadd.f32 %v18164_v39, %v11302_v16  ;;  %v11372_v37 = vmax.f32 %v11340_v60, 0.0 }
 0x701   : > { %v11339_v31 = vadd.f32 %v18164_v39, %v11300_v19  ;;  %v11370_v36 = vmax.f32 %v11338_v6, 0.0 }
 0x702   : > { %v11373_v12 = vmax.f32 %v11341_v14, 0.0 }
 0x703   : > { %v11371_v20 = vmax.f32 %v11339_v31, 0.0  ;;  %v13713_v41 = vpop.f32.mrb[16].mxu1 }
 0x704   : > { %v12374_v13 = vpack.c.bf16 %v11373_v12, %v11372_v37  ;;  %v11305_v2 = vmul.f32 %v13713_v41, %v18159_v40  ;;  %v11185_v8 = vpop.f32.mrb[17].mxu1 }
 0x705   : > { %v12369_v55 = vpack.c.bf16 %v11371_v20, %v11370_v36  ;;  %v11303_v63 = vmul.f32 %v18159_v40, %v11185_v8  ;;  %v13714_v43 = vpop.f32.mrb[18].mxu1 }
 0x706   : > { %12422 = vst [vmem:[%s18178_s30 + $0x38] sm:$0xff] %v12374_v13   ;;  %v11344_v11 = vadd.f32 %v18164_v39, %v11305_v2  ;;  %v11306_v38 = vmul.f32 %v13714_v43, %v18159_v40  ;;  %v11188_v52 = vpop.f32.mrb[19].mxu1 }
 0x707   : > { %12421 = vst [vmem:[%s18178_s30 + $0x30] sm:$0xff] %v12369_v55   ;;  %v11342_v46 = vadd.f32 %v18164_v39, %v11303_v63  ;;  %v11304_v7 = vmul.f32 %v18159_v40, %v11188_v52 }
 0x708   : > { %v11345_v53 = vadd.f32 %v18164_v39, %v11306_v38  ;;  %v11376_v34 = vmax.f32 %v11344_v11, 0.0 }
 0x709   : > { %v11343_v51 = vadd.f32 %v18164_v39, %v11304_v7  ;;  %v11374_v47 = vmax.f32 %v11342_v46, 0.0 }
 0x70a   : > { %v11377_v18 = vmax.f32 %v11345_v53, 0.0 }
 0x70b   : > { %v11375_v44 = vmax.f32 %v11343_v51, 0.0  ;;  %v13717_v33 = vpop.f32.mrb[20].mxu1 }
 0x70c   : > { %v12384_v21 = vpack.c.bf16 %v11377_v18, %v11376_v34  ;;  %v11309_v35 = vmul.f32 %v13717_v33, %v18159_v40  ;;  %v11201_v4 = vpop.f32.mrb[21].mxu1 }
 0x70d   : > { %v12379_v5 = vpack.c.bf16 %v11375_v44, %v11374_v47  ;;  %v11307_v61 = vmul.f32 %v18159_v40, %v11201_v4  ;;  %v13718_v24 = vpop.f32.mrb[22].mxu1 }
 0x70e   : > { %12424 = vst [vmem:[%s18178_s30 + $0x48] sm:$0xff] %v12384_v21   ;;  %v11348_v26 = vadd.f32 %v18164_v39, %v11309_v35  ;;  %v11310_v42 = vmul.f32 %v13718_v24, %v18159_v40  ;;  %v11204_v0 = vpop.f32.mrb[23].mxu1 }
 0x70f   : > { %12423 = vst [vmem:[%s18178_s30 + $0x40] sm:$0xff] %v12379_v5   ;;  %v11346_v22 = vadd.f32 %v18164_v39, %v11307_v61  ;;  %v11308_v28 = vmul.f32 %v18159_v40, %v11204_v0 }
 0x710   : > { %v11349_v1 = vadd.f32 %v18164_v39, %v11310_v42  ;;  %v11380_v50 = vmax.f32 %v11348_v26, 0.0 }
 0x711   : > { %v11347_v17 = vadd.f32 %v18164_v39, %v11308_v28  ;;  %v11378_v29 = vmax.f32 %v11346_v22, 0.0 }
 0x712   : > { %v11381_v57 = vmax.f32 %v11349_v1, 0.0 }
 0x713   : > { %v11379_v56 = vmax.f32 %v11347_v17, 0.0  ;;  %v13721_v3 = vpop.f32.mrb[24].mxu1 }
 0x714   : > { %v12394_v59 = vpack.c.bf16 %v11381_v57, %v11380_v50  ;;  %v11313_v58 = vmul.f32 %v13721_v3, %v18159_v40  ;;  %v11217_v25 = vpop.f32.mrb[25].mxu1 }
 0x715   : > { %v12389_v27 = vpack.c.bf16 %v11379_v56, %v11378_v29  ;;  %v11311_v10 = vmul.f32 %v18159_v40, %v11217_v25  ;;  %v13722_v23 = vpop.f32.mrb[26].mxu1 }
 0x716   : > { %12426 = vst [vmem:[%s18178_s30 + $0x58] sm:$0xff] %v12394_v59   ;;  %v11352_v48 = vadd.f32 %v18164_v39, %v11313_v58  ;;  %v11314_v49 = vmul.f32 %v13722_v23, %v18159_v40  ;;  %v11220_v32 = vpop.f32.mrb[27].mxu1 }
 0x717   : > { %12425 = vst [vmem:[%s18178_s30 + $0x50] sm:$0xff] %v12389_v27   ;;  %v11350_v9 = vadd.f32 %v18164_v39, %v11311_v10  ;;  %v11312_v54 = vmul.f32 %v18159_v40, %v11220_v32 }
 0x718   : > { %v11353_v30 = vadd.f32 %v18164_v39, %v11314_v49  ;;  %v11384_v45 = vmax.f32 %v11352_v48, 0.0 }
 0x719   : > { %v11351_v62 = vadd.f32 %v18164_v39, %v11312_v54  ;;  %v11382_v16 = vmax.f32 %v11350_v9, 0.0 }
 0x71a   : > { %v11385_v60 = vmax.f32 %v11353_v30, 0.0 }
 0x71b   : > { %v11383_v15 = vmax.f32 %v11351_v62, 0.0  ;;  %v13725_v6 = vpop.f32.mrb[28].mxu1 }
 0x71c   : > { %v12404_v19 = vpack.c.bf16 %v11385_v60, %v11384_v45  ;;  %v11317_v14 = vmul.f32 %v13725_v6, %v18159_v40  ;;  %v11233_v31 = vpop.f32.mrb[29].mxu1 }
 0x71d   : > { %v12399_v37 = vpack.c.bf16 %v11383_v15, %v11382_v16  ;;  %v11315_v12 = vmul.f32 %v18159_v40, %v11233_v31  ;;  %v13726_v36 = vpop.f32.mrb[30].mxu1 }
 0x71e   : > { %12428 = vst [vmem:[%s18178_s30 + $0x68] sm:$0xff] %v12404_v19   ;;  %v11356_v20 = vadd.f32 %v18164_v39, %v11317_v14  ;;  %v11318_v41 = vmul.f32 %v13726_v36, %v18159_v40  ;;  %v11236_v13 = vpop.f32.mrb[31].mxu1 }
 0x71f   : > { %12427 = vst [vmem:[%s18178_s30 + $0x60] sm:$0xff] %v12399_v37   ;;  %v11354_v2 = vadd.f32 %v18164_v39, %v11315_v12  ;;  %v11316_v8 = vmul.f32 %v18159_v40, %v11236_v13 }
 0x720   : > { %v11357_v55 = vadd.f32 %v18164_v39, %v11318_v41  ;;  %v11388_v43 = vmax.f32 %v11356_v20, 0.0 }
 0x721   : > { %v11355_v63 = vadd.f32 %v18164_v39, %v11316_v8  ;;  %v11386_v38 = vmax.f32 %v11354_v2, 0.0 }
 0x722   : > { %v11389_v11 = vmax.f32 %v11357_v55, 0.0 }
 0x723   : > { %v11387_v52 = vmax.f32 %v11355_v63, 0.0 }
 0x724   : > { %v12414_v46 = vpack.c.bf16 %v11389_v11, %v11388_v43 }
 0x725   : > { %v12409_v40 = vpack.c.bf16 %v11387_v52, %v11386_v38 }
 0x726   : > { %12430 = vst [vmem:[%s18178_s30 + $0x78] sm:$0xff] %v12414_v46  }
 0x727   : > { %12429 = vst [vmem:[%s18178_s30 + $0x70] sm:$0xff] %v12409_v40  }
 0x728   : > { %14730 = shalt.err (!%p14727_p1)
}
 0x729   : > { %s14731_s23 = scalar_lea.hbm %s18253_s10, 2048  ;;  %s14735_s30 = scalar_lea.hbm %s18308_s7, 4096 }
 0x72a   : > { %p14732_p13 = scmp.ne.s32.totalorder %s18253_s10, %s14731_s23  ;;  %p14736_p4 = scmp.lt.u32.totalorder %s18253_s10, %s18308_s7 }
 0x72b   : > { %p14737_p5 = scmp.lt.u32.totalorder %s14735_s30, %s14731_s23  ;;  %p14739_p11 = scmp.lt.u32.totalorder %s14731_s23, %s18253_s10 }
 0x72c   : > { %p14733_p6 = pnand %p14732_p13, %p18667_p0 }
 0x72d   : > { %p14738_p8 = por %p14737_p5, %p14736_p4 }
 0x72e   : > { %p14734_p10 = pneg %p14733_p6 }
 0x72f   : > { %p14740_p2 = por %p14739_p11, %p14738_p8 }
 0x731   : > { %p14741_p3 = pnand %p14740_p2, %p14734_p10 }
 0x733   : > { %14744 = shalt.err (!%p14741_p3)
}
 0x734   : > { %s14796_s11 = smov 64   ;;  %s14797_s15 = smov 4  }
 0x735   : > { %14249 = dma.vmem_to_hbm [thread:$0]  (%p18667_p0), %s18255_s9, 2048, %s18253_s10, %s11551_s28, %s14796_s11, %s14796_s11, %s14797_s15  }
 0x736 PF: > { %s11579_s19 = sand.u32 1, %s14775_s24   ;;  %p18668_p7 = scmp.ne.s32.totalorder %s18406_s8, 0 }
 0x737   : > { %p18669_p9 = scmp.ge.s32.totalorder %s14787_s27, 2  ;;  %s11580_s14 = scalar_lea.sflag [#allocation6], %s11579_s19 }
 0x739   : > { %p14263_p12 = pnand %p18669_p9, %p18668_p7 }
 0x73b   : > { %14770 = dma.done.wait (!%p14263_p12), %s11580_s14, 2048  }
 0x73c   : > { %14772 = vsyncadd (!%p14263_p12), %s11580_s14, 4294965248  ;;  %p21_p1 = scmp.ge.s32.totalorder %s14954_s12, 4   ;;  %s18670_s24 = smov %s14779_s25 }
 0x73d   : > { %s18671_s25 = smov %s14783_s26  ;;  %s18672_s26 = smov %s14970_s17 }
 0x73e   : > { %s18673_s27 = smov %s14954_s12  ;;  %23 = sbr.rel (!%p21_p1) target bundleno = 6 (0x6), region = 123 }
 0x745   :  { %11585 = vsyncpa [#allocation5], 1 }
 0x746   :  { %11587 = vsyncpa [#allocation5 + $0x1], 1 }
 0x747   :  { %11588 = vsyncpa [#allocation8], 1 }
 0x748   :  { %11589 = vsyncpa [#allocation6], 1 }
 0x749   :  { %11591 = vsyncpa [#allocation6 + $0x1], 1 }

</bundles_post_ra>
